<compile_context>
chip_gen: v6e
topology: v6e:2x2x1
jax: 0.10.0
libtpu: 0.0.40
codegen_flags: <defaults>
</compile_context>

<pallas_src>
import jax
import jax.numpy as jnp
import numpy as np
from jax import lax
from jax.experimental import pallas as pl
from jax.experimental.pallas import tpu as pltpu


# ---------------------------------------------------------------------------
# Pallas kernel 1: one M-tile of  out = relu(X @ W + b)   (conv1 / conv2)
# ---------------------------------------------------------------------------
def _gemm_bias_relu_kernel(x_ref, w_ref, b_ref, o_ref):
    acc = jnp.dot(x_ref[...], w_ref[...], preferred_element_type=jnp.float32)
    o_ref[...] = jnp.maximum(acc + b_ref[...], 0.0).astype(o_ref.dtype)


def gemm_bias_relu(x, w, b, *, m_blocks=1):
    """relu(x @ w + b); x:(M,K) f32, w:(K,N) f32, b:(1,N) f32.

    Blocks either cover the full K/N axes or use an 8-aligned M split, so no
    padding is ever materialized.
    """
    M, K = x.shape
    K2, N = w.shape
    assert K == K2 and b.shape == (1, N)
    assert M % m_blocks == 0
    tm = M // m_blocks
    if m_blocks > 1:
        assert tm % 8 == 0

    cost = pl.CostEstimate(
        flops=2 * M * K * N,
        transcendentals=0,
        bytes_accessed=4 * (M * K + K * N + N + M * N),
    )
    return pl.pallas_call(
        _gemm_bias_relu_kernel,
        out_shape=jax.ShapeDtypeStruct((M, N), jnp.float32),
        grid_spec=pltpu.PrefetchScalarGridSpec(
            num_scalar_prefetch=0,
            grid=(m_blocks,),
            in_specs=[
                pl.BlockSpec((tm, K), lambda i: (i, 0)),
                pl.BlockSpec((K, N), lambda i: (0, 0)),
                pl.BlockSpec((1, N), lambda i: (0, 0)),
            ],
            out_specs=pl.BlockSpec((tm, N), lambda i: (i, 0)),
        ),
        compiler_params=pltpu.CompilerParams(
            dimension_semantics=("parallel",),
            vmem_limit_bytes=32 * 1024 * 1024,
        ),
        cost_estimate=cost,
    )(x, w, b)


# ---------------------------------------------------------------------------
# Pallas kernel 2: fused  relu(conv3) -> flatten -> relu(fc4)
# ---------------------------------------------------------------------------
def _conv3_fc4_kernel(p3_ref, w3_ref, b3_ref, w4_ref, b4_ref, o_ref, x3_ref):
    # conv3 as GEMM: (P, K3) @ (K3, C3) -> (P, C3); rows ordered (h, w, batch).
    x3 = jnp.dot(p3_ref[...], w3_ref[...], preferred_element_type=jnp.float32)
    x3_ref[...] = jnp.maximum(x3 + b3_ref[...], 0.0)

    P, C3 = x3_ref.shape              # (98, 64)
    B = o_ref.shape[0]                # 2
    n_pos = P // B                    # 49 spatial positions (7x7)

    # fc4:  out[b,:] = sum_p  x3[(p, b), :] @ W4[p-th 64-row slab, :]
    # Same total MXU weight-push volume as one (B,3136)x(3136,512) GEMM, but
    # the conv3 activation stays in VMEM and no flatten/relayout is needed.
    acc = jnp.zeros(o_ref.shape, jnp.float32)
    for p in range(n_pos):
        xp = x3_ref[B * p:B * p + B, :]        # (B, C3): both batch rows of pos p
        wp = w4_ref[C3 * p:C3 * p + C3, :]     # (C3, 512): contiguous, aligned
        acc = acc + jnp.dot(xp, wp, preferred_element_type=jnp.float32)
    o_ref[...] = jnp.maximum(acc + b4_ref[...], 0.0).astype(o_ref.dtype)


def conv3_fc4(p3_pb, w3, b3, w4, b4):
    """p3_pb: (P, K3) conv3 im2col patches with rows ordered (h, w, batch)."""
    P, K3 = p3_pb.shape
    K3b, C3 = w3.shape
    K4, N4 = w4.shape
    assert K3 == K3b and b3.shape == (1, C3) and b4.shape == (1, N4)
    B = (P * C3) // K4
    assert B * K4 == P * C3

    cost = pl.CostEstimate(
        flops=2 * P * K3 * C3 + 2 * B * K4 * N4,
        transcendentals=0,
        bytes_accessed=4 * (P * K3 + K3 * C3 + C3 + K4 * N4 + N4 + B * N4),
    )
    return pl.pallas_call(
        _conv3_fc4_kernel,
        out_shape=jax.ShapeDtypeStruct((B, N4), jnp.float32),
        grid_spec=pltpu.PrefetchScalarGridSpec(
            num_scalar_prefetch=0,
            grid=(1,),
            in_specs=[
                pl.BlockSpec((P, K3), lambda i: (0, 0)),
                pl.BlockSpec((K3, C3), lambda i: (0, 0)),
                pl.BlockSpec((1, C3), lambda i: (0, 0)),
                pl.BlockSpec((K4, N4), lambda i: (0, 0)),
                pl.BlockSpec((1, N4), lambda i: (0, 0)),
            ],
            out_specs=pl.BlockSpec((B, N4), lambda i: (0, 0)),
            scratch_shapes=[pltpu.VMEM((P, C3), jnp.float32)],
        ),
        compiler_params=pltpu.CompilerParams(
            dimension_semantics=("arbitrary",),
            vmem_limit_bytes=64 * 1024 * 1024,
        ),
        cost_estimate=cost,
    )(p3_pb, w3, b3, w4, b4)


# ---------------------------------------------------------------------------
# im2col helpers (one fused XLA op each; weight prep runs once at init)
# ---------------------------------------------------------------------------
def _extract_patches(x_nhwc, kh, kw, stride):
    """(N,H,W,C) -> (N, Ho, Wo, kh*kw*C) as a single fused XLA op."""
    return lax.conv_general_dilated_patches(
        x_nhwc, (kh, kw), (stride, stride), "VALID",
        dimension_numbers=("NHWC", "HWIO", "NHWC"),
        precision=lax.Precision.HIGHEST,
    )


def _conv_weight_matrix(w_oihw):
    """OIHW conv weight -> (kh*kw*Cin, Cout) GEMM matrix whose row ordering
    matches `_extract_patches` by construction (same patch operator applied to
    the weight viewed as a (Cout, kh, kw, Cin) image)."""
    cout, cin, kh, kw = w_oihw.shape
    w_img = jnp.transpose(w_oihw, (0, 2, 3, 1))  # (Cout, kh, kw, Cin)
    cols = lax.conv_general_dilated_patches(
        w_img, (kh, kw), (1, 1), "VALID",
        dimension_numbers=("NHWC", "HWIO", "NHWC"),
        precision=lax.Precision.HIGHEST,
    )  # (Cout, 1, 1, kh*kw*Cin)
    return cols.reshape(cout, kh * kw * cin).T  # (K, Cout)


def prepare_gemm_params(params):
    """One-time layout prep: GEMM-ready weights/biases (no per-forward work)."""
    # fc4_w: (512, 3136), torch columns ordered by NCHW flatten (c, h, w).
    # Permute to (h, w, c)-major rows so row block [64p : 64p+64) is exactly
    # the weight slab of spatial position p in the NHWC conv3 output, then
    # pre-transpose to (K, N).
    w4 = jnp.transpose(
        params["fc4_w"].reshape(512, 64, 7, 7), (2, 3, 1, 0)
    ).reshape(7 * 7 * 64, 512)
    return {
        "w1": _conv_weight_matrix(params["conv1_w"]),
        "b1": params["conv1_b"].reshape(1, -1),
        "w2": _conv_weight_matrix(params["conv2_w"]),
        "b2": params["conv2_b"].reshape(1, -1),
        "w3": _conv_weight_matrix(params["conv3_w"]),
        "b3": params["conv3_b"].reshape(1, -1),
        "w4": w4,
        "b4": params["fc4_b"].reshape(1, -1),
    }


# ---------------------------------------------------------------------------
# ICM forward (== get_feature), NHWC end-to-end, 3 pallas_calls total
# ---------------------------------------------------------------------------
def icm_forward(gp, x_nchw):
    x = jnp.transpose(x_nchw, (0, 2, 3, 1)).astype(jnp.float32)  # NHWC, once

    # conv1: 4->32, k8 s4.  M = N*20*20 (800 at batch 2) -> 2-way "parallel" M
    # split so both v7x TensorCores are used (a cheap serial loop on v5e/v6e).
    p = _extract_patches(x, 8, 8, 4)
    n, ho, wo, k = p.shape
    p = p.reshape(n * ho * wo, k)
    mb = 2 if (p.shape[0] % 2 == 0 and (p.shape[0] // 2) % 8 == 0) else 1
    x = gemm_bias_relu(p, gp["w1"], gp["b1"], m_blocks=mb).reshape(n, ho, wo, 32)

    # conv2: 32->64, k4 s2.  M = 162 -> single full-M block, no padding.
    p = _extract_patches(x, 4, 4, 2)
    n, ho, wo, k = p.shape
    p = p.reshape(n * ho * wo, k)
    x = gemm_bias_relu(p, gp["w2"], gp["b2"]).reshape(n, ho, wo, 64)

    # conv3 + flatten + fc4 fused in ONE pallas_call.  Patch rows are ordered
    # (h, w, batch) so the kernel's fc4 accumulation reads contiguous 2-row
    # slabs per spatial position; fc4 weight rows were matched at init.
    p = _extract_patches(x, 3, 3, 1)              # (N, 7, 7, 576)
    n, ho, wo, k = p.shape
    p = jnp.transpose(p, (1, 2, 0, 3)).reshape(ho * wo * n, k)
    return conv3_fc4(p, gp["w3"], gp["b3"], gp["w4"], gp["b4"])


# ---------------------------------------------------------------------------
# Params + pure-JAX reference
# ---------------------------------------------------------------------------
def init_params(key):
    """Deterministic params matching the PyTorch module's shapes."""
    ks = jax.random.split(key, 8)

    def unif(k, shape, fan_in):
        bound = 1.0 / np.sqrt(fan_in)
        return jax.random.uniform(k, shape, jnp.float32, -bound, bound)

    return {
        "conv1_w": unif(ks[0], (32, 4, 8, 8), 4 * 8 * 8),
        "conv1_b": unif(ks[1], (32,), 4 * 8 * 8),
        "conv2_w": unif(ks[2], (64, 32, 4, 4), 32 * 4 * 4),
        "conv2_b": unif(ks[3], (64,), 32 * 4 * 4),
        "conv3_w": unif(ks[4], (64, 64, 3, 3), 64 * 3 * 3),
        "conv3_b": unif(ks[5], (64,), 64 * 3 * 3),
        "fc4_w": unif(ks[6], (512, 7 * 7 * 64), 7 * 7 * 64),
        "fc4_b": unif(ks[7], (512,), 7 * 7 * 64),
    }


def _reference_forward(params, x):
    def conv(x, w, b, s):
        y = lax.conv_general_dilated(
            x, w, window_strides=(s, s), padding="VALID",
            dimension_numbers=("NCHW", "OIHW", "NCHW"))
        return jax.nn.relu(y + b[None, :, None, None])

    x = conv(x, params["conv1_w"], params["conv1_b"], 4)
    x = conv(x, params["conv2_w"], params["conv2_b"], 2)
    x = conv(x, params["conv3_w"], params["conv3_b"], 1)
    x = x.reshape(x.shape[0], -1)
    return jax.nn.relu(x @ params["fc4_w"].T + params["fc4_b"])


if __name__ == "__main__":
    key = jax.random.PRNGKey(0)
    pkey, xkey = jax.random.split(key)
    params = init_params(pkey)
    gp = prepare_gemm_params(params)  # one-time weight layout prep

    # fc4 (7*7*64 -> 512) fixes the spatial size at 84x84 (Atari frame stack);
    # batch kept small.
    x = jax.random.normal(xkey, (2, 4, 84, 84), dtype=jnp.float32)

    forward = jax.jit(icm_forward)
    feat = jax.block_until_ready(forward(gp, x))
    assert feat.shape == (2, 512), feat.shape

    ref = jax.block_until_ready(jax.jit(_reference_forward)(params, x))
    np.testing.assert_allclose(np.asarray(feat), np.asarray(ref),
                               rtol=2e-4, atol=2e-4)

    print("KERNEL_OK")
</pallas_src>

<mosaic_0001>
module attributes {stable_mosaic.version = 11 : i64} {
  func.func @_gemm_bias_relu_kernel(%arg0: i32, %arg1: memref<400x256xf32, #tpu.memory_space<vmem>>, %arg2: memref<256x32xf32, #tpu.memory_space<vmem>>, %arg3: memref<1x32xf32, #tpu.memory_space<vmem>>, %arg4: memref<400x32xf32, #tpu.memory_space<vmem>>) attributes {dimension_semantics = [#tpu.dimension_semantics<parallel>], iteration_bounds = array<i64: 2>, scalar_prefetch = 0 : i64, scratch_operands = 0 : i64, tpu.core_type = #tpu.core_type<tc>, window_params = [{transform_indices = @transform_0, window_bounds = array<i64: 400, 256>}, {pipeline_mode = #tpu.pipeline_mode<synchronous>, transform_indices = @transform_1, window_bounds = array<i64: 256, 32>}, {pipeline_mode = #tpu.pipeline_mode<synchronous>, transform_indices = @transform_2, window_bounds = array<i64: 1, 32>}, {transform_indices = @transform_3, window_bounds = array<i64: 400, 32>}]} {
    %c0 = arith.constant 0 : index
    %c0_0 = arith.constant 0 : index
    %0 = vector.load %arg1[%c0, %c0_0] : memref<400x256xf32, #tpu.memory_space<vmem>>, vector<400x256xf32>
    %c0_1 = arith.constant 0 : index
    %c0_2 = arith.constant 0 : index
    %1 = vector.load %arg2[%c0_1, %c0_2] : memref<256x32xf32, #tpu.memory_space<vmem>>, vector<256x32xf32>
    %cst = arith.constant dense<0.000000e+00> : vector<400x32xf32>
    %2 = tpu.matmul %0, %1, %cst {dimension_numbers = #tpu.dot_dimension_numbers<[1], [0], [0], [1], [0, 0, 1, 1], [], []>} : vector<400x256xf32>, vector<256x32xf32>, vector<400x32xf32> -> vector<400x32xf32>
    %c0_3 = arith.constant 0 : index
    %c0_4 = arith.constant 0 : index
    %3 = vector.load %arg3[%c0_3, %c0_4] : memref<1x32xf32, #tpu.memory_space<vmem>>, vector<1x32xf32>
    %4 = vector.broadcast %3 : vector<1x32xf32> to vector<400x32xf32>
    %5 = arith.addf %2, %4 : vector<400x32xf32>
    %cst_5 = arith.constant 0.000000e+00 : f32
    %6 = vector.broadcast %cst_5 : f32 to vector<400x32xf32>
    %7 = arith.maximumf %5, %6 : vector<400x32xf32>
    %c0_6 = arith.constant 0 : index
    %c0_7 = arith.constant 0 : index
    %8 = vector.load %arg4[%c0_6, %c0_7] : memref<400x32xf32, #tpu.memory_space<vmem>>, vector<400x32xf32>
    tpu.vector_store %arg4[%c0_6, %c0_7], %7 {strides = array<i32>} : memref<400x32xf32, #tpu.memory_space<vmem>>, vector<400x32xf32>,
    return
  }
  func.func @transform_0(%arg0: i32) -> (i32, i32) {
    %c0_i32 = arith.constant 0 : i32
    %c0_i32_0 = arith.constant 0 : i32
    return %arg0, %c0_i32 : i32, i32
  }
  func.func @transform_1(%arg0: i32) -> (i32, i32) {
    %c0_i32 = arith.constant 0 : i32
    %c0_i32_0 = arith.constant 0 : i32
    %c0_i32_1 = arith.constant 0 : i32
    return %c0_i32, %c0_i32_0 : i32, i32
  }
  func.func @transform_2(%arg0: i32) -> (i32, i32) {
    %c0_i32 = arith.constant 0 : i32
    %c0_i32_0 = arith.constant 0 : i32
    %c0_i32_1 = arith.constant 0 : i32
    return %c0_i32, %c0_i32_0 : i32, i32
  }
  func.func @transform_3(%arg0: i32) -> (i32, i32) {
    %c0_i32 = arith.constant 0 : i32
    %c0_i32_0 = arith.constant 0 : i32
    return %arg0, %c0_i32 : i32, i32
  }
}

module attributes {stable_mosaic.version = 11 : i64} {
  func.func @_gemm_bias_relu_kernel(%arg0: i32, %arg1: memref<162x512xf32, #tpu.memory_space<vmem>>, %arg2: memref<512x64xf32, #tpu.memory_space<vmem>>, %arg3: memref<1x64xf32, #tpu.memory_space<vmem>>, %arg4: memref<162x64xf32, #tpu.memory_space<vmem>>) attributes {dimension_semantics = [#tpu.dimension_semantics<parallel>], iteration_bounds = array<i64: 1>, scalar_prefetch = 0 : i64, scratch_operands = 0 : i64, tpu.core_type = #tpu.core_type<tc>, window_params = [{transform_indices = @transform_0, window_bounds = array<i64: 162, 512>}, {pipeline_mode = #tpu.pipeline_mode<synchronous>, transform_indices = @transform_1, window_bounds = array<i64: 512, 64>}, {pipeline_mode = #tpu.pipeline_mode<synchronous>, transform_indices = @transform_2, window_bounds = array<i64: 1, 64>}, {transform_indices = @transform_3, window_bounds = array<i64: 162, 64>}]} {
    %c0 = arith.constant 0 : index
    %c0_0 = arith.constant 0 : index
    %0 = vector.load %arg1[%c0, %c0_0] : memref<162x512xf32, #tpu.memory_space<vmem>>, vector<162x512xf32>
    %c0_1 = arith.constant 0 : index
    %c0_2 = arith.constant 0 : index
    %1 = vector.load %arg2[%c0_1, %c0_2] : memref<512x64xf32, #tpu.memory_space<vmem>>, vector<512x64xf32>
    %cst = arith.constant dense<0.000000e+00> : vector<162x64xf32>
    %2 = tpu.matmul %0, %1, %cst {dimension_numbers = #tpu.dot_dimension_numbers<[1], [0], [0], [1], [0, 0, 1, 1], [], []>} : vector<162x512xf32>, vector<512x64xf32>, vector<162x64xf32> -> vector<162x64xf32>
    %c0_3 = arith.constant 0 : index
    %c0_4 = arith.constant 0 : index
    %3 = vector.load %arg3[%c0_3, %c0_4] : memref<1x64xf32, #tpu.memory_space<vmem>>, vector<1x64xf32>
    %4 = vector.broadcast %3 : vector<1x64xf32> to vector<162x64xf32>
    %5 = arith.addf %2, %4 : vector<162x64xf32>
    %cst_5 = arith.constant 0.000000e+00 : f32
    %6 = vector.broadcast %cst_5 : f32 to vector<162x64xf32>
    %7 = arith.maximumf %5, %6 : vector<162x64xf32>
    %c0_6 = arith.constant 0 : index
    %c0_7 = arith.constant 0 : index
    %8 = vector.load %arg4[%c0_6, %c0_7] : memref<162x64xf32, #tpu.memory_space<vmem>>, vector<162x64xf32>
    tpu.vector_store %arg4[%c0_6, %c0_7], %7 {strides = array<i32>} : memref<162x64xf32, #tpu.memory_space<vmem>>, vector<162x64xf32>,
    return
  }
  func.func @transform_0(%arg0: i32) -> (i32, i32) {
    %c0_i32 = arith.constant 0 : i32
    %c0_i32_0 = arith.constant 0 : i32
    return %arg0, %c0_i32 : i32, i32
  }
  func.func @transform_1(%arg0: i32) -> (i32, i32) {
    %c0_i32 = arith.constant 0 : i32
    %c0_i32_0 = arith.constant 0 : i32
    %c0_i32_1 = arith.constant 0 : i32
    return %c0_i32, %c0_i32_0 : i32, i32
  }
  func.func @transform_2(%arg0: i32) -> (i32, i32) {
    %c0_i32 = arith.constant 0 : i32
    %c0_i32_0 = arith.constant 0 : i32
    %c0_i32_1 = arith.constant 0 : i32
    return %c0_i32, %c0_i32_0 : i32, i32
  }
  func.func @transform_3(%arg0: i32) -> (i32, i32) {
    %c0_i32 = arith.constant 0 : i32
    %c0_i32_0 = arith.constant 0 : i32
    return %arg0, %c0_i32 : i32, i32
  }
}

module attributes {stable_mosaic.version = 11 : i64} {
  func.func @_conv3_fc4_kernel(%arg0: i32, %arg1: memref<98x576xf32, #tpu.memory_space<vmem>>, %arg2: memref<576x64xf32, #tpu.memory_space<vmem>>, %arg3: memref<1x64xf32, #tpu.memory_space<vmem>>, %arg4: memref<3136x512xf32, #tpu.memory_space<vmem>>, %arg5: memref<1x512xf32, #tpu.memory_space<vmem>>, %arg6: memref<2x512xf32, #tpu.memory_space<vmem>>, %arg7: memref<98x64xf32, #tpu.memory_space<vmem>>) attributes {dimension_semantics = [#tpu.dimension_semantics<arbitrary>], iteration_bounds = array<i64: 1>, scalar_prefetch = 0 : i64, scratch_operands = 1 : i64, tpu.core_type = #tpu.core_type<tc>, window_params = [{pipeline_mode = #tpu.pipeline_mode<synchronous>, transform_indices = @transform_0, window_bounds = array<i64: 98, 576>}, {pipeline_mode = #tpu.pipeline_mode<synchronous>, transform_indices = @transform_1, window_bounds = array<i64: 576, 64>}, {pipeline_mode = #tpu.pipeline_mode<synchronous>, transform_indices = @transform_2, window_bounds = array<i64: 1, 64>}, {pipeline_mode = #tpu.pipeline_mode<synchronous>, transform_indices = @transform_3, window_bounds = array<i64: 3136, 512>}, {pipeline_mode = #tpu.pipeline_mode<synchronous>, transform_indices = @transform_4, window_bounds = array<i64: 1, 512>}, {pipeline_mode = #tpu.pipeline_mode<synchronous>, transform_indices = @transform_5, window_bounds = array<i64: 2, 512>}]} {
    %c0 = arith.constant 0 : index
    %c0_0 = arith.constant 0 : index
    %0 = vector.load %arg1[%c0, %c0_0] : memref<98x576xf32, #tpu.memory_space<vmem>>, vector<98x576xf32>
    %c0_1 = arith.constant 0 : index
    %c0_2 = arith.constant 0 : index
    %1 = vector.load %arg2[%c0_1, %c0_2] : memref<576x64xf32, #tpu.memory_space<vmem>>, vector<576x64xf32>
    %cst = arith.constant dense<0.000000e+00> : vector<98x64xf32>
    %2 = tpu.matmul %0, %1, %cst {dimension_numbers = #tpu.dot_dimension_numbers<[1], [0], [0], [1], [0, 0, 1, 1], [], []>} : vector<98x576xf32>, vector<576x64xf32>, vector<98x64xf32> -> vector<98x64xf32>
    %c0_3 = arith.constant 0 : index
    %c0_4 = arith.constant 0 : index
    %3 = vector.load %arg3[%c0_3, %c0_4] : memref<1x64xf32, #tpu.memory_space<vmem>>, vector<1x64xf32>
    %4 = vector.broadcast %3 : vector<1x64xf32> to vector<98x64xf32>
    %5 = arith.addf %2, %4 : vector<98x64xf32>
    %cst_5 = arith.constant 0.000000e+00 : f32
    %6 = vector.broadcast %cst_5 : f32 to vector<98x64xf32>
    %7 = arith.maximumf %5, %6 : vector<98x64xf32>
    %c0_6 = arith.constant 0 : index
    %c0_7 = arith.constant 0 : index
    %8 = vector.load %arg7[%c0_6, %c0_7] : memref<98x64xf32, #tpu.memory_space<vmem>>, vector<98x64xf32>
    tpu.vector_store %arg7[%c0_6, %c0_7], %7 {strides = array<i32>} : memref<98x64xf32, #tpu.memory_space<vmem>>, vector<98x64xf32>,
    %cst_8 = arith.constant 0.000000e+00 : f32
    %9 = vector.broadcast %cst_8 : f32 to vector<2x512xf32>
    %c0_9 = arith.constant 0 : index
    %c0_10 = arith.constant 0 : index
    %10 = vector.load %arg7[%c0_9, %c0_10] : memref<98x64xf32, #tpu.memory_space<vmem>>, vector<2x64xf32>
    %c0_11 = arith.constant 0 : index
    %c0_12 = arith.constant 0 : index
    %11 = vector.load %arg4[%c0_11, %c0_12] : memref<3136x512xf32, #tpu.memory_space<vmem>>, vector<64x512xf32>
    %cst_13 = arith.constant dense<0.000000e+00> : vector<2x512xf32>
    %12 = tpu.matmul %10, %11, %cst_13 {dimension_numbers = #tpu.dot_dimension_numbers<[1], [0], [0], [1], [0, 0, 1, 1], [], []>} : vector<2x64xf32>, vector<64x512xf32>, vector<2x512xf32> -> vector<2x512xf32>
    %13 = arith.addf %9, %12 : vector<2x512xf32>
    %c2 = arith.constant 2 : index
    %c0_14 = arith.constant 0 : index
    %14 = vector.load %arg7[%c2, %c0_14] : memref<98x64xf32, #tpu.memory_space<vmem>>, vector<2x64xf32>
    %c64 = arith.constant 64 : index
    %c0_15 = arith.constant 0 : index
    %15 = vector.load %arg4[%c64, %c0_15] : memref<3136x512xf32, #tpu.memory_space<vmem>>, vector<64x512xf32>
    %cst_16 = arith.constant dense<0.000000e+00> : vector<2x512xf32>
    %16 = tpu.matmul %14, %15, %cst_16 {dimension_numbers = #tpu.dot_dimension_numbers<[1], [0], [0], [1], [0, 0, 1, 1], [], []>} : vector<2x64xf32>, vector<64x512xf32>, vector<2x512xf32> -> vector<2x512xf32>
    %17 = arith.addf %13, %16 : vector<2x512xf32>
    %c4 = arith.constant 4 : index
    %c0_17 = arith.constant 0 : index
    %18 = vector.load %arg7[%c4, %c0_17] : memref<98x64xf32, #tpu.memory_space<vmem>>, vector<2x64xf32>
    %c128 = arith.constant 128 : index
    %c0_18 = arith.constant 0 : index
    %19 = vector.load %arg4[%c128, %c0_18] : memref<3136x512xf32, #tpu.memory_space<vmem>>, vector<64x512xf32>
    %cst_19 = arith.constant dense<0.000000e+00> : vector<2x512xf32>
    %20 = tpu.matmul %18, %19, %cst_19 {dimension_numbers = #tpu.dot_dimension_numbers<[1], [0], [0], [1], [0, 0, 1, 1], [], []>} : vector<2x64xf32>, vector<64x512xf32>, vector<2x512xf32> -> vector<2x512xf32>
    %21 = arith.addf %17, %20 : vector<2x512xf32>
    %c6 = arith.constant 6 : index
    %c0_20 = arith.constant 0 : index
    %22 = vector.load %arg7[%c6, %c0_20] : memref<98x64xf32, #tpu.memory_space<vmem>>, vector<2x64xf32>
    %c192 = arith.constant 192 : index
    %c0_21 = arith.constant 0 : index
    %23 = vector.load %arg4[%c192, %c0_21] : memref<3136x512xf32, #tpu.memory_space<vmem>>, vector<64x512xf32>
    %cst_22 = arith.constant dense<0.000000e+00> : vector<2x512xf32>
    %24 = tpu.matmul %22, %23, %cst_22 {dimension_numbers = #tpu.dot_dimension_numbers<[1], [0], [0], [1], [0, 0, 1, 1], [], []>} : vector<2x64xf32>, vector<64x512xf32>, vector<2x512xf32> -> vector<2x512xf32>
    %25 = arith.addf %21, %24 : vector<2x512xf32>
    %c8 = arith.constant 8 : index
    %c0_23 = arith.constant 0 : index
    %26 = vector.load %arg7[%c8, %c0_23] : memref<98x64xf32, #tpu.memory_space<vmem>>, vector<2x64xf32>
    %c256 = arith.constant 256 : index
    %c0_24 = arith.constant 0 : index
    %27 = vector.load %arg4[%c256, %c0_24] : memref<3136x512xf32, #tpu.memory_space<vmem>>, vector<64x512xf32>
    %cst_25 = arith.constant dense<0.000000e+00> : vector<2x512xf32>
    %28 = tpu.matmul %26, %27, %cst_25 {dimension_numbers = #tpu.dot_dimension_numbers<[1], [0], [0], [1], [0, 0, 1, 1], [], []>} : vector<2x64xf32>, vector<64x512xf32>, vector<2x512xf32> -> vector<2x512xf32>
    %29 = arith.addf %25, %28 : vector<2x512xf32>
    %c10 = arith.constant 10 : index
    %c0_26 = arith.constant 0 : index
    %30 = vector.load %arg7[%c10, %c0_26] : memref<98x64xf32, #tpu.memory_space<vmem>>, vector<2x64xf32>
    %c320 = arith.constant 320 : index
    %c0_27 = arith.constant 0 : index
    %31 = vector.load %arg4[%c320, %c0_27] : memref<3136x512xf32, #tpu.memory_space<vmem>>, vector<64x512xf32>
    %cst_28 = arith.constant dense<0.000000e+00> : vector<2x512xf32>
    %32 = tpu.matmul %30, %31, %cst_28 {dimension_numbers = #tpu.dot_dimension_numbers<[1], [0], [0], [1], [0, 0, 1, 1], [], []>} : vector<2x64xf32>, vector<64x512xf32>, vector<2x512xf32> -> vector<2x512xf32>
    %33 = arith.addf %29, %32 : vector<2x512xf32>
    %c12 = arith.constant 12 : index
    %c0_29 = arith.constant 0 : index
    %34 = vector.load %arg7[%c12, %c0_29] : memref<98x64xf32, #tpu.memory_space<vmem>>, vector<2x64xf32>
    %c384 = arith.constant 384 : index
    %c0_30 = arith.constant 0 : index
    %35 = vector.load %arg4[%c384, %c0_30] : memref<3136x512xf32, #tpu.memory_space<vmem>>, vector<64x512xf32>
    %cst_31 = arith.constant dense<0.000000e+00> : vector<2x512xf32>
    %36 = tpu.matmul %34, %35, %cst_31 {dimension_numbers = #tpu.dot_dimension_numbers<[1], [0], [0], [1], [0, 0, 1, 1], [], []>} : vector<2x64xf32>, vector<64x512xf32>, vector<2x512xf32> -> vector<2x512xf32>
    %37 = arith.addf %33, %36 : vector<2x512xf32>
    %c14 = arith.constant 14 : index
    %c0_32 = arith.constant 0 : index
    %38 = vector.load %arg7[%c14, %c0_32] : memref<98x64xf32, #tpu.memory_space<vmem>>, vector<2x64xf32>
    %c448 = arith.constant 448 : index
    %c0_33 = arith.constant 0 : index
    %39 = vector.load %arg4[%c448, %c0_33] : memref<3136x512xf32, #tpu.memory_space<vmem>>, vector<64x512xf32>
    %cst_34 = arith.constant dense<0.000000e+00> : vector<2x512xf32>
    %40 = tpu.matmul %38, %39, %cst_34 {dimension_numbers = #tpu.dot_dimension_numbers<[1], [0], [0], [1], [0, 0, 1, 1], [], []>} : vector<2x64xf32>, vector<64x512xf32>, vector<2x512xf32> -> vector<2x512xf32>
    %41 = arith.addf %37, %40 : vector<2x512xf32>
    %c16 = arith.constant 16 : index
    %c0_35 = arith.constant 0 : index
    %42 = vector.load %arg7[%c16, %c0_35] : memref<98x64xf32, #tpu.memory_space<vmem>>, vector<2x64xf32>
    %c512 = arith.constant 512 : index
    %c0_36 = arith.constant 0 : index
    %43 = vector.load %arg4[%c512, %c0_36] : memref<3136x512xf32, #tpu.memory_space<vmem>>, vector<64x512xf32>
    %cst_37 = arith.constant dense<0.000000e+00> : vector<2x512xf32>
    %44 = tpu.matmul %42, %43, %cst_37 {dimension_numbers = #tpu.dot_dimension_numbers<[1], [0], [0], [1], [0, 0, 1, 1], [], []>} : vector<2x64xf32>, vector<64x512xf32>, vector<2x512xf32> -> vector<2x512xf32>
    %45 = arith.addf %41, %44 : vector<2x512xf32>
    %c18 = arith.constant 18 : index
    %c0_38 = arith.constant 0 : index
    %46 = vector.load %arg7[%c18, %c0_38] : memref<98x64xf32, #tpu.memory_space<vmem>>, vector<2x64xf32>
    %c576 = arith.constant 576 : index
    %c0_39 = arith.constant 0 : index
    %47 = vector.load %arg4[%c576, %c0_39] : memref<3136x512xf32, #tpu.memory_space<vmem>>, vector<64x512xf32>
    %cst_40 = arith.constant dense<0.000000e+00> : vector<2x512xf32>
    %48 = tpu.matmul %46, %47, %cst_40 {dimension_numbers = #tpu.dot_dimension_numbers<[1], [0], [0], [1], [0, 0, 1, 1], [], []>} : vector<2x64xf32>, vector<64x512xf32>, vector<2x512xf32> -> vector<2x512xf32>
    %49 = arith.addf %45, %48 : vector<2x512xf32>
    %c20 = arith.constant 20 : index
    %c0_41 = arith.constant 0 : index
    %50 = vector.load %arg7[%c20, %c0_41] : memref<98x64xf32, #tpu.memory_space<vmem>>, vector<2x64xf32>
    %c640 = arith.constant 640 : index
    %c0_42 = arith.constant 0 : index
    %51 = vector.load %arg4[%c640, %c0_42] : memref<3136x512xf32, #tpu.memory_space<vmem>>, vector<64x512xf32>
    %cst_43 = arith.constant dense<0.000000e+00> : vector<2x512xf32>
    %52 = tpu.matmul %50, %51, %cst_43 {dimension_numbers = #tpu.dot_dimension_numbers<[1], [0], [0], [1], [0, 0, 1, 1], [], []>} : vector<2x64xf32>, vector<64x512xf32>, vector<2x512xf32> -> vector<2x512xf32>
    %53 = arith.addf %49, %52 : vector<2x512xf32>
    %c22 = arith.constant 22 : index
    %c0_44 = arith.constant 0 : index
    %54 = vector.load %arg7[%c22, %c0_44] : memref<98x64xf32, #tpu.memory_space<vmem>>, vector<2x64xf32>
    %c704 = arith.constant 704 : index
    %c0_45 = arith.constant 0 : index
    %55 = vector.load %arg4[%c704, %c0_45] : memref<3136x512xf32, #tpu.memory_space<vmem>>, vector<64x512xf32>
    %cst_46 = arith.constant dense<0.000000e+00> : vector<2x512xf32>
    %56 = tpu.matmul %54, %55, %cst_46 {dimension_numbers = #tpu.dot_dimension_numbers<[1], [0], [0], [1], [0, 0, 1, 1], [], []>} : vector<2x64xf32>, vector<64x512xf32>, vector<2x512xf32> -> vector<2x512xf32>
    %57 = arith.addf %53, %56 : vector<2x512xf32>
    %c24 = arith.constant 24 : index
    %c0_47 = arith.constant 0 : index
    %58 = vector.load %arg7[%c24, %c0_47] : memref<98x64xf32, #tpu.memory_space<vmem>>, vector<2x64xf32>
    %c768 = arith.constant 768 : index
    %c0_48 = arith.constant 0 : index
    %59 = vector.load %arg4[%c768, %c0_48] : memref<3136x512xf32, #tpu.memory_space<vmem>>, vector<64x512xf32>
    %cst_49 = arith.constant dense<0.000000e+00> : vector<2x512xf32>
    %60 = tpu.matmul %58, %59, %cst_49 {dimension_numbers = #tpu.dot_dimension_numbers<[1], [0], [0], [1], [0, 0, 1, 1], [], []>} : vector<2x64xf32>, vector<64x512xf32>, vector<2x512xf32> -> vector<2x512xf32>
    %61 = arith.addf %57, %60 : vector<2x512xf32>
    %c26 = arith.constant 26 : index
    %c0_50 = arith.constant 0 : index
    %62 = vector.load %arg7[%c26, %c0_50] : memref<98x64xf32, #tpu.memory_space<vmem>>, vector<2x64xf32>
    %c832 = arith.constant 832 : index
    %c0_51 = arith.constant 0 : index
    %63 = vector.load %arg4[%c832, %c0_51] : memref<3136x512xf32, #tpu.memory_space<vmem>>, vector<64x512xf32>
    %cst_52 = arith.constant dense<0.000000e+00> : vector<2x512xf32>
    %64 = tpu.matmul %62, %63, %cst_52 {dimension_numbers = #tpu.dot_dimension_numbers<[1], [0], [0], [1], [0, 0, 1, 1], [], []>} : vector<2x64xf32>, vector<64x512xf32>, vector<2x512xf32> -> vector<2x512xf32>
    %65 = arith.addf %61, %64 : vector<2x512xf32>
    %c28 = arith.constant 28 : index
    %c0_53 = arith.constant 0 : index
    %66 = vector.load %arg7[%c28, %c0_53] : memref<98x64xf32, #tpu.memory_space<vmem>>, vector<2x64xf32>
    %c896 = arith.constant 896 : index
    %c0_54 = arith.constant 0 : index
    %67 = vector.load %arg4[%c896, %c0_54] : memref<3136x512xf32, #tpu.memory_space<vmem>>, vector<64x512xf32>
    %cst_55 = arith.constant dense<0.000000e+00> : vector<2x512xf32>
    %68 = tpu.matmul %66, %67, %cst_55 {dimension_numbers = #tpu.dot_dimension_numbers<[1], [0], [0], [1], [0, 0, 1, 1], [], []>} : vector<2x64xf32>, vector<64x512xf32>, vector<2x512xf32> -> vector<2x512xf32>
    %69 = arith.addf %65, %68 : vector<2x512xf32>
    %c30 = arith.constant 30 : index
    %c0_56 = arith.constant 0 : index
    %70 = vector.load %arg7[%c30, %c0_56] : memref<98x64xf32, #tpu.memory_space<vmem>>, vector<2x64xf32>
    %c960 = arith.constant 960 : index
    %c0_57 = arith.constant 0 : index
    %71 = vector.load %arg4[%c960, %c0_57] : memref<3136x512xf32, #tpu.memory_space<vmem>>, vector<64x512xf32>
    %cst_58 = arith.constant dense<0.000000e+00> : vector<2x512xf32>
    %72 = tpu.matmul %70, %71, %cst_58 {dimension_numbers = #tpu.dot_dimension_numbers<[1], [0], [0], [1], [0, 0, 1, 1], [], []>} : vector<2x64xf32>, vector<64x512xf32>, vector<2x512xf32> -> vector<2x512xf32>
    %73 = arith.addf %69, %72 : vector<2x512xf32>
    %c32 = arith.constant 32 : index
    %c0_59 = arith.constant 0 : index
    %74 = vector.load %arg7[%c32, %c0_59] : memref<98x64xf32, #tpu.memory_space<vmem>>, vector<2x64xf32>
    %c1024 = arith.constant 1024 : index
    %c0_60 = arith.constant 0 : index
    %75 = vector.load %arg4[%c1024, %c0_60] : memref<3136x512xf32, #tpu.memory_space<vmem>>, vector<64x512xf32>
    %cst_61 = arith.constant dense<0.000000e+00> : vector<2x512xf32>
    %76 = tpu.matmul %74, %75, %cst_61 {dimension_numbers = #tpu.dot_dimension_numbers<[1], [0], [0], [1], [0, 0, 1, 1], [], []>} : vector<2x64xf32>, vector<64x512xf32>, vector<2x512xf32> -> vector<2x512xf32>
    %77 = arith.addf %73, %76 : vector<2x512xf32>
    %c34 = arith.constant 34 : index
    %c0_62 = arith.constant 0 : index
    %78 = vector.load %arg7[%c34, %c0_62] : memref<98x64xf32, #tpu.memory_space<vmem>>, vector<2x64xf32>
    %c1088 = arith.constant 1088 : index
    %c0_63 = arith.constant 0 : index
    %79 = vector.load %arg4[%c1088, %c0_63] : memref<3136x512xf32, #tpu.memory_space<vmem>>, vector<64x512xf32>
    %cst_64 = arith.constant dense<0.000000e+00> : vector<2x512xf32>
    %80 = tpu.matmul %78, %79, %cst_64 {dimension_numbers = #tpu.dot_dimension_numbers<[1], [0], [0], [1], [0, 0, 1, 1], [], []>} : vector<2x64xf32>, vector<64x512xf32>, vector<2x512xf32> -> vector<2x512xf32>
    %81 = arith.addf %77, %80 : vector<2x512xf32>
    %c36 = arith.constant 36 : index
    %c0_65 = arith.constant 0 : index
    %82 = vector.load %arg7[%c36, %c0_65] : memref<98x64xf32, #tpu.memory_space<vmem>>, vector<2x64xf32>
    %c1152 = arith.constant 1152 : index
    %c0_66 = arith.constant 0 : index
    %83 = vector.load %arg4[%c1152, %c0_66] : memref<3136x512xf32, #tpu.memory_space<vmem>>, vector<64x512xf32>
    %cst_67 = arith.constant dense<0.000000e+00> : vector<2x512xf32>
    %84 = tpu.matmul %82, %83, %cst_67 {dimension_numbers = #tpu.dot_dimension_numbers<[1], [0], [0], [1], [0, 0, 1, 1], [], []>} : vector<2x64xf32>, vector<64x512xf32>, vector<2x512xf32> -> vector<2x512xf32>
    %85 = arith.addf %81, %84 : vector<2x512xf32>
    %c38 = arith.constant 38 : index
    %c0_68 = arith.constant 0 : index
    %86 = vector.load %arg7[%c38, %c0_68] : memref<98x64xf32, #tpu.memory_space<vmem>>, vector<2x64xf32>
    %c1216 = arith.constant 1216 : index
    %c0_69 = arith.constant 0 : index
    %87 = vector.load %arg4[%c1216, %c0_69] : memref<3136x512xf32, #tpu.memory_space<vmem>>, vector<64x512xf32>
    %cst_70 = arith.constant dense<0.000000e+00> : vector<2x512xf32>
    %88 = tpu.matmul %86, %87, %cst_70 {dimension_numbers = #tpu.dot_dimension_numbers<[1], [0], [0], [1], [0, 0, 1, 1], [], []>} : vector<2x64xf32>, vector<64x512xf32>, vector<2x512xf32> -> vector<2x512xf32>
    %89 = arith.addf %85, %88 : vector<2x512xf32>
    %c40 = arith.constant 40 : index
    %c0_71 = arith.constant 0 : index
    %90 = vector.load %arg7[%c40, %c0_71] : memref<98x64xf32, #tpu.memory_space<vmem>>, vector<2x64xf32>
    %c1280 = arith.constant 1280 : index
    %c0_72 = arith.constant 0 : index
    %91 = vector.load %arg4[%c1280, %c0_72] : memref<3136x512xf32, #tpu.memory_space<vmem>>, vector<64x512xf32>
    %cst_73 = arith.constant dense<0.000000e+00> : vector<2x512xf32>
    %92 = tpu.matmul %90, %91, %cst_73 {dimension_numbers = #tpu.dot_dimension_numbers<[1], [0], [0], [1], [0, 0, 1, 1], [], []>} : vector<2x64xf32>, vector<64x512xf32>, vector<2x512xf32> -> vector<2x512xf32>
    %93 = arith.addf %89, %92 : vector<2x512xf32>
    %c42 = arith.constant 42 : index
    %c0_74 = arith.constant 0 : index
    %94 = vector.load %arg7[%c42, %c0_74] : memref<98x64xf32, #tpu.memory_space<vmem>>, vector<2x64xf32>
    %c1344 = arith.constant 1344 : index
    %c0_75 = arith.constant 0 : index
    %95 = vector.load %arg4[%c1344, %c0_75] : memref<3136x512xf32, #tpu.memory_space<vmem>>, vector<64x512xf32>
    %cst_76 = arith.constant dense<0.000000e+00> : vector<2x512xf32>
    %96 = tpu.matmul %94, %95, %cst_76 {dimension_numbers = #tpu.dot_dimension_numbers<[1], [0], [0], [1], [0, 0, 1, 1], [], []>} : vector<2x64xf32>, vector<64x512xf32>, vector<2x512xf32> -> vector<2x512xf32>
    %97 = arith.addf %93, %96 : vector<2x512xf32>
    %c44 = arith.constant 44 : index
    %c0_77 = arith.constant 0 : index
    %98 = vector.load %arg7[%c44, %c0_77] : memref<98x64xf32, #tpu.memory_space<vmem>>, vector<2x64xf32>
    %c1408 = arith.constant 1408 : index
    %c0_78 = arith.constant 0 : index
    %99 = vector.load %arg4[%c1408, %c0_78] : memref<3136x512xf32, #tpu.memory_space<vmem>>, vector<64x512xf32>
    %cst_79 = arith.constant dense<0.000000e+00> : vector<2x512xf32>
    %100 = tpu.matmul %98, %99, %cst_79 {dimension_numbers = #tpu.dot_dimension_numbers<[1], [0], [0], [1], [0, 0, 1, 1], [], []>} : vector<2x64xf32>, vector<64x512xf32>, vector<2x512xf32> -> vector<2x512xf32>
    %101 = arith.addf %97, %100 : vector<2x512xf32>
    %c46 = arith.constant 46 : index
    %c0_80 = arith.constant 0 : index
    %102 = vector.load %arg7[%c46, %c0_80] : memref<98x64xf32, #tpu.memory_space<vmem>>, vector<2x64xf32>
    %c1472 = arith.constant 1472 : index
    %c0_81 = arith.constant 0 : index
    %103 = vector.load %arg4[%c1472, %c0_81] : memref<3136x512xf32, #tpu.memory_space<vmem>>, vector<64x512xf32>
    %cst_82 = arith.constant dense<0.000000e+00> : vector<2x512xf32>
    %104 = tpu.matmul %102, %103, %cst_82 {dimension_numbers = #tpu.dot_dimension_numbers<[1], [0], [0], [1], [0, 0, 1, 1], [], []>} : vector<2x64xf32>, vector<64x512xf32>, vector<2x512xf32> -> vector<2x512xf32>
    %105 = arith.addf %101, %104 : vector<2x512xf32>
    %c48 = arith.constant 48 : index
    %c0_83 = arith.constant 0 : index
    %106 = vector.load %arg7[%c48, %c0_83] : memref<98x64xf32, #tpu.memory_space<vmem>>, vector<2x64xf32>
    %c1536 = arith.constant 1536 : index
    %c0_84 = arith.constant 0 : index
    %107 = vector.load %arg4[%c1536, %c0_84] : memref<3136x512xf32, #tpu.memory_space<vmem>>, vector<64x512xf32>
    %cst_85 = arith.constant dense<0.000000e+00> : vector<2x512xf32>
    %108 = tpu.matmul %106, %107, %cst_85 {dimension_numbers = #tpu.dot_dimension_numbers<[1], [0], [0], [1], [0, 0, 1, 1], [], []>} : vector<2x64xf32>, vector<64x512xf32>, vector<2x512xf32> -> vector<2x512xf32>
    %109 = arith.addf %105, %108 : vector<2x512xf32>
    %c50 = arith.constant 50 : index
    %c0_86 = arith.constant 0 : index
    %110 = vector.load %arg7[%c50, %c0_86] : memref<98x64xf32, #tpu.memory_space<vmem>>, vector<2x64xf32>
    %c1600 = arith.constant 1600 : index
    %c0_87 = arith.constant 0 : index
    %111 = vector.load %arg4[%c1600, %c0_87] : memref<3136x512xf32, #tpu.memory_space<vmem>>, vector<64x512xf32>
    %cst_88 = arith.constant dense<0.000000e+00> : vector<2x512xf32>
    %112 = tpu.matmul %110, %111, %cst_88 {dimension_numbers = #tpu.dot_dimension_numbers<[1], [0], [0], [1], [0, 0, 1, 1], [], []>} : vector<2x64xf32>, vector<64x512xf32>, vector<2x512xf32> -> vector<2x512xf32>
    %113 = arith.addf %109, %112 : vector<2x512xf32>
    %c52 = arith.constant 52 : index
    %c0_89 = arith.constant 0 : index
    %114 = vector.load %arg7[%c52, %c0_89] : memref<98x64xf32, #tpu.memory_space<vmem>>, vector<2x64xf32>
    %c1664 = arith.constant 1664 : index
    %c0_90 = arith.constant 0 : index
    %115 = vector.load %arg4[%c1664, %c0_90] : memref<3136x512xf32, #tpu.memory_space<vmem>>, vector<64x512xf32>
    %cst_91 = arith.constant dense<0.000000e+00> : vector<2x512xf32>
    %116 = tpu.matmul %114, %115, %cst_91 {dimension_numbers = #tpu.dot_dimension_numbers<[1], [0], [0], [1], [0, 0, 1, 1], [], []>} : vector<2x64xf32>, vector<64x512xf32>, vector<2x512xf32> -> vector<2x512xf32>
    %117 = arith.addf %113, %116 : vector<2x512xf32>
    %c54 = arith.constant 54 : index
    %c0_92 = arith.constant 0 : index
    %118 = vector.load %arg7[%c54, %c0_92] : memref<98x64xf32, #tpu.memory_space<vmem>>, vector<2x64xf32>
    %c1728 = arith.constant 1728 : index
    %c0_93 = arith.constant 0 : index
    %119 = vector.load %arg4[%c1728, %c0_93] : memref<3136x512xf32, #tpu.memory_space<vmem>>, vector<64x512xf32>
    %cst_94 = arith.constant dense<0.000000e+00> : vector<2x512xf32>
    %120 = tpu.matmul %118, %119, %cst_94 {dimension_numbers = #tpu.dot_dimension_numbers<[1], [0], [0], [1], [0, 0, 1, 1], [], []>} : vector<2x64xf32>, vector<64x512xf32>, vector<2x512xf32> -> vector<2x512xf32>
    %121 = arith.addf %117, %120 : vector<2x512xf32>
    %c56 = arith.constant 56 : index
    %c0_95 = arith.constant 0 : index
    %122 = vector.load %arg7[%c56, %c0_95] : memref<98x64xf32, #tpu.memory_space<vmem>>, vector<2x64xf32>
    %c1792 = arith.constant 1792 : index
    %c0_96 = arith.constant 0 : index
    %123 = vector.load %arg4[%c1792, %c0_96] : memref<3136x512xf32, #tpu.memory_space<vmem>>, vector<64x512xf32>
    %cst_97 = arith.constant dense<0.000000e+00> : vector<2x512xf32>
    %124 = tpu.matmul %122, %123, %cst_97 {dimension_numbers = #tpu.dot_dimension_numbers<[1], [0], [0], [1], [0, 0, 1, 1], [], []>} : vector<2x64xf32>, vector<64x512xf32>, vector<2x512xf32> -> vector<2x512xf32>
    %125 = arith.addf %121, %124 : vector<2x512xf32>
    %c58 = arith.constant 58 : index
    %c0_98 = arith.constant 0 : index
    %126 = vector.load %arg7[%c58, %c0_98] : memref<98x64xf32, #tpu.memory_space<vmem>>, vector<2x64xf32>
    %c1856 = arith.constant 1856 : index
    %c0_99 = arith.constant 0 : index
    %127 = vector.load %arg4[%c1856, %c0_99] : memref<3136x512xf32, #tpu.memory_space<vmem>>, vector<64x512xf32>
    %cst_100 = arith.constant dense<0.000000e+00> : vector<2x512xf32>
    %128 = tpu.matmul %126, %127, %cst_100 {dimension_numbers = #tpu.dot_dimension_numbers<[1], [0], [0], [1], [0, 0, 1, 1], [], []>} : vector<2x64xf32>, vector<64x512xf32>, vector<2x512xf32> -> vector<2x512xf32>
    %129 = arith.addf %125, %128 : vector<2x512xf32>
    %c60 = arith.constant 60 : index
    %c0_101 = arith.constant 0 : index
    %130 = vector.load %arg7[%c60, %c0_101] : memref<98x64xf32, #tpu.memory_space<vmem>>, vector<2x64xf32>
    %c1920 = arith.constant 1920 : index
    %c0_102 = arith.constant 0 : index
    %131 = vector.load %arg4[%c1920, %c0_102] : memref<3136x512xf32, #tpu.memory_space<vmem>>, vector<64x512xf32>
    %cst_103 = arith.constant dense<0.000000e+00> : vector<2x512xf32>
    %132 = tpu.matmul %130, %131, %cst_103 {dimension_numbers = #tpu.dot_dimension_numbers<[1], [0], [0], [1], [0, 0, 1, 1], [], []>} : vector<2x64xf32>, vector<64x512xf32>, vector<2x512xf32> -> vector<2x512xf32>
    %133 = arith.addf %129, %132 : vector<2x512xf32>
    %c62 = arith.constant 62 : index
    %c0_104 = arith.constant 0 : index
    %134 = vector.load %arg7[%c62, %c0_104] : memref<98x64xf32, #tpu.memory_space<vmem>>, vector<2x64xf32>
    %c1984 = arith.constant 1984 : index
    %c0_105 = arith.constant 0 : index
    %135 = vector.load %arg4[%c1984, %c0_105] : memref<3136x512xf32, #tpu.memory_space<vmem>>, vector<64x512xf32>
    %cst_106 = arith.constant dense<0.000000e+00> : vector<2x512xf32>
    %136 = tpu.matmul %134, %135, %cst_106 {dimension_numbers = #tpu.dot_dimension_numbers<[1], [0], [0], [1], [0, 0, 1, 1], [], []>} : vector<2x64xf32>, vector<64x512xf32>, vector<2x512xf32> -> vector<2x512xf32>
    %137 = arith.addf %133, %136 : vector<2x512xf32>
    %c64_107 = arith.constant 64 : index
    %c0_108 = arith.constant 0 : index
    %138 = vector.load %arg7[%c64_107, %c0_108] : memref<98x64xf32, #tpu.memory_space<vmem>>, vector<2x64xf32>
    %c2048 = arith.constant 2048 : index
    %c0_109 = arith.constant 0 : index
    %139 = vector.load %arg4[%c2048, %c0_109] : memref<3136x512xf32, #tpu.memory_space<vmem>>, vector<64x512xf32>
    %cst_110 = arith.constant dense<0.000000e+00> : vector<2x512xf32>
    %140 = tpu.matmul %138, %139, %cst_110 {dimension_numbers = #tpu.dot_dimension_numbers<[1], [0], [0], [1], [0, 0, 1, 1], [], []>} : vector<2x64xf32>, vector<64x512xf32>, vector<2x512xf32> -> vector<2x512xf32>
    %141 = arith.addf %137, %140 : vector<2x512xf32>
    %c66 = arith.constant 66 : index
    %c0_111 = arith.constant 0 : index
    %142 = vector.load %arg7[%c66, %c0_111] : memref<98x64xf32, #tpu.memory_space<vmem>>, vector<2x64xf32>
    %c2112 = arith.constant 2112 : index
    %c0_112 = arith.constant 0 : index
    %143 = vector.load %arg4[%c2112, %c0_112] : memref<3136x512xf32, #tpu.memory_space<vmem>>, vector<64x512xf32>
    %cst_113 = arith.constant dense<0.000000e+00> : vector<2x512xf32>
    %144 = tpu.matmul %142, %143, %cst_113 {dimension_numbers = #tpu.dot_dimension_numbers<[1], [0], [0], [1], [0, 0, 1, 1], [], []>} : vector<2x64xf32>, vector<64x512xf32>, vector<2x512xf32> -> vector<2x512xf32>
    %145 = arith.addf %141, %144 : vector<2x512xf32>
    %c68 = arith.constant 68 : index
    %c0_114 = arith.constant 0 : index
    %146 = vector.load %arg7[%c68, %c0_114] : memref<98x64xf32, #tpu.memory_space<vmem>>, vector<2x64xf32>
    %c2176 = arith.constant 2176 : index
    %c0_115 = arith.constant 0 : index
    %147 = vector.load %arg4[%c2176, %c0_115] : memref<3136x512xf32, #tpu.memory_space<vmem>>, vector<64x512xf32>
    %cst_116 = arith.constant dense<0.000000e+00> : vector<2x512xf32>
    %148 = tpu.matmul %146, %147, %cst_116 {dimension_numbers = #tpu.dot_dimension_numbers<[1], [0], [0], [1], [0, 0, 1, 1], [], []>} : vector<2x64xf32>, vector<64x512xf32>, vector<2x512xf32> -> vector<2x512xf32>
    %149 = arith.addf %145, %148 : vector<2x512xf32>
    %c70 = arith.constant 70 : index
    %c0_117 = arith.constant 0 : index
    %150 = vector.load %arg7[%c70, %c0_117] : memref<98x64xf32, #tpu.memory_space<vmem>>, vector<2x64xf32>
    %c2240 = arith.constant 2240 : index
    %c0_118 = arith.constant 0 : index
    %151 = vector.load %arg4[%c2240, %c0_118] : memref<3136x512xf32, #tpu.memory_space<vmem>>, vector<64x512xf32>
    %cst_119 = arith.constant dense<0.000000e+00> : vector<2x512xf32>
    %152 = tpu.matmul %150, %151, %cst_119 {dimension_numbers = #tpu.dot_dimension_numbers<[1], [0], [0], [1], [0, 0, 1, 1], [], []>} : vector<2x64xf32>, vector<64x512xf32>, vector<2x512xf32> -> vector<2x512xf32>
    %153 = arith.addf %149, %152 : vector<2x512xf32>
    %c72 = arith.constant 72 : index
    %c0_120 = arith.constant 0 : index
    %154 = vector.load %arg7[%c72, %c0_120] : memref<98x64xf32, #tpu.memory_space<vmem>>, vector<2x64xf32>
    %c2304 = arith.constant 2304 : index
    %c0_121 = arith.constant 0 : index
    %155 = vector.load %arg4[%c2304, %c0_121] : memref<3136x512xf32, #tpu.memory_space<vmem>>, vector<64x512xf32>
    %cst_122 = arith.constant dense<0.000000e+00> : vector<2x512xf32>
    %156 = tpu.matmul %154, %155, %cst_122 {dimension_numbers = #tpu.dot_dimension_numbers<[1], [0], [0], [1], [0, 0, 1, 1], [], []>} : vector<2x64xf32>, vector<64x512xf32>, vector<2x512xf32> -> vector<2x512xf32>
    %157 = arith.addf %153, %156 : vector<2x512xf32>
    %c74 = arith.constant 74 : index
    %c0_123 = arith.constant 0 : index
    %158 = vector.load %arg7[%c74, %c0_123] : memref<98x64xf32, #tpu.memory_space<vmem>>, vector<2x64xf32>
    %c2368 = arith.constant 2368 : index
    %c0_124 = arith.constant 0 : index
    %159 = vector.load %arg4[%c2368, %c0_124] : memref<3136x512xf32, #tpu.memory_space<vmem>>, vector<64x512xf32>
    %cst_125 = arith.constant dense<0.000000e+00> : vector<2x512xf32>
    %160 = tpu.matmul %158, %159, %cst_125 {dimension_numbers = #tpu.dot_dimension_numbers<[1], [0], [0], [1], [0, 0, 1, 1], [], []>} : vector<2x64xf32>, vector<64x512xf32>, vector<2x512xf32> -> vector<2x512xf32>
    %161 = arith.addf %157, %160 : vector<2x512xf32>
    %c76 = arith.constant 76 : index
    %c0_126 = arith.constant 0 : index
    %162 = vector.load %arg7[%c76, %c0_126] : memref<98x64xf32, #tpu.memory_space<vmem>>, vector<2x64xf32>
    %c2432 = arith.constant 2432 : index
    %c0_127 = arith.constant 0 : index
    %163 = vector.load %arg4[%c2432, %c0_127] : memref<3136x512xf32, #tpu.memory_space<vmem>>, vector<64x512xf32>
    %cst_128 = arith.constant dense<0.000000e+00> : vector<2x512xf32>
    %164 = tpu.matmul %162, %163, %cst_128 {dimension_numbers = #tpu.dot_dimension_numbers<[1], [0], [0], [1], [0, 0, 1, 1], [], []>} : vector<2x64xf32>, vector<64x512xf32>, vector<2x512xf32> -> vector<2x512xf32>
    %165 = arith.addf %161, %164 : vector<2x512xf32>
    %c78 = arith.constant 78 : index
    %c0_129 = arith.constant 0 : index
    %166 = vector.load %arg7[%c78, %c0_129] : memref<98x64xf32, #tpu.memory_space<vmem>>, vector<2x64xf32>
    %c2496 = arith.constant 2496 : index
    %c0_130 = arith.constant 0 : index
    %167 = vector.load %arg4[%c2496, %c0_130] : memref<3136x512xf32, #tpu.memory_space<vmem>>, vector<64x512xf32>
    %cst_131 = arith.constant dense<0.000000e+00> : vector<2x512xf32>
    %168 = tpu.matmul %166, %167, %cst_131 {dimension_numbers = #tpu.dot_dimension_numbers<[1], [0], [0], [1], [0, 0, 1, 1], [], []>} : vector<2x64xf32>, vector<64x512xf32>, vector<2x512xf32> -> vector<2x512xf32>
    %169 = arith.addf %165, %168 : vector<2x512xf32>
    %c80 = arith.constant 80 : index
    %c0_132 = arith.constant 0 : index
    %170 = vector.load %arg7[%c80, %c0_132] : memref<98x64xf32, #tpu.memory_space<vmem>>, vector<2x64xf32>
    %c2560 = arith.constant 2560 : index
    %c0_133 = arith.constant 0 : index
    %171 = vector.load %arg4[%c2560, %c0_133] : memref<3136x512xf32, #tpu.memory_space<vmem>>, vector<64x512xf32>
    %cst_134 = arith.constant dense<0.000000e+00> : vector<2x512xf32>
    %172 = tpu.matmul %170, %171, %cst_134 {dimension_numbers = #tpu.dot_dimension_numbers<[1], [0], [0], [1], [0, 0, 1, 1], [], []>} : vector<2x64xf32>, vector<64x512xf32>, vector<2x512xf32> -> vector<2x512xf32>
    %173 = arith.addf %169, %172 : vector<2x512xf32>
    %c82 = arith.constant 82 : index
    %c0_135 = arith.constant 0 : index
    %174 = vector.load %arg7[%c82, %c0_135] : memref<98x64xf32, #tpu.memory_space<vmem>>, vector<2x64xf32>
    %c2624 = arith.constant 2624 : index
    %c0_136 = arith.constant 0 : index
    %175 = vector.load %arg4[%c2624, %c0_136] : memref<3136x512xf32, #tpu.memory_space<vmem>>, vector<64x512xf32>
    %cst_137 = arith.constant dense<0.000000e+00> : vector<2x512xf32>
    %176 = tpu.matmul %174, %175, %cst_137 {dimension_numbers = #tpu.dot_dimension_numbers<[1], [0], [0], [1], [0, 0, 1, 1], [], []>} : vector<2x64xf32>, vector<64x512xf32>, vector<2x512xf32> -> vector<2x512xf32>
    %177 = arith.addf %173, %176 : vector<2x512xf32>
    %c84 = arith.constant 84 : index
    %c0_138 = arith.constant 0 : index
    %178 = vector.load %arg7[%c84, %c0_138] : memref<98x64xf32, #tpu.memory_space<vmem>>, vector<2x64xf32>
    %c2688 = arith.constant 2688 : index
    %c0_139 = arith.constant 0 : index
    %179 = vector.load %arg4[%c2688, %c0_139] : memref<3136x512xf32, #tpu.memory_space<vmem>>, vector<64x512xf32>
    %cst_140 = arith.constant dense<0.000000e+00> : vector<2x512xf32>
    %180 = tpu.matmul %178, %179, %cst_140 {dimension_numbers = #tpu.dot_dimension_numbers<[1], [0], [0], [1], [0, 0, 1, 1], [], []>} : vector<2x64xf32>, vector<64x512xf32>, vector<2x512xf32> -> vector<2x512xf32>
    %181 = arith.addf %177, %180 : vector<2x512xf32>
    %c86 = arith.constant 86 : index
    %c0_141 = arith.constant 0 : index
    %182 = vector.load %arg7[%c86, %c0_141] : memref<98x64xf32, #tpu.memory_space<vmem>>, vector<2x64xf32>
    %c2752 = arith.constant 2752 : index
    %c0_142 = arith.constant 0 : index
    %183 = vector.load %arg4[%c2752, %c0_142] : memref<3136x512xf32, #tpu.memory_space<vmem>>, vector<64x512xf32>
    %cst_143 = arith.constant dense<0.000000e+00> : vector<2x512xf32>
    %184 = tpu.matmul %182, %183, %cst_143 {dimension_numbers = #tpu.dot_dimension_numbers<[1], [0], [0], [1], [0, 0, 1, 1], [], []>} : vector<2x64xf32>, vector<64x512xf32>, vector<2x512xf32> -> vector<2x512xf32>
    %185 = arith.addf %181, %184 : vector<2x512xf32>
    %c88 = arith.constant 88 : index
    %c0_144 = arith.constant 0 : index
    %186 = vector.load %arg7[%c88, %c0_144] : memref<98x64xf32, #tpu.memory_space<vmem>>, vector<2x64xf32>
    %c2816 = arith.constant 2816 : index
    %c0_145 = arith.constant 0 : index
    %187 = vector.load %arg4[%c2816, %c0_145] : memref<3136x512xf32, #tpu.memory_space<vmem>>, vector<64x512xf32>
    %cst_146 = arith.constant dense<0.000000e+00> : vector<2x512xf32>
    %188 = tpu.matmul %186, %187, %cst_146 {dimension_numbers = #tpu.dot_dimension_numbers<[1], [0], [0], [1], [0, 0, 1, 1], [], []>} : vector<2x64xf32>, vector<64x512xf32>, vector<2x512xf32> -> vector<2x512xf32>
    %189 = arith.addf %185, %188 : vector<2x512xf32>
    %c90 = arith.constant 90 : index
    %c0_147 = arith.constant 0 : index
    %190 = vector.load %arg7[%c90, %c0_147] : memref<98x64xf32, #tpu.memory_space<vmem>>, vector<2x64xf32>
    %c2880 = arith.constant 2880 : index
    %c0_148 = arith.constant 0 : index
    %191 = vector.load %arg4[%c2880, %c0_148] : memref<3136x512xf32, #tpu.memory_space<vmem>>, vector<64x512xf32>
    %cst_149 = arith.constant dense<0.000000e+00> : vector<2x512xf32>
    %192 = tpu.matmul %190, %191, %cst_149 {dimension_numbers = #tpu.dot_dimension_numbers<[1], [0], [0], [1], [0, 0, 1, 1], [], []>} : vector<2x64xf32>, vector<64x512xf32>, vector<2x512xf32> -> vector<2x512xf32>
    %193 = arith.addf %189, %192 : vector<2x512xf32>
    %c92 = arith.constant 92 : index
    %c0_150 = arith.constant 0 : index
    %194 = vector.load %arg7[%c92, %c0_150] : memref<98x64xf32, #tpu.memory_space<vmem>>, vector<2x64xf32>
    %c2944 = arith.constant 2944 : index
    %c0_151 = arith.constant 0 : index
    %195 = vector.load %arg4[%c2944, %c0_151] : memref<3136x512xf32, #tpu.memory_space<vmem>>, vector<64x512xf32>
    %cst_152 = arith.constant dense<0.000000e+00> : vector<2x512xf32>
    %196 = tpu.matmul %194, %195, %cst_152 {dimension_numbers = #tpu.dot_dimension_numbers<[1], [0], [0], [1], [0, 0, 1, 1], [], []>} : vector<2x64xf32>, vector<64x512xf32>, vector<2x512xf32> -> vector<2x512xf32>
    %197 = arith.addf %193, %196 : vector<2x512xf32>
    %c94 = arith.constant 94 : index
    %c0_153 = arith.constant 0 : index
    %198 = vector.load %arg7[%c94, %c0_153] : memref<98x64xf32, #tpu.memory_space<vmem>>, vector<2x64xf32>
    %c3008 = arith.constant 3008 : index
    %c0_154 = arith.constant 0 : index
    %199 = vector.load %arg4[%c3008, %c0_154] : memref<3136x512xf32, #tpu.memory_space<vmem>>, vector<64x512xf32>
    %cst_155 = arith.constant dense<0.000000e+00> : vector<2x512xf32>
    %200 = tpu.matmul %198, %199, %cst_155 {dimension_numbers = #tpu.dot_dimension_numbers<[1], [0], [0], [1], [0, 0, 1, 1], [], []>} : vector<2x64xf32>, vector<64x512xf32>, vector<2x512xf32> -> vector<2x512xf32>
    %201 = arith.addf %197, %200 : vector<2x512xf32>
    %c96 = arith.constant 96 : index
    %c0_156 = arith.constant 0 : index
    %202 = vector.load %arg7[%c96, %c0_156] : memref<98x64xf32, #tpu.memory_space<vmem>>, vector<2x64xf32>
    %c3072 = arith.constant 3072 : index
    %c0_157 = arith.constant 0 : index
    %203 = vector.load %arg4[%c3072, %c0_157] : memref<3136x512xf32, #tpu.memory_space<vmem>>, vector<64x512xf32>
    %cst_158 = arith.constant dense<0.000000e+00> : vector<2x512xf32>
    %204 = tpu.matmul %202, %203, %cst_158 {dimension_numbers = #tpu.dot_dimension_numbers<[1], [0], [0], [1], [0, 0, 1, 1], [], []>} : vector<2x64xf32>, vector<64x512xf32>, vector<2x512xf32> -> vector<2x512xf32>
    %205 = arith.addf %201, %204 : vector<2x512xf32>
    %c0_159 = arith.constant 0 : index
    %c0_160 = arith.constant 0 : index
    %206 = vector.load %arg5[%c0_159, %c0_160] : memref<1x512xf32, #tpu.memory_space<vmem>>, vector<1x512xf32>
    %207 = vector.broadcast %206 : vector<1x512xf32> to vector<2x512xf32>
    %208 = arith.addf %205, %207 : vector<2x512xf32>
    %cst_161 = arith.constant 0.000000e+00 : f32
    %209 = vector.broadcast %cst_161 : f32 to vector<2x512xf32>
    %210 = arith.maximumf %208, %209 : vector<2x512xf32>
    %c0_162 = arith.constant 0 : index
    %c0_163 = arith.constant 0 : index
    %211 = vector.load %arg6[%c0_162, %c0_163] : memref<2x512xf32, #tpu.memory_space<vmem>>, vector<2x512xf32>
    tpu.vector_store %arg6[%c0_162, %c0_163], %210 {strides = array<i32>} : memref<2x512xf32, #tpu.memory_space<vmem>>, vector<2x512xf32>,
    return
  }
  func.func @transform_0(%arg0: i32) -> (i32, i32) {
    %c0_i32 = arith.constant 0 : i32
    %c0_i32_0 = arith.constant 0 : i32
    %c0_i32_1 = arith.constant 0 : i32
    return %c0_i32, %c0_i32_0 : i32, i32
  }
  func.func @transform_1(%arg0: i32) -> (i32, i32) {
    %c0_i32 = arith.constant 0 : i32
    %c0_i32_0 = arith.constant 0 : i32
    %c0_i32_1 = arith.constant 0 : i32
    return %c0_i32, %c0_i32_0 : i32, i32
  }
  func.func @transform_2(%arg0: i32) -> (i32, i32) {
    %c0_i32 = arith.constant 0 : i32
    %c0_i32_0 = arith.constant 0 : i32
    %c0_i32_1 = arith.constant 0 : i32
    return %c0_i32, %c0_i32_0 : i32, i32
  }
  func.func @transform_3(%arg0: i32) -> (i32, i32) {
    %c0_i32 = arith.constant 0 : i32
    %c0_i32_0 = arith.constant 0 : i32
    %c0_i32_1 = arith.constant 0 : i32
    return %c0_i32, %c0_i32_0 : i32, i32
  }
  func.func @transform_4(%arg0: i32) -> (i32, i32) {
    %c0_i32 = arith.constant 0 : i32
    %c0_i32_0 = arith.constant 0 : i32
    %c0_i32_1 = arith.constant 0 : i32
    return %c0_i32, %c0_i32_0 : i32, i32
  }
  func.func @transform_5(%arg0: i32) -> (i32, i32) {
    %c0_i32 = arith.constant 0 : i32
    %c0_i32_0 = arith.constant 0 : i32
    %c0_i32_1 = arith.constant 0 : i32
    return %c0_i32, %c0_i32_0 : i32, i32
  }
}

</mosaic_0001>

<bundles_post_ra>
// kernel: icm_forward.3
= control target key start
LH: loop header
LB: loop body
LE: loop exit
PB: predicated region body
PF: predicated region fallthrough
CT: control target
= control target key end

     0   :  { %s902_s12 = smov 0   ;;  %s1344_s0 = inlined_call_operand.vmem [shape: f32[800,256], index: 0, kind: input, shape index: {}]   ;;  %s1345_s1 = inlined_call_operand.vmem [shape: f32[256,32], index: 1, kind: input, shape index: {}]   ;;  %s1346_s2 = inlined_call_operand.vmem [shape: f32[1,32], index: 2, kind: input, shape index: {}]   ;;  %s1347_s3 = inlined_call_operand.vmem [shape: f32[800,32], index: 3, kind: output, shape index: {}]  }
   0x1 LB: > { %s788_s13 = sadd.s32 4294967295, %s879_s12   ;;  %p792_p0 = scmp.ge.s32.totalorder %s879_s12, 1  ;;  %s879_s12 = sphi %s902_s12, %s13_s12  }
   0x2   : > { %p139_p1 = scmp.lt.s32.totalorder %s879_s12, 3 }
   0x4   : > { %p140_p2 = pnand %p792_p0, %p139_p1 }
   0x5   : > { %s164_s8 = smul.u32 (!%p140_p2), 50, %s788_s13 }
   0x6   : > { %143 = sbr.rel (%p140_p2) target bundleno = 371 (0x173), region = 32 }
   0x7   : > { %p165_p3 = scmp.lt.s32.totalorder (!%p140_p2), %s164_s8, 99 }
   0xb   : > { %v292_v0 = vld [vmem:[%s1345_s1 + $0x78] sm:$0xff]  ;;  %v881_v1 = vmov 0.0   ;;  %v291_v2 = vld [vmem:[%s1345_s1 + $0x70] sm:$0xff]  ;;  %v290_v3 = vld [vmem:[%s1345_s1 + $0x68] sm:$0xff]  ;;  %s1349_s8 = smov (!%p165_p3, %s164_s8), 99  ;;  %vm681_vm0 = vcmask 261120  }
   0xc   : > { %316 = vmatprep.subr.mxu0 %v881_v1  ;;  %800 = vmatprep.subr.mxu1 %v881_v1  ;;  %v289_v4 = vld [vmem:[%s1345_s1 + $0x60] sm:$0xff]  ;;  %v288_v5 = vld [vmem:[%s1345_s1 + $0x58] sm:$0xff]  ;;  %v287_v6 = vld [vmem:[%s1345_s1 + $0x50] sm:$0xff]  ;;  %s799_s22 = sshll.u32 %s1349_s8, 4  ;;  %s795_s7 = sshll.u32 %s1349_s8, 3 }
   0xd   : > { %317 = vmatpush1.msra.mxu0 %v292_v0  ;;  %832 = vmatpush1.msra.mxu1 %v292_v0  ;;  %v286_v7 = vld [vmem:[%s1345_s1 + $0x48] sm:$0xff]  ;;  %v285_v8 = vld [vmem:[%s1345_s1 + $0x40] sm:$0xff]  ;;  %v284_v9 = vld [vmem:[%s1345_s1 + $0x38] sm:$0xff]  ;;  %s1071_s29 = scalar_lea.vmem %s1344_s0, %s799_s22  ;;  %s1191_s11 = scalar_lea.vmem %s1347_s3, %s795_s7 }
   0xe   : > { %318 = vmatprep.subr.mxu0 %v881_v1  ;;  %801 = vmatprep.subr.mxu1 %v881_v1  ;;  %v283_v10 = vld [vmem:[%s1345_s1 + $0x30] sm:$0xff]  ;;  %v282_v11 = vld [vmem:[%s1345_s1 + $0x28] sm:$0xff]  ;;  %v281_v12 = vld [vmem:[%s1345_s1 + $0x20] sm:$0xff] }
   0xf   : > { %319 = vmatpush1.msra.mxu0 %v291_v2  ;;  %833 = vmatpush1.msra.mxu1 %v291_v2  ;;  %v280_v13 = vld [vmem:[%s1345_s1 + $0x18] sm:$0xff]  ;;  %v279_v14 = vld [vmem:[%s1345_s1 + $0x10] sm:$0xff]  ;;  %v278_v15 = vld [vmem:[%s1345_s1 + $0x8] sm:$0xff] }
  0x10   : > { %320 = vmatprep.subr.mxu0 %v881_v1  ;;  %802 = vmatprep.subr.mxu1 %v881_v1  ;;  %v277_v16 = vld [vmem:[%s1345_s1] sm:$0xff]  ;;  %v308_v17 = vld [vmem:[%s1345_s1 + $0xf8] sm:$0xff]  ;;  %v307_v18 = vld [vmem:[%s1345_s1 + $0xf0] sm:$0xff] }
  0x11   : > { %321 = vmatpush1.msra.mxu0 %v290_v3  ;;  %834 = vmatpush1.msra.mxu1 %v290_v3  ;;  %v306_v19 = vld [vmem:[%s1345_s1 + $0xe8] sm:$0xff]  ;;  %v305_v20 = vld [vmem:[%s1345_s1 + $0xe0] sm:$0xff]  ;;  %v304_v21 = vld [vmem:[%s1345_s1 + $0xd8] sm:$0xff] }
  0x12   : > { %322 = vmatprep.subr.mxu0 %v881_v1  ;;  %803 = vmatprep.subr.mxu1 %v881_v1  ;;  %v303_v22 = vld [vmem:[%s1345_s1 + $0xd0] sm:$0xff]  ;;  %v302_v23 = vld [vmem:[%s1345_s1 + $0xc8] sm:$0xff]  ;;  %v301_v24 = vld [vmem:[%s1345_s1 + $0xc0] sm:$0xff] }
  0x13   : > { %323 = vmatpush1.msra.mxu0 %v289_v4  ;;  %835 = vmatpush1.msra.mxu1 %v289_v4  ;;  %v300_v25 = vld [vmem:[%s1345_s1 + $0xb8] sm:$0xff]  ;;  %v299_v26 = vld [vmem:[%s1345_s1 + $0xb0] sm:$0xff]  ;;  %v298_v27 = vld [vmem:[%s1345_s1 + $0xa8] sm:$0xff] }
  0x14   : > { %324 = vmatprep.subr.mxu0 %v881_v1  ;;  %804 = vmatprep.subr.mxu1 %v881_v1  ;;  %v297_v28 = vld [vmem:[%s1345_s1 + $0xa0] sm:$0xff]  ;;  %v296_v29 = vld [vmem:[%s1345_s1 + $0x98] sm:$0xff]  ;;  %v295_v30 = vld [vmem:[%s1345_s1 + $0x90] sm:$0xff] }
  0x15   : > { %325 = vmatpush1.msra.mxu0 %v288_v5  ;;  %836 = vmatpush1.msra.mxu1 %v288_v5  ;;  %v294_v31 = vld [vmem:[%s1345_s1 + $0x88] sm:$0xff]  ;;  %v293_v32 = vld [vmem:[%s1345_s1 + $0x80] sm:$0xff]  ;;  %v228_v34 = vld [vmem:[%s1071_s29 + $0x198] sm:$0xff] }
  0x16   : > { %326 = vmatprep.subr.mxu0 %v881_v1  ;;  %805 = vmatprep.subr.mxu1 %v881_v1  ;;  %v178_v33 = vld [vmem:[%s1071_s29 + $0x8] sm:$0xff]  ;;  %v177_v35 = vld [vmem:[%s1071_s29] sm:$0xff]  ;;  %v227_v36 = vld [vmem:[%s1071_s29 + $0x190] sm:$0xff] }
  0x17   : > { %327 = vmatpush1.msra.mxu0 %v287_v6  ;;  %837 = vmatpush1.msra.mxu1 %v287_v6  ;;  %v180_v37 = vld [vmem:[%s1071_s29 + $0x18] sm:$0xff]  ;;  %v230_v38 = vld [vmem:[%s1071_s29 + $0x1a8] sm:$0xff]  ;;  %v179_v39 = vld [vmem:[%s1071_s29 + $0x10] sm:$0xff] }
  0x18   : > { %328 = vmatprep.subr.mxu0 %v881_v1  ;;  %806 = vmatprep.subr.mxu1 %v881_v1  ;;  %v229_v40 = vld [vmem:[%s1071_s29 + $0x1a0] sm:$0xff]  ;;  %v182_v41 = vld [vmem:[%s1071_s29 + $0x28] sm:$0xff]  ;;  %v232_v42 = vld [vmem:[%s1071_s29 + $0x1b8] sm:$0xff] }
  0x19   : > { %329 = vmatpush1.msra.mxu0 %v286_v7  ;;  %838 = vmatpush1.msra.mxu1 %v286_v7  ;;  %v181_v43 = vld [vmem:[%s1071_s29 + $0x20] sm:$0xff]  ;;  %v231_v44 = vld [vmem:[%s1071_s29 + $0x1b0] sm:$0xff]  ;;  %v184_v45 = vld [vmem:[%s1071_s29 + $0x38] sm:$0xff] }
  0x1a   : > { %330 = vmatprep.subr.mxu0 %v881_v1  ;;  %807 = vmatprep.subr.mxu1 %v881_v1  ;;  %v234_v46 = vld [vmem:[%s1071_s29 + $0x1c8] sm:$0xff]  ;;  %v183_v47 = vld [vmem:[%s1071_s29 + $0x30] sm:$0xff]  ;;  %v233_v48 = vld [vmem:[%s1071_s29 + $0x1c0] sm:$0xff] }
  0x1b   : > { %331 = vmatpush1.msra.mxu0 %v285_v8  ;;  %839 = vmatpush1.msra.mxu1 %v285_v8  ;;  %v186_v49 = vld [vmem:[%s1071_s29 + $0x48] sm:$0xff]  ;;  %v236_v50 = vld [vmem:[%s1071_s29 + $0x1d8] sm:$0xff]  ;;  %v185_v51 = vld [vmem:[%s1071_s29 + $0x40] sm:$0xff] }
  0x1c   : > { %332 = vmatprep.subr.mxu0 %v881_v1  ;;  %808 = vmatprep.subr.mxu1 %v881_v1  ;;  %v235_v52 = vld [vmem:[%s1071_s29 + $0x1d0] sm:$0xff]  ;;  %v188_v53 = vld [vmem:[%s1071_s29 + $0x58] sm:$0xff]  ;;  %v238_v54 = vld [vmem:[%s1071_s29 + $0x1e8] sm:$0xff] }
  0x1d   : > { %333 = vmatpush1.msra.mxu0 %v284_v9  ;;  %840 = vmatpush1.msra.mxu1 %v284_v9  ;;  %v187_v55 = vld [vmem:[%s1071_s29 + $0x50] sm:$0xff]  ;;  %v237_v56 = vld [vmem:[%s1071_s29 + $0x1e0] sm:$0xff]  ;;  %v190_v57 = vld [vmem:[%s1071_s29 + $0x68] sm:$0xff] }
  0x1e   : > { %334 = vmatprep.subr.mxu0 %v881_v1  ;;  %809 = vmatprep.subr.mxu1 %v881_v1  ;;  %v240_v58 = vld [vmem:[%s1071_s29 + $0x1f8] sm:$0xff]  ;;  %v189_v59 = vld [vmem:[%s1071_s29 + $0x60] sm:$0xff]  ;;  %v239_v60 = vld [vmem:[%s1071_s29 + $0x1f0] sm:$0xff] }
  0x1f   : > { %335 = vmatpush1.msra.mxu0 %v283_v10  ;;  %841 = vmatpush1.msra.mxu1 %v283_v10  ;;  %v192_v61 = vld [vmem:[%s1071_s29 + $0x78] sm:$0xff]  ;;  %v242_v62 = vld [vmem:[%s1071_s29 + $0x208] sm:$0xff]  ;;  %v191_v63 = vld [vmem:[%s1071_s29 + $0x70] sm:$0xff] }
  0x20   : > { %336 = vmatprep.subr.mxu0 %v881_v1  ;;  %810 = vmatprep.subr.mxu1 %v881_v1  ;;  %v241_v0 = vld [vmem:[%s1071_s29 + $0x200] sm:$0xff]  ;;  %v244_v2 = vld [vmem:[%s1071_s29 + $0x218] sm:$0xff]  ;;  %v243_v4 = vld [vmem:[%s1071_s29 + $0x210] sm:$0xff] }
  0x21   : > { %337 = vmatpush1.msra.mxu0 %v282_v11  ;;  %842 = vmatpush1.msra.mxu1 %v282_v11  ;;  %v193_v3 = vld [vmem:[%s1071_s29 + $0x80] sm:$0xff]  ;;  %v196_v5 = vld [vmem:[%s1071_s29 + $0x98] sm:$0xff]  ;;  %v246_v6 = vld [vmem:[%s1071_s29 + $0x228] sm:$0xff] }
  0x22   : > { %338 = vmatprep.subr.mxu0 %v881_v1  ;;  %811 = vmatprep.subr.mxu1 %v881_v1  ;;  %v195_v7 = vld [vmem:[%s1071_s29 + $0x90] sm:$0xff]  ;;  %v245_v8 = vld [vmem:[%s1071_s29 + $0x220] sm:$0xff]  ;;  %v198_v9 = vld [vmem:[%s1071_s29 + $0xa8] sm:$0xff] }
  0x23   : > { %339 = vmatpush1.msra.mxu0 %v281_v12  ;;  %843 = vmatpush1.msra.mxu1 %v281_v12  ;;  %v248_v10 = vld [vmem:[%s1071_s29 + $0x238] sm:$0xff]  ;;  %v197_v11 = vld [vmem:[%s1071_s29 + $0xa0] sm:$0xff]  ;;  %v247_v12 = vld [vmem:[%s1071_s29 + $0x230] sm:$0xff] }
  0x24   : > { %340 = vmatprep.subr.mxu0 %v881_v1  ;;  %812 = vmatprep.subr.mxu1 %v881_v1 }
  0x25   : > { %341 = vmatpush1.msra.mxu0 %v280_v13  ;;  %844 = vmatpush1.msra.mxu1 %v280_v13  ;;  %v200_v13 = vld [vmem:[%s1071_s29 + $0xb8] sm:$0xff] }
  0x26   : > { %342 = vmatprep.subr.mxu0 %v881_v1  ;;  %813 = vmatprep.subr.mxu1 %v881_v1 }
  0x27   : > { %343 = vmatpush1.msra.mxu0 %v279_v14  ;;  %845 = vmatpush1.msra.mxu1 %v279_v14  ;;  %v250_v14 = vld [vmem:[%s1071_s29 + $0x248] sm:$0xff] }
  0x28   : > { %344 = vmatprep.subr.mxu0 %v881_v1  ;;  %814 = vmatprep.subr.mxu1 %v881_v1 }
  0x29   : > { %345 = vmatpush1.msra.mxu0 %v278_v15  ;;  %846 = vmatpush1.msra.mxu1 %v278_v15  ;;  %v199_v15 = vld [vmem:[%s1071_s29 + $0xb0] sm:$0xff] }
  0x2a   : > { %346 = vmatprep.subr.mxu0 %v881_v1  ;;  %815 = vmatprep.subr.mxu1 %v881_v1 }
  0x2b   : > { %347 = vmatpush1.msra.mxu0 %v277_v16  ;;  %847 = vmatpush1.msra.mxu1 %v277_v16  ;;  %v249_v16 = vld [vmem:[%s1071_s29 + $0x240] sm:$0xff] }
  0x2c   : > { %348 = vmatprep.subr.mxu0 %v881_v1  ;;  %816 = vmatprep.subr.mxu1 %v881_v1 }
  0x2d   : > { %349 = vmatpush2.msra.mxu0 %v308_v17  ;;  %848 = vmatpush2.msra.mxu1 %v308_v17  ;;  %v202_v17 = vld [vmem:[%s1071_s29 + $0xc8] sm:$0xff] }
  0x2e   : > { %350 = vmatprep.subr.mxu0 %v881_v1  ;;  %817 = vmatprep.subr.mxu1 %v881_v1 }
  0x2f   : > { %351 = vmatpush2.msra.mxu0 %v307_v18  ;;  %849 = vmatpush2.msra.mxu1 %v307_v18  ;;  %v252_v18 = vld [vmem:[%s1071_s29 + $0x258] sm:$0xff] }
  0x30   : > { %352 = vmatprep.subr.mxu0 %v881_v1  ;;  %818 = vmatprep.subr.mxu1 %v881_v1 }
  0x31   : > { %353 = vmatpush2.msra.mxu0 %v306_v19  ;;  %850 = vmatpush2.msra.mxu1 %v306_v19  ;;  %v201_v19 = vld [vmem:[%s1071_s29 + $0xc0] sm:$0xff] }
  0x32   : > { %354 = vmatprep.subr.mxu0 %v881_v1  ;;  %819 = vmatprep.subr.mxu1 %v881_v1 }
  0x33   : > { %355 = vmatpush2.msra.mxu0 %v305_v20  ;;  %851 = vmatpush2.msra.mxu1 %v305_v20  ;;  %v251_v20 = vld [vmem:[%s1071_s29 + $0x250] sm:$0xff] }
  0x34   : > { %356 = vmatprep.subr.mxu0 %v881_v1  ;;  %820 = vmatprep.subr.mxu1 %v881_v1 }
  0x35   : > { %357 = vmatpush2.msra.mxu0 %v304_v21  ;;  %852 = vmatpush2.msra.mxu1 %v304_v21  ;;  %v204_v21 = vld [vmem:[%s1071_s29 + $0xd8] sm:$0xff] }
  0x36   : > { %358 = vmatprep.subr.mxu0 %v881_v1  ;;  %821 = vmatprep.subr.mxu1 %v881_v1 }
  0x37   : > { %359 = vmatpush2.msra.mxu0 %v303_v22  ;;  %853 = vmatpush2.msra.mxu1 %v303_v22  ;;  %v254_v22 = vld [vmem:[%s1071_s29 + $0x268] sm:$0xff] }
  0x38   : > { %360 = vmatprep.subr.mxu0 %v881_v1  ;;  %822 = vmatprep.subr.mxu1 %v881_v1 }
  0x39   : > { %361 = vmatpush2.msra.mxu0 %v302_v23  ;;  %854 = vmatpush2.msra.mxu1 %v302_v23  ;;  %v203_v23 = vld [vmem:[%s1071_s29 + $0xd0] sm:$0xff] }
  0x3a   : > { %362 = vmatprep.subr.mxu0 %v881_v1  ;;  %823 = vmatprep.subr.mxu1 %v881_v1 }
  0x3b   : > { %363 = vmatpush2.msra.mxu0 %v301_v24  ;;  %855 = vmatpush2.msra.mxu1 %v301_v24  ;;  %v253_v24 = vld [vmem:[%s1071_s29 + $0x260] sm:$0xff] }
  0x3c   : > { %364 = vmatprep.subr.mxu0 %v881_v1  ;;  %824 = vmatprep.subr.mxu1 %v881_v1 }
  0x3d   : > { %365 = vmatpush2.msra.mxu0 %v300_v25  ;;  %856 = vmatpush2.msra.mxu1 %v300_v25  ;;  %v206_v25 = vld [vmem:[%s1071_s29 + $0xe8] sm:$0xff] }
  0x3e   : > { %366 = vmatprep.subr.mxu0 %v881_v1  ;;  %825 = vmatprep.subr.mxu1 %v881_v1 }
  0x3f   : > { %367 = vmatpush2.msra.mxu0 %v299_v26  ;;  %857 = vmatpush2.msra.mxu1 %v299_v26  ;;  %v256_v26 = vld [vmem:[%s1071_s29 + $0x278] sm:$0xff] }
  0x40   : > { %368 = vmatprep.subr.mxu0 %v881_v1  ;;  %826 = vmatprep.subr.mxu1 %v881_v1 }
  0x41   : > { %369 = vmatpush2.msra.mxu0 %v298_v27  ;;  %858 = vmatpush2.msra.mxu1 %v298_v27  ;;  %v205_v27 = vld [vmem:[%s1071_s29 + $0xe0] sm:$0xff] }
  0x42   : > { %370 = vmatprep.subr.mxu0 %v881_v1  ;;  %827 = vmatprep.subr.mxu1 %v881_v1 }
  0x43   : > { %371 = vmatpush2.msra.mxu0 %v297_v28  ;;  %859 = vmatpush2.msra.mxu1 %v297_v28  ;;  %v255_v28 = vld [vmem:[%s1071_s29 + $0x270] sm:$0xff] }
  0x44   : > { %372 = vmatprep.subr.mxu0 %v881_v1  ;;  %828 = vmatprep.subr.mxu1 %v881_v1 }
  0x45   : > { %373 = vmatpush2.msra.mxu0 %v296_v29  ;;  %860 = vmatpush2.msra.mxu1 %v296_v29  ;;  %v208_v29 = vld [vmem:[%s1071_s29 + $0xf8] sm:$0xff] }
  0x46   : > { %374 = vmatprep.subr.mxu0 %v881_v1  ;;  %829 = vmatprep.subr.mxu1 %v881_v1 }
  0x47   : > { %375 = vmatpush2.msra.mxu0 %v295_v30  ;;  %861 = vmatpush2.msra.mxu1 %v295_v30  ;;  %v258_v30 = vld [vmem:[%s1071_s29 + $0x288] sm:$0xff] }
  0x48   : > { %376 = vmatprep.subr.mxu0 %v881_v1  ;;  %830 = vmatprep.subr.mxu1 %v881_v1 }
  0x49   : > { %377 = vmatpush2.msra.mxu0 %v294_v31  ;;  %862 = vmatpush2.msra.mxu1 %v294_v31  ;;  %v207_v31 = vld [vmem:[%s1071_s29 + $0xf0] sm:$0xff] }
  0x4a   : > { %378 = vmatprep.subr.mxu0 %v881_v1  ;;  %831 = vmatprep.subr.mxu1 %v881_v1  ;;  %v194_v1 = vld [vmem:[%s1071_s29 + $0x88] sm:$0xff] }
  0x4b   : > { %379 = vmatpush2.msra.mxu0 %v293_v32  ;;  %863 = vmatpush2.msra.mxu1 %v293_v32  ;;  %v257_v32 = vld [vmem:[%s1071_s29 + $0x280] sm:$0xff] }
  0x4c   : > { %380 = vmatprep.mubr.f32.mxu0 %v178_v33  ;;  %505 = vmatprep.mubr.f32.mxu1 %v228_v34  ;;  %v210_v33 = vld [vmem:[%s1071_s29 + $0x108] sm:$0xff]  ;;  %v260_v34 = vld [vmem:[%s1071_s29 + $0x298] sm:$0xff] }
  0x4d   : > { %381 = vmatmul.mubr.f32.vlgmr.msra.gmra.mxu0 %v177_v35  ;;  %506 = vmatmul.mubr.f32.vlgmr.msra.gmra.mxu1 %v227_v36  ;;  %v209_v35 = vld [vmem:[%s1071_s29 + $0x100] sm:$0xff]  ;;  %v259_v36 = vld [vmem:[%s1071_s29 + $0x290] sm:$0xff] }
  0x4e   : > { %385 = vmatprep.mubr.f32.mxu0 %v180_v37  ;;  %510 = vmatprep.mubr.f32.mxu1 %v230_v38  ;;  %v212_v37 = vld [vmem:[%s1071_s29 + $0x118] sm:$0xff]  ;;  %v262_v38 = vld [vmem:[%s1071_s29 + $0x2a8] sm:$0xff] }
  0x51   : > { %386 = vmatmul.mubr.f32.gmra.mxu0 %v179_v39  ;;  %511 = vmatmul.mubr.f32.gmra.mxu1 %v229_v40  ;;  %v211_v39 = vld [vmem:[%s1071_s29 + $0x110] sm:$0xff]  ;;  %v261_v40 = vld [vmem:[%s1071_s29 + $0x2a0] sm:$0xff] }
  0x52   : > { %390 = vmatprep.mubr.f32.mxu0 %v182_v41  ;;  %515 = vmatprep.mubr.f32.mxu1 %v232_v42  ;;  %v214_v41 = vld [vmem:[%s1071_s29 + $0x128] sm:$0xff]  ;;  %v264_v42 = vld [vmem:[%s1071_s29 + $0x2b8] sm:$0xff] }
  0x55   : > { %391 = vmatmul.mubr.f32.gmra.mxu0 %v181_v43  ;;  %516 = vmatmul.mubr.f32.gmra.mxu1 %v231_v44  ;;  %v213_v43 = vld [vmem:[%s1071_s29 + $0x120] sm:$0xff]  ;;  %v263_v44 = vld [vmem:[%s1071_s29 + $0x2b0] sm:$0xff] }
  0x56   : > { %395 = vmatprep.mubr.f32.mxu0 %v184_v45  ;;  %520 = vmatprep.mubr.f32.mxu1 %v234_v46  ;;  %v216_v45 = vld [vmem:[%s1071_s29 + $0x138] sm:$0xff]  ;;  %v266_v46 = vld [vmem:[%s1071_s29 + $0x2c8] sm:$0xff] }
  0x59   : > { %396 = vmatmul.mubr.f32.gmra.mxu0 %v183_v47  ;;  %521 = vmatmul.mubr.f32.gmra.mxu1 %v233_v48  ;;  %v215_v47 = vld [vmem:[%s1071_s29 + $0x130] sm:$0xff]  ;;  %v265_v48 = vld [vmem:[%s1071_s29 + $0x2c0] sm:$0xff] }
  0x5a   : > { %400 = vmatprep.mubr.f32.mxu0 %v186_v49  ;;  %525 = vmatprep.mubr.f32.mxu1 %v236_v50  ;;  %v218_v49 = vld [vmem:[%s1071_s29 + $0x148] sm:$0xff]  ;;  %v268_v50 = vld [vmem:[%s1071_s29 + $0x2d8] sm:$0xff] }
  0x5d   : > { %401 = vmatmul.mubr.f32.gmra.mxu0 %v185_v51  ;;  %526 = vmatmul.mubr.f32.gmra.mxu1 %v235_v52  ;;  %v217_v51 = vld [vmem:[%s1071_s29 + $0x140] sm:$0xff]  ;;  %v267_v52 = vld [vmem:[%s1071_s29 + $0x2d0] sm:$0xff] }
  0x5e   : > { %405 = vmatprep.mubr.f32.mxu0 %v188_v53  ;;  %530 = vmatprep.mubr.f32.mxu1 %v238_v54  ;;  %v220_v53 = vld [vmem:[%s1071_s29 + $0x158] sm:$0xff]  ;;  %v270_v54 = vld [vmem:[%s1071_s29 + $0x2e8] sm:$0xff] }
  0x61   : > { %406 = vmatmul.mubr.f32.gmra.mxu0 %v187_v55  ;;  %531 = vmatmul.mubr.f32.gmra.mxu1 %v237_v56  ;;  %v219_v55 = vld [vmem:[%s1071_s29 + $0x150] sm:$0xff]  ;;  %v269_v56 = vld [vmem:[%s1071_s29 + $0x2e0] sm:$0xff] }
  0x62   : > { %410 = vmatprep.mubr.f32.mxu0 %v190_v57  ;;  %535 = vmatprep.mubr.f32.mxu1 %v240_v58  ;;  %v222_v57 = vld [vmem:[%s1071_s29 + $0x168] sm:$0xff]  ;;  %v272_v58 = vld [vmem:[%s1071_s29 + $0x2f8] sm:$0xff] }
  0x65   : > { %411 = vmatmul.mubr.f32.gmra.mxu0 %v189_v59  ;;  %536 = vmatmul.mubr.f32.gmra.mxu1 %v239_v60  ;;  %v221_v59 = vld [vmem:[%s1071_s29 + $0x160] sm:$0xff]  ;;  %v271_v60 = vld [vmem:[%s1071_s29 + $0x2f0] sm:$0xff] }
  0x66   : > { %415 = vmatprep.mubr.f32.mxu0 %v192_v61  ;;  %540 = vmatprep.mubr.f32.mxu1 %v242_v62  ;;  %v224_v61 = vld [vmem:[%s1071_s29 + $0x178] sm:$0xff]  ;;  %v274_v62 = vld [vmem:[%s1071_s29 + $0x308] sm:$0xff] }
  0x69   : > { %416 = vmatmul.mubr.f32.gmra.mxu0 %v191_v63  ;;  %541 = vmatmul.mubr.f32.gmra.mxu1 %v241_v0  ;;  %v223_v63 = vld [vmem:[%s1071_s29 + $0x170] sm:$0xff]  ;;  %v273_v0 = vld [vmem:[%s1071_s29 + $0x300] sm:$0xff] }
  0x6a   : > { %420 = vmatprep.mubr.f32.mxu0 %v194_v1  ;;  %545 = vmatprep.mubr.f32.mxu1 %v244_v2  ;;  %v226_v1 = vld [vmem:[%s1071_s29 + $0x188] sm:$0xff]  ;;  %v276_v2 = vld [vmem:[%s1071_s29 + $0x318] sm:$0xff] }
  0x6d   : > { %421 = vmatmul.mubr.f32.gmra.mxu0 %v193_v3  ;;  %546 = vmatmul.mubr.f32.gmra.mxu1 %v243_v4  ;;  %v225_v3 = vld [vmem:[%s1071_s29 + $0x180] sm:$0xff]  ;;  %v275_v4 = vld [vmem:[%s1071_s29 + $0x310] sm:$0xff] }
  0x6e   : > { %425 = vmatprep.mubr.f32.mxu0 %v196_v5  ;;  %550 = vmatprep.mubr.f32.mxu1 %v246_v6  ;;  %v1183_v5 = vld [vmem:[%s1346_s2] ss:$0 sm:$0xff] }
  0x71   : > { %426 = vmatmul.mubr.f32.gmra.mxu0 %v195_v7  ;;  %551 = vmatmul.mubr.f32.gmra.mxu1 %v245_v8 }
  0x72   : > { %430 = vmatprep.mubr.f32.mxu0 %v198_v9  ;;  %555 = vmatprep.mubr.f32.mxu1 %v248_v10 }
  0x75   : > { %431 = vmatmul.mubr.f32.gmra.mxu0 %v197_v11  ;;  %556 = vmatmul.mubr.f32.gmra.mxu1 %v247_v12 }
  0x76   : > { %435 = vmatprep.mubr.f32.mxu0 %v200_v13  ;;  %560 = vmatprep.mubr.f32.mxu1 %v250_v14 }
  0x79   : > { %436 = vmatmul.mubr.f32.gmra.mxu0 %v199_v15  ;;  %561 = vmatmul.mubr.f32.gmra.mxu1 %v249_v16 }
  0x7a   : > { %440 = vmatprep.mubr.f32.mxu0 %v202_v17  ;;  %565 = vmatprep.mubr.f32.mxu1 %v252_v18 }
  0x7d   : > { %441 = vmatmul.mubr.f32.gmra.mxu0 %v201_v19  ;;  %566 = vmatmul.mubr.f32.gmra.mxu1 %v251_v20 }
  0x7e   : > { %445 = vmatprep.mubr.f32.mxu0 %v204_v21  ;;  %570 = vmatprep.mubr.f32.mxu1 %v254_v22 }
  0x81   : > { %446 = vmatmul.mubr.f32.gmra.mxu0 %v203_v23  ;;  %571 = vmatmul.mubr.f32.gmra.mxu1 %v253_v24 }
  0x82   : > { %450 = vmatprep.mubr.f32.mxu0 %v206_v25  ;;  %575 = vmatprep.mubr.f32.mxu1 %v256_v26 }
  0x85   : > { %451 = vmatmul.mubr.f32.gmra.mxu0 %v205_v27  ;;  %576 = vmatmul.mubr.f32.gmra.mxu1 %v255_v28 }
  0x86   : > { %455 = vmatprep.mubr.f32.mxu0 %v208_v29  ;;  %580 = vmatprep.mubr.f32.mxu1 %v258_v30 }
  0x89   : > { %456 = vmatmul.mubr.f32.gmra.mxu0 %v207_v31  ;;  %581 = vmatmul.mubr.f32.gmra.mxu1 %v257_v32 }
  0x8a   : > { %460 = vmatprep.mubr.f32.mxu0 %v210_v33  ;;  %585 = vmatprep.mubr.f32.mxu1 %v260_v34 }
  0x8d   : > { %461 = vmatmul.mubr.f32.gmra.mxu0 %v209_v35  ;;  %586 = vmatmul.mubr.f32.gmra.mxu1 %v259_v36 }
  0x8e   : > { %465 = vmatprep.mubr.f32.mxu0 %v212_v37  ;;  %590 = vmatprep.mubr.f32.mxu1 %v262_v38 }
  0x91   : > { %466 = vmatmul.mubr.f32.gmra.mxu0 %v211_v39  ;;  %591 = vmatmul.mubr.f32.gmra.mxu1 %v261_v40 }
  0x92   : > { %470 = vmatprep.mubr.f32.mxu0 %v214_v41  ;;  %595 = vmatprep.mubr.f32.mxu1 %v264_v42 }
  0x95   : > { %471 = vmatmul.mubr.f32.gmra.mxu0 %v213_v43  ;;  %596 = vmatmul.mubr.f32.gmra.mxu1 %v263_v44 }
  0x96   : > { %475 = vmatprep.mubr.f32.mxu0 %v216_v45  ;;  %600 = vmatprep.mubr.f32.mxu1 %v266_v46 }
  0x99   : > { %476 = vmatmul.mubr.f32.gmra.mxu0 %v215_v47  ;;  %601 = vmatmul.mubr.f32.gmra.mxu1 %v265_v48 }
  0x9a   : > { %480 = vmatprep.mubr.f32.mxu0 %v218_v49  ;;  %605 = vmatprep.mubr.f32.mxu1 %v268_v50 }
  0x9d   : > { %481 = vmatmul.mubr.f32.gmra.mxu0 %v217_v51  ;;  %606 = vmatmul.mubr.f32.gmra.mxu1 %v267_v52 }
  0x9e   : > { %485 = vmatprep.mubr.f32.mxu0 %v220_v53  ;;  %610 = vmatprep.mubr.f32.mxu1 %v270_v54 }
  0xa1   : > { %486 = vmatmul.mubr.f32.gmra.mxu0 %v219_v55  ;;  %611 = vmatmul.mubr.f32.gmra.mxu1 %v269_v56 }
  0xa2   : > { %490 = vmatprep.mubr.f32.mxu0 %v222_v57  ;;  %615 = vmatprep.mubr.f32.mxu1 %v272_v58 }
  0xa5   : > { %491 = vmatmul.mubr.f32.gmra.mxu0 %v221_v59  ;;  %616 = vmatmul.mubr.f32.gmra.mxu1 %v271_v60 }
  0xa6   : > { %495 = vmatprep.mubr.f32.mxu0 %v224_v61  ;;  %620 = vmatprep.mubr.f32.mxu1 %v274_v62 }
  0xa9   : > { %496 = vmatmul.mubr.f32.gmra.mxu0 %v223_v63  ;;  %621 = vmatmul.mubr.f32.gmra.mxu1 %v273_v0 }
  0xaa   : > { %500 = vmatprep.mubr.f32.mxu0 %v226_v1  ;;  %625 = vmatprep.mubr.f32.mxu1 %v276_v2 }
  0xad   : > { %501 = vmatmul.mubr.f32.gmra.mxu0 %v225_v3  ;;  %626 = vmatmul.mubr.f32.gmra.mxu1 %v275_v4 }
 0x10d   : > { %v382_v6 = vpop.f32.mrf.mxu0  ;;  %v507_v7 = vpop.f32.mrf.mxu1 }
 0x10e   : > { %v383_v8 = vadd.f32 %v1183_v5, %v382_v6  ;;  %v508_v9 = vadd.f32 %v1183_v5, %v507_v7 }
 0x10f   : > { %v384_v10 = vpop.f32.mrf.mxu0  ;;  %v509_v11 = vpop.f32.mrf.mxu1 }
 0x110   : > { %v631_v12 = vmax.f32 %v383_v8, 0.0  ;;  %v656_v13 = vmax.f32 %v508_v9, 0.0 }
 0x111   : > { %v387_v14 = vpop.f32.mrf.mxu0  ;;  %v512_v15 = vpop.f32.mrf.mxu1 }
 0x112   : > { %682 = vst.msk [vmem:[%s1191_s11] sm:$0xff] %vm681_vm0, %v631_v12  ;;  %707 = vst.msk [vmem:[%s1191_s11 + $0xc8] sm:$0xff] %vm681_vm0, %v656_v13  ;;  %v388_v16 = vadd.f32 %v1183_v5, %v387_v14  ;;  %v513_v17 = vadd.f32 %v1183_v5, %v512_v15 }
 0x113   : > { %v389_v18 = vpop.f32.mrf.mxu0  ;;  %v514_v19 = vpop.f32.mrf.mxu1 }
 0x114   : > { %v632_v20 = vmax.f32 %v388_v16, 0.0  ;;  %v657_v21 = vmax.f32 %v513_v17, 0.0 }
 0x115   : > { %v392_v22 = vpop.f32.mrf.mxu0  ;;  %v517_v23 = vpop.f32.mrf.mxu1 }
 0x116   : > { %683 = vst.msk [vmem:[%s1191_s11 + $0x8] sm:$0xff] %vm681_vm0, %v632_v20  ;;  %708 = vst.msk [vmem:[%s1191_s11 + $0xd0] sm:$0xff] %vm681_vm0, %v657_v21  ;;  %v393_v24 = vadd.f32 %v1183_v5, %v392_v22  ;;  %v518_v25 = vadd.f32 %v1183_v5, %v517_v23 }
 0x117   : > { %v394_v26 = vpop.f32.mrf.mxu0  ;;  %v519_v27 = vpop.f32.mrf.mxu1 }
 0x118   : > { %v633_v28 = vmax.f32 %v393_v24, 0.0  ;;  %v658_v29 = vmax.f32 %v518_v25, 0.0 }
 0x119   : > { %v397_v30 = vpop.f32.mrf.mxu0  ;;  %v522_v31 = vpop.f32.mrf.mxu1 }
 0x11a   : > { %684 = vst.msk [vmem:[%s1191_s11 + $0x10] sm:$0xff] %vm681_vm0, %v633_v28  ;;  %709 = vst.msk [vmem:[%s1191_s11 + $0xd8] sm:$0xff] %vm681_vm0, %v658_v29  ;;  %v398_v32 = vadd.f32 %v1183_v5, %v397_v30  ;;  %v523_v33 = vadd.f32 %v1183_v5, %v522_v31 }
 0x11b   : > { %v399_v34 = vpop.f32.mrf.mxu0  ;;  %v524_v35 = vpop.f32.mrf.mxu1 }
 0x11c   : > { %v634_v36 = vmax.f32 %v398_v32, 0.0  ;;  %v659_v37 = vmax.f32 %v523_v33, 0.0 }
 0x11d   : > { %v402_v38 = vpop.f32.mrf.mxu0  ;;  %v527_v39 = vpop.f32.mrf.mxu1 }
 0x11e   : > { %685 = vst.msk [vmem:[%s1191_s11 + $0x18] sm:$0xff] %vm681_vm0, %v634_v36  ;;  %710 = vst.msk [vmem:[%s1191_s11 + $0xe0] sm:$0xff] %vm681_vm0, %v659_v37  ;;  %v403_v40 = vadd.f32 %v1183_v5, %v402_v38  ;;  %v528_v41 = vadd.f32 %v1183_v5, %v527_v39 }
 0x11f   : > { %v404_v42 = vpop.f32.mrf.mxu0  ;;  %v529_v43 = vpop.f32.mrf.mxu1 }
 0x120   : > { %v635_v44 = vmax.f32 %v403_v40, 0.0  ;;  %v660_v45 = vmax.f32 %v528_v41, 0.0 }
 0x121   : > { %v407_v46 = vpop.f32.mrf.mxu0  ;;  %v532_v47 = vpop.f32.mrf.mxu1 }
 0x122   : > { %686 = vst.msk [vmem:[%s1191_s11 + $0x20] sm:$0xff] %vm681_vm0, %v635_v44  ;;  %711 = vst.msk [vmem:[%s1191_s11 + $0xe8] sm:$0xff] %vm681_vm0, %v660_v45  ;;  %v408_v48 = vadd.f32 %v1183_v5, %v407_v46  ;;  %v533_v49 = vadd.f32 %v1183_v5, %v532_v47 }
 0x123   : > { %v409_v50 = vpop.f32.mrf.mxu0  ;;  %v534_v51 = vpop.f32.mrf.mxu1 }
 0x124   : > { %v636_v52 = vmax.f32 %v408_v48, 0.0  ;;  %v661_v53 = vmax.f32 %v533_v49, 0.0 }
 0x125   : > { %v412_v54 = vpop.f32.mrf.mxu0  ;;  %v537_v55 = vpop.f32.mrf.mxu1 }
 0x126   : > { %687 = vst.msk [vmem:[%s1191_s11 + $0x28] sm:$0xff] %vm681_vm0, %v636_v52  ;;  %712 = vst.msk [vmem:[%s1191_s11 + $0xf0] sm:$0xff] %vm681_vm0, %v661_v53  ;;  %v413_v56 = vadd.f32 %v1183_v5, %v412_v54  ;;  %v538_v57 = vadd.f32 %v1183_v5, %v537_v55 }
 0x127   : > { %v414_v58 = vpop.f32.mrf.mxu0  ;;  %v539_v59 = vpop.f32.mrf.mxu1 }
 0x128   : > { %v637_v60 = vmax.f32 %v413_v56, 0.0  ;;  %v662_v61 = vmax.f32 %v538_v57, 0.0 }
 0x129   : > { %v417_v62 = vpop.f32.mrf.mxu0  ;;  %v542_v63 = vpop.f32.mrf.mxu1 }
 0x12a   : > { %688 = vst.msk [vmem:[%s1191_s11 + $0x30] sm:$0xff] %vm681_vm0, %v637_v60  ;;  %713 = vst.msk [vmem:[%s1191_s11 + $0xf8] sm:$0xff] %vm681_vm0, %v662_v61  ;;  %v418_v0 = vadd.f32 %v1183_v5, %v417_v62  ;;  %v543_v1 = vadd.f32 %v1183_v5, %v542_v63 }
 0x12b   : > { %v419_v2 = vpop.f32.mrf.mxu0  ;;  %v544_v3 = vpop.f32.mrf.mxu1 }
 0x12c   : > { %v638_v4 = vmax.f32 %v418_v0, 0.0  ;;  %v663_v6 = vmax.f32 %v543_v1, 0.0 }
 0x12d   : > { %v422_v7 = vpop.f32.mrf.mxu0  ;;  %v547_v8 = vpop.f32.mrf.mxu1 }
 0x12e   : > { %689 = vst.msk [vmem:[%s1191_s11 + $0x38] sm:$0xff] %vm681_vm0, %v638_v4  ;;  %714 = vst.msk [vmem:[%s1191_s11 + $0x100] sm:$0xff] %vm681_vm0, %v663_v6  ;;  %v423_v9 = vadd.f32 %v1183_v5, %v422_v7  ;;  %v548_v10 = vadd.f32 %v1183_v5, %v547_v8 }
 0x12f   : > { %v424_v11 = vpop.f32.mrf.mxu0  ;;  %v549_v12 = vpop.f32.mrf.mxu1 }
 0x130   : > { %v639_v13 = vmax.f32 %v423_v9, 0.0  ;;  %v664_v14 = vmax.f32 %v548_v10, 0.0 }
 0x131   : > { %v427_v15 = vpop.f32.mrf.mxu0  ;;  %v552_v16 = vpop.f32.mrf.mxu1 }
 0x132   : > { %690 = vst.msk [vmem:[%s1191_s11 + $0x40] sm:$0xff] %vm681_vm0, %v639_v13  ;;  %715 = vst.msk [vmem:[%s1191_s11 + $0x108] sm:$0xff] %vm681_vm0, %v664_v14  ;;  %v428_v17 = vadd.f32 %v1183_v5, %v427_v15  ;;  %v553_v18 = vadd.f32 %v1183_v5, %v552_v16 }
 0x133   : > { %v429_v19 = vpop.f32.mrf.mxu0  ;;  %v554_v20 = vpop.f32.mrf.mxu1 }
 0x134   : > { %v640_v21 = vmax.f32 %v428_v17, 0.0  ;;  %v665_v22 = vmax.f32 %v553_v18, 0.0 }
 0x135   : > { %v432_v23 = vpop.f32.mrf.mxu0  ;;  %v557_v24 = vpop.f32.mrf.mxu1 }
 0x136   : > { %691 = vst.msk [vmem:[%s1191_s11 + $0x48] sm:$0xff] %vm681_vm0, %v640_v21  ;;  %716 = vst.msk [vmem:[%s1191_s11 + $0x110] sm:$0xff] %vm681_vm0, %v665_v22  ;;  %v433_v25 = vadd.f32 %v1183_v5, %v432_v23  ;;  %v558_v26 = vadd.f32 %v1183_v5, %v557_v24 }
 0x137   : > { %v434_v27 = vpop.f32.mrf.mxu0  ;;  %v559_v28 = vpop.f32.mrf.mxu1 }
 0x138   : > { %v641_v29 = vmax.f32 %v433_v25, 0.0  ;;  %v666_v30 = vmax.f32 %v558_v26, 0.0 }
 0x139   : > { %v437_v31 = vpop.f32.mrf.mxu0  ;;  %v562_v32 = vpop.f32.mrf.mxu1 }
 0x13a   : > { %692 = vst.msk [vmem:[%s1191_s11 + $0x50] sm:$0xff] %vm681_vm0, %v641_v29  ;;  %717 = vst.msk [vmem:[%s1191_s11 + $0x118] sm:$0xff] %vm681_vm0, %v666_v30  ;;  %v438_v33 = vadd.f32 %v1183_v5, %v437_v31  ;;  %v563_v34 = vadd.f32 %v1183_v5, %v562_v32 }
 0x13b   : > { %v439_v35 = vpop.f32.mrf.mxu0  ;;  %v564_v36 = vpop.f32.mrf.mxu1 }
 0x13c   : > { %v642_v37 = vmax.f32 %v438_v33, 0.0  ;;  %v667_v38 = vmax.f32 %v563_v34, 0.0 }
 0x13d   : > { %v442_v39 = vpop.f32.mrf.mxu0  ;;  %v567_v40 = vpop.f32.mrf.mxu1 }
 0x13e   : > { %693 = vst.msk [vmem:[%s1191_s11 + $0x58] sm:$0xff] %vm681_vm0, %v642_v37  ;;  %718 = vst.msk [vmem:[%s1191_s11 + $0x120] sm:$0xff] %vm681_vm0, %v667_v38  ;;  %v443_v41 = vadd.f32 %v1183_v5, %v442_v39  ;;  %v568_v42 = vadd.f32 %v1183_v5, %v567_v40 }
 0x13f   : > { %v444_v43 = vpop.f32.mrf.mxu0  ;;  %v569_v44 = vpop.f32.mrf.mxu1 }
 0x140   : > { %v643_v45 = vmax.f32 %v443_v41, 0.0  ;;  %v668_v46 = vmax.f32 %v568_v42, 0.0 }
 0x141   : > { %v447_v47 = vpop.f32.mrf.mxu0  ;;  %v572_v48 = vpop.f32.mrf.mxu1 }
 0x142   : > { %694 = vst.msk [vmem:[%s1191_s11 + $0x60] sm:$0xff] %vm681_vm0, %v643_v45  ;;  %719 = vst.msk [vmem:[%s1191_s11 + $0x128] sm:$0xff] %vm681_vm0, %v668_v46  ;;  %v448_v49 = vadd.f32 %v1183_v5, %v447_v47  ;;  %v573_v50 = vadd.f32 %v1183_v5, %v572_v48 }
 0x143   : > { %v449_v51 = vpop.f32.mrf.mxu0  ;;  %v574_v52 = vpop.f32.mrf.mxu1 }
 0x144   : > { %v644_v53 = vmax.f32 %v448_v49, 0.0  ;;  %v669_v54 = vmax.f32 %v573_v50, 0.0 }
 0x145   : > { %v452_v55 = vpop.f32.mrf.mxu0  ;;  %v577_v56 = vpop.f32.mrf.mxu1 }
 0x146   : > { %695 = vst.msk [vmem:[%s1191_s11 + $0x68] sm:$0xff] %vm681_vm0, %v644_v53  ;;  %720 = vst.msk [vmem:[%s1191_s11 + $0x130] sm:$0xff] %vm681_vm0, %v669_v54  ;;  %v453_v57 = vadd.f32 %v1183_v5, %v452_v55  ;;  %v578_v58 = vadd.f32 %v1183_v5, %v577_v56 }
 0x147   : > { %v454_v59 = vpop.f32.mrf.mxu0  ;;  %v579_v60 = vpop.f32.mrf.mxu1 }
 0x148   : > { %v645_v61 = vmax.f32 %v453_v57, 0.0  ;;  %v670_v62 = vmax.f32 %v578_v58, 0.0 }
 0x149   : > { %v457_v63 = vpop.f32.mrf.mxu0  ;;  %v582_v0 = vpop.f32.mrf.mxu1 }
 0x14a   : > { %696 = vst.msk [vmem:[%s1191_s11 + $0x70] sm:$0xff] %vm681_vm0, %v645_v61  ;;  %721 = vst.msk [vmem:[%s1191_s11 + $0x138] sm:$0xff] %vm681_vm0, %v670_v62  ;;  %v458_v1 = vadd.f32 %v1183_v5, %v457_v63  ;;  %v583_v2 = vadd.f32 %v1183_v5, %v582_v0 }
 0x14b   : > { %v459_v3 = vpop.f32.mrf.mxu0  ;;  %v584_v4 = vpop.f32.mrf.mxu1 }
 0x14c   : > { %v646_v6 = vmax.f32 %v458_v1, 0.0  ;;  %v671_v7 = vmax.f32 %v583_v2, 0.0 }
 0x14d   : > { %v462_v8 = vpop.f32.mrf.mxu0  ;;  %v587_v9 = vpop.f32.mrf.mxu1 }
 0x14e   : > { %697 = vst.msk [vmem:[%s1191_s11 + $0x78] sm:$0xff] %vm681_vm0, %v646_v6  ;;  %722 = vst.msk [vmem:[%s1191_s11 + $0x140] sm:$0xff] %vm681_vm0, %v671_v7  ;;  %v463_v10 = vadd.f32 %v1183_v5, %v462_v8  ;;  %v588_v11 = vadd.f32 %v1183_v5, %v587_v9 }
 0x14f   : > { %v464_v12 = vpop.f32.mrf.mxu0  ;;  %v589_v13 = vpop.f32.mrf.mxu1 }
 0x150   : > { %v647_v14 = vmax.f32 %v463_v10, 0.0  ;;  %v672_v15 = vmax.f32 %v588_v11, 0.0 }
 0x151   : > { %v467_v16 = vpop.f32.mrf.mxu0  ;;  %v592_v17 = vpop.f32.mrf.mxu1 }
 0x152   : > { %698 = vst.msk [vmem:[%s1191_s11 + $0x80] sm:$0xff] %vm681_vm0, %v647_v14  ;;  %723 = vst.msk [vmem:[%s1191_s11 + $0x148] sm:$0xff] %vm681_vm0, %v672_v15  ;;  %v468_v18 = vadd.f32 %v1183_v5, %v467_v16  ;;  %v593_v19 = vadd.f32 %v1183_v5, %v592_v17 }
 0x153   : > { %v469_v20 = vpop.f32.mrf.mxu0  ;;  %v594_v21 = vpop.f32.mrf.mxu1 }
 0x154   : > { %v648_v22 = vmax.f32 %v468_v18, 0.0  ;;  %v673_v23 = vmax.f32 %v593_v19, 0.0 }
 0x155   : > { %v472_v24 = vpop.f32.mrf.mxu0  ;;  %v597_v25 = vpop.f32.mrf.mxu1 }
 0x156   : > { %699 = vst.msk [vmem:[%s1191_s11 + $0x88] sm:$0xff] %vm681_vm0, %v648_v22  ;;  %724 = vst.msk [vmem:[%s1191_s11 + $0x150] sm:$0xff] %vm681_vm0, %v673_v23  ;;  %v473_v26 = vadd.f32 %v1183_v5, %v472_v24  ;;  %v598_v27 = vadd.f32 %v1183_v5, %v597_v25 }
 0x157   : > { %v474_v28 = vpop.f32.mrf.mxu0  ;;  %v599_v29 = vpop.f32.mrf.mxu1 }
 0x158   : > { %v649_v30 = vmax.f32 %v473_v26, 0.0  ;;  %v674_v31 = vmax.f32 %v598_v27, 0.0 }
 0x159   : > { %v477_v32 = vpop.f32.mrf.mxu0  ;;  %v602_v33 = vpop.f32.mrf.mxu1 }
 0x15a   : > { %700 = vst.msk [vmem:[%s1191_s11 + $0x90] sm:$0xff] %vm681_vm0, %v649_v30  ;;  %725 = vst.msk [vmem:[%s1191_s11 + $0x158] sm:$0xff] %vm681_vm0, %v674_v31  ;;  %v478_v34 = vadd.f32 %v1183_v5, %v477_v32  ;;  %v603_v35 = vadd.f32 %v1183_v5, %v602_v33 }
 0x15b   : > { %v479_v36 = vpop.f32.mrf.mxu0  ;;  %v604_v37 = vpop.f32.mrf.mxu1 }
 0x15c   : > { %v650_v38 = vmax.f32 %v478_v34, 0.0  ;;  %v675_v39 = vmax.f32 %v603_v35, 0.0 }
 0x15d   : > { %v482_v40 = vpop.f32.mrf.mxu0  ;;  %v607_v41 = vpop.f32.mrf.mxu1 }
 0x15e   : > { %701 = vst.msk [vmem:[%s1191_s11 + $0x98] sm:$0xff] %vm681_vm0, %v650_v38  ;;  %726 = vst.msk [vmem:[%s1191_s11 + $0x160] sm:$0xff] %vm681_vm0, %v675_v39  ;;  %v483_v42 = vadd.f32 %v1183_v5, %v482_v40  ;;  %v608_v43 = vadd.f32 %v1183_v5, %v607_v41 }
 0x15f   : > { %v484_v44 = vpop.f32.mrf.mxu0  ;;  %v609_v45 = vpop.f32.mrf.mxu1 }
 0x160   : > { %v651_v46 = vmax.f32 %v483_v42, 0.0  ;;  %v676_v47 = vmax.f32 %v608_v43, 0.0 }
 0x161   : > { %v487_v48 = vpop.f32.mrf.mxu0  ;;  %v612_v49 = vpop.f32.mrf.mxu1 }
 0x162   : > { %702 = vst.msk [vmem:[%s1191_s11 + $0xa0] sm:$0xff] %vm681_vm0, %v651_v46  ;;  %727 = vst.msk [vmem:[%s1191_s11 + $0x168] sm:$0xff] %vm681_vm0, %v676_v47  ;;  %v488_v50 = vadd.f32 %v1183_v5, %v487_v48  ;;  %v613_v51 = vadd.f32 %v1183_v5, %v612_v49 }
 0x163   : > { %v489_v52 = vpop.f32.mrf.mxu0  ;;  %v614_v53 = vpop.f32.mrf.mxu1 }
 0x164   : > { %v652_v54 = vmax.f32 %v488_v50, 0.0  ;;  %v677_v55 = vmax.f32 %v613_v51, 0.0 }
 0x165   : > { %v492_v56 = vpop.f32.mrf.mxu0  ;;  %v617_v57 = vpop.f32.mrf.mxu1 }
 0x166   : > { %703 = vst.msk [vmem:[%s1191_s11 + $0xa8] sm:$0xff] %vm681_vm0, %v652_v54  ;;  %728 = vst.msk [vmem:[%s1191_s11 + $0x170] sm:$0xff] %vm681_vm0, %v677_v55  ;;  %v493_v58 = vadd.f32 %v1183_v5, %v492_v56  ;;  %v618_v59 = vadd.f32 %v1183_v5, %v617_v57 }
 0x167   : > { %v494_v60 = vpop.f32.mrf.mxu0  ;;  %v619_v61 = vpop.f32.mrf.mxu1 }
 0x168   : > { %v653_v62 = vmax.f32 %v493_v58, 0.0  ;;  %v678_v63 = vmax.f32 %v618_v59, 0.0 }
 0x169   : > { %v497_v0 = vpop.f32.mrf.mxu0  ;;  %v622_v1 = vpop.f32.mrf.mxu1 }
 0x16a   : > { %704 = vst.msk [vmem:[%s1191_s11 + $0xb0] sm:$0xff] %vm681_vm0, %v653_v62  ;;  %729 = vst.msk [vmem:[%s1191_s11 + $0x178] sm:$0xff] %vm681_vm0, %v678_v63  ;;  %v498_v2 = vadd.f32 %v1183_v5, %v497_v0  ;;  %v623_v3 = vadd.f32 %v1183_v5, %v622_v1 }
 0x16b   : > { %v499_v4 = vpop.f32.mrf.mxu0  ;;  %v624_v6 = vpop.f32.mrf.mxu1 }
 0x16c   : > { %v654_v7 = vmax.f32 %v498_v2, 0.0  ;;  %v679_v8 = vmax.f32 %v623_v3, 0.0 }
 0x16d   : > { %v502_v9 = vpop.f32.mrf.mxu0  ;;  %v627_v10 = vpop.f32.mrf.mxu1 }
 0x16e   : > { %705 = vst.msk [vmem:[%s1191_s11 + $0xb8] sm:$0xff] %vm681_vm0, %v654_v7  ;;  %730 = vst.msk [vmem:[%s1191_s11 + $0x180] sm:$0xff] %vm681_vm0, %v679_v8  ;;  %v503_v11 = vadd.f32 %v1183_v5, %v502_v9  ;;  %v628_v12 = vadd.f32 %v1183_v5, %v627_v10 }
 0x16f   : > { %v504_v13 = vpop.f32.mrf.mxu0  ;;  %v629_v14 = vpop.f32.mrf.mxu1 }
 0x170   : > { %v655_v15 = vmax.f32 %v503_v11, 0.0  ;;  %v680_v16 = vmax.f32 %v628_v12, 0.0 }
 0x172   : > { %706 = vst.msk [vmem:[%s1191_s11 + $0xc0] sm:$0xff] %vm681_vm0, %v655_v15  ;;  %731 = vst.msk [vmem:[%s1191_s11 + $0x188] sm:$0xff] %vm681_vm0, %v680_v16 }
 0x173 PF: > { %s13_s12 = sadd.s32 1, %s879_s12  }
 0x174   : > { %p10_p4 = scmp.ge.s32.totalorder %s13_s12, 4  }
 0x176   :  { %12 = sbr.rel (!%p10_p4) target bundleno = 1 (0x1), region = 62 }

// kernel: icm_forward.4
= control target key start
LH: loop header
LB: loop body
LE: loop exit
PB: predicated region body
PF: predicated region fallthrough
CT: control target
= control target key end

     0   :  { %v559_v0 = vmov 0.0   ;;  %vm530_vm0 = vcmask 523264   ;;  %vm551_vm1 = vcmask 517120   ;;  %s1197_s1 = inlined_call_operand.vmem [shape: f32[512,64], index: 1, kind: input, shape index: {}]   ;;  %s1198_s0 = inlined_call_operand.vmem [shape: f32[162,512], index: 0, kind: input, shape index: {}]   ;;  %s1199_s2 = inlined_call_operand.vmem [shape: f32[1,64], index: 2, kind: input, shape index: {}]   ;;  %s1200_s3 = inlined_call_operand.vmem [shape: f32[162,64], index: 3, kind: output, shape index: {}]  }
   0x1   :  { %169 = vmatprep.subr.mxu0 %v559_v0  ;;  %339 = vmatprep.subr.mxu1 %v559_v0  ;;  %v113_v1 = vld [vmem:[%s1197_s1 + $0x78] sm:$0xff]  ;;  %v112_v3 = vld [vmem:[%s1197_s1 + $0x70] sm:$0xff]  ;;  %v111_v5 = vld [vmem:[%s1197_s1 + $0x68] sm:$0xff] }
   0x2   :  { %v145_v2 = vld [vmem:[%s1197_s1 + $0x178] sm:$0xff]  ;;  %170 = vmatpush1.msra.mxu0 %v113_v1  ;;  %v144_v4 = vld [vmem:[%s1197_s1 + $0x170] sm:$0xff]  ;;  %v143_v6 = vld [vmem:[%s1197_s1 + $0x168] sm:$0xff] }
   0x3   :  { %340 = vmatpush1.msra.mxu1 %v145_v2  ;;  %171 = vmatprep.subr.mxu0 %v559_v0  ;;  %v110_v7 = vld [vmem:[%s1197_s1 + $0x60] sm:$0xff]  ;;  %v109_v9 = vld [vmem:[%s1197_s1 + $0x58] sm:$0xff]  ;;  %v108_v11 = vld [vmem:[%s1197_s1 + $0x50] sm:$0xff] }
   0x4   :  { %341 = vmatprep.subr.mxu1 %v559_v0  ;;  %172 = vmatpush1.msra.mxu0 %v112_v3  ;;  %v142_v8 = vld [vmem:[%s1197_s1 + $0x160] sm:$0xff]  ;;  %v141_v10 = vld [vmem:[%s1197_s1 + $0x158] sm:$0xff]  ;;  %v140_v12 = vld [vmem:[%s1197_s1 + $0x150] sm:$0xff] }
   0x5   :  { %342 = vmatpush1.msra.mxu1 %v144_v4  ;;  %173 = vmatprep.subr.mxu0 %v559_v0  ;;  %v107_v13 = vld [vmem:[%s1197_s1 + $0x48] sm:$0xff]  ;;  %v106_v15 = vld [vmem:[%s1197_s1 + $0x40] sm:$0xff]  ;;  %v105_v17 = vld [vmem:[%s1197_s1 + $0x38] sm:$0xff] }
   0x6   :  { %343 = vmatprep.subr.mxu1 %v559_v0  ;;  %174 = vmatpush1.msra.mxu0 %v111_v5  ;;  %v139_v14 = vld [vmem:[%s1197_s1 + $0x148] sm:$0xff]  ;;  %v138_v16 = vld [vmem:[%s1197_s1 + $0x140] sm:$0xff]  ;;  %v137_v18 = vld [vmem:[%s1197_s1 + $0x138] sm:$0xff] }
   0x7   :  { %344 = vmatpush1.msra.mxu1 %v143_v6  ;;  %175 = vmatprep.subr.mxu0 %v559_v0  ;;  %v104_v19 = vld [vmem:[%s1197_s1 + $0x30] sm:$0xff]  ;;  %v103_v21 = vld [vmem:[%s1197_s1 + $0x28] sm:$0xff]  ;;  %v102_v23 = vld [vmem:[%s1197_s1 + $0x20] sm:$0xff] }
   0x8   :  { %345 = vmatprep.subr.mxu1 %v559_v0  ;;  %176 = vmatpush1.msra.mxu0 %v110_v7  ;;  %v136_v20 = vld [vmem:[%s1197_s1 + $0x130] sm:$0xff]  ;;  %v135_v22 = vld [vmem:[%s1197_s1 + $0x128] sm:$0xff]  ;;  %v134_v24 = vld [vmem:[%s1197_s1 + $0x120] sm:$0xff] }
   0x9   :  { %346 = vmatpush1.msra.mxu1 %v142_v8  ;;  %177 = vmatprep.subr.mxu0 %v559_v0  ;;  %v101_v25 = vld [vmem:[%s1197_s1 + $0x18] sm:$0xff]  ;;  %v100_v27 = vld [vmem:[%s1197_s1 + $0x10] sm:$0xff]  ;;  %v99_v29 = vld [vmem:[%s1197_s1 + $0x8] sm:$0xff] }
   0xa   :  { %347 = vmatprep.subr.mxu1 %v559_v0  ;;  %178 = vmatpush1.msra.mxu0 %v109_v9  ;;  %v133_v26 = vld [vmem:[%s1197_s1 + $0x118] sm:$0xff]  ;;  %v132_v28 = vld [vmem:[%s1197_s1 + $0x110] sm:$0xff]  ;;  %v131_v30 = vld [vmem:[%s1197_s1 + $0x108] sm:$0xff] }
   0xb   :  { %348 = vmatpush1.msra.mxu1 %v141_v10  ;;  %179 = vmatprep.subr.mxu0 %v559_v0  ;;  %v98_v31 = vld [vmem:[%s1197_s1] sm:$0xff]  ;;  %v129_v33 = vld [vmem:[%s1197_s1 + $0xf8] sm:$0xff]  ;;  %v128_v35 = vld [vmem:[%s1197_s1 + $0xf0] sm:$0xff] }
   0xc   :  { %349 = vmatprep.subr.mxu1 %v559_v0  ;;  %180 = vmatpush1.msra.mxu0 %v108_v11  ;;  %v130_v32 = vld [vmem:[%s1197_s1 + $0x100] sm:$0xff]  ;;  %v161_v34 = vld [vmem:[%s1197_s1 + $0x1f8] sm:$0xff]  ;;  %v160_v36 = vld [vmem:[%s1197_s1 + $0x1f0] sm:$0xff] }
   0xd   :  { %350 = vmatpush1.msra.mxu1 %v140_v12  ;;  %181 = vmatprep.subr.mxu0 %v559_v0  ;;  %v127_v37 = vld [vmem:[%s1197_s1 + $0xe8] sm:$0xff]  ;;  %v126_v39 = vld [vmem:[%s1197_s1 + $0xe0] sm:$0xff]  ;;  %v125_v41 = vld [vmem:[%s1197_s1 + $0xd8] sm:$0xff] }
   0xe   :  { %351 = vmatprep.subr.mxu1 %v559_v0  ;;  %182 = vmatpush1.msra.mxu0 %v107_v13  ;;  %v159_v38 = vld [vmem:[%s1197_s1 + $0x1e8] sm:$0xff]  ;;  %v158_v40 = vld [vmem:[%s1197_s1 + $0x1e0] sm:$0xff]  ;;  %v157_v42 = vld [vmem:[%s1197_s1 + $0x1d8] sm:$0xff] }
   0xf   :  { %352 = vmatpush1.msra.mxu1 %v139_v14  ;;  %183 = vmatprep.subr.mxu0 %v559_v0  ;;  %v124_v43 = vld [vmem:[%s1197_s1 + $0xd0] sm:$0xff]  ;;  %v123_v45 = vld [vmem:[%s1197_s1 + $0xc8] sm:$0xff]  ;;  %v122_v47 = vld [vmem:[%s1197_s1 + $0xc0] sm:$0xff] }
  0x10   :  { %353 = vmatprep.subr.mxu1 %v559_v0  ;;  %184 = vmatpush1.msra.mxu0 %v106_v15  ;;  %v156_v44 = vld [vmem:[%s1197_s1 + $0x1d0] sm:$0xff]  ;;  %v155_v46 = vld [vmem:[%s1197_s1 + $0x1c8] sm:$0xff]  ;;  %v154_v48 = vld [vmem:[%s1197_s1 + $0x1c0] sm:$0xff] }
  0x11   :  { %354 = vmatpush1.msra.mxu1 %v138_v16  ;;  %185 = vmatprep.subr.mxu0 %v559_v0  ;;  %v121_v49 = vld [vmem:[%s1197_s1 + $0xb8] sm:$0xff]  ;;  %v120_v51 = vld [vmem:[%s1197_s1 + $0xb0] sm:$0xff]  ;;  %v119_v53 = vld [vmem:[%s1197_s1 + $0xa8] sm:$0xff] }
  0x12   :  { %355 = vmatprep.subr.mxu1 %v559_v0  ;;  %186 = vmatpush1.msra.mxu0 %v105_v17  ;;  %v153_v50 = vld [vmem:[%s1197_s1 + $0x1b8] sm:$0xff]  ;;  %v152_v52 = vld [vmem:[%s1197_s1 + $0x1b0] sm:$0xff]  ;;  %v151_v54 = vld [vmem:[%s1197_s1 + $0x1a8] sm:$0xff] }
  0x13   :  { %356 = vmatpush1.msra.mxu1 %v137_v18  ;;  %187 = vmatprep.subr.mxu0 %v559_v0  ;;  %v118_v55 = vld [vmem:[%s1197_s1 + $0xa0] sm:$0xff]  ;;  %v117_v57 = vld [vmem:[%s1197_s1 + $0x98] sm:$0xff]  ;;  %v116_v59 = vld [vmem:[%s1197_s1 + $0x90] sm:$0xff] }
  0x14   :  { %357 = vmatprep.subr.mxu1 %v559_v0  ;;  %188 = vmatpush1.msra.mxu0 %v104_v19  ;;  %v150_v56 = vld [vmem:[%s1197_s1 + $0x1a0] sm:$0xff]  ;;  %v149_v58 = vld [vmem:[%s1197_s1 + $0x198] sm:$0xff]  ;;  %v148_v60 = vld [vmem:[%s1197_s1 + $0x190] sm:$0xff] }
  0x15   :  { %358 = vmatpush1.msra.mxu1 %v136_v20  ;;  %189 = vmatprep.subr.mxu0 %v559_v0  ;;  %v115_v61 = vld [vmem:[%s1197_s1 + $0x88] sm:$0xff]  ;;  %v114_v63 = vld [vmem:[%s1197_s1 + $0x80] sm:$0xff]  ;;  %v17_v3 = vld [vmem:[%s1198_s0 + $0x18] sm:$0xff] }
  0x16   :  { %359 = vmatprep.subr.mxu1 %v559_v0  ;;  %190 = vmatpush1.msra.mxu0 %v103_v21  ;;  %v147_v62 = vld [vmem:[%s1197_s1 + $0x188] sm:$0xff]  ;;  %v146_v2 = vld [vmem:[%s1197_s1 + $0x180] sm:$0xff]  ;;  %v16_v5 = vld [vmem:[%s1198_s0 + $0x10] sm:$0xff] }
  0x17   :  { %360 = vmatpush1.msra.mxu1 %v135_v22  ;;  %191 = vmatprep.subr.mxu0 %v559_v0  ;;  %v15_v1 = vld [vmem:[%s1198_s0 + $0x8] sm:$0xff]  ;;  %v14_v4 = vld [vmem:[%s1198_s0] sm:$0xff]  ;;  %v21_v7 = vld [vmem:[%s1198_s0 + $0x38] sm:$0xff] }
  0x18   :  { %361 = vmatprep.subr.mxu1 %v559_v0  ;;  %192 = vmatpush1.msra.mxu0 %v102_v23  ;;  %v19_v6 = vld [vmem:[%s1198_s0 + $0x28] sm:$0xff]  ;;  %v20_v8 = vld [vmem:[%s1198_s0 + $0x30] sm:$0xff]  ;;  %v25_v10 = vld [vmem:[%s1198_s0 + $0x58] sm:$0xff] }
  0x19   :  { %362 = vmatpush1.msra.mxu1 %v134_v24  ;;  %193 = vmatprep.subr.mxu0 %v559_v0  ;;  %v23_v9 = vld [vmem:[%s1198_s0 + $0x48] sm:$0xff]  ;;  %v22_v11 = vld [vmem:[%s1198_s0 + $0x40] sm:$0xff]  ;;  %v24_v12 = vld [vmem:[%s1198_s0 + $0x50] sm:$0xff] }
  0x1a   :  { %363 = vmatprep.subr.mxu1 %v559_v0  ;;  %194 = vmatpush1.msra.mxu0 %v101_v25  ;;  %v27_v13 = vld [vmem:[%s1198_s0 + $0x68] sm:$0xff]  ;;  %v29_v14 = vld [vmem:[%s1198_s0 + $0x78] sm:$0xff]  ;;  %v26_v15 = vld [vmem:[%s1198_s0 + $0x60] sm:$0xff] }
  0x1b   :  { %364 = vmatpush1.msra.mxu1 %v133_v26  ;;  %195 = vmatprep.subr.mxu0 %v559_v0  ;;  %v28_v16 = vld [vmem:[%s1198_s0 + $0x70] sm:$0xff]  ;;  %v31_v17 = vld [vmem:[%s1198_s0 + $0x88] sm:$0xff]  ;;  %v33_v18 = vld [vmem:[%s1198_s0 + $0x98] sm:$0xff] }
  0x1c   :  { %365 = vmatprep.subr.mxu1 %v559_v0  ;;  %196 = vmatpush1.msra.mxu0 %v100_v27  ;;  %v30_v19 = vld [vmem:[%s1198_s0 + $0x80] sm:$0xff]  ;;  %v32_v20 = vld [vmem:[%s1198_s0 + $0x90] sm:$0xff]  ;;  %v35_v21 = vld [vmem:[%s1198_s0 + $0xa8] sm:$0xff] }
  0x1d   :  { %366 = vmatpush1.msra.mxu1 %v132_v28  ;;  %197 = vmatprep.subr.mxu0 %v559_v0  ;;  %v37_v22 = vld [vmem:[%s1198_s0 + $0xb8] sm:$0xff]  ;;  %v34_v23 = vld [vmem:[%s1198_s0 + $0xa0] sm:$0xff]  ;;  %v36_v24 = vld [vmem:[%s1198_s0 + $0xb0] sm:$0xff] }
  0x1e   :  { %367 = vmatprep.subr.mxu1 %v559_v0  ;;  %198 = vmatpush1.msra.mxu0 %v99_v29  ;;  %v39_v25 = vld [vmem:[%s1198_s0 + $0xc8] sm:$0xff]  ;;  %v41_v26 = vld [vmem:[%s1198_s0 + $0xd8] sm:$0xff]  ;;  %v38_v27 = vld [vmem:[%s1198_s0 + $0xc0] sm:$0xff] }
  0x1f   :  { %368 = vmatpush1.msra.mxu1 %v131_v30  ;;  %199 = vmatprep.subr.mxu0 %v559_v0  ;;  %v40_v28 = vld [vmem:[%s1198_s0 + $0xd0] sm:$0xff]  ;;  %v43_v29 = vld [vmem:[%s1198_s0 + $0xe8] sm:$0xff]  ;;  %v45_v30 = vld [vmem:[%s1198_s0 + $0xf8] sm:$0xff] }
  0x20   :  { %369 = vmatprep.subr.mxu1 %v559_v0  ;;  %200 = vmatpush1.msra.mxu0 %v98_v31  ;;  %v42_v31 = vld [vmem:[%s1198_s0 + $0xe0] sm:$0xff] }
  0x21   :  { %370 = vmatpush1.msra.mxu1 %v130_v32  ;;  %201 = vmatprep.subr.mxu0 %v559_v0  ;;  %v44_v32 = vld [vmem:[%s1198_s0 + $0xf0] sm:$0xff] }
  0x22   :  { %371 = vmatprep.subr.mxu1 %v559_v0  ;;  %202 = vmatpush2.msra.mxu0 %v129_v33  ;;  %v47_v33 = vld [vmem:[%s1198_s0 + $0x108] sm:$0xff] }
  0x23   :  { %372 = vmatpush2.msra.mxu1 %v161_v34  ;;  %203 = vmatprep.subr.mxu0 %v559_v0  ;;  %v49_v34 = vld [vmem:[%s1198_s0 + $0x118] sm:$0xff] }
  0x24   :  { %373 = vmatprep.subr.mxu1 %v559_v0  ;;  %204 = vmatpush2.msra.mxu0 %v128_v35  ;;  %v46_v35 = vld [vmem:[%s1198_s0 + $0x100] sm:$0xff] }
  0x25   :  { %374 = vmatpush2.msra.mxu1 %v160_v36  ;;  %205 = vmatprep.subr.mxu0 %v559_v0  ;;  %v48_v36 = vld [vmem:[%s1198_s0 + $0x110] sm:$0xff] }
  0x26   :  { %375 = vmatprep.subr.mxu1 %v559_v0  ;;  %206 = vmatpush2.msra.mxu0 %v127_v37  ;;  %v51_v37 = vld [vmem:[%s1198_s0 + $0x128] sm:$0xff] }
  0x27   :  { %376 = vmatpush2.msra.mxu1 %v159_v38  ;;  %207 = vmatprep.subr.mxu0 %v559_v0  ;;  %v53_v38 = vld [vmem:[%s1198_s0 + $0x138] sm:$0xff] }
  0x28   :  { %377 = vmatprep.subr.mxu1 %v559_v0  ;;  %208 = vmatpush2.msra.mxu0 %v126_v39  ;;  %v50_v39 = vld [vmem:[%s1198_s0 + $0x120] sm:$0xff] }
  0x29   :  { %378 = vmatpush2.msra.mxu1 %v158_v40  ;;  %209 = vmatprep.subr.mxu0 %v559_v0  ;;  %v52_v40 = vld [vmem:[%s1198_s0 + $0x130] sm:$0xff] }
  0x2a   :  { %379 = vmatprep.subr.mxu1 %v559_v0  ;;  %210 = vmatpush2.msra.mxu0 %v125_v41  ;;  %v55_v41 = vld [vmem:[%s1198_s0 + $0x148] sm:$0xff] }
  0x2b   :  { %380 = vmatpush2.msra.mxu1 %v157_v42  ;;  %211 = vmatprep.subr.mxu0 %v559_v0  ;;  %v57_v42 = vld [vmem:[%s1198_s0 + $0x158] sm:$0xff] }
  0x2c   :  { %381 = vmatprep.subr.mxu1 %v559_v0  ;;  %212 = vmatpush2.msra.mxu0 %v124_v43  ;;  %v54_v43 = vld [vmem:[%s1198_s0 + $0x140] sm:$0xff] }
  0x2d   :  { %382 = vmatpush2.msra.mxu1 %v156_v44  ;;  %213 = vmatprep.subr.mxu0 %v559_v0  ;;  %v56_v44 = vld [vmem:[%s1198_s0 + $0x150] sm:$0xff] }
  0x2e   :  { %383 = vmatprep.subr.mxu1 %v559_v0  ;;  %214 = vmatpush2.msra.mxu0 %v123_v45  ;;  %v59_v45 = vld [vmem:[%s1198_s0 + $0x168] sm:$0xff] }
  0x2f   :  { %384 = vmatpush2.msra.mxu1 %v155_v46  ;;  %215 = vmatprep.subr.mxu0 %v559_v0  ;;  %v61_v46 = vld [vmem:[%s1198_s0 + $0x178] sm:$0xff] }
  0x30   :  { %385 = vmatprep.subr.mxu1 %v559_v0  ;;  %216 = vmatpush2.msra.mxu0 %v122_v47  ;;  %v58_v47 = vld [vmem:[%s1198_s0 + $0x160] sm:$0xff] }
  0x31   :  { %386 = vmatpush2.msra.mxu1 %v154_v48  ;;  %217 = vmatprep.subr.mxu0 %v559_v0  ;;  %v60_v48 = vld [vmem:[%s1198_s0 + $0x170] sm:$0xff] }
  0x32   :  { %387 = vmatprep.subr.mxu1 %v559_v0  ;;  %218 = vmatpush2.msra.mxu0 %v121_v49  ;;  %v63_v49 = vld [vmem:[%s1198_s0 + $0x188] sm:$0xff] }
  0x33   :  { %388 = vmatpush2.msra.mxu1 %v153_v50  ;;  %219 = vmatprep.subr.mxu0 %v559_v0  ;;  %v65_v50 = vld [vmem:[%s1198_s0 + $0x198] sm:$0xff] }
  0x34   :  { %389 = vmatprep.subr.mxu1 %v559_v0  ;;  %220 = vmatpush2.msra.mxu0 %v120_v51  ;;  %v62_v51 = vld [vmem:[%s1198_s0 + $0x180] sm:$0xff] }
  0x35   :  { %390 = vmatpush2.msra.mxu1 %v152_v52  ;;  %221 = vmatprep.subr.mxu0 %v559_v0  ;;  %v64_v52 = vld [vmem:[%s1198_s0 + $0x190] sm:$0xff] }
  0x36   :  { %391 = vmatprep.subr.mxu1 %v559_v0  ;;  %222 = vmatpush2.msra.mxu0 %v119_v53  ;;  %v67_v53 = vld [vmem:[%s1198_s0 + $0x1a8] sm:$0xff] }
  0x37   :  { %392 = vmatpush2.msra.mxu1 %v151_v54  ;;  %223 = vmatprep.subr.mxu0 %v559_v0  ;;  %v69_v54 = vld [vmem:[%s1198_s0 + $0x1b8] sm:$0xff] }
  0x38   :  { %393 = vmatprep.subr.mxu1 %v559_v0  ;;  %224 = vmatpush2.msra.mxu0 %v118_v55  ;;  %v66_v55 = vld [vmem:[%s1198_s0 + $0x1a0] sm:$0xff] }
  0x39   :  { %394 = vmatpush2.msra.mxu1 %v150_v56  ;;  %225 = vmatprep.subr.mxu0 %v559_v0  ;;  %v68_v56 = vld [vmem:[%s1198_s0 + $0x1b0] sm:$0xff] }
  0x3a   :  { %395 = vmatprep.subr.mxu1 %v559_v0  ;;  %226 = vmatpush2.msra.mxu0 %v117_v57  ;;  %v71_v57 = vld [vmem:[%s1198_s0 + $0x1c8] sm:$0xff] }
  0x3b   :  { %396 = vmatpush2.msra.mxu1 %v149_v58  ;;  %227 = vmatprep.subr.mxu0 %v559_v0  ;;  %v73_v58 = vld [vmem:[%s1198_s0 + $0x1d8] sm:$0xff] }
  0x3c   :  { %397 = vmatprep.subr.mxu1 %v559_v0  ;;  %228 = vmatpush2.msra.mxu0 %v116_v59  ;;  %v70_v59 = vld [vmem:[%s1198_s0 + $0x1c0] sm:$0xff] }
  0x3d   :  { %398 = vmatpush2.msra.mxu1 %v148_v60  ;;  %229 = vmatprep.subr.mxu0 %v559_v0  ;;  %v72_v60 = vld [vmem:[%s1198_s0 + $0x1d0] sm:$0xff] }
  0x3e   :  { %399 = vmatprep.subr.mxu1 %v559_v0  ;;  %230 = vmatpush2.msra.mxu0 %v115_v61  ;;  %v75_v61 = vld [vmem:[%s1198_s0 + $0x1e8] sm:$0xff] }
  0x3f   :  { %400 = vmatpush2.msra.mxu1 %v147_v62  ;;  %231 = vmatprep.subr.mxu0 %v559_v0  ;;  %v77_v62 = vld [vmem:[%s1198_s0 + $0x1f8] sm:$0xff] }
  0x40   :  { %401 = vmatprep.subr.mxu1 %v559_v0  ;;  %232 = vmatpush2.msra.mxu0 %v114_v63  ;;  %v18_v0 = vld [vmem:[%s1198_s0 + $0x20] sm:$0xff] }
  0x41   :  { %233 = vmatprep.mubr.f32.mxu0 %v15_v1  ;;  %402 = vmatpush2.msra.mxu1 %v146_v2  ;;  %v74_v63 = vld [vmem:[%s1198_s0 + $0x1e0] sm:$0xff]  ;;  %v76_v1 = vld [vmem:[%s1198_s0 + $0x1f0] sm:$0xff]  ;;  %v79_v2 = vld [vmem:[%s1198_s0 + $0x208] sm:$0xff] }
  0x42   :  { %403 = vmatprep.mubr.f32.mxu1 %v17_v3  ;;  %234 = vmatmul.mubr.f32.vlgmr.msra.gmra.mxu0 %v14_v4  ;;  %v81_v3 = vld [vmem:[%s1198_s0 + $0x218] sm:$0xff]  ;;  %v78_v4 = vld [vmem:[%s1198_s0 + $0x200] sm:$0xff] }
  0x43   :  { %404 = vmatmul.mubr.f32.vlgmr.msra.gmra.mxu1 %v16_v5  ;;  %238 = vmatprep.mubr.f32.mxu0 %v19_v6  ;;  %v80_v5 = vld [vmem:[%s1198_s0 + $0x210] sm:$0xff]  ;;  %v83_v6 = vld [vmem:[%s1198_s0 + $0x228] sm:$0xff] }
  0x44   :  { %408 = vmatprep.mubr.f32.mxu1 %v21_v7  ;;  %v85_v7 = vld [vmem:[%s1198_s0 + $0x238] sm:$0xff] }
  0x46   :  { %239 = vmatmul.mubr.f32.gmra.mxu0 %v18_v0  ;;  %v82_v0 = vld [vmem:[%s1198_s0 + $0x220] sm:$0xff] }
  0x47   :  { %409 = vmatmul.mubr.f32.gmra.mxu1 %v20_v8  ;;  %243 = vmatprep.mubr.f32.mxu0 %v23_v9  ;;  %v84_v8 = vld [vmem:[%s1198_s0 + $0x230] sm:$0xff]  ;;  %v87_v9 = vld [vmem:[%s1198_s0 + $0x248] sm:$0xff] }
  0x48   :  { %413 = vmatprep.mubr.f32.mxu1 %v25_v10  ;;  %v89_v10 = vld [vmem:[%s1198_s0 + $0x258] sm:$0xff] }
  0x4a   :  { %244 = vmatmul.mubr.f32.gmra.mxu0 %v22_v11  ;;  %v86_v11 = vld [vmem:[%s1198_s0 + $0x240] sm:$0xff] }
  0x4b   :  { %414 = vmatmul.mubr.f32.gmra.mxu1 %v24_v12  ;;  %248 = vmatprep.mubr.f32.mxu0 %v27_v13  ;;  %v88_v12 = vld [vmem:[%s1198_s0 + $0x250] sm:$0xff]  ;;  %v91_v13 = vld [vmem:[%s1198_s0 + $0x268] sm:$0xff] }
  0x4c   :  { %418 = vmatprep.mubr.f32.mxu1 %v29_v14  ;;  %v93_v14 = vld [vmem:[%s1198_s0 + $0x278] sm:$0xff] }
  0x4e   :  { %249 = vmatmul.mubr.f32.gmra.mxu0 %v26_v15  ;;  %v90_v15 = vld [vmem:[%s1198_s0 + $0x260] sm:$0xff] }
  0x4f   :  { %419 = vmatmul.mubr.f32.gmra.mxu1 %v28_v16  ;;  %253 = vmatprep.mubr.f32.mxu0 %v31_v17  ;;  %v92_v16 = vld [vmem:[%s1198_s0 + $0x270] sm:$0xff]  ;;  %v95_v17 = vld [vmem:[%s1198_s0 + $0x288] sm:$0x3] }
  0x50   :  { %423 = vmatprep.mubr.f32.mxu1 %v33_v18  ;;  %v97_v18 = vld [vmem:[%s1198_s0 + $0x298] sm:$0x3] }
  0x52   :  { %254 = vmatmul.mubr.f32.gmra.mxu0 %v30_v19  ;;  %v94_v19 = vld [vmem:[%s1198_s0 + $0x280] sm:$0x3] }
  0x53   :  { %424 = vmatmul.mubr.f32.gmra.mxu1 %v32_v20  ;;  %258 = vmatprep.mubr.f32.mxu0 %v35_v21  ;;  %v96_v20 = vld [vmem:[%s1198_s0 + $0x290] sm:$0x3]  ;;  %v1091_v21 = vld [vmem:[%s1199_s2] ss:$0 sm:$0xff] }
  0x54   :  { %428 = vmatprep.mubr.f32.mxu1 %v37_v22 }
  0x56   :  { %259 = vmatmul.mubr.f32.gmra.mxu0 %v34_v23 }
  0x57   :  { %429 = vmatmul.mubr.f32.gmra.mxu1 %v36_v24  ;;  %263 = vmatprep.mubr.f32.mxu0 %v39_v25 }
  0x58   :  { %433 = vmatprep.mubr.f32.mxu1 %v41_v26 }
  0x5a   :  { %264 = vmatmul.mubr.f32.gmra.mxu0 %v38_v27 }
  0x5b   :  { %434 = vmatmul.mubr.f32.gmra.mxu1 %v40_v28  ;;  %268 = vmatprep.mubr.f32.mxu0 %v43_v29 }
  0x5c   :  { %438 = vmatprep.mubr.f32.mxu1 %v45_v30 }
  0x5e   :  { %269 = vmatmul.mubr.f32.gmra.mxu0 %v42_v31 }
  0x5f   :  { %439 = vmatmul.mubr.f32.gmra.mxu1 %v44_v32  ;;  %273 = vmatprep.mubr.f32.mxu0 %v47_v33 }
  0x60   :  { %443 = vmatprep.mubr.f32.mxu1 %v49_v34 }
  0x62   :  { %274 = vmatmul.mubr.f32.gmra.mxu0 %v46_v35 }
  0x63   :  { %444 = vmatmul.mubr.f32.gmra.mxu1 %v48_v36  ;;  %278 = vmatprep.mubr.f32.mxu0 %v51_v37 }
  0x64   :  { %448 = vmatprep.mubr.f32.mxu1 %v53_v38 }
  0x66   :  { %279 = vmatmul.mubr.f32.gmra.mxu0 %v50_v39 }
  0x67   :  { %449 = vmatmul.mubr.f32.gmra.mxu1 %v52_v40  ;;  %283 = vmatprep.mubr.f32.mxu0 %v55_v41 }
  0x68   :  { %453 = vmatprep.mubr.f32.mxu1 %v57_v42 }
  0x6a   :  { %284 = vmatmul.mubr.f32.gmra.mxu0 %v54_v43 }
  0x6b   :  { %454 = vmatmul.mubr.f32.gmra.mxu1 %v56_v44  ;;  %288 = vmatprep.mubr.f32.mxu0 %v59_v45 }
  0x6c   :  { %458 = vmatprep.mubr.f32.mxu1 %v61_v46 }
  0x6e   :  { %289 = vmatmul.mubr.f32.gmra.mxu0 %v58_v47 }
  0x6f   :  { %459 = vmatmul.mubr.f32.gmra.mxu1 %v60_v48  ;;  %293 = vmatprep.mubr.f32.mxu0 %v63_v49 }
  0x70   :  { %463 = vmatprep.mubr.f32.mxu1 %v65_v50 }
  0x72   :  { %294 = vmatmul.mubr.f32.gmra.mxu0 %v62_v51 }
  0x73   :  { %464 = vmatmul.mubr.f32.gmra.mxu1 %v64_v52  ;;  %298 = vmatprep.mubr.f32.mxu0 %v67_v53 }
  0x74   :  { %468 = vmatprep.mubr.f32.mxu1 %v69_v54 }
  0x76   :  { %299 = vmatmul.mubr.f32.gmra.mxu0 %v66_v55 }
  0x77   :  { %469 = vmatmul.mubr.f32.gmra.mxu1 %v68_v56  ;;  %303 = vmatprep.mubr.f32.mxu0 %v71_v57 }
  0x78   :  { %473 = vmatprep.mubr.f32.mxu1 %v73_v58 }
  0x7a   :  { %304 = vmatmul.mubr.f32.gmra.mxu0 %v70_v59 }
  0x7b   :  { %474 = vmatmul.mubr.f32.gmra.mxu1 %v72_v60  ;;  %308 = vmatprep.mubr.f32.mxu0 %v75_v61 }
  0x7c   :  { %478 = vmatprep.mubr.f32.mxu1 %v77_v62 }
  0x7e   :  { %309 = vmatmul.mubr.f32.gmra.mxu0 %v74_v63 }
  0x7f   :  { %479 = vmatmul.mubr.f32.gmra.mxu1 %v76_v1  ;;  %313 = vmatprep.mubr.f32.mxu0 %v79_v2 }
  0x80   :  { %483 = vmatprep.mubr.f32.mxu1 %v81_v3 }
  0x82   :  { %314 = vmatmul.mubr.f32.gmra.mxu0 %v78_v4 }
  0x83   :  { %484 = vmatmul.mubr.f32.gmra.mxu1 %v80_v5  ;;  %318 = vmatprep.mubr.f32.mxu0 %v83_v6 }
  0x84   :  { %488 = vmatprep.mubr.f32.mxu1 %v85_v7 }
  0x86   :  { %319 = vmatmul.mubr.f32.gmra.mxu0 %v82_v0 }
  0x87   :  { %489 = vmatmul.mubr.f32.gmra.mxu1 %v84_v8  ;;  %323 = vmatprep.mubr.f32.mxu0 %v87_v9 }
  0x88   :  { %493 = vmatprep.mubr.f32.mxu1 %v89_v10 }
  0x8a   :  { %324 = vmatmul.mubr.f32.gmra.mxu0 %v86_v11 }
  0x8b   :  { %494 = vmatmul.mubr.f32.gmra.mxu1 %v88_v12  ;;  %328 = vmatprep.mubr.f32.mxu0 %v91_v13 }
  0x8c   :  { %498 = vmatprep.mubr.f32.mxu1 %v93_v14 }
  0x8e   :  { %329 = vmatmul.mubr.f32.gmra.mxu0 %v90_v15 }
  0x8f   :  { %499 = vmatmul.mubr.f32.gmra.mxu1 %v92_v16  ;;  %333 = vmatprep.mubr.f32.mxu0 %v95_v17 }
  0x90   :  { %503 = vmatprep.mubr.f32.mxu1 %v97_v18 }
  0x92   :  { %334 = vmatmul.mubr.f32.gmra.mxu0 %v94_v19 }
  0x93   :  { %504 = vmatmul.mubr.f32.gmra.mxu1 %v96_v20 }
 0x102   :  { %v235_v22 = vpop.f32.mrf.mxu0 }
 0x103   :  { %v405_v23 = vpop.f32.mrf.mxu1  ;;  %v236_v24 = vadd.f32 %v1091_v21, %v235_v22 }
 0x104   :  { %v237_v25 = vpop.f32.mrf.mxu0 }
 0x105   :  { %v407_v26 = vpop.f32.mrf.mxu1  ;;  %v406_v27 = vadd.f32 %v405_v23, %v236_v24 }
 0x106   :  { %v240_v28 = vpop.f32.mrf.mxu0 }
 0x107   :  { %v410_v29 = vpop.f32.mrf.mxu1  ;;  %v509_v30 = vmax.f32 %v406_v27, 0.0  ;;  %v241_v31 = vadd.f32 %v1091_v21, %v240_v28 }
 0x108   :  { %v242_v32 = vpop.f32.mrf.mxu0 }
 0x109   :  { %v412_v33 = vpop.f32.mrf.mxu1  ;;  %531 = vst.msk [vmem:[%s1200_s3] sm:$0xff] %vm530_vm0, %v509_v30  ;;  %v411_v34 = vadd.f32 %v410_v29, %v241_v31 }
 0x10a   :  { %v245_v35 = vpop.f32.mrf.mxu0 }
 0x10b   :  { %v415_v36 = vpop.f32.mrf.mxu1  ;;  %v510_v37 = vmax.f32 %v411_v34, 0.0  ;;  %v246_v38 = vadd.f32 %v1091_v21, %v245_v35 }
 0x10c   :  { %v247_v39 = vpop.f32.mrf.mxu0 }
 0x10d   :  { %v417_v40 = vpop.f32.mrf.mxu1  ;;  %532 = vst.msk [vmem:[%s1200_s3 + $0x8] sm:$0xff] %vm530_vm0, %v510_v37  ;;  %v416_v41 = vadd.f32 %v415_v36, %v246_v38 }
 0x10e   :  { %v250_v42 = vpop.f32.mrf.mxu0 }
 0x10f   :  { %v420_v43 = vpop.f32.mrf.mxu1  ;;  %v511_v44 = vmax.f32 %v416_v41, 0.0  ;;  %v251_v45 = vadd.f32 %v1091_v21, %v250_v42 }
 0x110   :  { %v252_v46 = vpop.f32.mrf.mxu0 }
 0x111   :  { %v422_v47 = vpop.f32.mrf.mxu1  ;;  %533 = vst.msk [vmem:[%s1200_s3 + $0x10] sm:$0xff] %vm530_vm0, %v511_v44  ;;  %v421_v48 = vadd.f32 %v420_v43, %v251_v45 }
 0x112   :  { %v255_v49 = vpop.f32.mrf.mxu0 }
 0x113   :  { %v425_v50 = vpop.f32.mrf.mxu1  ;;  %v512_v51 = vmax.f32 %v421_v48, 0.0  ;;  %v256_v52 = vadd.f32 %v1091_v21, %v255_v49 }
 0x114   :  { %v257_v53 = vpop.f32.mrf.mxu0 }
 0x115   :  { %v427_v54 = vpop.f32.mrf.mxu1  ;;  %534 = vst.msk [vmem:[%s1200_s3 + $0x18] sm:$0xff] %vm530_vm0, %v512_v51  ;;  %v426_v55 = vadd.f32 %v425_v50, %v256_v52 }
 0x116   :  { %v260_v56 = vpop.f32.mrf.mxu0 }
 0x117   :  { %v430_v57 = vpop.f32.mrf.mxu1  ;;  %v513_v58 = vmax.f32 %v426_v55, 0.0  ;;  %v261_v59 = vadd.f32 %v1091_v21, %v260_v56 }
 0x118   :  { %v262_v60 = vpop.f32.mrf.mxu0 }
 0x119   :  { %v432_v61 = vpop.f32.mrf.mxu1  ;;  %535 = vst.msk [vmem:[%s1200_s3 + $0x20] sm:$0xff] %vm530_vm0, %v513_v58  ;;  %v431_v62 = vadd.f32 %v430_v57, %v261_v59 }
 0x11a   :  { %v265_v63 = vpop.f32.mrf.mxu0 }
 0x11b   :  { %v435_v1 = vpop.f32.mrf.mxu1  ;;  %v514_v2 = vmax.f32 %v431_v62, 0.0  ;;  %v266_v3 = vadd.f32 %v1091_v21, %v265_v63 }
 0x11c   :  { %v267_v4 = vpop.f32.mrf.mxu0 }
 0x11d   :  { %v437_v5 = vpop.f32.mrf.mxu1  ;;  %536 = vst.msk [vmem:[%s1200_s3 + $0x28] sm:$0xff] %vm530_vm0, %v514_v2  ;;  %v436_v6 = vadd.f32 %v435_v1, %v266_v3 }
 0x11e   :  { %v270_v7 = vpop.f32.mrf.mxu0 }
 0x11f   :  { %v440_v0 = vpop.f32.mrf.mxu1  ;;  %v515_v8 = vmax.f32 %v436_v6, 0.0  ;;  %v271_v9 = vadd.f32 %v1091_v21, %v270_v7 }
 0x120   :  { %v272_v10 = vpop.f32.mrf.mxu0 }
 0x121   :  { %v442_v11 = vpop.f32.mrf.mxu1  ;;  %537 = vst.msk [vmem:[%s1200_s3 + $0x30] sm:$0xff] %vm530_vm0, %v515_v8  ;;  %v441_v12 = vadd.f32 %v440_v0, %v271_v9 }
 0x122   :  { %v275_v13 = vpop.f32.mrf.mxu0 }
 0x123   :  { %v445_v14 = vpop.f32.mrf.mxu1  ;;  %v516_v15 = vmax.f32 %v441_v12, 0.0  ;;  %v276_v16 = vadd.f32 %v1091_v21, %v275_v13 }
 0x124   :  { %v277_v17 = vpop.f32.mrf.mxu0 }
 0x125   :  { %v447_v18 = vpop.f32.mrf.mxu1  ;;  %538 = vst.msk [vmem:[%s1200_s3 + $0x38] sm:$0xff] %vm530_vm0, %v516_v15  ;;  %v446_v19 = vadd.f32 %v445_v14, %v276_v16 }
 0x126   :  { %v280_v20 = vpop.f32.mrf.mxu0 }
 0x127   :  { %v450_v22 = vpop.f32.mrf.mxu1  ;;  %v517_v23 = vmax.f32 %v446_v19, 0.0  ;;  %v281_v24 = vadd.f32 %v1091_v21, %v280_v20 }
 0x128   :  { %v282_v25 = vpop.f32.mrf.mxu0 }
 0x129   :  { %v452_v26 = vpop.f32.mrf.mxu1  ;;  %539 = vst.msk [vmem:[%s1200_s3 + $0x40] sm:$0xff] %vm530_vm0, %v517_v23  ;;  %v451_v27 = vadd.f32 %v450_v22, %v281_v24 }
 0x12a   :  { %v285_v28 = vpop.f32.mrf.mxu0 }
 0x12b   :  { %v455_v29 = vpop.f32.mrf.mxu1  ;;  %v518_v30 = vmax.f32 %v451_v27, 0.0  ;;  %v286_v31 = vadd.f32 %v1091_v21, %v285_v28 }
 0x12c   :  { %v287_v32 = vpop.f32.mrf.mxu0 }
 0x12d   :  { %v457_v33 = vpop.f32.mrf.mxu1  ;;  %540 = vst.msk [vmem:[%s1200_s3 + $0x48] sm:$0xff] %vm530_vm0, %v518_v30  ;;  %v456_v34 = vadd.f32 %v455_v29, %v286_v31 }
 0x12e   :  { %v290_v35 = vpop.f32.mrf.mxu0 }
 0x12f   :  { %v460_v36 = vpop.f32.mrf.mxu1  ;;  %v519_v37 = vmax.f32 %v456_v34, 0.0  ;;  %v291_v38 = vadd.f32 %v1091_v21, %v290_v35 }
 0x130   :  { %v292_v39 = vpop.f32.mrf.mxu0 }
 0x131   :  { %v462_v40 = vpop.f32.mrf.mxu1  ;;  %541 = vst.msk [vmem:[%s1200_s3 + $0x50] sm:$0xff] %vm530_vm0, %v519_v37  ;;  %v461_v41 = vadd.f32 %v460_v36, %v291_v38 }
 0x132   :  { %v295_v42 = vpop.f32.mrf.mxu0 }
 0x133   :  { %v465_v43 = vpop.f32.mrf.mxu1  ;;  %v520_v44 = vmax.f32 %v461_v41, 0.0  ;;  %v296_v45 = vadd.f32 %v1091_v21, %v295_v42 }
 0x134   :  { %v297_v46 = vpop.f32.mrf.mxu0 }
 0x135   :  { %v467_v47 = vpop.f32.mrf.mxu1  ;;  %542 = vst.msk [vmem:[%s1200_s3 + $0x58] sm:$0xff] %vm530_vm0, %v520_v44  ;;  %v466_v48 = vadd.f32 %v465_v43, %v296_v45 }
 0x136   :  { %v300_v49 = vpop.f32.mrf.mxu0 }
 0x137   :  { %v470_v50 = vpop.f32.mrf.mxu1  ;;  %v521_v51 = vmax.f32 %v466_v48, 0.0  ;;  %v301_v52 = vadd.f32 %v1091_v21, %v300_v49 }
 0x138   :  { %v302_v53 = vpop.f32.mrf.mxu0 }
 0x139   :  { %v472_v54 = vpop.f32.mrf.mxu1  ;;  %543 = vst.msk [vmem:[%s1200_s3 + $0x60] sm:$0xff] %vm530_vm0, %v521_v51  ;;  %v471_v55 = vadd.f32 %v470_v50, %v301_v52 }
 0x13a   :  { %v305_v56 = vpop.f32.mrf.mxu0 }
 0x13b   :  { %v475_v57 = vpop.f32.mrf.mxu1  ;;  %v522_v58 = vmax.f32 %v471_v55, 0.0  ;;  %v306_v59 = vadd.f32 %v1091_v21, %v305_v56 }
 0x13c   :  { %v307_v60 = vpop.f32.mrf.mxu0 }
 0x13d   :  { %v477_v61 = vpop.f32.mrf.mxu1  ;;  %544 = vst.msk [vmem:[%s1200_s3 + $0x68] sm:$0xff] %vm530_vm0, %v522_v58  ;;  %v476_v62 = vadd.f32 %v475_v57, %v306_v59 }
 0x13e   :  { %v310_v63 = vpop.f32.mrf.mxu0 }
 0x13f   :  { %v480_v1 = vpop.f32.mrf.mxu1  ;;  %v523_v2 = vmax.f32 %v476_v62, 0.0  ;;  %v311_v3 = vadd.f32 %v1091_v21, %v310_v63 }
 0x140   :  { %v312_v4 = vpop.f32.mrf.mxu0 }
 0x141   :  { %v482_v5 = vpop.f32.mrf.mxu1  ;;  %545 = vst.msk [vmem:[%s1200_s3 + $0x70] sm:$0xff] %vm530_vm0, %v523_v2  ;;  %v481_v6 = vadd.f32 %v480_v1, %v311_v3 }
 0x142   :  { %v315_v7 = vpop.f32.mrf.mxu0 }
 0x143   :  { %v485_v0 = vpop.f32.mrf.mxu1  ;;  %v524_v8 = vmax.f32 %v481_v6, 0.0  ;;  %v316_v9 = vadd.f32 %v1091_v21, %v315_v7 }
 0x144   :  { %v317_v10 = vpop.f32.mrf.mxu0 }
 0x145   :  { %v487_v11 = vpop.f32.mrf.mxu1  ;;  %546 = vst.msk [vmem:[%s1200_s3 + $0x78] sm:$0xff] %vm530_vm0, %v524_v8  ;;  %v486_v12 = vadd.f32 %v485_v0, %v316_v9 }
 0x146   :  { %v320_v13 = vpop.f32.mrf.mxu0 }
 0x147   :  { %v490_v14 = vpop.f32.mrf.mxu1  ;;  %v525_v15 = vmax.f32 %v486_v12, 0.0  ;;  %v321_v16 = vadd.f32 %v1091_v21, %v320_v13 }
 0x148   :  { %v322_v17 = vpop.f32.mrf.mxu0 }
 0x149   :  { %v492_v18 = vpop.f32.mrf.mxu1  ;;  %547 = vst.msk [vmem:[%s1200_s3 + $0x80] sm:$0xff] %vm530_vm0, %v525_v15  ;;  %v491_v19 = vadd.f32 %v490_v14, %v321_v16 }
 0x14a   :  { %v325_v20 = vpop.f32.mrf.mxu0 }
 0x14b   :  { %v495_v22 = vpop.f32.mrf.mxu1  ;;  %v526_v23 = vmax.f32 %v491_v19, 0.0  ;;  %v326_v24 = vadd.f32 %v1091_v21, %v325_v20 }
 0x14c   :  { %v327_v25 = vpop.f32.mrf.mxu0 }
 0x14d   :  { %v497_v26 = vpop.f32.mrf.mxu1  ;;  %548 = vst.msk [vmem:[%s1200_s3 + $0x88] sm:$0xff] %vm530_vm0, %v526_v23  ;;  %v496_v27 = vadd.f32 %v495_v22, %v326_v24 }
 0x14e   :  { %v330_v28 = vpop.f32.mrf.mxu0 }
 0x14f   :  { %v500_v29 = vpop.f32.mrf.mxu1  ;;  %v527_v30 = vmax.f32 %v496_v27, 0.0  ;;  %v331_v31 = vadd.f32 %v1091_v21, %v330_v28 }
 0x150   :  { %v332_v32 = vpop.f32.mrf.mxu0 }
 0x151   :  { %v502_v33 = vpop.f32.mrf.mxu1  ;;  %549 = vst.msk [vmem:[%s1200_s3 + $0x90] sm:$0xff] %vm530_vm0, %v527_v30  ;;  %v501_v34 = vadd.f32 %v500_v29, %v331_v31 }
 0x152   :  { %v335_v35 = vpop.f32.mrf.mxu0 }
 0x153   :  { %v505_v36 = vpop.f32.mrf.mxu1  ;;  %v528_v37 = vmax.f32 %v501_v34, 0.0  ;;  %v336_v38 = vadd.f32 %v1091_v21, %v335_v35 }
 0x154   :  { %v337_v39 = vpop.f32.mrf.mxu0 }
 0x155   :  { %v507_v40 = vpop.f32.mrf.mxu1  ;;  %550 = vst.msk [vmem:[%s1200_s3 + $0x98] sm:$0xff] %vm530_vm0, %v528_v37  ;;  %v506_v41 = vadd.f32 %v505_v36, %v336_v38 }
 0x157   :  { %v529_v42 = vmax.f32 %v506_v41, 0.0 }
 0x159   :  { %552 = vst.msk [vmem:[%s1200_s3 + $0xa0] sm:$0x3] %vm551_vm1, %v529_v42 }

// kernel: icm_forward.5
= control target key start
LH: loop header
LB: loop body
LE: loop exit
PB: predicated region body
PF: predicated region fallthrough
CT: control target
= control target key end

     0   :  { %s16108_s0 = inlined_call_operand.vmem [shape: f32[98,576], index: 0, kind: input, shape index: {}]   ;;  %s16109_s1 = inlined_call_operand.vmem [shape: f32[576,64], index: 1, kind: input, shape index: {}]   ;;  %s16110_s2 = inlined_call_operand.vmem [shape: f32[1,64], index: 2, kind: input, shape index: {}]   ;;  %s16111_s3 = inlined_call_operand.vmem [shape: f32[3136,512], index: 3, kind: input, shape index: {}]   ;;  %s16112_s4 = inlined_call_operand.vmem [shape: f32[1,512], index: 4, kind: input, shape index: {}]   ;;  %s16113_s5 = inlined_call_operand.hbm [shape: f32[2,512], index: 5, kind: output, shape index: {}]  }
   0x1   :  { %v117_v0 = vld [vmem:[%s16109_s1 + $0xf8] sm:$0xff]  ;;  %v116_v2 = vld [vmem:[%s16109_s1 + $0xf0] sm:$0xff]  ;;  %v115_v6 = vld [vmem:[%s16109_s1 + $0xe8] sm:$0xff] }
   0x2   :  { %v101_v1 = vld [vmem:[%s16109_s1 + $0x78] sm:$0xff]  ;;  %9711 = vmatprep.subr.mxu0 %v117_v0  ;;  %v100_v4 = vld [vmem:[%s16109_s1 + $0x70] sm:$0xff]  ;;  %v99_v8 = vld [vmem:[%s16109_s1 + $0x68] sm:$0xff] }
   0x3   :  { %v149_v3 = vld [vmem:[%s16109_s1 + $0x1f8] sm:$0xff]  ;;  %9712 = vmatpush3.msra.mxu0 %v101_v1  ;;  %v148_v7 = vld [vmem:[%s16109_s1 + $0x1f0] sm:$0xff]  ;;  %v147_v10 = vld [vmem:[%s16109_s1 + $0x1e8] sm:$0xff] }
   0x4   :  { %v133_v5 = vld [vmem:[%s16109_s1 + $0x178] sm:$0xff]  ;;  %9782 = vmatprep.subr.mxu1 %v149_v3  ;;  %9713 = vmatprep.subr.mxu0 %v116_v2  ;;  %v132_v9 = vld [vmem:[%s16109_s1 + $0x170] sm:$0xff]  ;;  %v114_v11 = vld [vmem:[%s16109_s1 + $0xe0] sm:$0xff] }
   0x5   :  { %9783 = vmatpush3.msra.mxu1 %v133_v5  ;;  %9714 = vmatpush3.msra.mxu0 %v100_v4  ;;  %v131_v12 = vld [vmem:[%s16109_s1 + $0x168] sm:$0xff]  ;;  %v98_v13 = vld [vmem:[%s16109_s1 + $0x60] sm:$0xff]  ;;  %v113_v15 = vld [vmem:[%s16109_s1 + $0xd8] sm:$0xff] }
   0x6   :  { %9784 = vmatprep.subr.mxu1 %v148_v7  ;;  %9715 = vmatprep.subr.mxu0 %v115_v6  ;;  %v146_v14 = vld [vmem:[%s16109_s1 + $0x1e0] sm:$0xff]  ;;  %v97_v17 = vld [vmem:[%s16109_s1 + $0x58] sm:$0xff]  ;;  %v112_v19 = vld [vmem:[%s16109_s1 + $0xd0] sm:$0xff]  ;;  %v9955_v6 = vmov 0.0  }
   0x7   :  { %9785 = vmatpush3.msra.mxu1 %v132_v9  ;;  %9716 = vmatpush3.msra.mxu0 %v99_v8  ;;  %v130_v16 = vld [vmem:[%s16109_s1 + $0x160] sm:$0xff]  ;;  %v145_v18 = vld [vmem:[%s16109_s1 + $0x1d8] sm:$0xff]  ;;  %v96_v21 = vld [vmem:[%s16109_s1 + $0x50] sm:$0xff] }
   0x8   :  { %9786 = vmatprep.subr.mxu1 %v147_v10  ;;  %9717 = vmatprep.subr.mxu0 %v114_v11  ;;  %v129_v20 = vld [vmem:[%s16109_s1 + $0x158] sm:$0xff]  ;;  %v144_v22 = vld [vmem:[%s16109_s1 + $0x1d0] sm:$0xff]  ;;  %v111_v23 = vld [vmem:[%s16109_s1 + $0xc8] sm:$0xff] }
   0x9   :  { %9787 = vmatpush3.msra.mxu1 %v131_v12  ;;  %9718 = vmatpush3.msra.mxu0 %v98_v13  ;;  %v128_v24 = vld [vmem:[%s16109_s1 + $0x150] sm:$0xff]  ;;  %v95_v25 = vld [vmem:[%s16109_s1 + $0x48] sm:$0xff]  ;;  %v110_v27 = vld [vmem:[%s16109_s1 + $0xc0] sm:$0xff] }
   0xa   :  { %9788 = vmatprep.subr.mxu1 %v146_v14  ;;  %9719 = vmatprep.subr.mxu0 %v113_v15  ;;  %v143_v26 = vld [vmem:[%s16109_s1 + $0x1c8] sm:$0xff]  ;;  %v94_v29 = vld [vmem:[%s16109_s1 + $0x40] sm:$0xff]  ;;  %v109_v31 = vld [vmem:[%s16109_s1 + $0xb8] sm:$0xff] }
   0xb   :  { %9789 = vmatpush3.msra.mxu1 %v130_v16  ;;  %9720 = vmatpush3.msra.mxu0 %v97_v17  ;;  %v127_v28 = vld [vmem:[%s16109_s1 + $0x148] sm:$0xff]  ;;  %v142_v30 = vld [vmem:[%s16109_s1 + $0x1c0] sm:$0xff]  ;;  %v93_v33 = vld [vmem:[%s16109_s1 + $0x38] sm:$0xff] }
   0xc   :  { %9790 = vmatprep.subr.mxu1 %v145_v18  ;;  %9721 = vmatprep.subr.mxu0 %v112_v19  ;;  %v126_v32 = vld [vmem:[%s16109_s1 + $0x140] sm:$0xff]  ;;  %v141_v34 = vld [vmem:[%s16109_s1 + $0x1b8] sm:$0xff]  ;;  %v108_v35 = vld [vmem:[%s16109_s1 + $0xb0] sm:$0xff] }
   0xd   :  { %9791 = vmatpush3.msra.mxu1 %v129_v20  ;;  %9722 = vmatpush3.msra.mxu0 %v96_v21  ;;  %v125_v36 = vld [vmem:[%s16109_s1 + $0x138] sm:$0xff]  ;;  %v92_v37 = vld [vmem:[%s16109_s1 + $0x30] sm:$0xff]  ;;  %v107_v39 = vld [vmem:[%s16109_s1 + $0xa8] sm:$0xff] }
   0xe   :  { %9792 = vmatprep.subr.mxu1 %v144_v22  ;;  %9723 = vmatprep.subr.mxu0 %v111_v23  ;;  %v140_v38 = vld [vmem:[%s16109_s1 + $0x1b0] sm:$0xff]  ;;  %v91_v41 = vld [vmem:[%s16109_s1 + $0x28] sm:$0xff]  ;;  %v106_v43 = vld [vmem:[%s16109_s1 + $0xa0] sm:$0xff] }
   0xf   :  { %9793 = vmatpush3.msra.mxu1 %v128_v24  ;;  %9724 = vmatpush3.msra.mxu0 %v95_v25  ;;  %v124_v40 = vld [vmem:[%s16109_s1 + $0x130] sm:$0xff]  ;;  %v139_v42 = vld [vmem:[%s16109_s1 + $0x1a8] sm:$0xff]  ;;  %v90_v45 = vld [vmem:[%s16109_s1 + $0x20] sm:$0xff] }
  0x10   :  { %9794 = vmatprep.subr.mxu1 %v143_v26  ;;  %9725 = vmatprep.subr.mxu0 %v110_v27  ;;  %v123_v44 = vld [vmem:[%s16109_s1 + $0x128] sm:$0xff]  ;;  %v138_v46 = vld [vmem:[%s16109_s1 + $0x1a0] sm:$0xff]  ;;  %v105_v47 = vld [vmem:[%s16109_s1 + $0x98] sm:$0xff] }
  0x11   :  { %9795 = vmatpush3.msra.mxu1 %v127_v28  ;;  %9726 = vmatpush3.msra.mxu0 %v94_v29  ;;  %v122_v48 = vld [vmem:[%s16109_s1 + $0x120] sm:$0xff]  ;;  %v89_v49 = vld [vmem:[%s16109_s1 + $0x18] sm:$0xff]  ;;  %v104_v51 = vld [vmem:[%s16109_s1 + $0x90] sm:$0xff] }
  0x12   :  { %9796 = vmatprep.subr.mxu1 %v142_v30  ;;  %9727 = vmatprep.subr.mxu0 %v109_v31  ;;  %v137_v50 = vld [vmem:[%s16109_s1 + $0x198] sm:$0xff]  ;;  %v88_v53 = vld [vmem:[%s16109_s1 + $0x10] sm:$0xff]  ;;  %v103_v55 = vld [vmem:[%s16109_s1 + $0x88] sm:$0xff] }
  0x13   :  { %9797 = vmatpush3.msra.mxu1 %v126_v32  ;;  %9728 = vmatpush3.msra.mxu0 %v93_v33  ;;  %v121_v52 = vld [vmem:[%s16109_s1 + $0x118] sm:$0xff]  ;;  %v136_v54 = vld [vmem:[%s16109_s1 + $0x190] sm:$0xff]  ;;  %v87_v57 = vld [vmem:[%s16109_s1 + $0x8] sm:$0xff] }
  0x14   :  { %9798 = vmatprep.subr.mxu1 %v141_v34  ;;  %9729 = vmatprep.subr.mxu0 %v108_v35  ;;  %v120_v56 = vld [vmem:[%s16109_s1 + $0x110] sm:$0xff]  ;;  %v135_v58 = vld [vmem:[%s16109_s1 + $0x188] sm:$0xff]  ;;  %v102_v59 = vld [vmem:[%s16109_s1 + $0x80] sm:$0xff] }
  0x15   :  { %9799 = vmatpush3.msra.mxu1 %v125_v36  ;;  %9730 = vmatpush3.msra.mxu0 %v92_v37  ;;  %v22_v60 = vld [vmem:[%s16108_s0 + $0x8] sm:$0xff]  ;;  %v86_v61 = vld [vmem:[%s16109_s1] sm:$0xff]  ;;  %v24_v2 = vld [vmem:[%s16108_s0 + $0x18] sm:$0xff] }
  0x16   :  { %9800 = vmatprep.subr.mxu1 %v140_v38  ;;  %9731 = vmatprep.subr.mxu0 %v107_v39  ;;  %v119_v62 = vld [vmem:[%s16109_s1 + $0x108] sm:$0xff]  ;;  %v21_v63 = vld [vmem:[%s16108_s0] sm:$0xff]  ;;  %v157_v3 = vld [vmem:[%s16109_s1 + $0x238] sm:$0xff] }
  0x17   :  { %9801 = vmatpush3.msra.mxu1 %v124_v40  ;;  %9732 = vmatpush3.msra.mxu0 %v91_v41  ;;  %v134_v0 = vld [vmem:[%s16109_s1 + $0x180] sm:$0xff]  ;;  %v23_v4 = vld [vmem:[%s16108_s0 + $0x10] sm:$0xff]  ;;  %v26_v7 = vld [vmem:[%s16108_s0 + $0x28] sm:$0xff] }
  0x18   :  { %9802 = vmatprep.subr.mxu1 %v139_v42  ;;  %9733 = vmatprep.subr.mxu0 %v106_v43  ;;  %v118_v1 = vld [vmem:[%s16109_s1 + $0x100] sm:$0xff]  ;;  %v27_v5 = vld [vmem:[%s16108_s0 + $0x30] sm:$0xff]  ;;  %v32_v9 = vld [vmem:[%s16108_s0 + $0x58] sm:$0xff] }
  0x19   :  { %9803 = vmatpush3.msra.mxu1 %v123_v44  ;;  %9734 = vmatpush3.msra.mxu0 %v90_v45  ;;  %v29_v8 = vld [vmem:[%s16108_s0 + $0x40] sm:$0xff]  ;;  %v156_v10 = vld [vmem:[%s16109_s1 + $0x230] sm:$0xff]  ;;  %v28_v11 = vld [vmem:[%s16108_s0 + $0x38] sm:$0xff] }
  0x1a   :  { %9804 = vmatprep.subr.mxu1 %v138_v46  ;;  %9735 = vmatprep.subr.mxu0 %v105_v47  ;;  %v31_v12 = vld [vmem:[%s16108_s0 + $0x50] sm:$0xff]  ;;  %v34_v13 = vld [vmem:[%s16108_s0 + $0x68] sm:$0xff]  ;;  %v37_v14 = vld [vmem:[%s16108_s0 + $0x80] sm:$0xff] }
  0x1b   :  { %9805 = vmatpush3.msra.mxu1 %v122_v48  ;;  %9736 = vmatpush3.msra.mxu0 %v89_v49  ;;  %v155_v15 = vld [vmem:[%s16109_s1 + $0x228] sm:$0xff]  ;;  %v33_v16 = vld [vmem:[%s16108_s0 + $0x60] sm:$0xff]  ;;  %v36_v18 = vld [vmem:[%s16108_s0 + $0x78] sm:$0xff] }
  0x1c   :  { %9806 = vmatprep.subr.mxu1 %v137_v50  ;;  %9737 = vmatprep.subr.mxu0 %v104_v51  ;;  %v154_v17 = vld [vmem:[%s16109_s1 + $0x220] sm:$0xff]  ;;  %v39_v19 = vld [vmem:[%s16108_s0 + $0x90] sm:$0xff]  ;;  %v42_v20 = vld [vmem:[%s16108_s0 + $0xa8] sm:$0xff] }
  0x1d   :  { %9807 = vmatpush3.msra.mxu1 %v121_v52  ;;  %9738 = vmatpush3.msra.mxu0 %v88_v53  ;;  %v153_v21 = vld [vmem:[%s16109_s1 + $0x218] sm:$0xff]  ;;  %v38_v22 = vld [vmem:[%s16108_s0 + $0x88] sm:$0xff] }
  0x1e   :  { %9808 = vmatprep.subr.mxu1 %v136_v54  ;;  %9739 = vmatprep.subr.mxu0 %v103_v55 }
  0x1f   :  { %9809 = vmatpush3.msra.mxu1 %v120_v56  ;;  %9740 = vmatpush3.msra.mxu0 %v87_v57 }
  0x20   :  { %9810 = vmatprep.subr.mxu1 %v135_v58  ;;  %9741 = vmatprep.subr.mxu0 %v102_v59 }
  0x21   :  { %269 = vmatprep.mubr.f32.mxu0 %v22_v60  ;;  %9742 = vmatpush3.msra.mxu0 %v86_v61 }
  0x22   :  { %9811 = vmatpush3.msra.mxu1 %v119_v62  ;;  %270 = vmatmul.mubr.f32.vlgmr.msra.gmra.mxu0 %v21_v63 }
  0x23   :  { %9812 = vmatprep.subr.mxu1 %v134_v0  ;;  %9874 = vmatprep.subr.mxu0 %v9955_v6 }
  0x24   :  { %9813 = vmatpush3.msra.mxu1 %v118_v1  ;;  %399 = vmatprep.mubr.f32.mxu1 %v24_v2 }
  0x25   :  { %9875 = vmatpush3.msra.mxu0 %v157_v3  ;;  %400 = vmatmul.mubr.f32.vlgmr.msra.gmra.mxu1 %v23_v4 }
  0x26   :  { %274 = vmatprep.mubr.f32.mxu0 %v27_v5  ;;  %404 = vmatprep.mubr.f32.mxu1 %v29_v8 }
  0x27   :  { %275 = vmatmul.mubr.f32.gmra.mxu0 %v26_v7  ;;  %9876 = vmatprep.subr.mxu0 %v9955_v6 }
  0x28   :  { %279 = vmatprep.mubr.f32.mxu0 %v32_v9  ;;  %9877 = vmatpush3.msra.mxu0 %v156_v10 }
  0x29   :  { %405 = vmatmul.mubr.f32.gmra.mxu1 %v28_v11  ;;  %9878 = vmatprep.subr.mxu0 %v9955_v6 }
  0x2a   :  { %409 = vmatprep.mubr.f32.mxu1 %v34_v13  ;;  %9879 = vmatpush3.msra.mxu0 %v155_v15 }
  0x2b   :  { %280 = vmatmul.mubr.f32.gmra.mxu0 %v31_v12  ;;  %9880 = vmatprep.subr.mxu0 %v9955_v6 }
  0x2c   :  { %284 = vmatprep.mubr.f32.mxu0 %v37_v14  ;;  %9881 = vmatpush3.msra.mxu0 %v154_v17 }
  0x2d   :  { %410 = vmatmul.mubr.f32.gmra.mxu1 %v33_v16 }
  0x2e   :  { %414 = vmatprep.mubr.f32.mxu1 %v39_v19 }
  0x2f   :  { %285 = vmatmul.mubr.f32.gmra.mxu0 %v36_v18 }
  0x30   :  { %10 = vsyncpa [#allocation4], 0  ;;  %289 = vmatprep.mubr.f32.mxu0 %v42_v20  ;;  %v41_v23 = vld [vmem:[%s16108_s0 + $0xa0] sm:$0xff]  ;;  %v44_v24 = vld [vmem:[%s16108_s0 + $0xb8] sm:$0xff]  ;;  %9882 = vmatprep.subr.mxu0 %v9955_v6  ;;  %vm9956_vm0 = vmmov 0   ;;  %vm165_vm1 = vcmask 523264  }
  0x31   :  { %v47_v25 = vld [vmem:[%s16108_s0 + $0xd0] sm:$0xff]  ;;  %9883 = vmatpush3.msra.mxu0 %v153_v21  ;;  %415 = vmatmul.mubr.f32.gmra.mxu1 %v38_v22  ;;  %v151_v28 = vld [vmem:[%s16109_s1 + $0x208] sm:$0xff]  ;;  %v49_v30 = vld [vmem:[%s16108_s0 + $0xe0] sm:$0xff]  ;;  %vm620_vm2 = vcmask 517120  }
  0x32   :  { %v152_v26 = vld [vmem:[%s16109_s1 + $0x210] sm:$0xff]  ;;  %9884 = vmatprep.subr.mxu0 %v9955_v6  ;;  %419 = vmatprep.mubr.f32.mxu1 %v44_v24  ;;  %v46_v29 = vld [vmem:[%s16108_s0 + $0xc8] sm:$0xff]  ;;  %v52_v31 = vld [vmem:[%s16108_s0 + $0xf8] sm:$0xff] }
  0x33   :  { %290 = vmatmul.mubr.f32.gmra.mxu0 %v41_v23  ;;  %v43_v27 = vld [vmem:[%s16108_s0 + $0xb0] sm:$0xff]  ;;  %v150_v32 = vld [vmem:[%s16109_s1 + $0x200] sm:$0xff]  ;;  %v48_v33 = vld [vmem:[%s16108_s0 + $0xd8] sm:$0xff] }
  0x34   :  { %294 = vmatprep.mubr.f32.mxu0 %v47_v25  ;;  %9885 = vmatpush3.msra.mxu0 %v152_v26  ;;  %v51_v34 = vld [vmem:[%s16108_s0 + $0xf0] sm:$0xff]  ;;  %v54_v35 = vld [vmem:[%s16108_s0 + $0x108] sm:$0xff]  ;;  %v57_v36 = vld [vmem:[%s16108_s0 + $0x120] sm:$0xff] }
  0x35   :  { %9886 = vmatprep.subr.mxu0 %v9955_v6  ;;  %420 = vmatmul.mubr.f32.gmra.mxu1 %v43_v27  ;;  %v53_v37 = vld [vmem:[%s16108_s0 + $0x100] sm:$0xff]  ;;  %v56_v38 = vld [vmem:[%s16108_s0 + $0x118] sm:$0xff]  ;;  %v59_v39 = vld [vmem:[%s16108_s0 + $0x130] sm:$0xff] }
  0x36   :  { %9887 = vmatpush3.msra.mxu0 %v151_v28  ;;  %424 = vmatprep.mubr.f32.mxu1 %v49_v30  ;;  %v62_v40 = vld [vmem:[%s16108_s0 + $0x148] sm:$0xff]  ;;  %v61_v42 = vld [vmem:[%s16108_s0 + $0x140] sm:$0xff]  ;;  %v64_v43 = vld [vmem:[%s16108_s0 + $0x158] sm:$0xff] }
  0x37   :  { %295 = vmatmul.mubr.f32.gmra.mxu0 %v46_v29  ;;  %9888 = vmatprep.subr.mxu0 %v9955_v6  ;;  %v58_v41 = vld [vmem:[%s16108_s0 + $0x128] sm:$0xff]  ;;  %v67_v44 = vld [vmem:[%s16108_s0 + $0x170] sm:$0xff]  ;;  %v69_v47 = vld [vmem:[%s16108_s0 + $0x180] sm:$0xff] }
  0x38   :  { %299 = vmatprep.mubr.f32.mxu0 %v52_v31  ;;  %9889 = vmatpush3.msra.mxu0 %v150_v32  ;;  %v63_v45 = vld [vmem:[%s16108_s0 + $0x150] sm:$0xff]  ;;  %v66_v46 = vld [vmem:[%s16108_s0 + $0x168] sm:$0xff]  ;;  %v72_v48 = vld [vmem:[%s16108_s0 + $0x198] sm:$0xff] }
  0x39   :  { %425 = vmatmul.mubr.f32.gmra.mxu1 %v48_v33  ;;  %v68_v49 = vld [vmem:[%s16108_s0 + $0x178] sm:$0xff]  ;;  %v71_v50 = vld [vmem:[%s16108_s0 + $0x190] sm:$0xff]  ;;  %v74_v51 = vld [vmem:[%s16108_s0 + $0x1a8] sm:$0xff] }
  0x3a   :  { %429 = vmatprep.mubr.f32.mxu1 %v54_v35  ;;  %v77_v52 = vld [vmem:[%s16108_s0 + $0x1c0] sm:$0xff]  ;;  %v76_v54 = vld [vmem:[%s16108_s0 + $0x1b8] sm:$0xff]  ;;  %v79_v55 = vld [vmem:[%s16108_s0 + $0x1d0] sm:$0xff] }
  0x3b   :  { %300 = vmatmul.mubr.f32.gmra.mxu0 %v51_v34  ;;  %v73_v53 = vld [vmem:[%s16108_s0 + $0x1a0] sm:$0xff]  ;;  %v82_v56 = vld [vmem:[%s16108_s0 + $0x1e8] sm:$0x3]  ;;  %v84_v59 = vld [vmem:[%s16108_s0 + $0x1f8] sm:$0x3] }
  0x3c   :  { %304 = vmatprep.mubr.f32.mxu0 %v57_v36  ;;  %v78_v57 = vld [vmem:[%s16108_s0 + $0x1c8] sm:$0xff]  ;;  %v81_v58 = vld [vmem:[%s16108_s0 + $0x1e0] sm:$0x3]  ;;  %v83_v60 = vld [vmem:[%s16108_s0 + $0x1f0] sm:$0x3] }
  0x3d   :  { %430 = vmatmul.mubr.f32.gmra.mxu1 %v53_v37  ;;  %v25_v61 = vld [vmem:[%s16108_s0 + $0x20] sm:$0xff]  ;;  %v30_v62 = vld [vmem:[%s16108_s0 + $0x48] sm:$0xff]  ;;  %v35_v63 = vld [vmem:[%s16108_s0 + $0x70] sm:$0xff] }
  0x3e   :  { %434 = vmatprep.mubr.f32.mxu1 %v59_v39  ;;  %v40_v0 = vld [vmem:[%s16108_s0 + $0x98] sm:$0xff]  ;;  %v45_v1 = vld [vmem:[%s16108_s0 + $0xc0] sm:$0xff]  ;;  %v50_v2 = vld [vmem:[%s16108_s0 + $0xe8] sm:$0xff] }
  0x3f   :  { %305 = vmatmul.mubr.f32.gmra.mxu0 %v56_v38  ;;  %v55_v3 = vld [vmem:[%s16108_s0 + $0x110] sm:$0xff]  ;;  %v60_v4 = vld [vmem:[%s16108_s0 + $0x138] sm:$0xff]  ;;  %v685_v5 = vld [vmem:[%s16111_s3 + $0x1e8] sm:$0xff] }
  0x40   :  { %309 = vmatprep.mubr.f32.mxu0 %v62_v40  ;;  %707 = vmatprep.subr.mxu1 %v685_v5  ;;  %v65_v7 = vld [vmem:[%s16108_s0 + $0x160] sm:$0xff]  ;;  %v70_v9 = vld [vmem:[%s16108_s0 + $0x188] sm:$0xff]  ;;  %v75_v12 = vld [vmem:[%s16108_s0 + $0x1b0] sm:$0xff] }
  0x41   :  { %435 = vmatmul.mubr.f32.gmra.mxu1 %v58_v41  ;;  %v684_v8 = vld [vmem:[%s16111_s3 + $0x1e0] sm:$0xff]  ;;  %v681_v10 = vld [vmem:[%s16111_s3 + $0x1c8] sm:$0xff]  ;;  %v80_v13 = vld [vmem:[%s16108_s0 + $0x1d8] sm:$0xff] }
  0x42   :  { %439 = vmatprep.mubr.f32.mxu1 %v64_v43  ;;  %708 = vmatpush1.msra.mxu1 %v684_v8  ;;  %v680_v11 = vld [vmem:[%s16111_s3 + $0x1c0] sm:$0xff]  ;;  %v677_v14 = vld [vmem:[%s16111_s3 + $0x1a8] sm:$0xff]  ;;  %v687_v43 = vld [vmem:[%s16111_s3 + $0x1f8] sm:$0xff] }
  0x43   :  { %310 = vmatmul.mubr.f32.gmra.mxu0 %v61_v42  ;;  %709 = vmatprep.subr.mxu1 %v681_v10  ;;  %v676_v15 = vld [vmem:[%s16111_s3 + $0x1a0] sm:$0xff]  ;;  %v673_v17 = vld [vmem:[%s16111_s3 + $0x188] sm:$0xff] }
  0x44   :  { %314 = vmatprep.mubr.f32.mxu0 %v67_v44  ;;  %710 = vmatpush1.msra.mxu1 %v680_v11  ;;  %v85_v16 = vld [vmem:[%s16108_s0 + $0x200] sm:$0x3]  ;;  %v669_v19 = vld [vmem:[%s16111_s3 + $0x168] sm:$0xff] }
  0x45   :  { %440 = vmatmul.mubr.f32.gmra.mxu1 %v63_v45  ;;  %711 = vmatprep.subr.mxu1 %v677_v14  ;;  %v672_v18 = vld [vmem:[%s16111_s3 + $0x180] sm:$0xff]  ;;  %v1008_v21 = vld [vmem:[%s16111_s3 + $0x2e8] sm:$0xff] }
  0x46   :  { %444 = vmatprep.mubr.f32.mxu1 %v69_v47  ;;  %712 = vmatpush1.msra.mxu1 %v676_v15  ;;  %v668_v20 = vld [vmem:[%s16111_s3 + $0x160] sm:$0xff]  ;;  %v665_v22 = vld [vmem:[%s16111_s3 + $0x148] sm:$0xff] }
  0x47   :  { %315 = vmatmul.mubr.f32.gmra.mxu0 %v66_v46  ;;  %713 = vmatprep.subr.mxu1 %v673_v17  ;;  %v664_v23 = vld [vmem:[%s16111_s3 + $0x140] sm:$0xff]  ;;  %v1004_v25 = vld [vmem:[%s16111_s3 + $0x2c8] sm:$0xff] }
  0x48   :  { %319 = vmatprep.mubr.f32.mxu0 %v72_v48  ;;  %714 = vmatpush1.msra.mxu1 %v672_v18  ;;  %v1007_v24 = vld [vmem:[%s16111_s3 + $0x2e0] sm:$0xff]  ;;  %v1000_v27 = vld [vmem:[%s16111_s3 + $0x2a8] sm:$0xff] }
  0x49   :  { %445 = vmatmul.mubr.f32.gmra.mxu1 %v68_v49  ;;  %715 = vmatprep.subr.mxu1 %v669_v19  ;;  %v1003_v26 = vld [vmem:[%s16111_s3 + $0x2c0] sm:$0xff]  ;;  %v996_v29 = vld [vmem:[%s16111_s3 + $0x288] sm:$0xff] }
  0x4a   :  { %449 = vmatprep.mubr.f32.mxu1 %v74_v51  ;;  %716 = vmatpush1.msra.mxu1 %v668_v20  ;;  %v999_v28 = vld [vmem:[%s16111_s3 + $0x2a0] sm:$0xff]  ;;  %v992_v31 = vld [vmem:[%s16111_s3 + $0x268] sm:$0xff] }
  0x4b   :  { %320 = vmatmul.mubr.f32.gmra.mxu0 %v71_v50  ;;  %1030 = vmatprep.subr.mxu0 %v1008_v21  ;;  %v995_v30 = vld [vmem:[%s16111_s3 + $0x280] sm:$0xff]  ;;  %v661_v32 = vld [vmem:[%s16111_s3 + $0x128] sm:$0xff] }
  0x4c   :  { %324 = vmatprep.mubr.f32.mxu0 %v77_v52  ;;  %717 = vmatprep.subr.mxu1 %v665_v22  ;;  %v660_v33 = vld [vmem:[%s16111_s3 + $0x120] sm:$0xff]  ;;  %v988_v35 = vld [vmem:[%s16111_s3 + $0x248] sm:$0xff] }
  0x4d   :  { %450 = vmatmul.mubr.f32.gmra.mxu1 %v73_v53  ;;  %v991_v34 = vld [vmem:[%s16111_s3 + $0x260] sm:$0xff]  ;;  %v984_v37 = vld [vmem:[%s16111_s3 + $0x228] sm:$0xff] }
  0x4e   :  { %454 = vmatprep.mubr.f32.mxu1 %v79_v55  ;;  %718 = vmatpush1.msra.mxu1 %v664_v23  ;;  %v987_v36 = vld [vmem:[%s16111_s3 + $0x240] sm:$0xff]  ;;  %v657_v38 = vld [vmem:[%s16111_s3 + $0x108] sm:$0xff] }
  0x4f   :  { %325 = vmatmul.mubr.f32.gmra.mxu0 %v76_v54  ;;  %719 = vmatprep.subr.mxu1 %v661_v32  ;;  %v983_v39 = vld [vmem:[%s16111_s3 + $0x220] sm:$0xff]  ;;  %v980_v40 = vld [vmem:[%s16111_s3 + $0x208] sm:$0xff] }
  0x50   :  { %329 = vmatprep.mubr.f32.mxu0 %v82_v56  ;;  %720 = vmatpush1.msra.mxu1 %v660_v33  ;;  %v656_v41 = vld [vmem:[%s16111_s3 + $0x100] sm:$0xff]  ;;  %v1190_v44 = vld [vmem:[%s16111_s3 + $0x3e8] sm:$0xff] }
  0x51   :  { %455 = vmatmul.mubr.f32.gmra.mxu1 %v78_v57  ;;  %721 = vmatprep.subr.mxu1 %v657_v38  ;;  %v979_v42 = vld [vmem:[%s16111_s3 + $0x200] sm:$0xff] }
  0x52   :  { %459 = vmatprep.mubr.f32.mxu1 %v84_v59  ;;  %722 = vmatpush1.msra.mxu1 %v656_v41  ;;  %v10580_v18 = vld [vmem:[%s16110_s2] ss:$0 sm:$0xff] }
  0x53   :  { %330 = vmatmul.mubr.f32.gmra.mxu0 %v81_v58  ;;  %778 = vmatprep.subr.mxu1 %v687_v43 }
  0x54   :  { %9890 = vmatprep.mubr.msk.f32.mxu0 %vm9956_vm0, %v9955_v6 }
  0x55   :  { %460 = vmatmul.mubr.f32.gmra.mxu1 %v83_v60 }
  0x56   :  { %755 = vmatprep.mubr.f32.mxu1 %v9955_v6 }
  0x57   :  { %9891 = vmatmul.mubr.msk.f32.vlgmr.msra.gmra.mxu0 %vm165_vm1, %v25_v61 }
  0x58   :  { %9893 = vmatprep.mubr.msk.f32.mxu0 %vm9956_vm0, %v9955_v6  ;;  %1031 = vmatpush1.msra.mxu0 %v1007_v24 }
  0x59   :  { %1032 = vmatprep.subr.mxu0 %v1004_v25 }
  0x5a   :  { %1033 = vmatpush1.msra.mxu0 %v1003_v26 }
  0x5b   :  { %9894 = vmatmul.mubr.msk.f32.gmra.mxu0 %vm165_vm1, %v30_v62  ;;  %1034 = vmatprep.subr.mxu0 %v1000_v27 }
  0x5c   :  { %9896 = vmatprep.mubr.msk.f32.mxu0 %vm9956_vm0, %v9955_v6  ;;  %1035 = vmatpush1.msra.mxu0 %v999_v28 }
  0x5d   :  { %1036 = vmatprep.subr.mxu0 %v996_v29 }
  0x5e   :  { %1037 = vmatpush1.msra.mxu0 %v995_v30 }
  0x5f   :  { %9897 = vmatmul.mubr.msk.f32.gmra.mxu0 %vm165_vm1, %v35_v63  ;;  %1038 = vmatprep.subr.mxu0 %v992_v31 }
  0x60   :  { %9899 = vmatprep.mubr.msk.f32.mxu0 %vm9956_vm0, %v9955_v6  ;;  %1039 = vmatpush1.msra.mxu0 %v991_v34 }
  0x61   :  { %1040 = vmatprep.subr.mxu0 %v988_v35 }
  0x62   :  { %1041 = vmatpush1.msra.mxu0 %v987_v36 }
  0x63   :  { %9900 = vmatmul.mubr.msk.f32.gmra.mxu0 %vm165_vm1, %v40_v0  ;;  %1042 = vmatprep.subr.mxu0 %v984_v37 }
  0x64   :  { %9902 = vmatprep.mubr.msk.f32.mxu0 %vm9956_vm0, %v9955_v6  ;;  %1043 = vmatpush1.msra.mxu0 %v983_v39 }
  0x65   :  { %1044 = vmatprep.subr.mxu0 %v980_v40 }
  0x66   :  { %1045 = vmatpush1.msra.mxu0 %v979_v42 }
  0x67   :  { %9903 = vmatmul.mubr.msk.f32.gmra.mxu0 %vm165_vm1, %v45_v1  ;;  %1212 = vmatprep.subr.mxu0 %v1190_v44 }
  0x68   :  { %9905 = vmatprep.mubr.msk.f32.mxu0 %vm9956_vm0, %v9955_v6 }
  0x6b   :  { %9906 = vmatmul.mubr.msk.f32.gmra.mxu0 %vm165_vm1, %v50_v2 }
  0x6c   :  { %9908 = vmatprep.mubr.msk.f32.mxu0 %vm9956_vm0, %v9955_v6 }
  0x6f   :  { %9909 = vmatmul.mubr.msk.f32.gmra.mxu0 %vm165_vm1, %v55_v3 }
  0x70   :  { %9911 = vmatprep.mubr.msk.f32.mxu0 %vm9956_vm0, %v9955_v6 }
  0x73   :  { %9912 = vmatmul.mubr.msk.f32.gmra.mxu0 %vm165_vm1, %v60_v4 }
  0x74   :  { %9914 = vmatprep.mubr.msk.f32.mxu0 %vm9956_vm0, %v9955_v6 }
  0x77   :  { %9915 = vmatmul.mubr.msk.f32.gmra.mxu0 %vm165_vm1, %v65_v7 }
  0x78   :  { %9917 = vmatprep.mubr.msk.f32.mxu0 %vm9956_vm0, %v9955_v6 }
  0x7b   :  { %9918 = vmatmul.mubr.msk.f32.gmra.mxu0 %vm165_vm1, %v70_v9 }
  0x7c   :  { %9920 = vmatprep.mubr.msk.f32.mxu0 %vm9956_vm0, %v9955_v6 }
  0x7f   :  { %9921 = vmatmul.mubr.msk.f32.gmra.mxu0 %vm165_vm1, %v75_v12 }
  0x80   :  { %9923 = vmatprep.mubr.msk.f32.mxu0 %vm9956_vm0, %v9955_v6 }
  0x83   :  { %9924 = vmatmul.mubr.msk.f32.gmra.mxu0 %vm165_vm1, %v80_v13 }
  0x84   :  { %9926 = vmatprep.mubr.msk.f32.mxu0 %vm9956_vm0, %v9955_v6 }
  0x87   :  { %9927 = vmatmul.mubr.msk.f32.gmra.mxu0 %vm165_vm1, %v85_v16 }
  0x88   :  { %1078 = vmatprep.mubr.f32.mxu0 %v9955_v6 }
  0xe2   :  { %v9743_v45 = vpop.f32.mrf.mxu0 }
  0xe4   :  { %v9744_v46 = vpop.f32.mrf.mxu0 }
  0xe5   :  { %v9814_v47 = vpop.f32.mrf.mxu1  ;;  %v9745_v17 = vadd.f32 %v9744_v46, %v9743_v45 }
  0xe7   :  { %v9746_v48 = vpop.f32.mrf.mxu0  ;;  %v9815_v49 = vpop.f32.mrf.mxu1  ;;  %v272_v23 = vadd.f32 %v9745_v17, %v10580_v18 }
  0xe8   :  { %v9816_v24 = vadd.f32 %v9815_v49, %v9814_v47 }
  0xe9   :  { %v9747_v50 = vpop.f32.mrf.mxu0  ;;  %v9817_v51 = vpop.f32.mrf.mxu1 }
  0xea   :  { %v9748_v21 = vadd.f32 %v9747_v50, %v9746_v48  ;;  %v402_v31 = vadd.f32 %v9816_v24, %v272_v23  ;;  %v1185_v23 = vld [vmem:[%s16111_s3 + $0x3c0] sm:$0xff] }
  0xeb   :  { %v9749_v52 = vpop.f32.mrf.mxu0  ;;  %v9818_v53 = vpop.f32.mrf.mxu1 }
  0xec   :  { %v277_v27 = vadd.f32 %v9748_v21, %v10580_v18  ;;  %v9819_v28 = vadd.f32 %v9818_v53, %v9817_v51  ;;  %v682_v21 = vld [vmem:[%s16111_s3 + $0x1d0] sm:$0xff] }
  0xed   :  { %v9750_v54 = vpop.f32.mrf.mxu0  ;;  %v9820_v55 = vpop.f32.mrf.mxu1 }
  0xee   :  { %v9751_v30 = vadd.f32 %v9750_v54, %v9749_v52  ;;  %v407_v36 = vadd.f32 %v9819_v28, %v277_v27  ;;  %v679_v28 = vld [vmem:[%s16111_s3 + $0x1b8] sm:$0xff] }
  0xef   :  { %v9752_v56 = vpop.f32.mrf.mxu0  ;;  %v9821_v57 = vpop.f32.mrf.mxu1 }
  0xf0   :  { %v282_v37 = vadd.f32 %v9751_v30, %v10580_v18  ;;  %v9822_v38 = vadd.f32 %v9821_v57, %v9820_v55  ;;  %v1182_v30 = vld [vmem:[%s16111_s3 + $0x3a8] sm:$0xff] }
  0xf1   :  { %v9753_v58 = vpop.f32.mrf.mxu0  ;;  %v9823_v59 = vpop.f32.mrf.mxu1 }
  0xf2   :  { %v9754_v39 = vadd.f32 %v9753_v58, %v9752_v56  ;;  %v412_v49 = vadd.f32 %v9822_v38, %v282_v37  ;;  %v1181_v37 = vld [vmem:[%s16111_s3 + $0x3a0] sm:$0xff] }
  0xf3   :  { %v9755_v60 = vpop.f32.mrf.mxu0  ;;  %v9824_v62 = vpop.f32.mrf.mxu1 }
  0xf4   :  { %v287_v46 = vadd.f32 %v9754_v39, %v10580_v18  ;;  %v9825_v47 = vadd.f32 %v9824_v62, %v9823_v59  ;;  %v1189_v59 = vld [vmem:[%s16111_s3 + $0x3e0] sm:$0xff] }
  0xf5   :  { %v9756_v61 = vpop.f32.mrf.mxu0  ;;  %v9826_v1 = vpop.f32.mrf.mxu1 }
  0xf6   :  { %v9757_v44 = vadd.f32 %v9756_v61, %v9755_v60  ;;  %v417_v58 = vadd.f32 %v9825_v47, %v287_v46  ;;  %v686_v60 = vld [vmem:[%s16111_s3 + $0x1f0] sm:$0xff]  ;;  %v683_v61 = vld [vmem:[%s16111_s3 + $0x1d8] sm:$0xff] }
  0xf7   :  { %v9758_v63 = vpop.f32.mrf.mxu0  ;;  %v9827_v4 = vpop.f32.mrf.mxu1 }
  0xf8   :  { %v292_v53 = vadd.f32 %v9757_v44, %v10580_v18  ;;  %v9828_v54 = vadd.f32 %v9827_v4, %v9826_v1  ;;  %v671_v44 = vld [vmem:[%s16111_s3 + $0x178] sm:$0xff] }
  0xf9   :  { %v9759_v0 = vpop.f32.mrf.mxu0  ;;  %v10559_v8 = vpop.f32.mrf.mxu1 }
  0xfa   :  { %v9760_v56 = vadd.f32 %v9759_v0, %v9758_v63  ;;  %v1186_v0 = vld [vmem:[%s16111_s3 + $0x3c8] sm:$0xff]  ;;  %v422_v27 = vadd.f32 %v9828_v54, %v292_v53  ;;  %v666_v54 = vld [vmem:[%s16111_s3 + $0x150] sm:$0xff] }
  0xfb   :  { %v10551_v2 = vpop.f32.mrf.mxu0  ;;  %v10565_v11 = vpop.f32.mrf.mxu1 }
  0xfd   :  { %v10553_v3 = vpop.f32.mrf.mxu0  ;;  %v10571_v14 = vpop.f32.mrf.mxu1 }
  0xff   :  { %v10555_v5 = vpop.f32.mrf.mxu0  ;;  %v10582_v19 = vpop.f32.mrf.mxu1 }
 0x100   :  { %v9834_v47 = vadd.f32 %v10582_v19, %v10571_v14  ;;  %v667_v14 = vld [vmem:[%s16111_s3 + $0x158] sm:$0xff]  ;;  %v1170_v19 = vld [vmem:[%s16111_s3 + $0x348] sm:$0xff] }
 0x101   :  { %v10557_v7 = vpop.f32.mrf.mxu0  ;;  %v10589_v25 = vpop.f32.mrf.mxu1 }
 0x103   :  { %v10561_v9 = vpop.f32.mrf.mxu0  ;;  %v10596_v32 = vpop.f32.mrf.mxu1 }
 0x105   :  { %v10563_v10 = vpop.f32.mrf.mxu0  ;;  %v10599_v41 = vpop.f32.mrf.mxu1 }
 0x107   :  { %v10567_v12 = vpop.f32.mrf.mxu0  ;;  %v10603_v50 = vpop.f32.mrf.mxu1 }
 0x109   :  { %v10569_v13 = vpop.f32.mrf.mxu0  ;;  %v10616_v62 = vpop.f32.mrf.mxu1 }
 0x10b   :  { %v10573_v15 = vpop.f32.mrf.mxu0  ;;  %v10653_v38 = vpop.f32.mrf.mxu1 }
 0x10d   :  { %v10575_v16 = vpop.f32.mrf.mxu0 }
 0x10f   :  { %v10584_v20 = vpop.f32.mrf.mxu0 }
 0x111   :  { %v10586_v22 = vpop.f32.mrf.mxu0 }
 0x113   :  { %v10591_v26 = vpop.f32.mrf.mxu0 }
 0x115   :  { %v10594_v29 = vpop.f32.mrf.mxu0 }
 0x117   :  { %v531_v33 = vpop.f32.mrf.mxu0 }
 0x118   :  { %v532_v34 = vadd.f32 %v531_v33, %v402_v31  ;;  %v297_v31 = vadd.f32 %v9760_v56, %v10580_v18  ;;  %v9831_v33 = vadd.f32 %v10565_v11, %v10559_v8  ;;  %v674_v11 = vld [vmem:[%s16111_s3 + $0x190] sm:$0xff] }
 0x119   :  { %v9892_v35 = vpop.f32.mrf.mxu0 }
 0x11a   :  { %v595_v40 = vmax.f32 %v532_v34, 0.0  ;;  %v9763_v34 = vadd.f32 %v10553_v3, %v10551_v2  ;;  %v675_v2 = vld [vmem:[%s16111_s3 + $0x198] sm:$0xff]  ;;  %v1178_v3 = vld [vmem:[%s16111_s3 + $0x388] sm:$0xff] }
 0x11b   :  { %v536_v42 = vpop.f32.mrf.mxu0 }
 0x11c   :  { %608 = vst.msk [vmem:[#allocation2] sm:$0xff] %vm165_vm1, %v595_v40  ;;  %v537_v43 = vadd.f32 %v536_v42, %v407_v36  ;;  %v678_v36 = vld [vmem:[%s16111_s3 + $0x1b0] sm:$0xff]  ;;  %v1177_v40 = vld [vmem:[%s16111_s3 + $0x380] sm:$0xff]  ;;  %v9766_v42 = vadd.f32 %v10557_v7, %v10555_v5  ;;  %v302_v46 = vadd.f32 %v9763_v34, %v10580_v18  ;;  %v427_v5 = vadd.f32 %v9831_v33, %v297_v31 }
 0x11d   :  { %v9895_v45 = vpop.f32.mrf.mxu0  ;;  %v670_v7 = vld [vmem:[%s16111_s3 + $0x170] sm:$0xff]  ;;  %v9840_v33 = vadd.f32 %v10603_v50, %v10599_v41  ;;  %v9772_v34 = vadd.f32 %v10569_v13, %v10567_v12  ;;  %v1372_v41 = vld [vmem:[%s16111_s3 + $0x4e8] sm:$0xff]  ;;  %v651_v13 = vld [vmem:[%s16111_s3 + $0xe0] sm:$0xff] }
 0x11e   :  { %v596_v48 = vmax.f32 %v537_v43, 0.0  ;;  %v1174_v45 = vld [vmem:[%s16111_s3 + $0x368] sm:$0xff]  ;;  %v307_v56 = vadd.f32 %v9766_v42, %v10580_v18  ;;  %v1371_v50 = vld [vmem:[%s16111_s3 + $0x4e0] sm:$0xff] }
 0x11f   :  { %v541_v51 = vpop.f32.mrf.mxu0  ;;  %v317_v42 = vadd.f32 %v9772_v34, %v10580_v18 }
 0x120   :  { %609 = vst.msk [vmem:[#allocation2 + $0x8] sm:$0xff] %vm165_vm1, %v596_v48  ;;  %v542_v52 = vadd.f32 %v541_v51, %v412_v49  ;;  %v1173_v49 = vld [vmem:[%s16111_s3 + $0x360] sm:$0xff]  ;;  %v10685_v51 = vpop.f32.mrf.mxu1 }
 0x121   :  { %v9898_v55 = vpop.f32.mrf.mxu0 }
 0x122   :  { %v597_v57 = vmax.f32 %v542_v52, 0.0  ;;  %v1169_v55 = vld [vmem:[%s16111_s3 + $0x340] sm:$0xff] }
 0x123   :  { %v546_v17 = vpop.f32.mrf.mxu0  ;;  %v10618_v1 = vld [vmem:[#allocation2 + $0x2] sm:$0x3]  ;;  %v10620_v63 = vld [vmem:[#allocation2 + $0x4] sm:$0x3] }
 0x124   :  { %610 = vst.msk [vmem:[#allocation2 + $0x10] sm:$0xff] %vm165_vm1, %v597_v57  ;;  %v547_v4 = vadd.f32 %v546_v17, %v417_v58  ;;  %9613 = vmatmul.mubr.msk.f32.vlgmr.msra.gmra.mxu1 %vm165_vm1, %v10618_v1  ;;  %9617 = vmatmul.mubr.msk.f32.vlgmr.msra.gmra.mxu0 %vm165_vm1, %v10620_v63  ;;  %v9837_v57 = vadd.f32 %v10596_v32, %v10589_v25  ;;  %v662_v25 = vld [vmem:[%s16111_s3 + $0x130] sm:$0xff]  ;;  %v1165_v32 = vld [vmem:[%s16111_s3 + $0x320] sm:$0xff] }
 0x125   :  { %779 = vmatpush1.msra.mxu1 %v686_v60  ;;  %1213 = vmatpush1.msra.mxu0 %v1189_v59  ;;  %v9901_v24 = vpop.f32.mrf.mxu0  ;;  %v663_v60 = vld [vmem:[%s16111_s3 + $0x138] sm:$0xff]  ;;  %v1166_v59 = vld [vmem:[%s16111_s3 + $0x328] sm:$0xff] }
 0x126   :  { %v598_v35 = vmax.f32 %v547_v4, 0.0  ;;  %780 = vmatprep.subr.mxu1 %v683_v61  ;;  %1214 = vmatprep.subr.mxu0 %v1186_v0  ;;  %v9769_v61 = vadd.f32 %v10563_v10, %v10561_v9  ;;  %v432_v0 = vadd.f32 %v9834_v47, %v302_v46  ;;  %v9845_v4 = vpop.f32.mrf.mxu1  ;;  %v659_v9 = vld [vmem:[%s16111_s3 + $0x118] sm:$0xff]  ;;  %v1162_v10 = vld [vmem:[%s16111_s3 + $0x308] sm:$0xff]  ;;  %v658_v24 = vld [vmem:[%s16111_s3 + $0x110] sm:$0xff] }
 0x127   :  { %781 = vmatpush1.msra.mxu1 %v682_v21  ;;  %1215 = vmatpush1.msra.mxu0 %v1185_v23  ;;  %v551_v39 = vpop.f32.mrf.mxu0 }
 0x128   :  { %611 = vst.msk [vmem:[#allocation2 + $0x18] sm:$0xff] %vm165_vm1, %v598_v35  ;;  %v552_v8 = vadd.f32 %v551_v39, %v422_v27  ;;  %782 = vmatprep.subr.mxu1 %v679_v28  ;;  %1216 = vmatprep.subr.mxu0 %v1182_v30  ;;  %v1161_v28 = vld [vmem:[%s16111_s3 + $0x300] sm:$0xff]  ;;  %v437_v30 = vadd.f32 %v9837_v57, %v307_v56 }
 0x129   :  { %783 = vmatpush1.msra.mxu1 %v678_v36  ;;  %1217 = vmatpush1.msra.mxu0 %v1181_v37  ;;  %v9904_v43 = vpop.f32.mrf.mxu0  ;;  %v312_v31 = vadd.f32 %v9769_v61, %v10580_v18  ;;  %v652_v36 = vld [vmem:[%s16111_s3 + $0xe8] sm:$0xff]  ;;  %v10738_v37 = vpop.f32.mrf.mxu1  ;;  %v1355_v61 = vld [vmem:[%s16111_s3 + $0x460] sm:$0xff] }
 0x12a   :  { %v599_v48 = vmax.f32 %v552_v8, 0.0  ;;  %784 = vmatprep.subr.mxu1 %v675_v2  ;;  %1218 = vmatprep.subr.mxu0 %v1178_v3  ;;  %v9775_v2 = vadd.f32 %v10575_v16, %v10573_v15  ;;  %v10756_v3 = vld [vmem:[#allocation2 + $0x6] sm:$0x3]  ;;  %v9843_v15 = vadd.f32 %v10653_v38, %v10616_v62  ;;  %v644_v62 = vld [vmem:[%s16111_s3 + $0xa8] sm:$0xff] }
 0x12b   :  { %785 = vmatpush1.msra.mxu1 %v674_v11  ;;  %1219 = vmatpush1.msra.mxu0 %v1177_v40  ;;  %v556_v52 = vpop.f32.mrf.mxu0  ;;  %v648_v11 = vld [vmem:[%s16111_s3 + $0xc8] sm:$0xff]  ;;  %v1367_v43 = vld [vmem:[%s16111_s3 + $0x4c0] sm:$0xff] }
 0x12c   :  { %612 = vst.msk [vmem:[#allocation2 + $0x20] sm:$0xff] %vm165_vm1, %v599_v48  ;;  %v557_v53 = vadd.f32 %v556_v52, %v427_v5  ;;  %786 = vmatprep.subr.mxu1 %v671_v44  ;;  %1220 = vmatprep.subr.mxu0 %v1174_v45  ;;  %v1368_v40 = vld [vmem:[%s16111_s3 + $0x4c8] sm:$0xff]  ;;  %v442_v44 = vadd.f32 %v9840_v33, %v312_v31  ;;  %v9848_v45 = vpop.f32.mrf.mxu1  ;;  %v643_v48 = vld [vmem:[%s16111_s3 + $0xa0] sm:$0xff] }
 0x12d   :  { %787 = vmatpush1.msra.mxu1 %v670_v7  ;;  %1221 = vmatpush1.msra.mxu0 %v1173_v49  ;;  %v9907_v58 = vpop.f32.mrf.mxu0  ;;  %v1364_v38 = vld [vmem:[%s16111_s3 + $0x4a8] sm:$0xff]  ;;  %v1363_v5 = vld [vmem:[%s16111_s3 + $0x4a0] sm:$0xff]  ;;  %v322_v7 = vadd.f32 %v9775_v2, %v10580_v18  ;;  %v9846_v49 = vadd.f32 %v9845_v4, %v10685_v51  ;;  %v447_v56 = vadd.f32 %v9843_v15, %v317_v42 }
 0x12e   :  { %v600_v17 = vmax.f32 %v557_v53, 0.0  ;;  %788 = vmatprep.subr.mxu1 %v667_v14  ;;  %1222 = vmatprep.subr.mxu0 %v1170_v19  ;;  %v640_v14 = vld [vmem:[%s16111_s3 + $0x88] sm:$0xff]  ;;  %v9778_v53 = vadd.f32 %v10586_v22, %v10584_v20  ;;  %v639_v51 = vld [vmem:[%s16111_s3 + $0x80] sm:$0xff]  ;;  %v9850_v57 = vpop.f32.mrf.mxu1 }
 0x12f   :  { %789 = vmatpush1.msra.mxu1 %v666_v54  ;;  %1223 = vmatpush1.msra.mxu0 %v1169_v55  ;;  %v561_v21 = vpop.f32.mrf.mxu0  ;;  %v1360_v19 = vld [vmem:[%s16111_s3 + $0x488] sm:$0xff]  ;;  %v1359_v55 = vld [vmem:[%s16111_s3 + $0x480] sm:$0xff] }
 0x130   :  { %613 = vst.msk [vmem:[#allocation2 + $0x28] sm:$0xff] %vm165_vm1, %v600_v17  ;;  %v562_v23 = vadd.f32 %v561_v21, %v432_v0  ;;  %790 = vmatprep.subr.mxu1 %v663_v60  ;;  %1224 = vmatprep.subr.mxu0 %v1166_v59  ;;  %v636_v20 = vld [vmem:[%s16111_s3 + $0x68] sm:$0xff]  ;;  %v635_v59 = vld [vmem:[%s16111_s3 + $0x60] sm:$0xff]  ;;  %v327_v4 = vadd.f32 %v9778_v53, %v10580_v18  ;;  %v642_v53 = vld [vmem:[%s16111_s3 + $0x98] sm:$0xff] }
 0x131   :  { %791 = vmatpush1.msra.mxu1 %v662_v25  ;;  %1225 = vmatpush1.msra.mxu0 %v1165_v32  ;;  %v9910_v27 = vpop.f32.mrf.mxu0  ;;  %v1356_v22 = vld [vmem:[%s16111_s3 + $0x468] sm:$0xff]  ;;  %v452_v32 = vadd.f32 %v9846_v49, %v322_v7  ;;  %v9849_v21 = vadd.f32 %v9848_v45, %v10738_v37  ;;  %v627_v31 = vld [vmem:[%s16111_s3 + $0x20] sm:$0xff]  ;;  %v650_v45 = vld [vmem:[%s16111_s3 + $0xd8] sm:$0xff] }
 0x132   :  { %v601_v35 = vmax.f32 %v562_v23, 0.0  ;;  %792 = vmatprep.subr.mxu1 %v659_v9  ;;  %1226 = vmatprep.subr.mxu0 %v1162_v10  ;;  %v632_v0 = vld [vmem:[%s16111_s3 + $0x48] sm:$0xff]  ;;  %v9781_v9 = vadd.f32 %v10594_v29, %v10591_v26  ;;  %v631_v23 = vld [vmem:[%s16111_s3 + $0x40] sm:$0xff]  ;;  %v9851_v27 = vpop.f32.mrf.mxu1 }
 0x133   :  { %793 = vmatpush1.msra.mxu1 %v658_v24  ;;  %826 = vmatprep.mubr.f32.mxu1 %v9955_v6  ;;  %v566_v39 = vpop.f32.mrf.mxu0  ;;  %v1352_v25 = vld [vmem:[%s16111_s3 + $0x448] sm:$0xff]  ;;  %v1351_v24 = vld [vmem:[%s16111_s3 + $0x440] sm:$0xff] }
 0x134   :  { %614 = vst.msk [vmem:[#allocation2 + $0x30] sm:$0xff] %vm165_vm1, %v601_v35  ;;  %1227 = vmatpush1.msra.mxu0 %v1161_v28  ;;  %1260 = vmatprep.mubr.f32.mxu0 %v9955_v6  ;;  %v567_v12 = vadd.f32 %v566_v39, %v437_v30  ;;  %v628_v30 = vld [vmem:[%s16111_s3 + $0x28] sm:$0xff]  ;;  %v1347_v33 = vld [vmem:[%s16111_s3 + $0x420] sm:$0xff]  ;;  %v332_v37 = vadd.f32 %v9781_v9, %v10580_v18  ;;  %v625_v9 = vld [vmem:[%s16111_s3 + $0x10] sm:$0xff] }
 0x135   :  { %9614 = vmatmul.mubr.msk.f32.vlgmr.msra.gmra.mxu1 %vm165_vm1, %v10618_v1  ;;  %852 = vmatprep.subr.mxu1 %v652_v36  ;;  %v9913_v8 = vpop.f32.mrf.mxu0  ;;  %v647_v1 = vld [vmem:[%s16111_s3 + $0xc0] sm:$0xff]  ;;  %v1348_v26 = vld [vmem:[%s16111_s3 + $0x428] sm:$0xff]  ;;  %v9852_v39 = vadd.f32 %v9851_v27, %v9850_v57  ;;  %v1009_v27 = vld [vmem:[%s16111_s3 + $0x2f0] sm:$0xff] }
 0x136   :  { %v602_v16 = vmax.f32 %v567_v12, 0.0  ;;  %9619 = vmatmul.mubr.msk.f32.vlgmr.msra.gmra.mxu0 %vm165_vm1, %v10756_v3  ;;  %1394 = vmatprep.subr.mxu0 %v1372_v41  ;;  %v624_v35 = vld [vmem:[%s16111_s3 + $0x8] sm:$0xff]  ;;  %v623_v12 = vld [vmem:[%s16111_s3] sm:$0xff]  ;;  %v654_v8 = vld [vmem:[%s16111_s3 + $0xf8] sm:$0xff] }
 0x137   :  { %853 = vmatpush1.msra.mxu1 %v651_v13  ;;  %1395 = vmatpush1.msra.mxu0 %v1371_v50  ;;  %v571_v46 = vpop.f32.mrf.mxu0  ;;  %v1344_v36 = vld [vmem:[%s16111_s3 + $0x408] sm:$0xff]  ;;  %v457_v13 = vadd.f32 %v9849_v21, %v327_v4  ;;  %v1343_v50 = vld [vmem:[%s16111_s3 + $0x400] sm:$0xff]  ;;  %v626_v4 = vld [vmem:[%s16111_s3 + $0x18] sm:$0xff] }
 0x138   :  { %615 = vst.msk [vmem:[#allocation2 + $0x38] sm:$0xff] %vm165_vm1, %v602_v16  ;;  %854 = vmatprep.subr.mxu1 %v648_v11  ;;  %1396 = vmatprep.subr.mxu0 %v1368_v40  ;;  %v572_v47 = vadd.f32 %v571_v46, %v442_v44  ;;  %v1554_v11 = vld [vmem:[%s16111_s3 + $0x5e8] sm:$0xff]  ;;  %v10868_v15 = vld [vmem:[#allocation2] sm:$0x3]  ;;  %v653_v16 = vld [vmem:[%s16111_s3 + $0xf0] sm:$0xff] }
 0x139   :  { %855 = vmatpush1.msra.mxu1 %v647_v1  ;;  %1397 = vmatpush1.msra.mxu0 %v1367_v43  ;;  %v9916_v52 = vpop.f32.mrf.mxu0  ;;  %v1553_v1 = vld [vmem:[%s16111_s3 + $0x5e0] sm:$0xff]  ;;  %v462_v43 = vadd.f32 %v9852_v39, %v332_v37  ;;  %v10878_v44 = vld [vmem:[#allocation2 + $0x8] sm:$0x3]  ;;  %v998_v39 = vld [vmem:[%s16111_s3 + $0x298] sm:$0xff] }
 0x13a   :  { %v603_v54 = vmax.f32 %v572_v47, 0.0  ;;  %856 = vmatprep.subr.mxu1 %v644_v62  ;;  %1398 = vmatprep.subr.mxu0 %v1364_v38  ;;  %v1550_v46 = vld [vmem:[%s16111_s3 + $0x5c8] sm:$0xff]  ;;  %v649_v38 = vld [vmem:[%s16111_s3 + $0xd0] sm:$0xff]  ;;  %v1549_v47 = vld [vmem:[%s16111_s3 + $0x5c0] sm:$0xff] }
 0x13b   :  { %857 = vmatpush1.msra.mxu1 %v643_v48  ;;  %1399 = vmatpush1.msra.mxu0 %v1363_v5  ;;  %v576_v58 = vpop.f32.mrf.mxu0  ;;  %v646_v5 = vld [vmem:[%s16111_s3 + $0xb8] sm:$0xff]  ;;  %v1546_v7 = vld [vmem:[%s16111_s3 + $0x5a8] sm:$0xff]  ;;  %v1727_v37 = vld [vmem:[%s16111_s3 + $0x6a0] sm:$0xff] }
 0x13c   :  { %616 = vst.msk [vmem:[#allocation2 + $0x40] sm:$0xff] %vm165_vm1, %v603_v54  ;;  %858 = vmatprep.subr.mxu1 %v640_v14  ;;  %1400 = vmatprep.subr.mxu0 %v1360_v19  ;;  %v577_v60 = vadd.f32 %v576_v58, %v447_v56  ;;  %v645_v14 = vld [vmem:[%s16111_s3 + $0xb0] sm:$0xff]  ;;  %v1545_v19 = vld [vmem:[%s16111_s3 + $0x5a0] sm:$0xff]  ;;  %v1542_v54 = vld [vmem:[%s16111_s3 + $0x588] sm:$0xff] }
 0x13d   :  { %859 = vmatpush1.msra.mxu1 %v639_v51  ;;  %1401 = vmatpush1.msra.mxu0 %v1359_v55  ;;  %v9919_v17 = vpop.f32.mrf.mxu0  ;;  %v641_v51 = vld [vmem:[%s16111_s3 + $0x90] sm:$0xff]  ;;  %v1541_v55 = vld [vmem:[%s16111_s3 + $0x580] sm:$0xff]  ;;  %v638_v56 = vld [vmem:[%s16111_s3 + $0x78] sm:$0xff] }
 0x13e   :  { %v604_v10 = vmax.f32 %v577_v60, 0.0  ;;  %860 = vmatprep.subr.mxu1 %v636_v20  ;;  %1402 = vmatprep.subr.mxu0 %v1356_v22  ;;  %v1538_v57 = vld [vmem:[%s16111_s3 + $0x568] sm:$0xff]  ;;  %v637_v58 = vld [vmem:[%s16111_s3 + $0x70] sm:$0xff]  ;;  %v1537_v20 = vld [vmem:[%s16111_s3 + $0x560] sm:$0xff] }
 0x13f   :  { %861 = vmatpush1.msra.mxu1 %v635_v59  ;;  %1403 = vmatpush1.msra.mxu0 %v1355_v61  ;;  %v581_v28 = vpop.f32.mrf.mxu0  ;;  %v634_v22 = vld [vmem:[%s16111_s3 + $0x58] sm:$0xff]  ;;  %v1534_v60 = vld [vmem:[%s16111_s3 + $0x548] sm:$0xff]  ;;  %v633_v59 = vld [vmem:[%s16111_s3 + $0x50] sm:$0xff] }
 0x140   :  { %617 = vst.msk [vmem:[#allocation2 + $0x48] sm:$0xff] %vm165_vm1, %v604_v10  ;;  %862 = vmatprep.subr.mxu1 %v632_v0  ;;  %1404 = vmatprep.subr.mxu0 %v1352_v25  ;;  %v582_v29 = vadd.f32 %v581_v28, %v452_v32  ;;  %v1533_v61 = vld [vmem:[%s16111_s3 + $0x540] sm:$0xff]  ;;  %v630_v17 = vld [vmem:[%s16111_s3 + $0x38] sm:$0xff]  ;;  %v1530_v0 = vld [vmem:[%s16111_s3 + $0x528] sm:$0xff] }
 0x141   :  { %863 = vmatpush1.msra.mxu1 %v631_v23  ;;  %1405 = vmatpush1.msra.mxu0 %v1351_v24  ;;  %v9922_v34 = vpop.f32.mrf.mxu0  ;;  %v629_v25 = vld [vmem:[%s16111_s3 + $0x30] sm:$0xff]  ;;  %v1529_v32 = vld [vmem:[%s16111_s3 + $0x520] sm:$0xff]  ;;  %v1526_v21 = vld [vmem:[%s16111_s3 + $0x508] sm:$0xff] }
 0x142   :  { %v605_v41 = vmax.f32 %v582_v29, 0.0  ;;  %864 = vmatprep.subr.mxu1 %v628_v30  ;;  %1406 = vmatprep.subr.mxu0 %v1348_v26  ;;  %v1525_v10 = vld [vmem:[%s16111_s3 + $0x500] sm:$0xff]  ;;  %v1010_v23 = vld [vmem:[%s16111_s3 + $0x2f8] sm:$0xff]  ;;  %v1736_v24 = vld [vmem:[%s16111_s3 + $0x6e8] sm:$0xff] }
 0x143   :  { %865 = vmatpush1.msra.mxu1 %v627_v31  ;;  %1407 = vmatpush1.msra.mxu0 %v1347_v33  ;;  %v586_v2 = vpop.f32.mrf.mxu0  ;;  %v1735_v28 = vld [vmem:[%s16111_s3 + $0x6e0] sm:$0xff]  ;;  %v10983_v30 = vld [vmem:[#allocation2 + $0xa] sm:$0x3]  ;;  %v1006_v26 = vld [vmem:[%s16111_s3 + $0x2d8] sm:$0xff] }
 0x144   :  { %618 = vst.msk [vmem:[#allocation2 + $0x50] sm:$0xff] %vm165_vm1, %v605_v41  ;;  %866 = vmatprep.subr.mxu1 %v624_v35  ;;  %1408 = vmatprep.subr.mxu0 %v1344_v36  ;;  %v587_v18 = vadd.f32 %v586_v2, %v457_v13  ;;  %v1732_v29 = vld [vmem:[%s16111_s3 + $0x6c8] sm:$0xff]  ;;  %v1005_v31 = vld [vmem:[%s16111_s3 + $0x2d0] sm:$0xff]  ;;  %v1731_v33 = vld [vmem:[%s16111_s3 + $0x6c0] sm:$0xff] }
 0x145   :  { %867 = vmatpush1.msra.mxu1 %v623_v12  ;;  %900 = vmatprep.mubr.f32.mxu1 %v9955_v6  ;;  %v9925_v40 = vpop.f32.mrf.mxu0  ;;  %v1002_v34 = vld [vmem:[%s16111_s3 + $0x2b8] sm:$0xff]  ;;  %v1728_v35 = vld [vmem:[%s16111_s3 + $0x6a8] sm:$0xff]  ;;  %v1001_v36 = vld [vmem:[%s16111_s3 + $0x2b0] sm:$0xff] }
 0x146   :  { %1409 = vmatpush1.msra.mxu0 %v1343_v50  ;;  %1442 = vmatprep.mubr.f32.mxu0 %v9955_v6  ;;  %v606_v42 = vmax.f32 %v587_v18, 0.0  ;;  %v1724_v41 = vld [vmem:[%s16111_s3 + $0x688] sm:$0xff]  ;;  %v997_v12 = vld [vmem:[%s16111_s3 + $0x290] sm:$0xff]  ;;  %v1723_v13 = vld [vmem:[%s16111_s3 + $0x680] sm:$0xff] }
 0x147   :  { %9615 = vmatmul.mubr.msk.f32.vlgmr.msra.gmra.mxu1 %vm165_vm1, %v10868_v15  ;;  %923 = vmatprep.subr.mxu1 %v654_v8  ;;  %v591_v62 = vpop.f32.mrf.mxu0  ;;  %v994_v50 = vld [vmem:[%s16111_s3 + $0x278] sm:$0xff]  ;;  %v1720_v2 = vld [vmem:[%s16111_s3 + $0x668] sm:$0xff]  ;;  %v993_v18 = vld [vmem:[%s16111_s3 + $0x270] sm:$0xff] }
 0x148   :  { %619 = vst.msk [vmem:[#allocation2 + $0x58] sm:$0xff] %vm165_vm1, %v606_v42  ;;  %9621 = vmatmul.mubr.msk.f32.vlgmr.msra.gmra.mxu0 %vm165_vm1, %v10878_v44  ;;  %1576 = vmatprep.subr.mxu0 %v1554_v11  ;;  %v592_v48 = vadd.f32 %v591_v62, %v462_v43  ;;  %v1719_v8 = vld [vmem:[%s16111_s3 + $0x660] sm:$0xff]  ;;  %v990_v11 = vld [vmem:[%s16111_s3 + $0x258] sm:$0xff]  ;;  %v1716_v40 = vld [vmem:[%s16111_s3 + $0x648] sm:$0xff] }
 0x149   :  { %924 = vmatpush1.msra.mxu1 %v653_v16  ;;  %1577 = vmatpush1.msra.mxu0 %v1553_v1  ;;  %v9928_v49 = vpop.f32.mrf.mxu0  ;;  %v989_v42 = vld [vmem:[%s16111_s3 + $0x250] sm:$0xff]  ;;  %v986_v16 = vld [vmem:[%s16111_s3 + $0x238] sm:$0xff]  ;;  %v1712_v1 = vld [vmem:[%s16111_s3 + $0x628] sm:$0xff] }
 0x14a   :  { %925 = vmatprep.subr.mxu1 %v650_v45  ;;  %1578 = vmatprep.subr.mxu0 %v1550_v46  ;;  %v607_v52 = vmax.f32 %v592_v48, 0.0  ;;  %v985_v43 = vld [vmem:[%s16111_s3 + $0x230] sm:$0xff]  ;;  %v1711_v45 = vld [vmem:[%s16111_s3 + $0x620] sm:$0xff]  ;;  %v982_v46 = vld [vmem:[%s16111_s3 + $0x218] sm:$0xff] }
 0x14b   :  { %926 = vmatpush1.msra.mxu1 %v649_v38  ;;  %1579 = vmatpush1.msra.mxu0 %v1549_v47  ;;  %v1708_v62 = vld [vmem:[%s16111_s3 + $0x608] sm:$0xff]  ;;  %v981_v38 = vld [vmem:[%s16111_s3 + $0x210] sm:$0xff]  ;;  %v1707_v47 = vld [vmem:[%s16111_s3 + $0x600] sm:$0xff] }
 0x14c   :  { %621 = vst.msk [vmem:[#allocation2 + $0x60] sm:$0x3] %vm620_vm2, %v607_v52  ;;  %927 = vmatprep.subr.mxu1 %v646_v5  ;;  %1580 = vmatprep.subr.mxu0 %v1546_v7  ;;  %v1192_v48 = vld [vmem:[%s16111_s3 + $0x3f8] sm:$0xff]  ;;  %v1918_v5 = vld [vmem:[%s16111_s3 + $0x7e8] sm:$0xff]  ;;  %v1191_v7 = vld [vmem:[%s16111_s3 + $0x3f0] sm:$0xff] }
 0x14d   :  { %928 = vmatpush1.msra.mxu1 %v645_v14  ;;  %1581 = vmatpush1.msra.mxu0 %v1545_v19  ;;  %v1917_v49 = vld [vmem:[%s16111_s3 + $0x7e0] sm:$0xff]  ;;  %v11087_v52 = vld [vmem:[#allocation2 + $0xc] sm:$0x3]  ;;  %v1188_v14 = vld [vmem:[%s16111_s3 + $0x3d8] sm:$0xff] }
 0x14e   :  { %929 = vmatprep.subr.mxu1 %v642_v53  ;;  %1582 = vmatprep.subr.mxu0 %v1542_v54  ;;  %v1914_v19 = vld [vmem:[%s16111_s3 + $0x7c8] sm:$0xff]  ;;  %v1187_v53 = vld [vmem:[%s16111_s3 + $0x3d0] sm:$0xff]  ;;  %v1184_v54 = vld [vmem:[%s16111_s3 + $0x3b8] sm:$0xff] }
 0x14f   :  { %930 = vmatpush1.msra.mxu1 %v641_v51  ;;  %1583 = vmatpush1.msra.mxu0 %v1541_v55  ;;  %v1910_v51 = vld [vmem:[%s16111_s3 + $0x7a8] sm:$0xff]  ;;  %v1183_v55 = vld [vmem:[%s16111_s3 + $0x3b0] sm:$0xff] }
 0x150   :  { %931 = vmatprep.subr.mxu1 %v638_v56  ;;  %1584 = vmatprep.subr.mxu0 %v1538_v57  ;;  %v1909_v56 = vld [vmem:[%s16111_s3 + $0x7a0] sm:$0xff]  ;;  %v1180_v57 = vld [vmem:[%s16111_s3 + $0x398] sm:$0xff] }
 0x151   :  { %932 = vmatpush1.msra.mxu1 %v637_v58  ;;  %1585 = vmatpush1.msra.mxu0 %v1537_v20  ;;  %v1906_v58 = vld [vmem:[%s16111_s3 + $0x788] sm:$0xff]  ;;  %v1179_v20 = vld [vmem:[%s16111_s3 + $0x390] sm:$0xff] }
 0x152   :  { %933 = vmatprep.subr.mxu1 %v634_v22  ;;  %1586 = vmatprep.subr.mxu0 %v1534_v60  ;;  %v1905_v22 = vld [vmem:[%s16111_s3 + $0x780] sm:$0xff]  ;;  %v1176_v60 = vld [vmem:[%s16111_s3 + $0x378] sm:$0xff] }
 0x153   :  { %934 = vmatpush1.msra.mxu1 %v633_v59  ;;  %1587 = vmatpush1.msra.mxu0 %v1533_v61  ;;  %v1902_v59 = vld [vmem:[%s16111_s3 + $0x768] sm:$0xff]  ;;  %v1175_v61 = vld [vmem:[%s16111_s3 + $0x370] sm:$0xff] }
 0x154   :  { %935 = vmatprep.subr.mxu1 %v630_v17  ;;  %1588 = vmatprep.subr.mxu0 %v1530_v0  ;;  %v1901_v17 = vld [vmem:[%s16111_s3 + $0x760] sm:$0xff]  ;;  %v1172_v0 = vld [vmem:[%s16111_s3 + $0x358] sm:$0xff] }
 0x155   :  { %936 = vmatpush1.msra.mxu1 %v629_v25  ;;  %1589 = vmatpush1.msra.mxu0 %v1529_v32  ;;  %v1898_v25 = vld [vmem:[%s16111_s3 + $0x748] sm:$0xff]  ;;  %v1171_v32 = vld [vmem:[%s16111_s3 + $0x350] sm:$0xff] }
 0x156   :  { %937 = vmatprep.subr.mxu1 %v626_v4  ;;  %1590 = vmatprep.subr.mxu0 %v1526_v21  ;;  %v1897_v4 = vld [vmem:[%s16111_s3 + $0x740] sm:$0xff]  ;;  %v1168_v21 = vld [vmem:[%s16111_s3 + $0x338] sm:$0xff] }
 0x157   :  { %938 = vmatpush1.msra.mxu1 %v625_v9  ;;  %971 = vmatprep.mubr.f32.mxu1 %v9955_v6  ;;  %v1894_v9 = vld [vmem:[%s16111_s3 + $0x728] sm:$0xff] }
 0x158   :  { %1591 = vmatpush1.msra.mxu0 %v1525_v10  ;;  %1624 = vmatprep.mubr.f32.mxu0 %v9955_v6  ;;  %v1167_v10 = vld [vmem:[%s16111_s3 + $0x330] sm:$0xff] }
 0x159   :  { %9616 = vmatmul.mubr.msk.f32.vlgmr.msra.gmra.mxu1 %vm165_vm1, %v10868_v15  ;;  %1101 = vmatprep.subr.mxu1 %v1010_v23  ;;  %v1715_v15 = vld [vmem:[%s16111_s3 + $0x640] sm:$0xff] }
 0x15a   :  { %9623 = vmatmul.mubr.msk.f32.vlgmr.msra.gmra.mxu0 %vm165_vm1, %v10983_v30  ;;  %1758 = vmatprep.subr.mxu0 %v1736_v24  ;;  %v1893_v23 = vld [vmem:[%s16111_s3 + $0x720] sm:$0xff]  ;;  %v1164_v24 = vld [vmem:[%s16111_s3 + $0x318] sm:$0xff] }
 0x15b   :  { %1102 = vmatpush1.msra.mxu1 %v1009_v27  ;;  %1759 = vmatpush1.msra.mxu0 %v1735_v28  ;;  %v1890_v27 = vld [vmem:[%s16111_s3 + $0x708] sm:$0xff]  ;;  %v1163_v28 = vld [vmem:[%s16111_s3 + $0x310] sm:$0xff] }
 0x15c   :  { %1103 = vmatprep.subr.mxu1 %v1006_v26  ;;  %1760 = vmatprep.subr.mxu0 %v1732_v29  ;;  %v1889_v26 = vld [vmem:[%s16111_s3 + $0x700] sm:$0xff]  ;;  %v1374_v29 = vld [vmem:[%s16111_s3 + $0x4f8] sm:$0xff] }
 0x15d   :  { %1104 = vmatpush1.msra.mxu1 %v1005_v31  ;;  %1761 = vmatpush1.msra.mxu0 %v1731_v33  ;;  %v2100_v31 = vld [vmem:[%s16111_s3 + $0x8e8] sm:$0xff]  ;;  %v1373_v33 = vld [vmem:[%s16111_s3 + $0x4f0] sm:$0xff] }
 0x15e   :  { %1105 = vmatprep.subr.mxu1 %v1002_v34  ;;  %1762 = vmatprep.subr.mxu0 %v1728_v35  ;;  %v2099_v34 = vld [vmem:[%s16111_s3 + $0x8e0] sm:$0xff]  ;;  %v11191_v35 = vld [vmem:[#allocation2 + $0xe] sm:$0x3] }
 0x15f   :  { %1106 = vmatpush1.msra.mxu1 %v1001_v36  ;;  %1763 = vmatpush1.msra.mxu0 %v1727_v37  ;;  %v1370_v36 = vld [vmem:[%s16111_s3 + $0x4d8] sm:$0xff]  ;;  %v2096_v37 = vld [vmem:[%s16111_s3 + $0x8c8] sm:$0xff] }
 0x160   :  { %1107 = vmatprep.subr.mxu1 %v998_v39  ;;  %1764 = vmatprep.subr.mxu0 %v1724_v41  ;;  %v1369_v39 = vld [vmem:[%s16111_s3 + $0x4d0] sm:$0xff]  ;;  %v1366_v41 = vld [vmem:[%s16111_s3 + $0x4b8] sm:$0xff] }
 0x161   :  { %1108 = vmatpush1.msra.mxu1 %v997_v12  ;;  %1765 = vmatpush1.msra.mxu0 %v1723_v13  ;;  %v2092_v12 = vld [vmem:[%s16111_s3 + $0x8a8] sm:$0xff]  ;;  %v1365_v13 = vld [vmem:[%s16111_s3 + $0x4b0] sm:$0xff] }
 0x162   :  { %1109 = vmatprep.subr.mxu1 %v994_v50  ;;  %1766 = vmatprep.subr.mxu0 %v1720_v2  ;;  %v2091_v50 = vld [vmem:[%s16111_s3 + $0x8a0] sm:$0xff]  ;;  %v1362_v2 = vld [vmem:[%s16111_s3 + $0x498] sm:$0xff] }
 0x163   :  { %1110 = vmatpush1.msra.mxu1 %v993_v18  ;;  %1767 = vmatpush1.msra.mxu0 %v1719_v8  ;;  %v2088_v18 = vld [vmem:[%s16111_s3 + $0x888] sm:$0xff]  ;;  %v1361_v8 = vld [vmem:[%s16111_s3 + $0x490] sm:$0xff] }
 0x164   :  { %1111 = vmatprep.subr.mxu1 %v990_v11  ;;  %1768 = vmatprep.subr.mxu0 %v1716_v40  ;;  %v2087_v11 = vld [vmem:[%s16111_s3 + $0x880] sm:$0xff]  ;;  %v1358_v40 = vld [vmem:[%s16111_s3 + $0x478] sm:$0xff] }
 0x165   :  { %1112 = vmatpush1.msra.mxu1 %v989_v42  ;;  %1769 = vmatpush1.msra.mxu0 %v1715_v15  ;;  %v2084_v42 = vld [vmem:[%s16111_s3 + $0x868] sm:$0xff]  ;;  %v1357_v15 = vld [vmem:[%s16111_s3 + $0x470] sm:$0xff] }
 0x166   :  { %1113 = vmatprep.subr.mxu1 %v986_v16  ;;  %1770 = vmatprep.subr.mxu0 %v1712_v1  ;;  %v2083_v16 = vld [vmem:[%s16111_s3 + $0x860] sm:$0xff]  ;;  %v1354_v1 = vld [vmem:[%s16111_s3 + $0x458] sm:$0xff] }
 0x167   :  { %1114 = vmatpush1.msra.mxu1 %v985_v43  ;;  %1771 = vmatpush1.msra.mxu0 %v1711_v45  ;;  %v2080_v43 = vld [vmem:[%s16111_s3 + $0x848] sm:$0xff]  ;;  %v1353_v45 = vld [vmem:[%s16111_s3 + $0x450] sm:$0xff] }
 0x168   :  { %1115 = vmatprep.subr.mxu1 %v982_v46  ;;  %1772 = vmatprep.subr.mxu0 %v1708_v62  ;;  %v2079_v46 = vld [vmem:[%s16111_s3 + $0x840] sm:$0xff]  ;;  %v1350_v62 = vld [vmem:[%s16111_s3 + $0x438] sm:$0xff] }
 0x169   :  { %1116 = vmatpush1.msra.mxu1 %v981_v38  ;;  %1149 = vmatprep.mubr.f32.mxu1 %v9955_v6  ;;  %v2076_v38 = vld [vmem:[%s16111_s3 + $0x828] sm:$0xff] }
 0x16a   :  { %1773 = vmatpush1.msra.mxu0 %v1707_v47  ;;  %1806 = vmatprep.mubr.f32.mxu0 %v9955_v6  ;;  %v1349_v47 = vld [vmem:[%s16111_s3 + $0x430] sm:$0xff] }
 0x16b   :  { %9618 = vmatmul.mubr.msk.f32.vlgmr.msra.gmra.mxu1 %vm165_vm1, %v10620_v63  ;;  %1283 = vmatprep.subr.mxu1 %v1192_v48  ;;  %v1913_v63 = vld [vmem:[%s16111_s3 + $0x7c0] sm:$0xff] }
 0x16c   :  { %9625 = vmatmul.mubr.msk.f32.vlgmr.msra.gmra.mxu0 %vm165_vm1, %v11087_v52  ;;  %1940 = vmatprep.subr.mxu0 %v1918_v5  ;;  %v2075_v48 = vld [vmem:[%s16111_s3 + $0x820] sm:$0xff]  ;;  %v1346_v5 = vld [vmem:[%s16111_s3 + $0x418] sm:$0xff] }
 0x16d   :  { %1284 = vmatpush1.msra.mxu1 %v1191_v7  ;;  %1941 = vmatpush1.msra.mxu0 %v1917_v49  ;;  %v2072_v7 = vld [vmem:[%s16111_s3 + $0x808] sm:$0xff]  ;;  %v1345_v49 = vld [vmem:[%s16111_s3 + $0x410] sm:$0xff] }
 0x16e   :  { %1285 = vmatprep.subr.mxu1 %v1188_v14  ;;  %1942 = vmatprep.subr.mxu0 %v1914_v19  ;;  %v2071_v14 = vld [vmem:[%s16111_s3 + $0x800] sm:$0xff]  ;;  %v1556_v19 = vld [vmem:[%s16111_s3 + $0x5f8] sm:$0xff] }
 0x16f   :  { %1286 = vmatpush1.msra.mxu1 %v1187_v53  ;;  %1943 = vmatpush1.msra.mxu0 %v1913_v63  ;;  %v2282_v53 = vld [vmem:[%s16111_s3 + $0x9e8] sm:$0xff]  ;;  %v1555_v63 = vld [vmem:[%s16111_s3 + $0x5f0] sm:$0xff] }
 0x170   :  { %1287 = vmatprep.subr.mxu1 %v1184_v54  ;;  %1944 = vmatprep.subr.mxu0 %v1910_v51  ;;  %v2281_v54 = vld [vmem:[%s16111_s3 + $0x9e0] sm:$0xff]  ;;  %v11295_v51 = vld [vmem:[#allocation2 + $0x10] sm:$0x3] }
 0x171   :  { %1288 = vmatpush1.msra.mxu1 %v1183_v55  ;;  %1945 = vmatpush1.msra.mxu0 %v1909_v56  ;;  %v1552_v55 = vld [vmem:[%s16111_s3 + $0x5d8] sm:$0xff]  ;;  %v2278_v56 = vld [vmem:[%s16111_s3 + $0x9c8] sm:$0xff] }
 0x172   :  { %1289 = vmatprep.subr.mxu1 %v1180_v57  ;;  %1946 = vmatprep.subr.mxu0 %v1906_v58  ;;  %v1551_v57 = vld [vmem:[%s16111_s3 + $0x5d0] sm:$0xff]  ;;  %v1548_v58 = vld [vmem:[%s16111_s3 + $0x5b8] sm:$0xff] }
 0x173   :  { %1290 = vmatpush1.msra.mxu1 %v1179_v20  ;;  %1947 = vmatpush1.msra.mxu0 %v1905_v22  ;;  %v2274_v20 = vld [vmem:[%s16111_s3 + $0x9a8] sm:$0xff]  ;;  %v1547_v22 = vld [vmem:[%s16111_s3 + $0x5b0] sm:$0xff] }
 0x174   :  { %1291 = vmatprep.subr.mxu1 %v1176_v60  ;;  %1948 = vmatprep.subr.mxu0 %v1902_v59  ;;  %v2273_v60 = vld [vmem:[%s16111_s3 + $0x9a0] sm:$0xff]  ;;  %v1544_v59 = vld [vmem:[%s16111_s3 + $0x598] sm:$0xff] }
 0x175   :  { %1292 = vmatpush1.msra.mxu1 %v1175_v61  ;;  %1949 = vmatpush1.msra.mxu0 %v1901_v17  ;;  %v2270_v61 = vld [vmem:[%s16111_s3 + $0x988] sm:$0xff]  ;;  %v1543_v17 = vld [vmem:[%s16111_s3 + $0x590] sm:$0xff] }
 0x176   :  { %1293 = vmatprep.subr.mxu1 %v1172_v0  ;;  %1950 = vmatprep.subr.mxu0 %v1898_v25  ;;  %v2269_v0 = vld [vmem:[%s16111_s3 + $0x980] sm:$0xff]  ;;  %v1540_v25 = vld [vmem:[%s16111_s3 + $0x578] sm:$0xff] }
 0x177   :  { %1294 = vmatpush1.msra.mxu1 %v1171_v32  ;;  %1951 = vmatpush1.msra.mxu0 %v1897_v4  ;;  %v2266_v32 = vld [vmem:[%s16111_s3 + $0x968] sm:$0xff]  ;;  %v1539_v4 = vld [vmem:[%s16111_s3 + $0x570] sm:$0xff] }
 0x178   :  { %1295 = vmatprep.subr.mxu1 %v1168_v21  ;;  %1952 = vmatprep.subr.mxu0 %v1894_v9  ;;  %v2265_v21 = vld [vmem:[%s16111_s3 + $0x960] sm:$0xff]  ;;  %v1536_v9 = vld [vmem:[%s16111_s3 + $0x558] sm:$0xff] }
 0x179   :  { %1296 = vmatpush1.msra.mxu1 %v1167_v10  ;;  %1953 = vmatpush1.msra.mxu0 %v1893_v23  ;;  %v2262_v10 = vld [vmem:[%s16111_s3 + $0x948] sm:$0xff]  ;;  %v1535_v23 = vld [vmem:[%s16111_s3 + $0x550] sm:$0xff] }
 0x17a   :  { %1297 = vmatprep.subr.mxu1 %v1164_v24  ;;  %1954 = vmatprep.subr.mxu0 %v1890_v27  ;;  %v2261_v24 = vld [vmem:[%s16111_s3 + $0x940] sm:$0xff]  ;;  %v1532_v27 = vld [vmem:[%s16111_s3 + $0x538] sm:$0xff] }
 0x17b   :  { %1298 = vmatpush1.msra.mxu1 %v1163_v28  ;;  %1331 = vmatprep.mubr.f32.mxu1 %v9955_v6  ;;  %v2258_v28 = vld [vmem:[%s16111_s3 + $0x928] sm:$0xff] }
 0x17c   :  { %1955 = vmatpush1.msra.mxu0 %v1889_v26  ;;  %1988 = vmatprep.mubr.f32.mxu0 %v9955_v6  ;;  %v1531_v26 = vld [vmem:[%s16111_s3 + $0x530] sm:$0xff] }
 0x17d   :  { %9620 = vmatmul.mubr.msk.f32.vlgmr.msra.gmra.mxu1 %vm165_vm1, %v10756_v3  ;;  %1465 = vmatprep.subr.mxu1 %v1374_v29  ;;  %v2095_v3 = vld [vmem:[%s16111_s3 + $0x8c0] sm:$0xff] }
 0x17e   :  { %9627 = vmatmul.mubr.msk.f32.vlgmr.msra.gmra.mxu0 %vm165_vm1, %v11191_v35  ;;  %2122 = vmatprep.subr.mxu0 %v2100_v31  ;;  %v2257_v29 = vld [vmem:[%s16111_s3 + $0x920] sm:$0xff]  ;;  %v1528_v31 = vld [vmem:[%s16111_s3 + $0x518] sm:$0xff] }
 0x17f   :  { %1466 = vmatpush1.msra.mxu1 %v1373_v33  ;;  %2123 = vmatpush1.msra.mxu0 %v2099_v34  ;;  %v2254_v33 = vld [vmem:[%s16111_s3 + $0x908] sm:$0xff]  ;;  %v1527_v34 = vld [vmem:[%s16111_s3 + $0x510] sm:$0xff] }
 0x180   :  { %1467 = vmatprep.subr.mxu1 %v1370_v36  ;;  %2124 = vmatprep.subr.mxu0 %v2096_v37  ;;  %v2253_v36 = vld [vmem:[%s16111_s3 + $0x900] sm:$0xff]  ;;  %v1738_v37 = vld [vmem:[%s16111_s3 + $0x6f8] sm:$0xff] }
 0x181   :  { %1468 = vmatpush1.msra.mxu1 %v1369_v39  ;;  %2125 = vmatpush1.msra.mxu0 %v2095_v3  ;;  %v2464_v39 = vld [vmem:[%s16111_s3 + $0xae8] sm:$0xff]  ;;  %v1737_v3 = vld [vmem:[%s16111_s3 + $0x6f0] sm:$0xff] }
 0x182   :  { %1469 = vmatprep.subr.mxu1 %v1366_v41  ;;  %2126 = vmatprep.subr.mxu0 %v2092_v12  ;;  %v2463_v41 = vld [vmem:[%s16111_s3 + $0xae0] sm:$0xff]  ;;  %v11399_v12 = vld [vmem:[#allocation2 + $0x12] sm:$0x3] }
 0x183   :  { %1470 = vmatpush1.msra.mxu1 %v1365_v13  ;;  %2127 = vmatpush1.msra.mxu0 %v2091_v50  ;;  %v1734_v13 = vld [vmem:[%s16111_s3 + $0x6d8] sm:$0xff]  ;;  %v2460_v50 = vld [vmem:[%s16111_s3 + $0xac8] sm:$0xff] }
 0x184   :  { %1471 = vmatprep.subr.mxu1 %v1362_v2  ;;  %2128 = vmatprep.subr.mxu0 %v2088_v18  ;;  %v1733_v2 = vld [vmem:[%s16111_s3 + $0x6d0] sm:$0xff]  ;;  %v1730_v18 = vld [vmem:[%s16111_s3 + $0x6b8] sm:$0xff] }
 0x185   :  { %1472 = vmatpush1.msra.mxu1 %v1361_v8  ;;  %2129 = vmatpush1.msra.mxu0 %v2087_v11  ;;  %v2456_v8 = vld [vmem:[%s16111_s3 + $0xaa8] sm:$0xff]  ;;  %v1729_v11 = vld [vmem:[%s16111_s3 + $0x6b0] sm:$0xff] }
 0x186   :  { %1473 = vmatprep.subr.mxu1 %v1358_v40  ;;  %2130 = vmatprep.subr.mxu0 %v2084_v42  ;;  %v2455_v40 = vld [vmem:[%s16111_s3 + $0xaa0] sm:$0xff]  ;;  %v1726_v42 = vld [vmem:[%s16111_s3 + $0x698] sm:$0xff] }
 0x187   :  { %1474 = vmatpush1.msra.mxu1 %v1357_v15  ;;  %2131 = vmatpush1.msra.mxu0 %v2083_v16  ;;  %v2452_v15 = vld [vmem:[%s16111_s3 + $0xa88] sm:$0xff]  ;;  %v1725_v16 = vld [vmem:[%s16111_s3 + $0x690] sm:$0xff] }
 0x188   :  { %1475 = vmatprep.subr.mxu1 %v1354_v1  ;;  %2132 = vmatprep.subr.mxu0 %v2080_v43  ;;  %v2451_v1 = vld [vmem:[%s16111_s3 + $0xa80] sm:$0xff]  ;;  %v1722_v43 = vld [vmem:[%s16111_s3 + $0x678] sm:$0xff] }
 0x189   :  { %1476 = vmatpush1.msra.mxu1 %v1353_v45  ;;  %2133 = vmatpush1.msra.mxu0 %v2079_v46  ;;  %v2448_v45 = vld [vmem:[%s16111_s3 + $0xa68] sm:$0xff]  ;;  %v1721_v46 = vld [vmem:[%s16111_s3 + $0x670] sm:$0xff] }
 0x18a   :  { %1477 = vmatprep.subr.mxu1 %v1350_v62  ;;  %2134 = vmatprep.subr.mxu0 %v2076_v38  ;;  %v2447_v62 = vld [vmem:[%s16111_s3 + $0xa60] sm:$0xff]  ;;  %v1718_v38 = vld [vmem:[%s16111_s3 + $0x658] sm:$0xff] }
 0x18b   :  { %1478 = vmatpush1.msra.mxu1 %v1349_v47  ;;  %2135 = vmatpush1.msra.mxu0 %v2075_v48  ;;  %v2444_v47 = vld [vmem:[%s16111_s3 + $0xa48] sm:$0xff]  ;;  %v1717_v48 = vld [vmem:[%s16111_s3 + $0x650] sm:$0xff] }
 0x18c   :  { %1479 = vmatprep.subr.mxu1 %v1346_v5  ;;  %2136 = vmatprep.subr.mxu0 %v2072_v7  ;;  %v2443_v5 = vld [vmem:[%s16111_s3 + $0xa40] sm:$0xff]  ;;  %v1714_v7 = vld [vmem:[%s16111_s3 + $0x638] sm:$0xff] }
 0x18d   :  { %1480 = vmatpush1.msra.mxu1 %v1345_v49  ;;  %1513 = vmatprep.mubr.f32.mxu1 %v9955_v6  ;;  %v2440_v49 = vld [vmem:[%s16111_s3 + $0xa28] sm:$0xff] }
 0x18e   :  { %2137 = vmatpush1.msra.mxu0 %v2071_v14  ;;  %2170 = vmatprep.mubr.f32.mxu0 %v9955_v6  ;;  %v1713_v14 = vld [vmem:[%s16111_s3 + $0x630] sm:$0xff] }
 0x18f   :  { %9622 = vmatmul.mubr.msk.f32.vlgmr.msra.gmra.mxu1 %vm165_vm1, %v10878_v44  ;;  %1647 = vmatprep.subr.mxu1 %v1556_v19  ;;  %v2277_v44 = vld [vmem:[%s16111_s3 + $0x9c0] sm:$0xff] }
 0x190   :  { %9629 = vmatmul.mubr.msk.f32.vlgmr.msra.gmra.mxu0 %vm165_vm1, %v11295_v51  ;;  %2304 = vmatprep.subr.mxu0 %v2282_v53  ;;  %v2439_v19 = vld [vmem:[%s16111_s3 + $0xa20] sm:$0xff]  ;;  %v1710_v53 = vld [vmem:[%s16111_s3 + $0x618] sm:$0xff] }
 0x191   :  { %1648 = vmatpush1.msra.mxu1 %v1555_v63  ;;  %2305 = vmatpush1.msra.mxu0 %v2281_v54  ;;  %v2436_v63 = vld [vmem:[%s16111_s3 + $0xa08] sm:$0xff]  ;;  %v1709_v54 = vld [vmem:[%s16111_s3 + $0x610] sm:$0xff] }
 0x192   :  { %1649 = vmatprep.subr.mxu1 %v1552_v55  ;;  %2306 = vmatprep.subr.mxu0 %v2278_v56  ;;  %v2435_v55 = vld [vmem:[%s16111_s3 + $0xa00] sm:$0xff]  ;;  %v1920_v56 = vld [vmem:[%s16111_s3 + $0x7f8] sm:$0xff] }
 0x193   :  { %1650 = vmatpush1.msra.mxu1 %v1551_v57  ;;  %2307 = vmatpush1.msra.mxu0 %v2277_v44  ;;  %v2646_v57 = vld [vmem:[%s16111_s3 + $0xbe8] sm:$0xff]  ;;  %v1919_v44 = vld [vmem:[%s16111_s3 + $0x7f0] sm:$0xff] }
 0x194   :  { %1651 = vmatprep.subr.mxu1 %v1548_v58  ;;  %2308 = vmatprep.subr.mxu0 %v2274_v20  ;;  %v2645_v58 = vld [vmem:[%s16111_s3 + $0xbe0] sm:$0xff]  ;;  %v11503_v20 = vld [vmem:[#allocation2 + $0x14] sm:$0x3] }
 0x195   :  { %1652 = vmatpush1.msra.mxu1 %v1547_v22  ;;  %2309 = vmatpush1.msra.mxu0 %v2273_v60  ;;  %v1916_v22 = vld [vmem:[%s16111_s3 + $0x7d8] sm:$0xff]  ;;  %v2642_v60 = vld [vmem:[%s16111_s3 + $0xbc8] sm:$0xff] }
 0x196   :  { %1653 = vmatprep.subr.mxu1 %v1544_v59  ;;  %2310 = vmatprep.subr.mxu0 %v2270_v61  ;;  %v1915_v59 = vld [vmem:[%s16111_s3 + $0x7d0] sm:$0xff]  ;;  %v1912_v61 = vld [vmem:[%s16111_s3 + $0x7b8] sm:$0xff] }
 0x197   :  { %1654 = vmatpush1.msra.mxu1 %v1543_v17  ;;  %2311 = vmatpush1.msra.mxu0 %v2269_v0  ;;  %v2638_v17 = vld [vmem:[%s16111_s3 + $0xba8] sm:$0xff]  ;;  %v1911_v0 = vld [vmem:[%s16111_s3 + $0x7b0] sm:$0xff] }
 0x198   :  { %1655 = vmatprep.subr.mxu1 %v1540_v25  ;;  %2312 = vmatprep.subr.mxu0 %v2266_v32  ;;  %v2637_v25 = vld [vmem:[%s16111_s3 + $0xba0] sm:$0xff]  ;;  %v1908_v32 = vld [vmem:[%s16111_s3 + $0x798] sm:$0xff] }
 0x199   :  { %1656 = vmatpush1.msra.mxu1 %v1539_v4  ;;  %2313 = vmatpush1.msra.mxu0 %v2265_v21  ;;  %v2634_v4 = vld [vmem:[%s16111_s3 + $0xb88] sm:$0xff]  ;;  %v1907_v21 = vld [vmem:[%s16111_s3 + $0x790] sm:$0xff] }
 0x19a   :  { %1657 = vmatprep.subr.mxu1 %v1536_v9  ;;  %2314 = vmatprep.subr.mxu0 %v2262_v10  ;;  %v2633_v9 = vld [vmem:[%s16111_s3 + $0xb80] sm:$0xff]  ;;  %v1904_v10 = vld [vmem:[%s16111_s3 + $0x778] sm:$0xff] }
 0x19b   :  { %1658 = vmatpush1.msra.mxu1 %v1535_v23  ;;  %2315 = vmatpush1.msra.mxu0 %v2261_v24  ;;  %v2630_v23 = vld [vmem:[%s16111_s3 + $0xb68] sm:$0xff]  ;;  %v1903_v24 = vld [vmem:[%s16111_s3 + $0x770] sm:$0xff] }
 0x19c   :  { %1659 = vmatprep.subr.mxu1 %v1532_v27  ;;  %2316 = vmatprep.subr.mxu0 %v2258_v28  ;;  %v2629_v27 = vld [vmem:[%s16111_s3 + $0xb60] sm:$0xff]  ;;  %v1900_v28 = vld [vmem:[%s16111_s3 + $0x758] sm:$0xff] }
 0x19d   :  { %1660 = vmatpush1.msra.mxu1 %v1531_v26  ;;  %2317 = vmatpush1.msra.mxu0 %v2257_v29  ;;  %v2626_v26 = vld [vmem:[%s16111_s3 + $0xb48] sm:$0xff]  ;;  %v1899_v29 = vld [vmem:[%s16111_s3 + $0x750] sm:$0xff] }
 0x19e   :  { %1661 = vmatprep.subr.mxu1 %v1528_v31  ;;  %2318 = vmatprep.subr.mxu0 %v2254_v33  ;;  %v2625_v31 = vld [vmem:[%s16111_s3 + $0xb40] sm:$0xff]  ;;  %v1896_v33 = vld [vmem:[%s16111_s3 + $0x738] sm:$0xff] }
 0x19f   :  { %1662 = vmatpush1.msra.mxu1 %v1527_v34  ;;  %1695 = vmatprep.mubr.f32.mxu1 %v9955_v6  ;;  %v2622_v34 = vld [vmem:[%s16111_s3 + $0xb28] sm:$0xff] }
 0x1a0   :  { %2319 = vmatpush1.msra.mxu0 %v2253_v36  ;;  %2352 = vmatprep.mubr.f32.mxu0 %v9955_v6  ;;  %v1895_v36 = vld [vmem:[%s16111_s3 + $0x730] sm:$0xff] }
 0x1a1   :  { %9624 = vmatmul.mubr.msk.f32.vlgmr.msra.gmra.mxu1 %vm165_vm1, %v10983_v30  ;;  %1829 = vmatprep.subr.mxu1 %v1738_v37  ;;  %v2459_v30 = vld [vmem:[%s16111_s3 + $0xac0] sm:$0xff] }
 0x1a2   :  { %9631 = vmatmul.mubr.msk.f32.vlgmr.msra.gmra.mxu0 %vm165_vm1, %v11399_v12  ;;  %2486 = vmatprep.subr.mxu0 %v2464_v39  ;;  %v2621_v37 = vld [vmem:[%s16111_s3 + $0xb20] sm:$0xff]  ;;  %v1892_v39 = vld [vmem:[%s16111_s3 + $0x718] sm:$0xff] }
 0x1a3   :  { %1830 = vmatpush1.msra.mxu1 %v1737_v3  ;;  %2487 = vmatpush1.msra.mxu0 %v2463_v41  ;;  %v2618_v3 = vld [vmem:[%s16111_s3 + $0xb08] sm:$0xff]  ;;  %v1891_v41 = vld [vmem:[%s16111_s3 + $0x710] sm:$0xff] }
 0x1a4   :  { %1831 = vmatprep.subr.mxu1 %v1734_v13  ;;  %2488 = vmatprep.subr.mxu0 %v2460_v50  ;;  %v2617_v13 = vld [vmem:[%s16111_s3 + $0xb00] sm:$0xff]  ;;  %v2102_v50 = vld [vmem:[%s16111_s3 + $0x8f8] sm:$0xff] }
 0x1a5   :  { %1832 = vmatpush1.msra.mxu1 %v1733_v2  ;;  %2489 = vmatpush1.msra.mxu0 %v2459_v30  ;;  %v2828_v2 = vld [vmem:[%s16111_s3 + $0xce8] sm:$0xff]  ;;  %v2101_v30 = vld [vmem:[%s16111_s3 + $0x8f0] sm:$0xff] }
 0x1a6   :  { %1833 = vmatprep.subr.mxu1 %v1730_v18  ;;  %2490 = vmatprep.subr.mxu0 %v2456_v8  ;;  %v2827_v18 = vld [vmem:[%s16111_s3 + $0xce0] sm:$0xff]  ;;  %v11607_v8 = vld [vmem:[#allocation2 + $0x16] sm:$0x3] }
 0x1a7   :  { %1834 = vmatpush1.msra.mxu1 %v1729_v11  ;;  %2491 = vmatpush1.msra.mxu0 %v2455_v40  ;;  %v2098_v11 = vld [vmem:[%s16111_s3 + $0x8d8] sm:$0xff]  ;;  %v2824_v40 = vld [vmem:[%s16111_s3 + $0xcc8] sm:$0xff] }
 0x1a8   :  { %1835 = vmatprep.subr.mxu1 %v1726_v42  ;;  %2492 = vmatprep.subr.mxu0 %v2452_v15  ;;  %v2097_v42 = vld [vmem:[%s16111_s3 + $0x8d0] sm:$0xff]  ;;  %v2094_v15 = vld [vmem:[%s16111_s3 + $0x8b8] sm:$0xff] }
 0x1a9   :  { %1836 = vmatpush1.msra.mxu1 %v1725_v16  ;;  %2493 = vmatpush1.msra.mxu0 %v2451_v1  ;;  %v2820_v16 = vld [vmem:[%s16111_s3 + $0xca8] sm:$0xff]  ;;  %v2093_v1 = vld [vmem:[%s16111_s3 + $0x8b0] sm:$0xff] }
 0x1aa   :  { %1837 = vmatprep.subr.mxu1 %v1722_v43  ;;  %2494 = vmatprep.subr.mxu0 %v2448_v45  ;;  %v2819_v43 = vld [vmem:[%s16111_s3 + $0xca0] sm:$0xff]  ;;  %v2090_v45 = vld [vmem:[%s16111_s3 + $0x898] sm:$0xff] }
 0x1ab   :  { %1838 = vmatpush1.msra.mxu1 %v1721_v46  ;;  %2495 = vmatpush1.msra.mxu0 %v2447_v62  ;;  %v2816_v46 = vld [vmem:[%s16111_s3 + $0xc88] sm:$0xff]  ;;  %v2089_v62 = vld [vmem:[%s16111_s3 + $0x890] sm:$0xff] }
 0x1ac   :  { %1839 = vmatprep.subr.mxu1 %v1718_v38  ;;  %2496 = vmatprep.subr.mxu0 %v2444_v47  ;;  %v2815_v38 = vld [vmem:[%s16111_s3 + $0xc80] sm:$0xff]  ;;  %v2086_v47 = vld [vmem:[%s16111_s3 + $0x878] sm:$0xff] }
 0x1ad   :  { %1840 = vmatpush1.msra.mxu1 %v1717_v48  ;;  %2497 = vmatpush1.msra.mxu0 %v2443_v5  ;;  %v2812_v48 = vld [vmem:[%s16111_s3 + $0xc68] sm:$0xff]  ;;  %v2085_v5 = vld [vmem:[%s16111_s3 + $0x870] sm:$0xff] }
 0x1ae   :  { %1841 = vmatprep.subr.mxu1 %v1714_v7  ;;  %2498 = vmatprep.subr.mxu0 %v2440_v49  ;;  %v2811_v7 = vld [vmem:[%s16111_s3 + $0xc60] sm:$0xff]  ;;  %v2082_v49 = vld [vmem:[%s16111_s3 + $0x858] sm:$0xff] }
 0x1af   :  { %1842 = vmatpush1.msra.mxu1 %v1713_v14  ;;  %2499 = vmatpush1.msra.mxu0 %v2439_v19  ;;  %v2808_v14 = vld [vmem:[%s16111_s3 + $0xc48] sm:$0xff]  ;;  %v2081_v19 = vld [vmem:[%s16111_s3 + $0x850] sm:$0xff] }
 0x1b0   :  { %1843 = vmatprep.subr.mxu1 %v1710_v53  ;;  %2500 = vmatprep.subr.mxu0 %v2436_v63  ;;  %v2807_v53 = vld [vmem:[%s16111_s3 + $0xc40] sm:$0xff]  ;;  %v2078_v63 = vld [vmem:[%s16111_s3 + $0x838] sm:$0xff] }
 0x1b1   :  { %1844 = vmatpush1.msra.mxu1 %v1709_v54  ;;  %1877 = vmatprep.mubr.f32.mxu1 %v9955_v6  ;;  %v2804_v54 = vld [vmem:[%s16111_s3 + $0xc28] sm:$0xff] }
 0x1b2   :  { %2501 = vmatpush1.msra.mxu0 %v2435_v55  ;;  %2534 = vmatprep.mubr.f32.mxu0 %v9955_v6  ;;  %v2077_v55 = vld [vmem:[%s16111_s3 + $0x830] sm:$0xff] }
 0x1b3   :  { %9626 = vmatmul.mubr.msk.f32.vlgmr.msra.gmra.mxu1 %vm165_vm1, %v11087_v52  ;;  %2011 = vmatprep.subr.mxu1 %v1920_v56  ;;  %v2641_v52 = vld [vmem:[%s16111_s3 + $0xbc0] sm:$0xff] }
 0x1b4   :  { %9633 = vmatmul.mubr.msk.f32.vlgmr.msra.gmra.mxu0 %vm165_vm1, %v11503_v20  ;;  %2668 = vmatprep.subr.mxu0 %v2646_v57  ;;  %v2803_v56 = vld [vmem:[%s16111_s3 + $0xc20] sm:$0xff]  ;;  %v2074_v57 = vld [vmem:[%s16111_s3 + $0x818] sm:$0xff] }
 0x1b5   :  { %2012 = vmatpush1.msra.mxu1 %v1919_v44  ;;  %2669 = vmatpush1.msra.mxu0 %v2645_v58  ;;  %v2800_v44 = vld [vmem:[%s16111_s3 + $0xc08] sm:$0xff]  ;;  %v2073_v58 = vld [vmem:[%s16111_s3 + $0x810] sm:$0xff] }
 0x1b6   :  { %2013 = vmatprep.subr.mxu1 %v1916_v22  ;;  %2670 = vmatprep.subr.mxu0 %v2642_v60  ;;  %v2799_v22 = vld [vmem:[%s16111_s3 + $0xc00] sm:$0xff]  ;;  %v2284_v60 = vld [vmem:[%s16111_s3 + $0x9f8] sm:$0xff] }
 0x1b7   :  { %2014 = vmatpush1.msra.mxu1 %v1915_v59  ;;  %2671 = vmatpush1.msra.mxu0 %v2641_v52  ;;  %v3010_v59 = vld [vmem:[%s16111_s3 + $0xde8] sm:$0xff]  ;;  %v2283_v52 = vld [vmem:[%s16111_s3 + $0x9f0] sm:$0xff] }
 0x1b8   :  { %2015 = vmatprep.subr.mxu1 %v1912_v61  ;;  %2672 = vmatprep.subr.mxu0 %v2638_v17  ;;  %v3009_v61 = vld [vmem:[%s16111_s3 + $0xde0] sm:$0xff]  ;;  %v11711_v17 = vld [vmem:[#allocation2 + $0x18] sm:$0x3] }
 0x1b9   :  { %2016 = vmatpush1.msra.mxu1 %v1911_v0  ;;  %2673 = vmatpush1.msra.mxu0 %v2637_v25  ;;  %v2280_v0 = vld [vmem:[%s16111_s3 + $0x9d8] sm:$0xff]  ;;  %v3006_v25 = vld [vmem:[%s16111_s3 + $0xdc8] sm:$0xff] }
 0x1ba   :  { %2017 = vmatprep.subr.mxu1 %v1908_v32  ;;  %2674 = vmatprep.subr.mxu0 %v2634_v4  ;;  %v2279_v32 = vld [vmem:[%s16111_s3 + $0x9d0] sm:$0xff]  ;;  %v2276_v4 = vld [vmem:[%s16111_s3 + $0x9b8] sm:$0xff] }
 0x1bb   :  { %2018 = vmatpush1.msra.mxu1 %v1907_v21  ;;  %2675 = vmatpush1.msra.mxu0 %v2633_v9  ;;  %v3002_v21 = vld [vmem:[%s16111_s3 + $0xda8] sm:$0xff]  ;;  %v2275_v9 = vld [vmem:[%s16111_s3 + $0x9b0] sm:$0xff] }
 0x1bc   :  { %2019 = vmatprep.subr.mxu1 %v1904_v10  ;;  %2676 = vmatprep.subr.mxu0 %v2630_v23  ;;  %v3001_v10 = vld [vmem:[%s16111_s3 + $0xda0] sm:$0xff]  ;;  %v2272_v23 = vld [vmem:[%s16111_s3 + $0x998] sm:$0xff] }
 0x1bd   :  { %2020 = vmatpush1.msra.mxu1 %v1903_v24  ;;  %2677 = vmatpush1.msra.mxu0 %v2629_v27  ;;  %v2998_v24 = vld [vmem:[%s16111_s3 + $0xd88] sm:$0xff]  ;;  %v2271_v27 = vld [vmem:[%s16111_s3 + $0x990] sm:$0xff] }
 0x1be   :  { %2021 = vmatprep.subr.mxu1 %v1900_v28  ;;  %2678 = vmatprep.subr.mxu0 %v2626_v26  ;;  %v2997_v28 = vld [vmem:[%s16111_s3 + $0xd80] sm:$0xff]  ;;  %v2268_v26 = vld [vmem:[%s16111_s3 + $0x978] sm:$0xff] }
 0x1bf   :  { %2022 = vmatpush1.msra.mxu1 %v1899_v29  ;;  %2679 = vmatpush1.msra.mxu0 %v2625_v31  ;;  %v2994_v29 = vld [vmem:[%s16111_s3 + $0xd68] sm:$0xff]  ;;  %v2267_v31 = vld [vmem:[%s16111_s3 + $0x970] sm:$0xff] }
 0x1c0   :  { %2023 = vmatprep.subr.mxu1 %v1896_v33  ;;  %2680 = vmatprep.subr.mxu0 %v2622_v34  ;;  %v2993_v33 = vld [vmem:[%s16111_s3 + $0xd60] sm:$0xff]  ;;  %v2264_v34 = vld [vmem:[%s16111_s3 + $0x958] sm:$0xff] }
 0x1c1   :  { %2024 = vmatpush1.msra.mxu1 %v1895_v36  ;;  %2681 = vmatpush1.msra.mxu0 %v2621_v37  ;;  %v2990_v36 = vld [vmem:[%s16111_s3 + $0xd48] sm:$0xff]  ;;  %v2263_v37 = vld [vmem:[%s16111_s3 + $0x950] sm:$0xff] }
 0x1c2   :  { %2025 = vmatprep.subr.mxu1 %v1892_v39  ;;  %2682 = vmatprep.subr.mxu0 %v2618_v3  ;;  %v2989_v39 = vld [vmem:[%s16111_s3 + $0xd40] sm:$0xff]  ;;  %v2260_v3 = vld [vmem:[%s16111_s3 + $0x938] sm:$0xff] }
 0x1c3   :  { %2026 = vmatpush1.msra.mxu1 %v1891_v41  ;;  %2059 = vmatprep.mubr.f32.mxu1 %v9955_v6  ;;  %v2986_v41 = vld [vmem:[%s16111_s3 + $0xd28] sm:$0xff] }
 0x1c4   :  { %2683 = vmatpush1.msra.mxu0 %v2617_v13  ;;  %2716 = vmatprep.mubr.f32.mxu0 %v9955_v6  ;;  %v2259_v13 = vld [vmem:[%s16111_s3 + $0x930] sm:$0xff] }
 0x1c5   :  { %9628 = vmatmul.mubr.msk.f32.vlgmr.msra.gmra.mxu1 %vm165_vm1, %v11191_v35  ;;  %2193 = vmatprep.subr.mxu1 %v2102_v50  ;;  %v2823_v35 = vld [vmem:[%s16111_s3 + $0xcc0] sm:$0xff] }
 0x1c6   :  { %9635 = vmatmul.mubr.msk.f32.vlgmr.msra.gmra.mxu0 %vm165_vm1, %v11607_v8  ;;  %2850 = vmatprep.subr.mxu0 %v2828_v2  ;;  %v2985_v50 = vld [vmem:[%s16111_s3 + $0xd20] sm:$0xff]  ;;  %v2256_v2 = vld [vmem:[%s16111_s3 + $0x918] sm:$0xff] }
 0x1c7   :  { %2194 = vmatpush1.msra.mxu1 %v2101_v30  ;;  %2851 = vmatpush1.msra.mxu0 %v2827_v18  ;;  %v2982_v30 = vld [vmem:[%s16111_s3 + $0xd08] sm:$0xff]  ;;  %v2255_v18 = vld [vmem:[%s16111_s3 + $0x910] sm:$0xff] }
 0x1c8   :  { %2195 = vmatprep.subr.mxu1 %v2098_v11  ;;  %2852 = vmatprep.subr.mxu0 %v2824_v40  ;;  %v2981_v11 = vld [vmem:[%s16111_s3 + $0xd00] sm:$0xff]  ;;  %v2466_v40 = vld [vmem:[%s16111_s3 + $0xaf8] sm:$0xff] }
 0x1c9   :  { %2196 = vmatpush1.msra.mxu1 %v2097_v42  ;;  %2853 = vmatpush1.msra.mxu0 %v2823_v35  ;;  %v3192_v42 = vld [vmem:[%s16111_s3 + $0xee8] sm:$0xff]  ;;  %v2465_v35 = vld [vmem:[%s16111_s3 + $0xaf0] sm:$0xff] }
 0x1ca   :  { %2197 = vmatprep.subr.mxu1 %v2094_v15  ;;  %2854 = vmatprep.subr.mxu0 %v2820_v16  ;;  %v3191_v15 = vld [vmem:[%s16111_s3 + $0xee0] sm:$0xff]  ;;  %v11815_v16 = vld [vmem:[#allocation2 + $0x1a] sm:$0x3] }
 0x1cb   :  { %2198 = vmatpush1.msra.mxu1 %v2093_v1  ;;  %2855 = vmatpush1.msra.mxu0 %v2819_v43  ;;  %v2462_v1 = vld [vmem:[%s16111_s3 + $0xad8] sm:$0xff]  ;;  %v3188_v43 = vld [vmem:[%s16111_s3 + $0xec8] sm:$0xff] }
 0x1cc   :  { %2199 = vmatprep.subr.mxu1 %v2090_v45  ;;  %2856 = vmatprep.subr.mxu0 %v2816_v46  ;;  %v2461_v45 = vld [vmem:[%s16111_s3 + $0xad0] sm:$0xff]  ;;  %v2458_v46 = vld [vmem:[%s16111_s3 + $0xab8] sm:$0xff] }
 0x1cd   :  { %2200 = vmatpush1.msra.mxu1 %v2089_v62  ;;  %2857 = vmatpush1.msra.mxu0 %v2815_v38  ;;  %v3184_v62 = vld [vmem:[%s16111_s3 + $0xea8] sm:$0xff]  ;;  %v2457_v38 = vld [vmem:[%s16111_s3 + $0xab0] sm:$0xff] }
 0x1ce   :  { %2201 = vmatprep.subr.mxu1 %v2086_v47  ;;  %2858 = vmatprep.subr.mxu0 %v2812_v48  ;;  %v3183_v47 = vld [vmem:[%s16111_s3 + $0xea0] sm:$0xff]  ;;  %v2454_v48 = vld [vmem:[%s16111_s3 + $0xa98] sm:$0xff] }
 0x1cf   :  { %2202 = vmatpush1.msra.mxu1 %v2085_v5  ;;  %2859 = vmatpush1.msra.mxu0 %v2811_v7  ;;  %v3180_v5 = vld [vmem:[%s16111_s3 + $0xe88] sm:$0xff]  ;;  %v2453_v7 = vld [vmem:[%s16111_s3 + $0xa90] sm:$0xff] }
 0x1d0   :  { %2203 = vmatprep.subr.mxu1 %v2082_v49  ;;  %2860 = vmatprep.subr.mxu0 %v2808_v14  ;;  %v3179_v49 = vld [vmem:[%s16111_s3 + $0xe80] sm:$0xff]  ;;  %v2450_v14 = vld [vmem:[%s16111_s3 + $0xa78] sm:$0xff] }
 0x1d1   :  { %2204 = vmatpush1.msra.mxu1 %v2081_v19  ;;  %2861 = vmatpush1.msra.mxu0 %v2807_v53  ;;  %v3176_v19 = vld [vmem:[%s16111_s3 + $0xe68] sm:$0xff]  ;;  %v2449_v53 = vld [vmem:[%s16111_s3 + $0xa70] sm:$0xff] }
 0x1d2   :  { %2205 = vmatprep.subr.mxu1 %v2078_v63  ;;  %2862 = vmatprep.subr.mxu0 %v2804_v54  ;;  %v3175_v63 = vld [vmem:[%s16111_s3 + $0xe60] sm:$0xff]  ;;  %v2446_v54 = vld [vmem:[%s16111_s3 + $0xa58] sm:$0xff] }
 0x1d3   :  { %2206 = vmatpush1.msra.mxu1 %v2077_v55  ;;  %2863 = vmatpush1.msra.mxu0 %v2803_v56  ;;  %v3172_v55 = vld [vmem:[%s16111_s3 + $0xe48] sm:$0xff]  ;;  %v2445_v56 = vld [vmem:[%s16111_s3 + $0xa50] sm:$0xff] }
 0x1d4   :  { %2207 = vmatprep.subr.mxu1 %v2074_v57  ;;  %2864 = vmatprep.subr.mxu0 %v2800_v44  ;;  %v3171_v57 = vld [vmem:[%s16111_s3 + $0xe40] sm:$0xff]  ;;  %v2442_v44 = vld [vmem:[%s16111_s3 + $0xa38] sm:$0xff] }
 0x1d5   :  { %2208 = vmatpush1.msra.mxu1 %v2073_v58  ;;  %2241 = vmatprep.mubr.f32.mxu1 %v9955_v6  ;;  %v3168_v58 = vld [vmem:[%s16111_s3 + $0xe28] sm:$0xff] }
 0x1d6   :  { %2865 = vmatpush1.msra.mxu0 %v2799_v22  ;;  %2898 = vmatprep.mubr.f32.mxu0 %v9955_v6  ;;  %v2441_v22 = vld [vmem:[%s16111_s3 + $0xa30] sm:$0xff] }
 0x1d7   :  { %9630 = vmatmul.mubr.msk.f32.vlgmr.msra.gmra.mxu1 %vm165_vm1, %v11295_v51  ;;  %2375 = vmatprep.subr.mxu1 %v2284_v60  ;;  %v3005_v51 = vld [vmem:[%s16111_s3 + $0xdc0] sm:$0xff] }
 0x1d8   :  { %9637 = vmatmul.mubr.msk.f32.vlgmr.msra.gmra.mxu0 %vm165_vm1, %v11711_v17  ;;  %3032 = vmatprep.subr.mxu0 %v3010_v59  ;;  %v3167_v60 = vld [vmem:[%s16111_s3 + $0xe20] sm:$0xff]  ;;  %v2438_v59 = vld [vmem:[%s16111_s3 + $0xa18] sm:$0xff] }
 0x1d9   :  { %2376 = vmatpush1.msra.mxu1 %v2283_v52  ;;  %3033 = vmatpush1.msra.mxu0 %v3009_v61  ;;  %v3164_v52 = vld [vmem:[%s16111_s3 + $0xe08] sm:$0xff]  ;;  %v2437_v61 = vld [vmem:[%s16111_s3 + $0xa10] sm:$0xff] }
 0x1da   :  { %2377 = vmatprep.subr.mxu1 %v2280_v0  ;;  %3034 = vmatprep.subr.mxu0 %v3006_v25  ;;  %v3163_v0 = vld [vmem:[%s16111_s3 + $0xe00] sm:$0xff]  ;;  %v2648_v25 = vld [vmem:[%s16111_s3 + $0xbf8] sm:$0xff] }
 0x1db   :  { %2378 = vmatpush1.msra.mxu1 %v2279_v32  ;;  %3035 = vmatpush1.msra.mxu0 %v3005_v51  ;;  %v3374_v32 = vld [vmem:[%s16111_s3 + $0xfe8] sm:$0xff]  ;;  %v2647_v51 = vld [vmem:[%s16111_s3 + $0xbf0] sm:$0xff] }
 0x1dc   :  { %2379 = vmatprep.subr.mxu1 %v2276_v4  ;;  %3036 = vmatprep.subr.mxu0 %v3002_v21  ;;  %v3373_v4 = vld [vmem:[%s16111_s3 + $0xfe0] sm:$0xff]  ;;  %v11919_v21 = vld [vmem:[#allocation2 + $0x1c] sm:$0x3] }
 0x1dd   :  { %2380 = vmatpush1.msra.mxu1 %v2275_v9  ;;  %3037 = vmatpush1.msra.mxu0 %v3001_v10  ;;  %v2644_v10 = vld [vmem:[%s16111_s3 + $0xbd8] sm:$0xff] }
 0x1de   :  { %2381 = vmatprep.subr.mxu1 %v2272_v23  ;;  %3038 = vmatprep.subr.mxu0 %v2998_v24  ;;  %v3370_v23 = vld [vmem:[%s16111_s3 + $0xfc8] sm:$0xff]  ;;  %v3369_v24 = vld [vmem:[%s16111_s3 + $0xfc0] sm:$0xff] }
 0x1df   :  { %2382 = vmatpush1.msra.mxu1 %v2271_v27  ;;  %3039 = vmatpush1.msra.mxu0 %v2997_v28  ;;  %v2640_v27 = vld [vmem:[%s16111_s3 + $0xbb8] sm:$0xff]  ;;  %v3366_v28 = vld [vmem:[%s16111_s3 + $0xfa8] sm:$0xff] }
 0x1e0   :  { %2383 = vmatprep.subr.mxu1 %v2268_v26  ;;  %3040 = vmatprep.subr.mxu0 %v2994_v29  ;;  %v2639_v26 = vld [vmem:[%s16111_s3 + $0xbb0] sm:$0xff]  ;;  %v3365_v29 = vld [vmem:[%s16111_s3 + $0xfa0] sm:$0xff] }
 0x1e1   :  { %2384 = vmatpush1.msra.mxu1 %v2267_v31  ;;  %3041 = vmatpush1.msra.mxu0 %v2993_v33 }
 0x1e2   :  { %2385 = vmatprep.subr.mxu1 %v2264_v34  ;;  %3042 = vmatprep.subr.mxu0 %v2990_v36  ;;  %v2636_v34 = vld [vmem:[%s16111_s3 + $0xb98] sm:$0xff]  ;;  %v3362_v36 = vld [vmem:[%s16111_s3 + $0xf88] sm:$0xff] }
 0x1e3   :  { %2386 = vmatpush1.msra.mxu1 %v2263_v37  ;;  %3043 = vmatpush1.msra.mxu0 %v2989_v39  ;;  %v2635_v37 = vld [vmem:[%s16111_s3 + $0xb90] sm:$0xff]  ;;  %v3361_v39 = vld [vmem:[%s16111_s3 + $0xf80] sm:$0xff] }
 0x1e4   :  { %2387 = vmatprep.subr.mxu1 %v2260_v3  ;;  %3044 = vmatprep.subr.mxu0 %v2986_v41  ;;  %v757_v9 = vpop.f32.mrf.mxu1  ;;  %v1080_v31 = vpop.f32.mrf.mxu0  ;;  %v2632_v3 = vld [vmem:[%s16111_s3 + $0xb78] sm:$0xff]  ;;  %v3358_v41 = vld [vmem:[%s16111_s3 + $0xf68] sm:$0xff] }
 0x1e5   :  { %2388 = vmatpush1.msra.mxu1 %v2259_v13  ;;  %3045 = vmatpush1.msra.mxu0 %v2985_v50  ;;  %v2631_v50 = vld [vmem:[%s16111_s3 + $0xb70] sm:$0xff] }
 0x1e6   :  { %2389 = vmatprep.subr.mxu1 %v2256_v2  ;;  %3046 = vmatprep.subr.mxu0 %v2982_v30  ;;  %v759_v33 = vpop.f32.mrf.mxu1  ;;  %v3357_v2 = vld [vmem:[%s16111_s3 + $0xf60] sm:$0xff]  ;;  %v1082_v30 = vpop.f32.mrf.mxu0 }
 0x1e7   :  { %2390 = vmatpush1.msra.mxu1 %v2255_v18  ;;  %2423 = vmatprep.mubr.f32.mxu1 %v9955_v6  ;;  %v2628_v18 = vld [vmem:[%s16111_s3 + $0xb58] sm:$0xff] }
 0x1e8   :  { %3047 = vmatpush1.msra.mxu0 %v2981_v11  ;;  %3080 = vmatprep.mubr.f32.mxu0 %v9955_v6  ;;  %v3354_v11 = vld [vmem:[%s16111_s3 + $0xf48] sm:$0xff] }
 0x1e9   :  { %9632 = vmatmul.mubr.msk.f32.vlgmr.msra.gmra.mxu1 %vm165_vm1, %v11399_v12  ;;  %2557 = vmatprep.subr.mxu1 %v2466_v40  ;;  %v3187_v12 = vld [vmem:[%s16111_s3 + $0xec0] sm:$0xff]  ;;  %v2627_v40 = vld [vmem:[%s16111_s3 + $0xb50] sm:$0xff] }
 0x1ea   :  { %9639 = vmatmul.mubr.msk.f32.vlgmr.msra.gmra.mxu0 %vm165_vm1, %v11815_v16  ;;  %3214 = vmatprep.subr.mxu0 %v3192_v42  ;;  %v3353_v42 = vld [vmem:[%s16111_s3 + $0xf40] sm:$0xff] }
 0x1eb   :  { %2558 = vmatpush1.msra.mxu1 %v2465_v35  ;;  %3215 = vmatpush1.msra.mxu0 %v3191_v15  ;;  %v2624_v35 = vld [vmem:[%s16111_s3 + $0xb38] sm:$0xff]  ;;  %v3350_v15 = vld [vmem:[%s16111_s3 + $0xf28] sm:$0xff] }
 0x1ec   :  { %2559 = vmatprep.subr.mxu1 %v2462_v1  ;;  %3216 = vmatprep.subr.mxu0 %v3188_v43 }
 0x1ed   :  { %2560 = vmatpush1.msra.mxu1 %v2461_v45  ;;  %3217 = vmatpush1.msra.mxu0 %v3187_v12  ;;  %v2623_v45 = vld [vmem:[%s16111_s3 + $0xb30] sm:$0xff]  ;;  %v3349_v12 = vld [vmem:[%s16111_s3 + $0xf20] sm:$0xff] }
 0x1ee   :  { %2561 = vmatprep.subr.mxu1 %v2458_v46  ;;  %3218 = vmatprep.subr.mxu0 %v3184_v62  ;;  %v2620_v46 = vld [vmem:[%s16111_s3 + $0xb18] sm:$0xff]  ;;  %v3346_v62 = vld [vmem:[%s16111_s3 + $0xf08] sm:$0xff] }
 0x1ef   :  { %2562 = vmatpush1.msra.mxu1 %v2457_v38  ;;  %3219 = vmatpush1.msra.mxu0 %v3183_v47  ;;  %v2619_v47 = vld [vmem:[%s16111_s3 + $0xb10] sm:$0xff] }
 0x1f0   :  { %2563 = vmatprep.subr.mxu1 %v2454_v48  ;;  %3220 = vmatprep.subr.mxu0 %v3180_v5  ;;  %v3345_v5 = vld [vmem:[%s16111_s3 + $0xf00] sm:$0xff] }
 0x1f1   :  { %2564 = vmatpush1.msra.mxu1 %v2453_v7  ;;  %3221 = vmatpush1.msra.mxu0 %v3179_v49 }
 0x1f2   :  { %2565 = vmatprep.subr.mxu1 %v2450_v14  ;;  %3222 = vmatprep.subr.mxu0 %v3176_v19  ;;  %v2830_v14 = vld [vmem:[%s16111_s3 + $0xcf8] sm:$0xff] }
 0x1f3   :  { %2566 = vmatpush1.msra.mxu1 %v2449_v53  ;;  %3223 = vmatpush1.msra.mxu0 %v3175_v63  ;;  %v3556_v63 = vld [vmem:[%s16111_s3 + $0x10e8] sm:$0xff] }
 0x1f4   :  { %2567 = vmatprep.subr.mxu1 %v2446_v54  ;;  %3224 = vmatprep.subr.mxu0 %v3172_v55  ;;  %v2829_v55 = vld [vmem:[%s16111_s3 + $0xcf0] sm:$0xff] }
 0x1f5   :  { %2568 = vmatpush1.msra.mxu1 %v2445_v56  ;;  %3225 = vmatpush1.msra.mxu0 %v3171_v57  ;;  %v11965_v13 = vpop.f32.mrf.mxu1  ;;  %v3555_v56 = vld [vmem:[%s16111_s3 + $0x10e0] sm:$0xff] }
 0x1f6   :  { %2569 = vmatprep.subr.mxu1 %v2442_v44  ;;  %3226 = vmatprep.subr.mxu0 %v3168_v58  ;;  %v1262_v1 = vpop.f32.mrf.mxu0  ;;  %v12027_v58 = vld [vmem:[#allocation2 + $0x1e] sm:$0x3] }
 0x1f7   :  { %2570 = vmatpush1.msra.mxu1 %v2441_v22  ;;  %3227 = vmatpush1.msra.mxu0 %v3167_v60  ;;  %v11991_v43 = vpop.f32.mrf.mxu1  ;;  %v2826_v22 = vld [vmem:[%s16111_s3 + $0xcd8] sm:$0xff]  ;;  %v3552_v60 = vld [vmem:[%s16111_s3 + $0x10c8] sm:$0xff] }
 0x1f8   :  { %2571 = vmatprep.subr.mxu1 %v2438_v59  ;;  %3228 = vmatprep.subr.mxu0 %v3164_v52  ;;  %v1264_v7 = vpop.f32.mrf.mxu0  ;;  %v2825_v59 = vld [vmem:[%s16111_s3 + $0xcd0] sm:$0xff] }
 0x1f9   :  { %2572 = vmatpush1.msra.mxu1 %v2437_v61  ;;  %2605 = vmatprep.mubr.f32.mxu1 %v9955_v6 }
 0x1fa   :  { %3229 = vmatpush1.msra.mxu0 %v3163_v0  ;;  %3262 = vmatprep.mubr.f32.mxu0 %v9955_v6  ;;  %v2822_v0 = vld [vmem:[%s16111_s3 + $0xcb8] sm:$0xff] }
 0x1fb   :  { %9634 = vmatmul.mubr.msk.f32.vlgmr.msra.gmra.mxu1 %vm165_vm1, %v11503_v20  ;;  %2739 = vmatprep.subr.mxu1 %v2648_v25  ;;  %v2643_v20 = vld [vmem:[%s16111_s3 + $0xbd0] sm:$0xff]  ;;  %v3548_v25 = vld [vmem:[%s16111_s3 + $0x10a8] sm:$0xff] }
 0x1fc   :  { %9641 = vmatmul.mubr.msk.f32.vlgmr.msra.gmra.mxu0 %vm165_vm1, %v11919_v21  ;;  %3396 = vmatprep.subr.mxu0 %v3374_v32 }
 0x1fd   :  { %2740 = vmatpush1.msra.mxu1 %v2647_v51  ;;  %3397 = vmatpush1.msra.mxu0 %v3373_v4  ;;  %v2821_v51 = vld [vmem:[%s16111_s3 + $0xcb0] sm:$0xff]  ;;  %v3547_v4 = vld [vmem:[%s16111_s3 + $0x10a0] sm:$0xff] }
 0x1fe   :  { %2741 = vmatprep.subr.mxu1 %v2644_v10  ;;  %3398 = vmatprep.subr.mxu0 %v3370_v23  ;;  %v2818_v10 = vld [vmem:[%s16111_s3 + $0xc98] sm:$0xff]  ;;  %v3544_v23 = vld [vmem:[%s16111_s3 + $0x1088] sm:$0xff] }
 0x1ff   :  { %2742 = vmatpush1.msra.mxu1 %v2643_v20  ;;  %3399 = vmatpush1.msra.mxu0 %v3369_v24  ;;  %v2817_v20 = vld [vmem:[%s16111_s3 + $0xc90] sm:$0xff]  ;;  %v3543_v24 = vld [vmem:[%s16111_s3 + $0x1080] sm:$0xff] }
 0x200   :  { %2743 = vmatprep.subr.mxu1 %v2640_v27  ;;  %3400 = vmatprep.subr.mxu0 %v3366_v28  ;;  %v2814_v27 = vld [vmem:[%s16111_s3 + $0xc78] sm:$0xff]  ;;  %v3540_v28 = vld [vmem:[%s16111_s3 + $0x1068] sm:$0xff] }
 0x201   :  { %2744 = vmatpush1.msra.mxu1 %v2639_v26  ;;  %3401 = vmatpush1.msra.mxu0 %v3365_v29  ;;  %v2813_v26 = vld [vmem:[%s16111_s3 + $0xc70] sm:$0xff]  ;;  %v3539_v29 = vld [vmem:[%s16111_s3 + $0x1060] sm:$0xff] }
 0x202   :  { %2745 = vmatprep.subr.mxu1 %v2636_v34  ;;  %3402 = vmatprep.subr.mxu0 %v3362_v36  ;;  %v2809_v34 = vld [vmem:[%s16111_s3 + $0xc50] sm:$0xff]  ;;  %v3535_v36 = vld [vmem:[%s16111_s3 + $0x1040] sm:$0xff] }
 0x203   :  { %2746 = vmatpush1.msra.mxu1 %v2635_v37  ;;  %3403 = vmatpush1.msra.mxu0 %v3361_v39  ;;  %v2806_v37 = vld [vmem:[%s16111_s3 + $0xc38] sm:$0xff]  ;;  %v3532_v39 = vld [vmem:[%s16111_s3 + $0x1028] sm:$0xff] }
 0x204   :  { %2747 = vmatprep.subr.mxu1 %v2632_v3  ;;  %3404 = vmatprep.subr.mxu0 %v3358_v41  ;;  %v2805_v3 = vld [vmem:[%s16111_s3 + $0xc30] sm:$0xff]  ;;  %v3531_v41 = vld [vmem:[%s16111_s3 + $0x1020] sm:$0xff] }
 0x205   :  { %2748 = vmatpush1.msra.mxu1 %v2631_v50  ;;  %3405 = vmatpush1.msra.mxu0 %v3357_v2  ;;  %v2802_v50 = vld [vmem:[%s16111_s3 + $0xc18] sm:$0xff]  ;;  %v3528_v2 = vld [vmem:[%s16111_s3 + $0x1008] sm:$0xff] }
 0x206   :  { %2749 = vmatprep.subr.mxu1 %v2628_v18  ;;  %3406 = vmatprep.subr.mxu0 %v3354_v11  ;;  %v2801_v18 = vld [vmem:[%s16111_s3 + $0xc10] sm:$0xff] }
 0x207   :  { %2750 = vmatpush1.msra.mxu1 %v2627_v40  ;;  %3407 = vmatpush1.msra.mxu0 %v3353_v42  ;;  %v902_v38 = vpop.f32.mrf.mxu1  ;;  %v3527_v42 = vld [vmem:[%s16111_s3 + $0x1000] sm:$0xff] }
 0x208   :  { %2751 = vmatprep.subr.mxu1 %v2624_v35  ;;  %3408 = vmatprep.subr.mxu0 %v3350_v15  ;;  %v903_v48 = vadd.f32 %v902_v38, %v757_v9  ;;  %v1444_v54 = vpop.f32.mrf.mxu0  ;;  %v12141_v38 = vld [vmem:[#allocation2 + $0x20] sm:$0x3] }
 0x209   :  { %2752 = vmatpush1.msra.mxu1 %v2623_v45  ;;  %3409 = vmatpush1.msra.mxu0 %v3349_v12  ;;  %v904_v49 = vpop.f32.mrf.mxu1  ;;  %v3738_v12 = vld [vmem:[%s16111_s3 + $0x11e8] sm:$0xff] }
 0x20a   :  { %2753 = vmatprep.subr.mxu1 %v2620_v46  ;;  %3410 = vmatprep.subr.mxu0 %v3346_v62  ;;  %v1156_v19 = vadd.f32 %v1080_v31, %v903_v48  ;;  %v905_v53 = vadd.f32 %v904_v49, %v759_v33  ;;  %v1446_v32 = vpop.f32.mrf.mxu0  ;;  %v2810_v31 = vld [vmem:[%s16111_s3 + $0xc58] sm:$0xff]  ;;  %v3536_v33 = vld [vmem:[%s16111_s3 + $0x1048] sm:$0xff]  ;;  %v3011_v62 = vld [vmem:[%s16111_s3 + $0xdf0] sm:$0xff] }
 0x20b   :  { %2754 = vmatpush1.msra.mxu1 %v2619_v47  ;;  %2787 = vmatprep.mubr.f32.mxu1 %v9955_v6  ;;  %v3008_v47 = vld [vmem:[%s16111_s3 + $0xdd8] sm:$0xff]  ;;  %v3734_v48 = vld [vmem:[%s16111_s3 + $0x11c8] sm:$0xff] }
 0x20c   :  { %3411 = vmatpush1.msra.mxu0 %v3345_v5  ;;  %3444 = vmatprep.mubr.f32.mxu0 %v9955_v6  ;;  %v1338_v57 = vadd.f32 %v1262_v1, %v1156_v19  ;;  %v1157_v44 = vadd.f32 %v1082_v30, %v905_v53  ;;  %v3012_v1 = vld [vmem:[%s16111_s3 + $0xdf8] sm:$0xff]  ;;  %v3007_v5 = vld [vmem:[%s16111_s3 + $0xdd0] sm:$0xff]  ;;  %v3730_v49 = vld [vmem:[%s16111_s3 + $0x11a8] sm:$0xff] }
 0x20d   :  { %9636 = vmatmul.mubr.msk.f32.vlgmr.msra.gmra.mxu1 %vm165_vm1, %v11607_v8  ;;  %2921 = vmatprep.subr.mxu1 %v2830_v14  ;;  %v3551_v8 = vld [vmem:[%s16111_s3 + $0x10c0] sm:$0xff]  ;;  %v3003_v14 = vld [vmem:[%s16111_s3 + $0xdb0] sm:$0xff]  ;;  %v3000_v53 = vld [vmem:[%s16111_s3 + $0xd98] sm:$0xff] }
 0x20e   :  { %9643 = vmatmul.mubr.msk.f32.vlgmr.msra.gmra.mxu0 %vm165_vm1, %v12027_v58  ;;  %3578 = vmatprep.subr.mxu0 %v3556_v63  ;;  %v1520_v52 = vadd.f32 %v1444_v54, %v1338_v57  ;;  %v1339_v61 = vadd.f32 %v1264_v7, %v1157_v44  ;;  %v3004_v7 = vld [vmem:[%s16111_s3 + $0xdb8] sm:$0xff]  ;;  %v3729_v19 = vld [vmem:[%s16111_s3 + $0x11a0] sm:$0xff]  ;;  %v3726_v63 = vld [vmem:[%s16111_s3 + $0x1188] sm:$0xff] }
 0x20f   :  { %2922 = vmatpush1.msra.mxu1 %v2829_v55  ;;  %3579 = vmatpush1.msra.mxu0 %v3555_v56  ;;  %v2999_v54 = vld [vmem:[%s16111_s3 + $0xd90] sm:$0xff]  ;;  %v3725_v55 = vld [vmem:[%s16111_s3 + $0x1180] sm:$0xff]  ;;  %v2996_v56 = vld [vmem:[%s16111_s3 + $0xd78] sm:$0xff] }
 0x210   :  { %2923 = vmatprep.subr.mxu1 %v2826_v22  ;;  %3580 = vmatprep.subr.mxu0 %v3552_v60  ;;  %v1521_v9 = vadd.f32 %v1446_v32, %v1339_v61  ;;  %v3722_v57 = vld [vmem:[%s16111_s3 + $0x1168] sm:$0xff]  ;;  %v2995_v44 = vld [vmem:[%s16111_s3 + $0xd70] sm:$0xff]  ;;  %v3721_v22 = vld [vmem:[%s16111_s3 + $0x1160] sm:$0xff] }
 0x211   :  { %2924 = vmatpush1.msra.mxu1 %v2825_v59  ;;  %3581 = vmatpush1.msra.mxu0 %v3551_v8  ;;  %v2992_v60 = vld [vmem:[%s16111_s3 + $0xd58] sm:$0xff]  ;;  %v3718_v59 = vld [vmem:[%s16111_s3 + $0x1148] sm:$0xff]  ;;  %v2991_v8 = vld [vmem:[%s16111_s3 + $0xd50] sm:$0xff] }
 0x212   :  { %2925 = vmatprep.subr.mxu1 %v2822_v0  ;;  %3582 = vmatprep.subr.mxu0 %v3548_v25  ;;  %v2988_v61 = vld [vmem:[%s16111_s3 + $0xd38] sm:$0xff]  ;;  %v3714_v0 = vld [vmem:[%s16111_s3 + $0x1128] sm:$0xff]  ;;  %v2987_v25 = vld [vmem:[%s16111_s3 + $0xd30] sm:$0xff] }
 0x213   :  { %2926 = vmatpush1.msra.mxu1 %v2821_v51  ;;  %3583 = vmatpush1.msra.mxu0 %v3547_v4  ;;  %v3713_v32 = vld [vmem:[%s16111_s3 + $0x1120] sm:$0xff]  ;;  %v2984_v51 = vld [vmem:[%s16111_s3 + $0xd18] sm:$0xff]  ;;  %v3710_v4 = vld [vmem:[%s16111_s3 + $0x1108] sm:$0xff] }
 0x214   :  { %2927 = vmatprep.subr.mxu1 %v2818_v10  ;;  %3584 = vmatprep.subr.mxu0 %v3544_v23  ;;  %v2983_v10 = vld [vmem:[%s16111_s3 + $0xd10] sm:$0xff] }
 0x215   :  { %2928 = vmatpush1.msra.mxu1 %v2817_v20  ;;  %3585 = vmatpush1.msra.mxu0 %v3543_v24  ;;  %v3709_v24 = vld [vmem:[%s16111_s3 + $0x1100] sm:$0xff] }
 0x216   :  { %2929 = vmatprep.subr.mxu1 %v2814_v27  ;;  %3586 = vmatprep.subr.mxu0 %v3540_v28 }
 0x217   :  { %2930 = vmatpush1.msra.mxu1 %v2813_v26  ;;  %3587 = vmatpush1.msra.mxu0 %v3539_v29  ;;  %v3194_v26 = vld [vmem:[%s16111_s3 + $0xef8] sm:$0xff] }
 0x218   :  { %2931 = vmatprep.subr.mxu1 %v2810_v31  ;;  %3588 = vmatprep.subr.mxu0 %v3536_v33  ;;  %v3920_v33 = vld [vmem:[%s16111_s3 + $0x12e8] sm:$0xff] }
 0x219   :  { %2932 = vmatpush1.msra.mxu1 %v2809_v34  ;;  %3589 = vmatpush1.msra.mxu0 %v3535_v36  ;;  %v973_v30 = vpop.f32.mrf.mxu1  ;;  %v3193_v36 = vld [vmem:[%s16111_s3 + $0xef0] sm:$0xff] }
 0x21a   :  { %2933 = vmatprep.subr.mxu1 %v2806_v37  ;;  %3590 = vmatprep.subr.mxu0 %v3532_v39  ;;  %v12113_v11 = vadd.f32 %v973_v30, %v11965_v13  ;;  %v1626_v40 = vpop.f32.mrf.mxu0  ;;  %v3919_v37 = vld [vmem:[%s16111_s3 + $0x12e0] sm:$0xff]  ;;  %v3912_v30 = vld [vmem:[%s16111_s3 + $0x12a8] sm:$0xff] }
 0x21b   :  { %2934 = vmatpush1.msra.mxu1 %v2805_v3  ;;  %3591 = vmatpush1.msra.mxu0 %v3531_v41  ;;  %v12118_v35 = vadd.f32 %v1626_v40, %v1520_v52  ;;  %v975_v15 = vpop.f32.mrf.mxu1  ;;  %v3717_v52 = vld [vmem:[%s16111_s3 + $0x1140] sm:$0xff]  ;;  %v3190_v3 = vld [vmem:[%s16111_s3 + $0xed8] sm:$0xff]  ;;  %v3916_v41 = vld [vmem:[%s16111_s3 + $0x12c8] sm:$0xff] }
 0x21c   :  { %2935 = vmatprep.subr.mxu1 %v2802_v50  ;;  %3592 = vmatprep.subr.mxu0 %v3528_v2  ;;  %v12124_v45 = vadd.f32 %v975_v15, %v11991_v43  ;;  %v1628_v13 = vpop.f32.mrf.mxu0  ;;  %v3737_v43 = vld [vmem:[%s16111_s3 + $0x11e0] sm:$0xff]  ;;  %v3189_v50 = vld [vmem:[%s16111_s3 + $0xed0] sm:$0xff]  ;;  %v3186_v2 = vld [vmem:[%s16111_s3 + $0xeb8] sm:$0xff] }
 0x21d   :  { %2936 = vmatpush1.msra.mxu1 %v2801_v18  ;;  %2969 = vmatprep.mubr.f32.mxu1 %v9955_v6  ;;  %v12130_v46 = vadd.f32 %v1628_v13, %v1521_v9  ;;  %v12257_v39 = vld [vmem:[#allocation2 + $0x22] sm:$0x3]  ;;  %v3185_v18 = vld [vmem:[%s16111_s3 + $0xeb0] sm:$0xff]  ;;  %v3182_v40 = vld [vmem:[%s16111_s3 + $0xe98] sm:$0xff] }
 0x21e   :  { %3593 = vmatpush1.msra.mxu0 %v3527_v42  ;;  %3626 = vmatprep.mubr.f32.mxu0 %v9955_v6  ;;  %v3908_v42 = vld [vmem:[%s16111_s3 + $0x1288] sm:$0xff]  ;;  %v3907_v15 = vld [vmem:[%s16111_s3 + $0x1280] sm:$0xff]  ;;  %v3177_v13 = vld [vmem:[%s16111_s3 + $0xe70] sm:$0xff] }
 0x21f   :  { %9638 = vmatmul.mubr.msk.f32.vlgmr.msra.gmra.mxu1 %vm165_vm1, %v11711_v17  ;;  %3103 = vmatprep.subr.mxu1 %v3012_v1  ;;  %v3733_v17 = vld [vmem:[%s16111_s3 + $0x11c0] sm:$0xff]  ;;  %v3178_v1 = vld [vmem:[%s16111_s3 + $0xe78] sm:$0xff] }
 0x220   :  { %9645 = vmatmul.mubr.msk.f32.vlgmr.msra.gmra.mxu0 %vm165_vm1, %v12141_v38  ;;  %3760 = vmatprep.subr.mxu0 %v3738_v12  ;;  %v3903_v12 = vld [vmem:[%s16111_s3 + $0x1260] sm:$0xff] }
 0x221   :  { %3104 = vmatpush1.msra.mxu1 %v3011_v62  ;;  %3761 = vmatpush1.msra.mxu0 %v3737_v43  ;;  %v3900_v62 = vld [vmem:[%s16111_s3 + $0x1248] sm:$0xff]  ;;  %v3173_v43 = vld [vmem:[%s16111_s3 + $0xe50] sm:$0xff] }
 0x222   :  { %3105 = vmatprep.subr.mxu1 %v3008_v47  ;;  %3762 = vmatprep.subr.mxu0 %v3734_v48  ;;  %v3899_v47 = vld [vmem:[%s16111_s3 + $0x1240] sm:$0xff]  ;;  %v3170_v48 = vld [vmem:[%s16111_s3 + $0xe38] sm:$0xff] }
 0x223   :  { %3106 = vmatpush1.msra.mxu1 %v3007_v5  ;;  %3763 = vmatpush1.msra.mxu0 %v3733_v17  ;;  %v3896_v5 = vld [vmem:[%s16111_s3 + $0x1228] sm:$0xff]  ;;  %v3169_v17 = vld [vmem:[%s16111_s3 + $0xe30] sm:$0xff] }
 0x224   :  { %3107 = vmatprep.subr.mxu1 %v3004_v7  ;;  %3764 = vmatprep.subr.mxu0 %v3730_v49  ;;  %v3895_v7 = vld [vmem:[%s16111_s3 + $0x1220] sm:$0xff]  ;;  %v3166_v49 = vld [vmem:[%s16111_s3 + $0xe18] sm:$0xff] }
 0x225   :  { %3108 = vmatpush1.msra.mxu1 %v3003_v14  ;;  %3765 = vmatpush1.msra.mxu0 %v3729_v19  ;;  %v3892_v14 = vld [vmem:[%s16111_s3 + $0x1208] sm:$0xff] }
 0x226   :  { %3109 = vmatprep.subr.mxu1 %v3000_v53  ;;  %3766 = vmatprep.subr.mxu0 %v3726_v63  ;;  %v3165_v53 = vld [vmem:[%s16111_s3 + $0xe10] sm:$0xff] }
 0x227   :  { %3110 = vmatpush1.msra.mxu1 %v2999_v54  ;;  %3767 = vmatpush1.msra.mxu0 %v3725_v55  ;;  %v3891_v55 = vld [vmem:[%s16111_s3 + $0x1200] sm:$0xff] }
 0x228   :  { %3111 = vmatprep.subr.mxu1 %v2996_v56  ;;  %3768 = vmatprep.subr.mxu0 %v3722_v57 }
 0x229   :  { %3112 = vmatpush1.msra.mxu1 %v2995_v44  ;;  %3769 = vmatpush1.msra.mxu0 %v3721_v22  ;;  %v3376_v44 = vld [vmem:[%s16111_s3 + $0xff8] sm:$0xff] }
 0x22a   :  { %3113 = vmatprep.subr.mxu1 %v2992_v60  ;;  %3770 = vmatprep.subr.mxu0 %v3718_v59  ;;  %v4102_v59 = vld [vmem:[%s16111_s3 + $0x13e8] sm:$0xff] }
 0x22b   :  { %3114 = vmatpush1.msra.mxu1 %v2991_v8  ;;  %3771 = vmatpush1.msra.mxu0 %v3717_v52  ;;  %v1151_v9 = vpop.f32.mrf.mxu1  ;;  %v3375_v52 = vld [vmem:[%s16111_s3 + $0xff0] sm:$0xff] }
 0x22c   :  { %3115 = vmatprep.subr.mxu1 %v2988_v61  ;;  %3772 = vmatprep.subr.mxu0 %v3714_v0  ;;  %v12227_v23 = vadd.f32 %v1151_v9, %v12113_v11  ;;  %v1808_v20 = vpop.f32.mrf.mxu0  ;;  %v3911_v11 = vld [vmem:[%s16111_s3 + $0x12a0] sm:$0xff]  ;;  %v4094_v9 = vld [vmem:[%s16111_s3 + $0x13a8] sm:$0xff] }
 0x22d   :  { %3116 = vmatpush1.msra.mxu1 %v2987_v25  ;;  %3773 = vmatpush1.msra.mxu0 %v3713_v32  ;;  %v12233_v27 = vadd.f32 %v1808_v20, %v12118_v35  ;;  %v1153_v28 = vpop.f32.mrf.mxu1  ;;  %v3181_v35 = vld [vmem:[%s16111_s3 + $0xe90] sm:$0xff]  ;;  %v4101_v61 = vld [vmem:[%s16111_s3 + $0x13e0] sm:$0xff]  ;;  %v3372_v25 = vld [vmem:[%s16111_s3 + $0xfd8] sm:$0xff] }
 0x22e   :  { %3117 = vmatprep.subr.mxu1 %v2984_v51  ;;  %3774 = vmatprep.subr.mxu0 %v3710_v4  ;;  %v12239_v29 = vadd.f32 %v1153_v28, %v12124_v45  ;;  %v1810_v31 = vpop.f32.mrf.mxu0  ;;  %v3904_v45 = vld [vmem:[%s16111_s3 + $0x1268] sm:$0xff]  ;;  %v12373_v0 = vld [vmem:[#allocation2 + $0x24] sm:$0x3]  ;;  %v3371_v51 = vld [vmem:[%s16111_s3 + $0xfd0] sm:$0xff] }
 0x22f   :  { %3118 = vmatpush1.msra.mxu1 %v2983_v10  ;;  %3151 = vmatprep.mubr.f32.mxu1 %v9955_v6  ;;  %v12246_v34 = vadd.f32 %v1810_v31, %v12130_v46  ;;  %v3174_v46 = vld [vmem:[%s16111_s3 + $0xe58] sm:$0xff]  ;;  %v4098_v32 = vld [vmem:[%s16111_s3 + $0x13c8] sm:$0xff]  ;;  %v3367_v10 = vld [vmem:[%s16111_s3 + $0xfb0] sm:$0xff] }
 0x230   :  { %3775 = vmatpush1.msra.mxu0 %v3709_v24  ;;  %3808 = vmatprep.mubr.f32.mxu0 %v9955_v6  ;;  %v3368_v4 = vld [vmem:[%s16111_s3 + $0xfb8] sm:$0xff]  ;;  %v4090_v24 = vld [vmem:[%s16111_s3 + $0x1388] sm:$0xff]  ;;  %v4089_v28 = vld [vmem:[%s16111_s3 + $0x1380] sm:$0xff] }
 0x231   :  { %9640 = vmatmul.mubr.msk.f32.vlgmr.msra.gmra.mxu1 %vm165_vm1, %v11815_v16  ;;  %3285 = vmatprep.subr.mxu1 %v3194_v26  ;;  %v3915_v16 = vld [vmem:[%s16111_s3 + $0x12c0] sm:$0xff]  ;;  %v3364_v20 = vld [vmem:[%s16111_s3 + $0xf98] sm:$0xff]  ;;  %v3359_v31 = vld [vmem:[%s16111_s3 + $0xf70] sm:$0xff] }
 0x232   :  { %9647 = vmatmul.mubr.msk.f32.vlgmr.msra.gmra.mxu0 %vm165_vm1, %v12257_v39  ;;  %3942 = vmatprep.subr.mxu0 %v3920_v33  ;;  %v3360_v26 = vld [vmem:[%s16111_s3 + $0xf78] sm:$0xff]  ;;  %v4085_v33 = vld [vmem:[%s16111_s3 + $0x1360] sm:$0xff] }
 0x233   :  { %3286 = vmatpush1.msra.mxu1 %v3193_v36  ;;  %3943 = vmatpush1.msra.mxu0 %v3919_v37  ;;  %v4082_v36 = vld [vmem:[%s16111_s3 + $0x1348] sm:$0xff]  ;;  %v3355_v37 = vld [vmem:[%s16111_s3 + $0xf50] sm:$0xff] }
 0x234   :  { %3287 = vmatprep.subr.mxu1 %v3190_v3  ;;  %3944 = vmatprep.subr.mxu0 %v3916_v41  ;;  %v4081_v3 = vld [vmem:[%s16111_s3 + $0x1340] sm:$0xff]  ;;  %v3352_v41 = vld [vmem:[%s16111_s3 + $0xf38] sm:$0xff] }
 0x235   :  { %3288 = vmatpush1.msra.mxu1 %v3189_v50  ;;  %3945 = vmatpush1.msra.mxu0 %v3915_v16  ;;  %v4078_v50 = vld [vmem:[%s16111_s3 + $0x1328] sm:$0xff]  ;;  %v3351_v16 = vld [vmem:[%s16111_s3 + $0xf30] sm:$0xff] }
 0x236   :  { %3289 = vmatprep.subr.mxu1 %v3186_v2  ;;  %3946 = vmatprep.subr.mxu0 %v3912_v30  ;;  %v4077_v2 = vld [vmem:[%s16111_s3 + $0x1320] sm:$0xff]  ;;  %v3348_v30 = vld [vmem:[%s16111_s3 + $0xf18] sm:$0xff] }
 0x237   :  { %3290 = vmatpush1.msra.mxu1 %v3185_v18  ;;  %3947 = vmatpush1.msra.mxu0 %v3911_v11  ;;  %v4074_v18 = vld [vmem:[%s16111_s3 + $0x1308] sm:$0xff] }
 0x238   :  { %3291 = vmatprep.subr.mxu1 %v3182_v40  ;;  %3948 = vmatprep.subr.mxu0 %v3908_v42  ;;  %v3347_v40 = vld [vmem:[%s16111_s3 + $0xf10] sm:$0xff] }
 0x239   :  { %3292 = vmatpush1.msra.mxu1 %v3181_v35  ;;  %3949 = vmatpush1.msra.mxu0 %v3907_v15  ;;  %v4073_v15 = vld [vmem:[%s16111_s3 + $0x1300] sm:$0xff] }
 0x23a   :  { %3293 = vmatprep.subr.mxu1 %v3178_v1  ;;  %3950 = vmatprep.subr.mxu0 %v3904_v45 }
 0x23b   :  { %3294 = vmatpush1.msra.mxu1 %v3177_v13  ;;  %3951 = vmatpush1.msra.mxu0 %v3903_v12  ;;  %v3558_v13 = vld [vmem:[%s16111_s3 + $0x10f8] sm:$0xff] }
 0x23c   :  { %3295 = vmatprep.subr.mxu1 %v3174_v46  ;;  %3952 = vmatprep.subr.mxu0 %v3900_v62  ;;  %v4284_v62 = vld [vmem:[%s16111_s3 + $0x14e8] sm:$0xff] }
 0x23d   :  { %3296 = vmatpush1.msra.mxu1 %v3173_v43  ;;  %3953 = vmatpush1.msra.mxu0 %v3899_v47  ;;  %v1333_v19 = vpop.f32.mrf.mxu1  ;;  %v3557_v47 = vld [vmem:[%s16111_s3 + $0x10f0] sm:$0xff] }
 0x23e   :  { %3297 = vmatprep.subr.mxu1 %v3170_v48  ;;  %3954 = vmatprep.subr.mxu0 %v3896_v5  ;;  %v12343_v63 = vadd.f32 %v1333_v19, %v12227_v23  ;;  %v1990_v54 = vpop.f32.mrf.mxu0  ;;  %v4093_v23 = vld [vmem:[%s16111_s3 + $0x13a0] sm:$0xff]  ;;  %v4276_v19 = vld [vmem:[%s16111_s3 + $0x14a8] sm:$0xff] }
 0x23f   :  { %3298 = vmatpush1.msra.mxu1 %v3169_v17  ;;  %3955 = vmatpush1.msra.mxu0 %v3895_v7  ;;  %v12349_v56 = vadd.f32 %v1990_v54, %v12233_v27  ;;  %v1335_v57 = vpop.f32.mrf.mxu1  ;;  %v3363_v27 = vld [vmem:[%s16111_s3 + $0xf90] sm:$0xff]  ;;  %v4283_v48 = vld [vmem:[%s16111_s3 + $0x14e0] sm:$0xff]  ;;  %v3554_v17 = vld [vmem:[%s16111_s3 + $0x10d8] sm:$0xff] }
 0x240   :  { %3299 = vmatprep.subr.mxu1 %v3166_v49  ;;  %3956 = vmatprep.subr.mxu0 %v3892_v14  ;;  %v12355_v22 = vadd.f32 %v1335_v57, %v12239_v29  ;;  %v1992_v60 = vpop.f32.mrf.mxu0  ;;  %v4086_v29 = vld [vmem:[%s16111_s3 + $0x1368] sm:$0xff]  ;;  %v12489_v5 = vld [vmem:[#allocation2 + $0x26] sm:$0x3]  ;;  %v3553_v49 = vld [vmem:[%s16111_s3 + $0x10d0] sm:$0xff] }
 0x241   :  { %3300 = vmatpush1.msra.mxu1 %v3165_v53  ;;  %3333 = vmatprep.mubr.f32.mxu1 %v9955_v6  ;;  %v12362_v8 = vadd.f32 %v1992_v60, %v12246_v34  ;;  %v3356_v34 = vld [vmem:[%s16111_s3 + $0xf58] sm:$0xff]  ;;  %v4280_v7 = vld [vmem:[%s16111_s3 + $0x14c8] sm:$0xff]  ;;  %v3549_v53 = vld [vmem:[%s16111_s3 + $0x10b0] sm:$0xff] }
 0x242   :  { %3957 = vmatpush1.msra.mxu0 %v3891_v55  ;;  %3990 = vmatprep.mubr.f32.mxu0 %v9955_v6  ;;  %v3550_v14 = vld [vmem:[%s16111_s3 + $0x10b8] sm:$0xff]  ;;  %v4272_v55 = vld [vmem:[%s16111_s3 + $0x1488] sm:$0xff]  ;;  %v4271_v57 = vld [vmem:[%s16111_s3 + $0x1480] sm:$0xff] }
 0x243   :  { %9642 = vmatmul.mubr.msk.f32.vlgmr.msra.gmra.mxu1 %vm165_vm1, %v11919_v21  ;;  %3467 = vmatprep.subr.mxu1 %v3376_v44  ;;  %v4097_v21 = vld [vmem:[%s16111_s3 + $0x13c0] sm:$0xff]  ;;  %v3546_v54 = vld [vmem:[%s16111_s3 + $0x1098] sm:$0xff]  ;;  %v3541_v60 = vld [vmem:[%s16111_s3 + $0x1070] sm:$0xff] }
 0x244   :  { %9649 = vmatmul.mubr.msk.f32.vlgmr.msra.gmra.mxu0 %vm165_vm1, %v12373_v0  ;;  %4124 = vmatprep.subr.mxu0 %v4102_v59  ;;  %v3542_v44 = vld [vmem:[%s16111_s3 + $0x1078] sm:$0xff]  ;;  %v4267_v59 = vld [vmem:[%s16111_s3 + $0x1460] sm:$0xff] }
 0x245   :  { %3468 = vmatpush1.msra.mxu1 %v3375_v52  ;;  %4125 = vmatpush1.msra.mxu0 %v4101_v61  ;;  %v4264_v52 = vld [vmem:[%s16111_s3 + $0x1448] sm:$0xff]  ;;  %v3537_v61 = vld [vmem:[%s16111_s3 + $0x1050] sm:$0xff] }
 0x246   :  { %3469 = vmatprep.subr.mxu1 %v3372_v25  ;;  %4126 = vmatprep.subr.mxu0 %v4098_v32  ;;  %v4263_v25 = vld [vmem:[%s16111_s3 + $0x1440] sm:$0xff]  ;;  %v3534_v32 = vld [vmem:[%s16111_s3 + $0x1038] sm:$0xff] }
 0x247   :  { %3470 = vmatpush1.msra.mxu1 %v3371_v51  ;;  %4127 = vmatpush1.msra.mxu0 %v4097_v21  ;;  %v4260_v51 = vld [vmem:[%s16111_s3 + $0x1428] sm:$0xff]  ;;  %v3533_v21 = vld [vmem:[%s16111_s3 + $0x1030] sm:$0xff] }
 0x248   :  { %3471 = vmatprep.subr.mxu1 %v3368_v4  ;;  %4128 = vmatprep.subr.mxu0 %v4094_v9  ;;  %v4259_v4 = vld [vmem:[%s16111_s3 + $0x1420] sm:$0xff]  ;;  %v3530_v9 = vld [vmem:[%s16111_s3 + $0x1018] sm:$0xff] }
 0x249   :  { %3472 = vmatpush1.msra.mxu1 %v3367_v10  ;;  %4129 = vmatpush1.msra.mxu0 %v4093_v23  ;;  %v4256_v10 = vld [vmem:[%s16111_s3 + $0x1408] sm:$0xff] }
 0x24a   :  { %3473 = vmatprep.subr.mxu1 %v3364_v20  ;;  %4130 = vmatprep.subr.mxu0 %v4090_v24  ;;  %v3529_v20 = vld [vmem:[%s16111_s3 + $0x1010] sm:$0xff] }
 0x24b   :  { %3474 = vmatpush1.msra.mxu1 %v3363_v27  ;;  %4131 = vmatpush1.msra.mxu0 %v4089_v28  ;;  %v4255_v28 = vld [vmem:[%s16111_s3 + $0x1400] sm:$0xff] }
 0x24c   :  { %3475 = vmatprep.subr.mxu1 %v3360_v26  ;;  %4132 = vmatprep.subr.mxu0 %v4086_v29 }
 0x24d   :  { %3476 = vmatpush1.msra.mxu1 %v3359_v31  ;;  %4133 = vmatpush1.msra.mxu0 %v4085_v33  ;;  %v3740_v31 = vld [vmem:[%s16111_s3 + $0x11f8] sm:$0xff] }
 0x24e   :  { %3477 = vmatprep.subr.mxu1 %v3356_v34  ;;  %4134 = vmatprep.subr.mxu0 %v4082_v36  ;;  %v4466_v36 = vld [vmem:[%s16111_s3 + $0x15e8] sm:$0xff] }
 0x24f   :  { %3478 = vmatpush1.msra.mxu1 %v3355_v37  ;;  %4135 = vmatpush1.msra.mxu0 %v4081_v3  ;;  %v1515_v11 = vpop.f32.mrf.mxu1  ;;  %v3739_v3 = vld [vmem:[%s16111_s3 + $0x11f0] sm:$0xff] }
 0x250   :  { %3479 = vmatprep.subr.mxu1 %v3352_v41  ;;  %4136 = vmatprep.subr.mxu0 %v4078_v50  ;;  %v12459_v42 = vadd.f32 %v1515_v11, %v12343_v63  ;;  %v2172_v35 = vpop.f32.mrf.mxu0  ;;  %v4275_v63 = vld [vmem:[%s16111_s3 + $0x14a0] sm:$0xff]  ;;  %v12605_v50 = vld [vmem:[#allocation2 + $0x28] sm:$0x3] }
 0x251   :  { %3480 = vmatpush1.msra.mxu1 %v3351_v16  ;;  %4137 = vmatpush1.msra.mxu0 %v4077_v2  ;;  %v12465_v1 = vadd.f32 %v2172_v35, %v12349_v56  ;;  %v1517_v45 = vpop.f32.mrf.mxu1  ;;  %v3545_v56 = vld [vmem:[%s16111_s3 + $0x1090] sm:$0xff]  ;;  %v4465_v41 = vld [vmem:[%s16111_s3 + $0x15e0] sm:$0xff]  ;;  %v3736_v16 = vld [vmem:[%s16111_s3 + $0x11d8] sm:$0xff] }
 0x252   :  { %3481 = vmatprep.subr.mxu1 %v3348_v30  ;;  %4138 = vmatprep.subr.mxu0 %v4074_v18  ;;  %v12471_v12 = vadd.f32 %v1517_v45, %v12355_v22  ;;  %v2174_v46 = vpop.f32.mrf.mxu0  ;;  %v4268_v22 = vld [vmem:[%s16111_s3 + $0x1468] sm:$0xff]  ;;  %v3735_v30 = vld [vmem:[%s16111_s3 + $0x11d0] sm:$0xff]  ;;  %v3732_v18 = vld [vmem:[%s16111_s3 + $0x11b8] sm:$0xff] }
 0x253   :  { %3482 = vmatpush1.msra.mxu1 %v3347_v40  ;;  %3515 = vmatprep.mubr.f32.mxu1 %v9955_v6  ;;  %v12478_v43 = vadd.f32 %v2174_v46, %v12362_v8  ;;  %v3538_v8 = vld [vmem:[%s16111_s3 + $0x1058] sm:$0xff]  ;;  %v4462_v2 = vld [vmem:[%s16111_s3 + $0x15c8] sm:$0xff]  ;;  %v3731_v40 = vld [vmem:[%s16111_s3 + $0x11b0] sm:$0xff] }
 0x254   :  { %4139 = vmatpush1.msra.mxu0 %v4073_v15  ;;  %4172 = vmatprep.mubr.f32.mxu0 %v9955_v6  ;;  %v4458_v11 = vld [vmem:[%s16111_s3 + $0x15a8] sm:$0xff]  ;;  %v3728_v35 = vld [vmem:[%s16111_s3 + $0x1198] sm:$0xff]  ;;  %v4453_v45 = vld [vmem:[%s16111_s3 + $0x1580] sm:$0xff] }
 0x255   :  { %9644 = vmatmul.mubr.msk.f32.vlgmr.msra.gmra.mxu1 %vm165_vm1, %v12027_v58  ;;  %3649 = vmatprep.subr.mxu1 %v3558_v13  ;;  %v4279_v58 = vld [vmem:[%s16111_s3 + $0x14c0] sm:$0xff]  ;;  %v4454_v15 = vld [vmem:[%s16111_s3 + $0x1588] sm:$0xff]  ;;  %v3724_v13 = vld [vmem:[%s16111_s3 + $0x1178] sm:$0xff] }
 0x256   :  { %9651 = vmatmul.mubr.msk.f32.vlgmr.msra.gmra.mxu0 %vm165_vm1, %v12489_v5  ;;  %4306 = vmatprep.subr.mxu0 %v4284_v62  ;;  %v3723_v46 = vld [vmem:[%s16111_s3 + $0x1170] sm:$0xff]  ;;  %v4449_v62 = vld [vmem:[%s16111_s3 + $0x1560] sm:$0xff] }
 0x257   :  { %3650 = vmatpush1.msra.mxu1 %v3557_v47  ;;  %4307 = vmatpush1.msra.mxu0 %v4283_v48  ;;  %v4446_v47 = vld [vmem:[%s16111_s3 + $0x1548] sm:$0xff]  ;;  %v3719_v48 = vld [vmem:[%s16111_s3 + $0x1150] sm:$0xff] }
 0x258   :  { %3651 = vmatprep.subr.mxu1 %v3554_v17  ;;  %4308 = vmatprep.subr.mxu0 %v4280_v7  ;;  %v4445_v17 = vld [vmem:[%s16111_s3 + $0x1540] sm:$0xff]  ;;  %v3716_v7 = vld [vmem:[%s16111_s3 + $0x1138] sm:$0xff] }
 0x259   :  { %3652 = vmatpush1.msra.mxu1 %v3553_v49  ;;  %4309 = vmatpush1.msra.mxu0 %v4279_v58  ;;  %v4442_v49 = vld [vmem:[%s16111_s3 + $0x1528] sm:$0xff]  ;;  %v3715_v58 = vld [vmem:[%s16111_s3 + $0x1130] sm:$0xff] }
 0x25a   :  { %3653 = vmatprep.subr.mxu1 %v3550_v14  ;;  %4310 = vmatprep.subr.mxu0 %v4276_v19  ;;  %v4441_v14 = vld [vmem:[%s16111_s3 + $0x1520] sm:$0xff]  ;;  %v3712_v19 = vld [vmem:[%s16111_s3 + $0x1118] sm:$0xff] }
 0x25b   :  { %3654 = vmatpush1.msra.mxu1 %v3549_v53  ;;  %4311 = vmatpush1.msra.mxu0 %v4275_v63  ;;  %v4438_v53 = vld [vmem:[%s16111_s3 + $0x1508] sm:$0xff] }
 0x25c   :  { %3655 = vmatprep.subr.mxu1 %v3546_v54  ;;  %4312 = vmatprep.subr.mxu0 %v4272_v55  ;;  %v3711_v54 = vld [vmem:[%s16111_s3 + $0x1110] sm:$0xff] }
 0x25d   :  { %3656 = vmatpush1.msra.mxu1 %v3545_v56  ;;  %4313 = vmatpush1.msra.mxu0 %v4271_v57  ;;  %v4437_v57 = vld [vmem:[%s16111_s3 + $0x1500] sm:$0xff] }
 0x25e   :  { %3657 = vmatprep.subr.mxu1 %v3542_v44  ;;  %4314 = vmatprep.subr.mxu0 %v4268_v22 }
 0x25f   :  { %3658 = vmatpush1.msra.mxu1 %v3541_v60  ;;  %4315 = vmatpush1.msra.mxu0 %v4267_v59  ;;  %v3922_v60 = vld [vmem:[%s16111_s3 + $0x12f8] sm:$0xff] }
 0x260   :  { %3659 = vmatprep.subr.mxu1 %v3538_v8  ;;  %4316 = vmatprep.subr.mxu0 %v4264_v52  ;;  %v4648_v52 = vld [vmem:[%s16111_s3 + $0x16e8] sm:$0xff] }
 0x261   :  { %3660 = vmatpush1.msra.mxu1 %v3537_v61  ;;  %4317 = vmatpush1.msra.mxu0 %v4263_v25  ;;  %v1697_v23 = vpop.f32.mrf.mxu1  ;;  %v3921_v25 = vld [vmem:[%s16111_s3 + $0x12f0] sm:$0xff] }
 0x262   :  { %3661 = vmatprep.subr.mxu1 %v3534_v32  ;;  %4318 = vmatprep.subr.mxu0 %v4260_v51  ;;  %v12575_v24 = vadd.f32 %v1697_v23, %v12459_v42  ;;  %v2354_v27 = vpop.f32.mrf.mxu0  ;;  %v4457_v42 = vld [vmem:[%s16111_s3 + $0x15a0] sm:$0xff]  ;;  %v12721_v51 = vld [vmem:[#allocation2 + $0x2a] sm:$0x3] }
 0x263   :  { %3662 = vmatpush1.msra.mxu1 %v3533_v21  ;;  %4319 = vmatpush1.msra.mxu0 %v4259_v4  ;;  %v12581_v26 = vadd.f32 %v2354_v27, %v12465_v1  ;;  %v1699_v29 = vpop.f32.mrf.mxu1  ;;  %v3727_v1 = vld [vmem:[%s16111_s3 + $0x1190] sm:$0xff]  ;;  %v4647_v32 = vld [vmem:[%s16111_s3 + $0x16e0] sm:$0xff]  ;;  %v3918_v21 = vld [vmem:[%s16111_s3 + $0x12d8] sm:$0xff] }
 0x264   :  { %3663 = vmatprep.subr.mxu1 %v3530_v9  ;;  %4320 = vmatprep.subr.mxu0 %v4256_v10  ;;  %v12587_v33 = vadd.f32 %v1699_v29, %v12471_v12  ;;  %v2356_v34 = vpop.f32.mrf.mxu0  ;;  %v4450_v12 = vld [vmem:[%s16111_s3 + $0x1568] sm:$0xff]  ;;  %v3917_v9 = vld [vmem:[%s16111_s3 + $0x12d0] sm:$0xff]  ;;  %v3914_v10 = vld [vmem:[%s16111_s3 + $0x12b8] sm:$0xff] }
 0x265   :  { %3664 = vmatpush1.msra.mxu1 %v3529_v20  ;;  %3697 = vmatprep.mubr.f32.mxu1 %v9955_v6  ;;  %v12594_v37 = vadd.f32 %v2356_v34, %v12478_v43  ;;  %v3720_v43 = vld [vmem:[%s16111_s3 + $0x1158] sm:$0xff]  ;;  %v4644_v4 = vld [vmem:[%s16111_s3 + $0x16c8] sm:$0xff]  ;;  %v3913_v20 = vld [vmem:[%s16111_s3 + $0x12b0] sm:$0xff] }
 0x266   :  { %4321 = vmatpush1.msra.mxu0 %v4255_v28  ;;  %4354 = vmatprep.mubr.f32.mxu0 %v9955_v6  ;;  %v4640_v23 = vld [vmem:[%s16111_s3 + $0x16a8] sm:$0xff]  ;;  %v3910_v27 = vld [vmem:[%s16111_s3 + $0x1298] sm:$0xff]  ;;  %v4635_v29 = vld [vmem:[%s16111_s3 + $0x1680] sm:$0xff] }
 0x267   :  { %9646 = vmatmul.mubr.msk.f32.vlgmr.msra.gmra.mxu1 %vm165_vm1, %v12141_v38  ;;  %3831 = vmatprep.subr.mxu1 %v3740_v31  ;;  %v4461_v38 = vld [vmem:[%s16111_s3 + $0x15c0] sm:$0xff]  ;;  %v4636_v28 = vld [vmem:[%s16111_s3 + $0x1688] sm:$0xff]  ;;  %v3906_v31 = vld [vmem:[%s16111_s3 + $0x1278] sm:$0xff] }
 0x268   :  { %9653 = vmatmul.mubr.msk.f32.vlgmr.msra.gmra.mxu0 %vm165_vm1, %v12605_v50  ;;  %4488 = vmatprep.subr.mxu0 %v4466_v36  ;;  %v3905_v34 = vld [vmem:[%s16111_s3 + $0x1270] sm:$0xff]  ;;  %v4631_v36 = vld [vmem:[%s16111_s3 + $0x1660] sm:$0xff] }
 0x269   :  { %3832 = vmatpush1.msra.mxu1 %v3739_v3  ;;  %4489 = vmatpush1.msra.mxu0 %v4465_v41  ;;  %v4628_v3 = vld [vmem:[%s16111_s3 + $0x1648] sm:$0xff]  ;;  %v3901_v41 = vld [vmem:[%s16111_s3 + $0x1250] sm:$0xff] }
 0x26a   :  { %3833 = vmatprep.subr.mxu1 %v3736_v16  ;;  %4490 = vmatprep.subr.mxu0 %v4462_v2  ;;  %v4627_v16 = vld [vmem:[%s16111_s3 + $0x1640] sm:$0xff]  ;;  %v3898_v2 = vld [vmem:[%s16111_s3 + $0x1238] sm:$0xff] }
 0x26b   :  { %3834 = vmatpush1.msra.mxu1 %v3735_v30  ;;  %4491 = vmatpush1.msra.mxu0 %v4461_v38  ;;  %v4624_v30 = vld [vmem:[%s16111_s3 + $0x1628] sm:$0xff]  ;;  %v3897_v38 = vld [vmem:[%s16111_s3 + $0x1230] sm:$0xff] }
 0x26c   :  { %3835 = vmatprep.subr.mxu1 %v3732_v18  ;;  %4492 = vmatprep.subr.mxu0 %v4458_v11  ;;  %v4623_v18 = vld [vmem:[%s16111_s3 + $0x1620] sm:$0xff]  ;;  %v3894_v11 = vld [vmem:[%s16111_s3 + $0x1218] sm:$0xff] }
 0x26d   :  { %3836 = vmatpush1.msra.mxu1 %v3731_v40  ;;  %4493 = vmatpush1.msra.mxu0 %v4457_v42  ;;  %v4620_v40 = vld [vmem:[%s16111_s3 + $0x1608] sm:$0xff] }
 0x26e   :  { %3837 = vmatprep.subr.mxu1 %v3728_v35  ;;  %4494 = vmatprep.subr.mxu0 %v4454_v15  ;;  %v3893_v35 = vld [vmem:[%s16111_s3 + $0x1210] sm:$0xff] }
 0x26f   :  { %3838 = vmatpush1.msra.mxu1 %v3727_v1  ;;  %4495 = vmatpush1.msra.mxu0 %v4453_v45  ;;  %v4619_v45 = vld [vmem:[%s16111_s3 + $0x1600] sm:$0xff] }
 0x270   :  { %3839 = vmatprep.subr.mxu1 %v3724_v13  ;;  %4496 = vmatprep.subr.mxu0 %v4450_v12 }
 0x271   :  { %3840 = vmatpush1.msra.mxu1 %v3723_v46  ;;  %4497 = vmatpush1.msra.mxu0 %v4449_v62  ;;  %v4104_v46 = vld [vmem:[%s16111_s3 + $0x13f8] sm:$0xff] }
 0x272   :  { %3841 = vmatprep.subr.mxu1 %v3720_v43  ;;  %4498 = vmatprep.subr.mxu0 %v4446_v47  ;;  %v4830_v47 = vld [vmem:[%s16111_s3 + $0x17e8] sm:$0xff] }
 0x273   :  { %3842 = vmatpush1.msra.mxu1 %v3719_v48  ;;  %4499 = vmatpush1.msra.mxu0 %v4445_v17  ;;  %v1879_v63 = vpop.f32.mrf.mxu1  ;;  %v4103_v17 = vld [vmem:[%s16111_s3 + $0x13f0] sm:$0xff] }
 0x274   :  { %3843 = vmatprep.subr.mxu1 %v3716_v7  ;;  %4500 = vmatprep.subr.mxu0 %v4442_v49  ;;  %v12691_v55 = vadd.f32 %v1879_v63, %v12575_v24  ;;  %v2536_v56 = vpop.f32.mrf.mxu0  ;;  %v4639_v24 = vld [vmem:[%s16111_s3 + $0x16a0] sm:$0xff]  ;;  %v12837_v49 = vld [vmem:[#allocation2 + $0x2c] sm:$0x3] }
 0x275   :  { %3844 = vmatpush1.msra.mxu1 %v3715_v58  ;;  %4501 = vmatpush1.msra.mxu0 %v4441_v14  ;;  %v12697_v44 = vadd.f32 %v2536_v56, %v12581_v26  ;;  %v1881_v22 = vpop.f32.mrf.mxu1  ;;  %v3909_v26 = vld [vmem:[%s16111_s3 + $0x1290] sm:$0xff]  ;;  %v4829_v7 = vld [vmem:[%s16111_s3 + $0x17e0] sm:$0xff]  ;;  %v4100_v58 = vld [vmem:[%s16111_s3 + $0x13d8] sm:$0xff] }
 0x276   :  { %3845 = vmatprep.subr.mxu1 %v3712_v19  ;;  %4502 = vmatprep.subr.mxu0 %v4438_v53  ;;  %v12703_v59 = vadd.f32 %v1881_v22, %v12587_v33  ;;  %v2538_v8 = vpop.f32.mrf.mxu0  ;;  %v4632_v33 = vld [vmem:[%s16111_s3 + $0x1668] sm:$0xff]  ;;  %v4099_v19 = vld [vmem:[%s16111_s3 + $0x13d0] sm:$0xff]  ;;  %v4096_v53 = vld [vmem:[%s16111_s3 + $0x13b8] sm:$0xff] }
 0x277   :  { %3846 = vmatpush1.msra.mxu1 %v3711_v54  ;;  %3879 = vmatprep.mubr.f32.mxu1 %v9955_v6  ;;  %v12710_v61 = vadd.f32 %v2538_v8, %v12594_v37  ;;  %v3902_v37 = vld [vmem:[%s16111_s3 + $0x1258] sm:$0xff]  ;;  %v4826_v14 = vld [vmem:[%s16111_s3 + $0x17c8] sm:$0xff]  ;;  %v4095_v54 = vld [vmem:[%s16111_s3 + $0x13b0] sm:$0xff] }
 0x278   :  { %4503 = vmatpush1.msra.mxu0 %v4437_v57  ;;  %4536 = vmatprep.mubr.f32.mxu0 %v9955_v6  ;;  %v4822_v63 = vld [vmem:[%s16111_s3 + $0x17a8] sm:$0xff]  ;;  %v4092_v56 = vld [vmem:[%s16111_s3 + $0x1398] sm:$0xff]  ;;  %v4817_v22 = vld [vmem:[%s16111_s3 + $0x1780] sm:$0xff] }
 0x279   :  { %9648 = vmatmul.mubr.msk.f32.vlgmr.msra.gmra.mxu1 %vm165_vm1, %v12257_v39  ;;  %4013 = vmatprep.subr.mxu1 %v3922_v60  ;;  %v4643_v39 = vld [vmem:[%s16111_s3 + $0x16c0] sm:$0xff]  ;;  %v4818_v57 = vld [vmem:[%s16111_s3 + $0x1788] sm:$0xff]  ;;  %v4088_v60 = vld [vmem:[%s16111_s3 + $0x1378] sm:$0xff] }
 0x27a   :  { %9655 = vmatmul.mubr.msk.f32.vlgmr.msra.gmra.mxu0 %vm165_vm1, %v12721_v51  ;;  %4670 = vmatprep.subr.mxu0 %v4648_v52  ;;  %v4087_v8 = vld [vmem:[%s16111_s3 + $0x1370] sm:$0xff]  ;;  %v4813_v52 = vld [vmem:[%s16111_s3 + $0x1760] sm:$0xff] }
 0x27b   :  { %4014 = vmatpush1.msra.mxu1 %v3921_v25  ;;  %4671 = vmatpush1.msra.mxu0 %v4647_v32  ;;  %v4810_v25 = vld [vmem:[%s16111_s3 + $0x1748] sm:$0xff]  ;;  %v4083_v32 = vld [vmem:[%s16111_s3 + $0x1350] sm:$0xff] }
 0x27c   :  { %4015 = vmatprep.subr.mxu1 %v3918_v21  ;;  %4672 = vmatprep.subr.mxu0 %v4644_v4  ;;  %v4809_v21 = vld [vmem:[%s16111_s3 + $0x1740] sm:$0xff]  ;;  %v4080_v4 = vld [vmem:[%s16111_s3 + $0x1338] sm:$0xff] }
 0x27d   :  { %4016 = vmatpush1.msra.mxu1 %v3917_v9  ;;  %4673 = vmatpush1.msra.mxu0 %v4643_v39  ;;  %v4806_v9 = vld [vmem:[%s16111_s3 + $0x1728] sm:$0xff]  ;;  %v4079_v39 = vld [vmem:[%s16111_s3 + $0x1330] sm:$0xff] }
 0x27e   :  { %4017 = vmatprep.subr.mxu1 %v3914_v10  ;;  %4674 = vmatprep.subr.mxu0 %v4640_v23  ;;  %v4805_v10 = vld [vmem:[%s16111_s3 + $0x1720] sm:$0xff]  ;;  %v4076_v23 = vld [vmem:[%s16111_s3 + $0x1318] sm:$0xff] }
 0x27f   :  { %4018 = vmatpush1.msra.mxu1 %v3913_v20  ;;  %4675 = vmatpush1.msra.mxu0 %v4639_v24  ;;  %v4802_v20 = vld [vmem:[%s16111_s3 + $0x1708] sm:$0xff] }
 0x280   :  { %4019 = vmatprep.subr.mxu1 %v3910_v27  ;;  %4676 = vmatprep.subr.mxu0 %v4636_v28  ;;  %v4075_v27 = vld [vmem:[%s16111_s3 + $0x1310] sm:$0xff] }
 0x281   :  { %4020 = vmatpush1.msra.mxu1 %v3909_v26  ;;  %4677 = vmatpush1.msra.mxu0 %v4635_v29  ;;  %v4801_v29 = vld [vmem:[%s16111_s3 + $0x1700] sm:$0xff] }
 0x282   :  { %4021 = vmatprep.subr.mxu1 %v3906_v31  ;;  %4678 = vmatprep.subr.mxu0 %v4632_v33 }
 0x283   :  { %4022 = vmatpush1.msra.mxu1 %v3905_v34  ;;  %4679 = vmatpush1.msra.mxu0 %v4631_v36  ;;  %v4286_v34 = vld [vmem:[%s16111_s3 + $0x14f8] sm:$0xff] }
 0x284   :  { %4023 = vmatprep.subr.mxu1 %v3902_v37  ;;  %4680 = vmatprep.subr.mxu0 %v4628_v3  ;;  %v5012_v3 = vld [vmem:[%s16111_s3 + $0x18e8] sm:$0xff] }
 0x285   :  { %4024 = vmatpush1.msra.mxu1 %v3901_v41  ;;  %4681 = vmatpush1.msra.mxu0 %v4627_v16  ;;  %v2061_v42 = vpop.f32.mrf.mxu1  ;;  %v4285_v16 = vld [vmem:[%s16111_s3 + $0x14f0] sm:$0xff] }
 0x286   :  { %4025 = vmatprep.subr.mxu1 %v3898_v2  ;;  %4682 = vmatprep.subr.mxu0 %v4624_v30  ;;  %v12807_v15 = vadd.f32 %v2061_v42, %v12691_v55  ;;  %v2718_v1 = vpop.f32.mrf.mxu0  ;;  %v4821_v55 = vld [vmem:[%s16111_s3 + $0x17a0] sm:$0xff]  ;;  %v12953_v30 = vld [vmem:[#allocation2 + $0x2e] sm:$0x3] }
 0x287   :  { %4026 = vmatpush1.msra.mxu1 %v3897_v38  ;;  %4683 = vmatpush1.msra.mxu0 %v4623_v18  ;;  %v12813_v13 = vadd.f32 %v2718_v1, %v12697_v44  ;;  %v2063_v12 = vpop.f32.mrf.mxu1  ;;  %v4091_v44 = vld [vmem:[%s16111_s3 + $0x1390] sm:$0xff]  ;;  %v5011_v2 = vld [vmem:[%s16111_s3 + $0x18e0] sm:$0xff]  ;;  %v4282_v38 = vld [vmem:[%s16111_s3 + $0x14d8] sm:$0xff] }
 0x288   :  { %4027 = vmatprep.subr.mxu1 %v3894_v11  ;;  %4684 = vmatprep.subr.mxu0 %v4620_v40  ;;  %v12819_v62 = vadd.f32 %v2063_v12, %v12703_v59  ;;  %v2720_v43 = vpop.f32.mrf.mxu0  ;;  %v4814_v59 = vld [vmem:[%s16111_s3 + $0x1768] sm:$0xff]  ;;  %v4281_v11 = vld [vmem:[%s16111_s3 + $0x14d0] sm:$0xff]  ;;  %v4278_v40 = vld [vmem:[%s16111_s3 + $0x14b8] sm:$0xff] }
 0x289   :  { %4028 = vmatpush1.msra.mxu1 %v3893_v35  ;;  %4061 = vmatprep.mubr.f32.mxu1 %v9955_v6  ;;  %v12826_v48 = vadd.f32 %v2720_v43, %v12710_v61  ;;  %v4084_v61 = vld [vmem:[%s16111_s3 + $0x1358] sm:$0xff]  ;;  %v5008_v18 = vld [vmem:[%s16111_s3 + $0x18c8] sm:$0xff]  ;;  %v4277_v35 = vld [vmem:[%s16111_s3 + $0x14b0] sm:$0xff] }
 0x28a   :  { %4685 = vmatpush1.msra.mxu0 %v4619_v45  ;;  %4718 = vmatprep.mubr.f32.mxu0 %v9955_v6  ;;  %v5004_v42 = vld [vmem:[%s16111_s3 + $0x18a8] sm:$0xff]  ;;  %v4274_v1 = vld [vmem:[%s16111_s3 + $0x1498] sm:$0xff]  ;;  %v4999_v12 = vld [vmem:[%s16111_s3 + $0x1880] sm:$0xff] }
 0x28b   :  { %9650 = vmatmul.mubr.msk.f32.vlgmr.msra.gmra.mxu1 %vm165_vm1, %v12373_v0  ;;  %4195 = vmatprep.subr.mxu1 %v4104_v46  ;;  %v4825_v0 = vld [vmem:[%s16111_s3 + $0x17c0] sm:$0xff]  ;;  %v5000_v45 = vld [vmem:[%s16111_s3 + $0x1888] sm:$0xff]  ;;  %v4270_v46 = vld [vmem:[%s16111_s3 + $0x1478] sm:$0xff] }
 0x28c   :  { %9657 = vmatmul.mubr.msk.f32.vlgmr.msra.gmra.mxu0 %vm165_vm1, %v12837_v49  ;;  %4852 = vmatprep.subr.mxu0 %v4830_v47  ;;  %v4269_v43 = vld [vmem:[%s16111_s3 + $0x1470] sm:$0xff]  ;;  %v4995_v47 = vld [vmem:[%s16111_s3 + $0x1860] sm:$0xff] }
 0x28d   :  { %4196 = vmatpush1.msra.mxu1 %v4103_v17  ;;  %4853 = vmatpush1.msra.mxu0 %v4829_v7  ;;  %v4992_v17 = vld [vmem:[%s16111_s3 + $0x1848] sm:$0xff]  ;;  %v4265_v7 = vld [vmem:[%s16111_s3 + $0x1450] sm:$0xff] }
 0x28e   :  { %4197 = vmatprep.subr.mxu1 %v4100_v58  ;;  %4854 = vmatprep.subr.mxu0 %v4826_v14  ;;  %v4991_v58 = vld [vmem:[%s16111_s3 + $0x1840] sm:$0xff]  ;;  %v4262_v14 = vld [vmem:[%s16111_s3 + $0x1438] sm:$0xff] }
 0x28f   :  { %4198 = vmatpush1.msra.mxu1 %v4099_v19  ;;  %4855 = vmatpush1.msra.mxu0 %v4825_v0  ;;  %v4988_v19 = vld [vmem:[%s16111_s3 + $0x1828] sm:$0xff]  ;;  %v4261_v0 = vld [vmem:[%s16111_s3 + $0x1430] sm:$0xff] }
 0x290   :  { %4199 = vmatprep.subr.mxu1 %v4096_v53  ;;  %4856 = vmatprep.subr.mxu0 %v4822_v63  ;;  %v4987_v53 = vld [vmem:[%s16111_s3 + $0x1820] sm:$0xff]  ;;  %v4258_v63 = vld [vmem:[%s16111_s3 + $0x1418] sm:$0xff] }
 0x291   :  { %4200 = vmatpush1.msra.mxu1 %v4095_v54  ;;  %4857 = vmatpush1.msra.mxu0 %v4821_v55  ;;  %v4984_v54 = vld [vmem:[%s16111_s3 + $0x1808] sm:$0xff] }
 0x292   :  { %4201 = vmatprep.subr.mxu1 %v4092_v56  ;;  %4858 = vmatprep.subr.mxu0 %v4818_v57  ;;  %v4257_v56 = vld [vmem:[%s16111_s3 + $0x1410] sm:$0xff] }
 0x293   :  { %4202 = vmatpush1.msra.mxu1 %v4091_v44  ;;  %4859 = vmatpush1.msra.mxu0 %v4817_v22  ;;  %v4983_v22 = vld [vmem:[%s16111_s3 + $0x1800] sm:$0xff] }
 0x294   :  { %4203 = vmatprep.subr.mxu1 %v4088_v60  ;;  %4860 = vmatprep.subr.mxu0 %v4814_v59 }
 0x295   :  { %4204 = vmatpush1.msra.mxu1 %v4087_v8  ;;  %4861 = vmatpush1.msra.mxu0 %v4813_v52  ;;  %v4468_v8 = vld [vmem:[%s16111_s3 + $0x15f8] sm:$0xff] }
 0x296   :  { %4205 = vmatprep.subr.mxu1 %v4084_v61  ;;  %4862 = vmatprep.subr.mxu0 %v4810_v25  ;;  %v5194_v25 = vld [vmem:[%s16111_s3 + $0x19e8] sm:$0xff] }
 0x297   :  { %4206 = vmatpush1.msra.mxu1 %v4083_v32  ;;  %4863 = vmatpush1.msra.mxu0 %v4809_v21  ;;  %v2243_v24 = vpop.f32.mrf.mxu1  ;;  %v4467_v21 = vld [vmem:[%s16111_s3 + $0x15f0] sm:$0xff] }
 0x298   :  { %4207 = vmatprep.subr.mxu1 %v4080_v4  ;;  %4864 = vmatprep.subr.mxu0 %v4806_v9  ;;  %v12923_v28 = vadd.f32 %v2243_v24, %v12807_v15  ;;  %v2900_v26 = vpop.f32.mrf.mxu0  ;;  %v5003_v15 = vld [vmem:[%s16111_s3 + $0x18a0] sm:$0xff]  ;;  %v13069_v9 = vld [vmem:[#allocation2 + $0x30] sm:$0x3]  ;;  %v5186_v24 = vld [vmem:[%s16111_s3 + $0x19a8] sm:$0xff] }
 0x299   :  { %4208 = vmatpush1.msra.mxu1 %v4079_v39  ;;  %4865 = vmatpush1.msra.mxu0 %v4805_v10  ;;  %v12929_v31 = vadd.f32 %v2900_v26, %v12813_v13  ;;  %v2245_v33 = vpop.f32.mrf.mxu1  ;;  %v4273_v13 = vld [vmem:[%s16111_s3 + $0x1490] sm:$0xff]  ;;  %v5193_v4 = vld [vmem:[%s16111_s3 + $0x19e0] sm:$0xff]  ;;  %v4464_v39 = vld [vmem:[%s16111_s3 + $0x15d8] sm:$0xff] }
 0x29a   :  { %4209 = vmatprep.subr.mxu1 %v4076_v23  ;;  %4866 = vmatprep.subr.mxu0 %v4802_v20  ;;  %v12935_v36 = vadd.f32 %v2245_v33, %v12819_v62  ;;  %v2902_v37 = vpop.f32.mrf.mxu0  ;;  %v4996_v62 = vld [vmem:[%s16111_s3 + $0x1868] sm:$0xff]  ;;  %v4463_v23 = vld [vmem:[%s16111_s3 + $0x15d0] sm:$0xff]  ;;  %v4460_v20 = vld [vmem:[%s16111_s3 + $0x15b8] sm:$0xff] }
 0x29b   :  { %4210 = vmatpush1.msra.mxu1 %v4075_v27  ;;  %4243 = vmatprep.mubr.f32.mxu1 %v9955_v6  ;;  %v12942_v41 = vadd.f32 %v2902_v37, %v12826_v48  ;;  %v4266_v48 = vld [vmem:[%s16111_s3 + $0x1458] sm:$0xff]  ;;  %v5190_v10 = vld [vmem:[%s16111_s3 + $0x19c8] sm:$0xff]  ;;  %v4459_v27 = vld [vmem:[%s16111_s3 + $0x15b0] sm:$0xff] }
 0x29c   :  { %4867 = vmatpush1.msra.mxu0 %v4801_v29  ;;  %4900 = vmatprep.mubr.f32.mxu0 %v9955_v6  ;;  %v4456_v26 = vld [vmem:[%s16111_s3 + $0x1598] sm:$0xff]  ;;  %v5182_v29 = vld [vmem:[%s16111_s3 + $0x1988] sm:$0xff]  ;;  %v5181_v33 = vld [vmem:[%s16111_s3 + $0x1980] sm:$0xff] }
 0x29d   :  { %9652 = vmatmul.mubr.msk.f32.vlgmr.msra.gmra.mxu1 %vm165_vm1, %v12489_v5  ;;  %4377 = vmatprep.subr.mxu1 %v4286_v34  ;;  %v5007_v5 = vld [vmem:[%s16111_s3 + $0x18c0] sm:$0xff]  ;;  %v4452_v34 = vld [vmem:[%s16111_s3 + $0x1578] sm:$0xff]  ;;  %v4451_v37 = vld [vmem:[%s16111_s3 + $0x1570] sm:$0xff] }
 0x29e   :  { %9659 = vmatmul.mubr.msk.f32.vlgmr.msra.gmra.mxu0 %vm165_vm1, %v12953_v30  ;;  %5034 = vmatprep.subr.mxu0 %v5012_v3  ;;  %v5177_v3 = vld [vmem:[%s16111_s3 + $0x1960] sm:$0xff] }
 0x29f   :  { %4378 = vmatpush1.msra.mxu1 %v4285_v16  ;;  %5035 = vmatpush1.msra.mxu0 %v5011_v2  ;;  %v5174_v16 = vld [vmem:[%s16111_s3 + $0x1948] sm:$0xff]  ;;  %v4447_v2 = vld [vmem:[%s16111_s3 + $0x1550] sm:$0xff] }
 0x2a0   :  { %4379 = vmatprep.subr.mxu1 %v4282_v38  ;;  %5036 = vmatprep.subr.mxu0 %v5008_v18  ;;  %v5173_v38 = vld [vmem:[%s16111_s3 + $0x1940] sm:$0xff]  ;;  %v4444_v18 = vld [vmem:[%s16111_s3 + $0x1538] sm:$0xff] }
 0x2a1   :  { %4380 = vmatpush1.msra.mxu1 %v4281_v11  ;;  %5037 = vmatpush1.msra.mxu0 %v5007_v5  ;;  %v5170_v11 = vld [vmem:[%s16111_s3 + $0x1928] sm:$0xff]  ;;  %v4443_v5 = vld [vmem:[%s16111_s3 + $0x1530] sm:$0xff] }
 0x2a2   :  { %4381 = vmatprep.subr.mxu1 %v4278_v40  ;;  %5038 = vmatprep.subr.mxu0 %v5004_v42  ;;  %v5169_v40 = vld [vmem:[%s16111_s3 + $0x1920] sm:$0xff]  ;;  %v4440_v42 = vld [vmem:[%s16111_s3 + $0x1518] sm:$0xff] }
 0x2a3   :  { %4382 = vmatpush1.msra.mxu1 %v4277_v35  ;;  %5039 = vmatpush1.msra.mxu0 %v5003_v15  ;;  %v5166_v35 = vld [vmem:[%s16111_s3 + $0x1908] sm:$0xff] }
 0x2a4   :  { %4383 = vmatprep.subr.mxu1 %v4274_v1  ;;  %5040 = vmatprep.subr.mxu0 %v5000_v45  ;;  %v4439_v1 = vld [vmem:[%s16111_s3 + $0x1510] sm:$0xff] }
 0x2a5   :  { %4384 = vmatpush1.msra.mxu1 %v4273_v13  ;;  %5041 = vmatpush1.msra.mxu0 %v4999_v12  ;;  %v5165_v12 = vld [vmem:[%s16111_s3 + $0x1900] sm:$0xff] }
 0x2a6   :  { %4385 = vmatprep.subr.mxu1 %v4270_v46  ;;  %5042 = vmatprep.subr.mxu0 %v4996_v62 }
 0x2a7   :  { %4386 = vmatpush1.msra.mxu1 %v4269_v43  ;;  %5043 = vmatpush1.msra.mxu0 %v4995_v47  ;;  %v4650_v43 = vld [vmem:[%s16111_s3 + $0x16f8] sm:$0xff] }
 0x2a8   :  { %4387 = vmatprep.subr.mxu1 %v4266_v48  ;;  %5044 = vmatprep.subr.mxu0 %v4992_v17  ;;  %v5376_v17 = vld [vmem:[%s16111_s3 + $0x1ae8] sm:$0xff] }
 0x2a9   :  { %4388 = vmatpush1.msra.mxu1 %v4265_v7  ;;  %5045 = vmatpush1.msra.mxu0 %v4991_v58  ;;  %v2425_v55 = vpop.f32.mrf.mxu1  ;;  %v4649_v58 = vld [vmem:[%s16111_s3 + $0x16f0] sm:$0xff] }
 0x2aa   :  { %4389 = vmatprep.subr.mxu1 %v4262_v14  ;;  %5046 = vmatprep.subr.mxu0 %v4988_v19  ;;  %v13039_v57 = vadd.f32 %v2425_v55, %v12923_v28  ;;  %v3082_v44 = vpop.f32.mrf.mxu0  ;;  %v5185_v28 = vld [vmem:[%s16111_s3 + $0x19a0] sm:$0xff]  ;;  %v13185_v19 = vld [vmem:[#allocation2 + $0x32] sm:$0x3]  ;;  %v5368_v55 = vld [vmem:[%s16111_s3 + $0x1aa8] sm:$0xff] }
 0x2ab   :  { %4390 = vmatpush1.msra.mxu1 %v4261_v0  ;;  %5047 = vmatpush1.msra.mxu0 %v4987_v53  ;;  %v13045_v60 = vadd.f32 %v3082_v44, %v12929_v31  ;;  %v2427_v59 = vpop.f32.mrf.mxu1  ;;  %v4455_v31 = vld [vmem:[%s16111_s3 + $0x1590] sm:$0xff]  ;;  %v5375_v14 = vld [vmem:[%s16111_s3 + $0x1ae0] sm:$0xff]  ;;  %v4646_v0 = vld [vmem:[%s16111_s3 + $0x16d8] sm:$0xff] }
 0x2ac   :  { %4391 = vmatprep.subr.mxu1 %v4258_v63  ;;  %5048 = vmatprep.subr.mxu0 %v4984_v54  ;;  %v13051_v52 = vadd.f32 %v2427_v59, %v12935_v36  ;;  %v3084_v61 = vpop.f32.mrf.mxu0  ;;  %v5178_v36 = vld [vmem:[%s16111_s3 + $0x1968] sm:$0xff]  ;;  %v4645_v63 = vld [vmem:[%s16111_s3 + $0x16d0] sm:$0xff]  ;;  %v4642_v54 = vld [vmem:[%s16111_s3 + $0x16b8] sm:$0xff] }
 0x2ad   :  { %4392 = vmatpush1.msra.mxu1 %v4257_v56  ;;  %4425 = vmatprep.mubr.f32.mxu1 %v9955_v6  ;;  %v13058_v32 = vadd.f32 %v3084_v61, %v12942_v41  ;;  %v4448_v41 = vld [vmem:[%s16111_s3 + $0x1558] sm:$0xff]  ;;  %v5372_v53 = vld [vmem:[%s16111_s3 + $0x1ac8] sm:$0xff]  ;;  %v4641_v56 = vld [vmem:[%s16111_s3 + $0x16b0] sm:$0xff] }
 0x2ae   :  { %5049 = vmatpush1.msra.mxu0 %v4983_v22  ;;  %5082 = vmatprep.mubr.f32.mxu0 %v9955_v6  ;;  %v4638_v44 = vld [vmem:[%s16111_s3 + $0x1698] sm:$0xff]  ;;  %v5364_v22 = vld [vmem:[%s16111_s3 + $0x1a88] sm:$0xff]  ;;  %v5363_v59 = vld [vmem:[%s16111_s3 + $0x1a80] sm:$0xff] }
 0x2af   :  { %9654 = vmatmul.mubr.msk.f32.vlgmr.msra.gmra.mxu1 %vm165_vm1, %v12605_v50  ;;  %4559 = vmatprep.subr.mxu1 %v4468_v8  ;;  %v5189_v50 = vld [vmem:[%s16111_s3 + $0x19c0] sm:$0xff]  ;;  %v4634_v8 = vld [vmem:[%s16111_s3 + $0x1678] sm:$0xff]  ;;  %v4633_v61 = vld [vmem:[%s16111_s3 + $0x1670] sm:$0xff] }
 0x2b0   :  { %9661 = vmatmul.mubr.msk.f32.vlgmr.msra.gmra.mxu0 %vm165_vm1, %v13069_v9  ;;  %5216 = vmatprep.subr.mxu0 %v5194_v25  ;;  %v5359_v25 = vld [vmem:[%s16111_s3 + $0x1a60] sm:$0xff] }
 0x2b1   :  { %4560 = vmatpush1.msra.mxu1 %v4467_v21  ;;  %5217 = vmatpush1.msra.mxu0 %v5193_v4  ;;  %v5356_v21 = vld [vmem:[%s16111_s3 + $0x1a48] sm:$0xff]  ;;  %v4629_v4 = vld [vmem:[%s16111_s3 + $0x1650] sm:$0xff] }
 0x2b2   :  { %4561 = vmatprep.subr.mxu1 %v4464_v39  ;;  %5218 = vmatprep.subr.mxu0 %v5190_v10  ;;  %v5355_v39 = vld [vmem:[%s16111_s3 + $0x1a40] sm:$0xff]  ;;  %v4626_v10 = vld [vmem:[%s16111_s3 + $0x1638] sm:$0xff] }
 0x2b3   :  { %4562 = vmatpush1.msra.mxu1 %v4463_v23  ;;  %5219 = vmatpush1.msra.mxu0 %v5189_v50  ;;  %v5352_v23 = vld [vmem:[%s16111_s3 + $0x1a28] sm:$0xff]  ;;  %v4625_v50 = vld [vmem:[%s16111_s3 + $0x1630] sm:$0xff] }
 0x2b4   :  { %4563 = vmatprep.subr.mxu1 %v4460_v20  ;;  %5220 = vmatprep.subr.mxu0 %v5186_v24  ;;  %v5351_v20 = vld [vmem:[%s16111_s3 + $0x1a20] sm:$0xff]  ;;  %v4622_v24 = vld [vmem:[%s16111_s3 + $0x1618] sm:$0xff] }
 0x2b5   :  { %4564 = vmatpush1.msra.mxu1 %v4459_v27  ;;  %5221 = vmatpush1.msra.mxu0 %v5185_v28  ;;  %v5348_v27 = vld [vmem:[%s16111_s3 + $0x1a08] sm:$0xff] }
 0x2b6   :  { %4565 = vmatprep.subr.mxu1 %v4456_v26  ;;  %5222 = vmatprep.subr.mxu0 %v5182_v29  ;;  %v4621_v26 = vld [vmem:[%s16111_s3 + $0x1610] sm:$0xff] }
 0x2b7   :  { %4566 = vmatpush1.msra.mxu1 %v4455_v31  ;;  %5223 = vmatpush1.msra.mxu0 %v5181_v33  ;;  %v5347_v33 = vld [vmem:[%s16111_s3 + $0x1a00] sm:$0xff] }
 0x2b8   :  { %4567 = vmatprep.subr.mxu1 %v4452_v34  ;;  %5224 = vmatprep.subr.mxu0 %v5178_v36 }
 0x2b9   :  { %4568 = vmatpush1.msra.mxu1 %v4451_v37  ;;  %5225 = vmatpush1.msra.mxu0 %v5177_v3  ;;  %v4832_v37 = vld [vmem:[%s16111_s3 + $0x17f8] sm:$0xff] }
 0x2ba   :  { %4569 = vmatprep.subr.mxu1 %v4448_v41  ;;  %5226 = vmatprep.subr.mxu0 %v5174_v16  ;;  %v5558_v16 = vld [vmem:[%s16111_s3 + $0x1be8] sm:$0xff] }
 0x2bb   :  { %4570 = vmatpush1.msra.mxu1 %v4447_v2  ;;  %5227 = vmatpush1.msra.mxu0 %v5173_v38  ;;  %v2607_v15 = vpop.f32.mrf.mxu1  ;;  %v4831_v38 = vld [vmem:[%s16111_s3 + $0x17f0] sm:$0xff] }
 0x2bc   :  { %4571 = vmatprep.subr.mxu1 %v4444_v18  ;;  %5228 = vmatprep.subr.mxu0 %v5170_v11  ;;  %v13155_v45 = vadd.f32 %v2607_v15, %v13039_v57  ;;  %v3264_v13 = vpop.f32.mrf.mxu0  ;;  %v5367_v57 = vld [vmem:[%s16111_s3 + $0x1aa0] sm:$0xff]  ;;  %v13301_v11 = vld [vmem:[#allocation2 + $0x34] sm:$0x3]  ;;  %v5550_v15 = vld [vmem:[%s16111_s3 + $0x1ba8] sm:$0xff] }
 0x2bd   :  { %4572 = vmatpush1.msra.mxu1 %v4443_v5  ;;  %5229 = vmatpush1.msra.mxu0 %v5169_v40  ;;  %v13161_v46 = vadd.f32 %v3264_v13, %v13045_v60  ;;  %v2609_v62 = vpop.f32.mrf.mxu1  ;;  %v4637_v60 = vld [vmem:[%s16111_s3 + $0x1690] sm:$0xff]  ;;  %v5557_v18 = vld [vmem:[%s16111_s3 + $0x1be0] sm:$0xff]  ;;  %v4828_v5 = vld [vmem:[%s16111_s3 + $0x17d8] sm:$0xff] }
 0x2be   :  { %4573 = vmatprep.subr.mxu1 %v4440_v42  ;;  %5230 = vmatprep.subr.mxu0 %v5166_v35  ;;  %v13167_v47 = vadd.f32 %v2609_v62, %v13051_v52  ;;  %v3266_v48 = vpop.f32.mrf.mxu0  ;;  %v5360_v52 = vld [vmem:[%s16111_s3 + $0x1a68] sm:$0xff]  ;;  %v4827_v42 = vld [vmem:[%s16111_s3 + $0x17d0] sm:$0xff]  ;;  %v4824_v35 = vld [vmem:[%s16111_s3 + $0x17b8] sm:$0xff] }
 0x2bf   :  { %4574 = vmatpush1.msra.mxu1 %v4439_v1  ;;  %4607 = vmatprep.mubr.f32.mxu1 %v9955_v6  ;;  %v13174_v7 = vadd.f32 %v3266_v48, %v13058_v32  ;;  %v4630_v32 = vld [vmem:[%s16111_s3 + $0x1658] sm:$0xff]  ;;  %v5554_v40 = vld [vmem:[%s16111_s3 + $0x1bc8] sm:$0xff]  ;;  %v4823_v1 = vld [vmem:[%s16111_s3 + $0x17b0] sm:$0xff] }
 0x2c0   :  { %5231 = vmatpush1.msra.mxu0 %v5165_v12  ;;  %5264 = vmatprep.mubr.f32.mxu0 %v9955_v6  ;;  %v4820_v13 = vld [vmem:[%s16111_s3 + $0x1798] sm:$0xff]  ;;  %v5546_v12 = vld [vmem:[%s16111_s3 + $0x1b88] sm:$0xff]  ;;  %v5545_v62 = vld [vmem:[%s16111_s3 + $0x1b80] sm:$0xff] }
 0x2c1   :  { %9656 = vmatmul.mubr.msk.f32.vlgmr.msra.gmra.mxu1 %vm165_vm1, %v12721_v51  ;;  %4741 = vmatprep.subr.mxu1 %v4650_v43  ;;  %v5371_v51 = vld [vmem:[%s16111_s3 + $0x1ac0] sm:$0xff]  ;;  %v4816_v43 = vld [vmem:[%s16111_s3 + $0x1778] sm:$0xff]  ;;  %v4815_v48 = vld [vmem:[%s16111_s3 + $0x1770] sm:$0xff] }
 0x2c2   :  { %9663 = vmatmul.mubr.msk.f32.vlgmr.msra.gmra.mxu0 %vm165_vm1, %v13185_v19  ;;  %5398 = vmatprep.subr.mxu0 %v5376_v17  ;;  %v5541_v17 = vld [vmem:[%s16111_s3 + $0x1b60] sm:$0xff] }
 0x2c3   :  { %4742 = vmatpush1.msra.mxu1 %v4649_v58  ;;  %5399 = vmatpush1.msra.mxu0 %v5375_v14  ;;  %v5538_v58 = vld [vmem:[%s16111_s3 + $0x1b48] sm:$0xff]  ;;  %v4811_v14 = vld [vmem:[%s16111_s3 + $0x1750] sm:$0xff] }
 0x2c4   :  { %4743 = vmatprep.subr.mxu1 %v4646_v0  ;;  %5400 = vmatprep.subr.mxu0 %v5372_v53  ;;  %v5537_v0 = vld [vmem:[%s16111_s3 + $0x1b40] sm:$0xff]  ;;  %v4808_v53 = vld [vmem:[%s16111_s3 + $0x1738] sm:$0xff] }
 0x2c5   :  { %4744 = vmatpush1.msra.mxu1 %v4645_v63  ;;  %5401 = vmatpush1.msra.mxu0 %v5371_v51  ;;  %v5534_v63 = vld [vmem:[%s16111_s3 + $0x1b28] sm:$0xff]  ;;  %v4807_v51 = vld [vmem:[%s16111_s3 + $0x1730] sm:$0xff] }
 0x2c6   :  { %4745 = vmatprep.subr.mxu1 %v4642_v54  ;;  %5402 = vmatprep.subr.mxu0 %v5368_v55  ;;  %v5533_v54 = vld [vmem:[%s16111_s3 + $0x1b20] sm:$0xff]  ;;  %v4804_v55 = vld [vmem:[%s16111_s3 + $0x1718] sm:$0xff] }
 0x2c7   :  { %4746 = vmatpush1.msra.mxu1 %v4641_v56  ;;  %5403 = vmatpush1.msra.mxu0 %v5367_v57  ;;  %v5530_v56 = vld [vmem:[%s16111_s3 + $0x1b08] sm:$0xff] }
 0x2c8   :  { %4747 = vmatprep.subr.mxu1 %v4638_v44  ;;  %5404 = vmatprep.subr.mxu0 %v5364_v22  ;;  %v4803_v44 = vld [vmem:[%s16111_s3 + $0x1710] sm:$0xff] }
 0x2c9   :  { %4748 = vmatpush1.msra.mxu1 %v4637_v60  ;;  %5405 = vmatpush1.msra.mxu0 %v5363_v59  ;;  %v5529_v59 = vld [vmem:[%s16111_s3 + $0x1b00] sm:$0xff] }
 0x2ca   :  { %4749 = vmatprep.subr.mxu1 %v4634_v8  ;;  %5406 = vmatprep.subr.mxu0 %v5360_v52 }
 0x2cb   :  { %4750 = vmatpush1.msra.mxu1 %v4633_v61  ;;  %5407 = vmatpush1.msra.mxu0 %v5359_v25  ;;  %v5014_v61 = vld [vmem:[%s16111_s3 + $0x18f8] sm:$0xff] }
 0x2cc   :  { %4751 = vmatprep.subr.mxu1 %v4630_v32  ;;  %5408 = vmatprep.subr.mxu0 %v5356_v21  ;;  %v5740_v21 = vld [vmem:[%s16111_s3 + $0x1ce8] sm:$0xff] }
 0x2cd   :  { %4752 = vmatpush1.msra.mxu1 %v4629_v4  ;;  %5409 = vmatpush1.msra.mxu0 %v5355_v39  ;;  %v2789_v28 = vpop.f32.mrf.mxu1  ;;  %v5013_v39 = vld [vmem:[%s16111_s3 + $0x18f0] sm:$0xff] }
 0x2ce   :  { %4753 = vmatprep.subr.mxu1 %v4626_v10  ;;  %5410 = vmatprep.subr.mxu0 %v5352_v23  ;;  %v13271_v29 = vadd.f32 %v2789_v28, %v13155_v45  ;;  %v3446_v31 = vpop.f32.mrf.mxu0  ;;  %v5549_v45 = vld [vmem:[%s16111_s3 + $0x1ba0] sm:$0xff]  ;;  %v13417_v23 = vld [vmem:[#allocation2 + $0x36] sm:$0x3]  ;;  %v5732_v28 = vld [vmem:[%s16111_s3 + $0x1ca8] sm:$0xff] }
 0x2cf   :  { %4754 = vmatpush1.msra.mxu1 %v4625_v50  ;;  %5411 = vmatpush1.msra.mxu0 %v5351_v20  ;;  %v13277_v34 = vadd.f32 %v3446_v31, %v13161_v46  ;;  %v2791_v36 = vpop.f32.mrf.mxu1  ;;  %v4819_v46 = vld [vmem:[%s16111_s3 + $0x1790] sm:$0xff]  ;;  %v5739_v10 = vld [vmem:[%s16111_s3 + $0x1ce0] sm:$0xff]  ;;  %v5010_v50 = vld [vmem:[%s16111_s3 + $0x18d8] sm:$0xff] }
 0x2d0   :  { %4755 = vmatprep.subr.mxu1 %v4622_v24  ;;  %5412 = vmatprep.subr.mxu0 %v5348_v27  ;;  %v13283_v3 = vadd.f32 %v2791_v36, %v13167_v47  ;;  %v3448_v41 = vpop.f32.mrf.mxu0  ;;  %v5542_v47 = vld [vmem:[%s16111_s3 + $0x1b68] sm:$0xff]  ;;  %v5009_v24 = vld [vmem:[%s16111_s3 + $0x18d0] sm:$0xff]  ;;  %v5006_v27 = vld [vmem:[%s16111_s3 + $0x18b8] sm:$0xff] }
 0x2d1   :  { %4756 = vmatpush1.msra.mxu1 %v4621_v26  ;;  %4789 = vmatprep.mubr.f32.mxu1 %v9955_v6  ;;  %v13290_v2 = vadd.f32 %v3448_v41, %v13174_v7  ;;  %v4812_v7 = vld [vmem:[%s16111_s3 + $0x1758] sm:$0xff]  ;;  %v5736_v20 = vld [vmem:[%s16111_s3 + $0x1cc8] sm:$0xff]  ;;  %v5005_v26 = vld [vmem:[%s16111_s3 + $0x18b0] sm:$0xff] }
 0x2d2   :  { %5413 = vmatpush1.msra.mxu0 %v5347_v33  ;;  %5446 = vmatprep.mubr.f32.mxu0 %v9955_v6  ;;  %v5002_v31 = vld [vmem:[%s16111_s3 + $0x1898] sm:$0xff]  ;;  %v5728_v33 = vld [vmem:[%s16111_s3 + $0x1c88] sm:$0xff]  ;;  %v5727_v36 = vld [vmem:[%s16111_s3 + $0x1c80] sm:$0xff] }
 0x2d3   :  { %9658 = vmatmul.mubr.msk.f32.vlgmr.msra.gmra.mxu1 %vm165_vm1, %v12837_v49  ;;  %4923 = vmatprep.subr.mxu1 %v4832_v37  ;;  %v5553_v49 = vld [vmem:[%s16111_s3 + $0x1bc0] sm:$0xff]  ;;  %v4998_v37 = vld [vmem:[%s16111_s3 + $0x1878] sm:$0xff]  ;;  %v4997_v41 = vld [vmem:[%s16111_s3 + $0x1870] sm:$0xff] }
 0x2d4   :  { %9665 = vmatmul.mubr.msk.f32.vlgmr.msra.gmra.mxu0 %vm165_vm1, %v13301_v11  ;;  %5580 = vmatprep.subr.mxu0 %v5558_v16  ;;  %v5723_v16 = vld [vmem:[%s16111_s3 + $0x1c60] sm:$0xff] }
 0x2d5   :  { %4924 = vmatpush1.msra.mxu1 %v4831_v38  ;;  %5581 = vmatpush1.msra.mxu0 %v5557_v18  ;;  %v5720_v38 = vld [vmem:[%s16111_s3 + $0x1c48] sm:$0xff]  ;;  %v4993_v18 = vld [vmem:[%s16111_s3 + $0x1850] sm:$0xff] }
 0x2d6   :  { %4925 = vmatprep.subr.mxu1 %v4828_v5  ;;  %5582 = vmatprep.subr.mxu0 %v5554_v40  ;;  %v5719_v5 = vld [vmem:[%s16111_s3 + $0x1c40] sm:$0xff]  ;;  %v4990_v40 = vld [vmem:[%s16111_s3 + $0x1838] sm:$0xff] }
 0x2d7   :  { %4926 = vmatpush1.msra.mxu1 %v4827_v42  ;;  %5583 = vmatpush1.msra.mxu0 %v5553_v49  ;;  %v5716_v42 = vld [vmem:[%s16111_s3 + $0x1c28] sm:$0xff]  ;;  %v4989_v49 = vld [vmem:[%s16111_s3 + $0x1830] sm:$0xff] }
 0x2d8   :  { %4927 = vmatprep.subr.mxu1 %v4824_v35  ;;  %5584 = vmatprep.subr.mxu0 %v5550_v15  ;;  %v5715_v35 = vld [vmem:[%s16111_s3 + $0x1c20] sm:$0xff]  ;;  %v4986_v15 = vld [vmem:[%s16111_s3 + $0x1818] sm:$0xff] }
 0x2d9   :  { %4928 = vmatpush1.msra.mxu1 %v4823_v1  ;;  %5585 = vmatpush1.msra.mxu0 %v5549_v45  ;;  %v5712_v1 = vld [vmem:[%s16111_s3 + $0x1c08] sm:$0xff] }
 0x2da   :  { %4929 = vmatprep.subr.mxu1 %v4820_v13  ;;  %5586 = vmatprep.subr.mxu0 %v5546_v12  ;;  %v4985_v13 = vld [vmem:[%s16111_s3 + $0x1810] sm:$0xff] }
 0x2db   :  { %4930 = vmatpush1.msra.mxu1 %v4819_v46  ;;  %5587 = vmatpush1.msra.mxu0 %v5545_v62  ;;  %v5711_v62 = vld [vmem:[%s16111_s3 + $0x1c00] sm:$0xff] }
 0x2dc   :  { %4931 = vmatprep.subr.mxu1 %v4816_v43  ;;  %5588 = vmatprep.subr.mxu0 %v5542_v47 }
 0x2dd   :  { %4932 = vmatpush1.msra.mxu1 %v4815_v48  ;;  %5589 = vmatpush1.msra.mxu0 %v5541_v17  ;;  %v5196_v48 = vld [vmem:[%s16111_s3 + $0x19f8] sm:$0xff] }
 0x2de   :  { %4933 = vmatprep.subr.mxu1 %v4812_v7  ;;  %5590 = vmatprep.subr.mxu0 %v5538_v58  ;;  %v5922_v7 = vld [vmem:[%s16111_s3 + $0x1de8] sm:$0xff]  ;;  %v5195_v58 = vld [vmem:[%s16111_s3 + $0x19f0] sm:$0xff] }
 0x2df   :  { %4934 = vmatpush1.msra.mxu1 %v4811_v14  ;;  %5591 = vmatpush1.msra.mxu0 %v5537_v0  ;;  %v2971_v57 = vpop.f32.mrf.mxu1  ;;  %v5921_v14 = vld [vmem:[%s16111_s3 + $0x1de0] sm:$0xff]  ;;  %v13530_v0 = vld [vmem:[#allocation2 + $0x38] sm:$0x3] }
 0x2e0   :  { %4935 = vmatprep.subr.mxu1 %v4808_v53  ;;  %5592 = vmatprep.subr.mxu0 %v5534_v63  ;;  %v13387_v22 = vadd.f32 %v2971_v57, %v13271_v29  ;;  %v3628_v60 = vpop.f32.mrf.mxu0  ;;  %v5731_v29 = vld [vmem:[%s16111_s3 + $0x1ca0] sm:$0xff]  ;;  %v5192_v53 = vld [vmem:[%s16111_s3 + $0x19d8] sm:$0xff]  ;;  %v5918_v63 = vld [vmem:[%s16111_s3 + $0x1dc8] sm:$0xff] }
 0x2e1   :  { %4936 = vmatpush1.msra.mxu1 %v4807_v51  ;;  %5593 = vmatpush1.msra.mxu0 %v5533_v54  ;;  %v13393_v8 = vadd.f32 %v3628_v60, %v13277_v34  ;;  %v2973_v52 = vpop.f32.mrf.mxu1  ;;  %v5001_v34 = vld [vmem:[%s16111_s3 + $0x1890] sm:$0xff]  ;;  %v5188_v54 = vld [vmem:[%s16111_s3 + $0x19b8] sm:$0xff]  ;;  %v5913_v57 = vld [vmem:[%s16111_s3 + $0x1da0] sm:$0xff] }
 0x2e2   :  { %4937 = vmatprep.subr.mxu1 %v4804_v55  ;;  %5594 = vmatprep.subr.mxu0 %v5530_v56  ;;  %v13399_v25 = vadd.f32 %v2973_v52, %v13283_v3  ;;  %v3630_v32 = vpop.f32.mrf.mxu0  ;;  %v5724_v3 = vld [vmem:[%s16111_s3 + $0x1c68] sm:$0xff]  ;;  %v5191_v51 = vld [vmem:[%s16111_s3 + $0x19d0] sm:$0xff] }
 0x2e3   :  { %4938 = vmatpush1.msra.mxu1 %v4803_v44  ;;  %4971 = vmatprep.mubr.f32.mxu1 %v9955_v6  ;;  %v13406_v4 = vadd.f32 %v3630_v32, %v13290_v2  ;;  %v4994_v2 = vld [vmem:[%s16111_s3 + $0x1858] sm:$0xff]  ;;  %v5914_v55 = vld [vmem:[%s16111_s3 + $0x1da8] sm:$0xff]  ;;  %v5187_v56 = vld [vmem:[%s16111_s3 + $0x19b0] sm:$0xff] }
 0x2e4   :  { %5595 = vmatpush1.msra.mxu0 %v5529_v59  ;;  %5628 = vmatprep.mubr.f32.mxu0 %v9955_v6  ;;  %v5184_v44 = vld [vmem:[%s16111_s3 + $0x1998] sm:$0xff]  ;;  %v5183_v60 = vld [vmem:[%s16111_s3 + $0x1990] sm:$0xff]  ;;  %v5909_v59 = vld [vmem:[%s16111_s3 + $0x1d80] sm:$0xff] }
 0x2e5   :  { %9660 = vmatmul.mubr.msk.f32.vlgmr.msra.gmra.mxu1 %vm165_vm1, %v12953_v30  ;;  %5105 = vmatprep.subr.mxu1 %v5014_v61  ;;  %v5735_v30 = vld [vmem:[%s16111_s3 + $0x1cc0] sm:$0xff]  ;;  %v5906_v52 = vld [vmem:[%s16111_s3 + $0x1d68] sm:$0xff]  ;;  %v5179_v61 = vld [vmem:[%s16111_s3 + $0x1970] sm:$0xff] }
 0x2e6   :  { %9667 = vmatmul.mubr.msk.f32.vlgmr.msra.gmra.mxu0 %vm165_vm1, %v13417_v23  ;;  %5762 = vmatprep.subr.mxu0 %v5740_v21  ;;  %v5176_v32 = vld [vmem:[%s16111_s3 + $0x1958] sm:$0xff]  ;;  %v5902_v21 = vld [vmem:[%s16111_s3 + $0x1d48] sm:$0xff] }
 0x2e7   :  { %5106 = vmatpush1.msra.mxu1 %v5013_v39  ;;  %5763 = vmatpush1.msra.mxu0 %v5739_v10  ;;  %v5175_v39 = vld [vmem:[%s16111_s3 + $0x1950] sm:$0xff]  ;;  %v5901_v10 = vld [vmem:[%s16111_s3 + $0x1d40] sm:$0xff] }
 0x2e8   :  { %5107 = vmatprep.subr.mxu1 %v5010_v50  ;;  %5764 = vmatprep.subr.mxu0 %v5736_v20  ;;  %v5172_v50 = vld [vmem:[%s16111_s3 + $0x1938] sm:$0xff]  ;;  %v5898_v20 = vld [vmem:[%s16111_s3 + $0x1d28] sm:$0xff] }
 0x2e9   :  { %5108 = vmatpush1.msra.mxu1 %v5009_v24  ;;  %5765 = vmatpush1.msra.mxu0 %v5735_v30  ;;  %v5171_v24 = vld [vmem:[%s16111_s3 + $0x1930] sm:$0xff]  ;;  %v5897_v30 = vld [vmem:[%s16111_s3 + $0x1d20] sm:$0xff] }
 0x2ea   :  { %5109 = vmatprep.subr.mxu1 %v5006_v27  ;;  %5766 = vmatprep.subr.mxu0 %v5732_v28  ;;  %v5168_v27 = vld [vmem:[%s16111_s3 + $0x1918] sm:$0xff]  ;;  %v5894_v28 = vld [vmem:[%s16111_s3 + $0x1d08] sm:$0xff] }
 0x2eb   :  { %5110 = vmatpush1.msra.mxu1 %v5005_v26  ;;  %5767 = vmatpush1.msra.mxu0 %v5731_v29  ;;  %v5167_v29 = vld [vmem:[%s16111_s3 + $0x1910] sm:$0xff] }
 0x2ec   :  { %5111 = vmatprep.subr.mxu1 %v5002_v31  ;;  %5768 = vmatprep.subr.mxu0 %v5728_v33  ;;  %v5893_v33 = vld [vmem:[%s16111_s3 + $0x1d00] sm:$0xff] }
 0x2ed   :  { %5112 = vmatpush1.msra.mxu1 %v5001_v34  ;;  %5769 = vmatpush1.msra.mxu0 %v5727_v36  ;;  %v5378_v36 = vld [vmem:[%s16111_s3 + $0x1af8] sm:$0xff] }
 0x2ee   :  { %5113 = vmatprep.subr.mxu1 %v4998_v37  ;;  %5770 = vmatprep.subr.mxu0 %v5724_v3  ;;  %v6104_v3 = vld [vmem:[%s16111_s3 + $0x1ee8] sm:$0xff] }
 0x2ef   :  { %5114 = vmatpush1.msra.mxu1 %v4997_v41  ;;  %5771 = vmatpush1.msra.mxu0 %v5723_v16  ;;  %v5377_v41 = vld [vmem:[%s16111_s3 + $0x1af0] sm:$0xff]  ;;  %v6103_v16 = vld [vmem:[%s16111_s3 + $0x1ee0] sm:$0xff] }
 0x2f0   :  { %5115 = vmatprep.subr.mxu1 %v4994_v2  ;;  %5772 = vmatprep.subr.mxu0 %v5720_v38  ;;  %v13640_v2 = vld [vmem:[#allocation2 + $0x3a] sm:$0x3] }
 0x2f1   :  { %5116 = vmatpush1.msra.mxu1 %v4993_v18  ;;  %5773 = vmatpush1.msra.mxu0 %v5719_v5  ;;  %v3153_v45 = vpop.f32.mrf.mxu1  ;;  %v5374_v38 = vld [vmem:[%s16111_s3 + $0x1ad8] sm:$0xff]  ;;  %v6100_v18 = vld [vmem:[%s16111_s3 + $0x1ec8] sm:$0xff]  ;;  %v5373_v5 = vld [vmem:[%s16111_s3 + $0x1ad0] sm:$0xff] }
 0x2f2   :  { %5117 = vmatprep.subr.mxu1 %v4990_v40  ;;  %5774 = vmatprep.subr.mxu0 %v5716_v42  ;;  %v13503_v12 = vadd.f32 %v3153_v45, %v13387_v22  ;;  %v3810_v46 = vpop.f32.mrf.mxu0  ;;  %v5910_v22 = vld [vmem:[%s16111_s3 + $0x1d88] sm:$0xff]  ;;  %v5370_v40 = vld [vmem:[%s16111_s3 + $0x1ab8] sm:$0xff]  ;;  %v5365_v45 = vld [vmem:[%s16111_s3 + $0x1a90] sm:$0xff] }
 0x2f3   :  { %5118 = vmatpush1.msra.mxu1 %v4989_v49  ;;  %5775 = vmatpush1.msra.mxu0 %v5715_v35  ;;  %v13509_v43 = vadd.f32 %v3810_v46, %v13393_v8  ;;  %v3155_v47 = vpop.f32.mrf.mxu1  ;;  %v5180_v8 = vld [vmem:[%s16111_s3 + $0x1978] sm:$0xff]  ;;  %v6096_v42 = vld [vmem:[%s16111_s3 + $0x1ea8] sm:$0xff]  ;;  %v5369_v49 = vld [vmem:[%s16111_s3 + $0x1ab0] sm:$0xff] }
 0x2f4   :  { %5119 = vmatprep.subr.mxu1 %v4986_v15  ;;  %5776 = vmatprep.subr.mxu0 %v5712_v1  ;;  %v13515_v17 = vadd.f32 %v3155_v47, %v13399_v25  ;;  %v5905_v25 = vld [vmem:[%s16111_s3 + $0x1d60] sm:$0xff]  ;;  %v5366_v15 = vld [vmem:[%s16111_s3 + $0x1a98] sm:$0xff]  ;;  %v6092_v1 = vld [vmem:[%s16111_s3 + $0x1e88] sm:$0xff] }
 0x2f5   :  { %5120 = vmatpush1.msra.mxu1 %v4985_v13  ;;  %5153 = vmatprep.mubr.f32.mxu1 %v9955_v6  ;;  %v6095_v35 = vld [vmem:[%s16111_s3 + $0x1ea0] sm:$0xff]  ;;  %v6088_v46 = vld [vmem:[%s16111_s3 + $0x1e68] sm:$0xff] }
 0x2f6   :  { %5777 = vmatpush1.msra.mxu0 %v5711_v62  ;;  %5810 = vmatprep.mubr.f32.mxu0 %v9955_v6  ;;  %v6091_v13 = vld [vmem:[%s16111_s3 + $0x1e80] sm:$0xff]  ;;  %v5361_v62 = vld [vmem:[%s16111_s3 + $0x1a70] sm:$0xff] }
 0x2f7   :  { %9662 = vmatmul.mubr.msk.f32.vlgmr.msra.gmra.mxu1 %vm165_vm1, %v13069_v9  ;;  %5287 = vmatprep.subr.mxu1 %v5196_v48  ;;  %v5917_v9 = vld [vmem:[%s16111_s3 + $0x1dc0] sm:$0xff]  ;;  %v5358_v48 = vld [vmem:[%s16111_s3 + $0x1a58] sm:$0xff] }
 0x2f8   :  { %9669 = vmatmul.mubr.msk.f32.vlgmr.msra.gmra.mxu0 %vm165_vm1, %v13530_v0  ;;  %5944 = vmatprep.subr.mxu0 %v5922_v7  ;;  %v6087_v47 = vld [vmem:[%s16111_s3 + $0x1e60] sm:$0xff]  ;;  %v5357_v7 = vld [vmem:[%s16111_s3 + $0x1a50] sm:$0xff] }
 0x2f9   :  { %5288 = vmatpush1.msra.mxu1 %v5195_v58  ;;  %5945 = vmatpush1.msra.mxu0 %v5921_v14  ;;  %v6083_v58 = vld [vmem:[%s16111_s3 + $0x1e40] sm:$0xff]  ;;  %v5354_v14 = vld [vmem:[%s16111_s3 + $0x1a38] sm:$0xff] }
 0x2fa   :  { %5289 = vmatprep.subr.mxu1 %v5192_v53  ;;  %5946 = vmatprep.subr.mxu0 %v5918_v63  ;;  %v6080_v53 = vld [vmem:[%s16111_s3 + $0x1e28] sm:$0xff]  ;;  %v5353_v63 = vld [vmem:[%s16111_s3 + $0x1a30] sm:$0xff] }
 0x2fb   :  { %5290 = vmatpush1.msra.mxu1 %v5191_v51  ;;  %5947 = vmatpush1.msra.mxu0 %v5917_v9  ;;  %v6079_v51 = vld [vmem:[%s16111_s3 + $0x1e20] sm:$0xff]  ;;  %v5350_v9 = vld [vmem:[%s16111_s3 + $0x1a18] sm:$0xff] }
 0x2fc   :  { %5291 = vmatprep.subr.mxu1 %v5188_v54  ;;  %5948 = vmatprep.subr.mxu0 %v5914_v55  ;;  %v6076_v54 = vld [vmem:[%s16111_s3 + $0x1e08] sm:$0xff] }
 0x2fd   :  { %5292 = vmatpush1.msra.mxu1 %v5187_v56  ;;  %5949 = vmatpush1.msra.mxu0 %v5913_v57  ;;  %v5349_v56 = vld [vmem:[%s16111_s3 + $0x1a10] sm:$0xff] }
 0x2fe   :  { %5293 = vmatprep.subr.mxu1 %v5184_v44  ;;  %5950 = vmatprep.subr.mxu0 %v5910_v22  ;;  %v6075_v44 = vld [vmem:[%s16111_s3 + $0x1e00] sm:$0xff] }
 0x2ff   :  { %5294 = vmatpush1.msra.mxu1 %v5183_v60  ;;  %5951 = vmatpush1.msra.mxu0 %v5909_v59  ;;  %v5560_v60 = vld [vmem:[%s16111_s3 + $0x1bf8] sm:$0xff] }
 0x300   :  { %5295 = vmatprep.subr.mxu1 %v5180_v8  ;;  %5952 = vmatprep.subr.mxu0 %v5906_v52  ;;  %v6286_v8 = vld [vmem:[%s16111_s3 + $0x1fe8] sm:$0xff]  ;;  %v5559_v52 = vld [vmem:[%s16111_s3 + $0x1bf0] sm:$0xff] }
 0x301   :  { %5296 = vmatpush1.msra.mxu1 %v5179_v61  ;;  %5953 = vmatpush1.msra.mxu0 %v5905_v25  ;;  %v6285_v61 = vld [vmem:[%s16111_s3 + $0x1fe0] sm:$0xff]  ;;  %v13750_v25 = vld [vmem:[#allocation2 + $0x3c] sm:$0x3] }
 0x302   :  { %5297 = vmatprep.subr.mxu1 %v5176_v32  ;;  %5954 = vmatprep.subr.mxu0 %v5902_v21  ;;  %v5556_v32 = vld [vmem:[%s16111_s3 + $0x1bd8] sm:$0xff]  ;;  %v6282_v21 = vld [vmem:[%s16111_s3 + $0x1fc8] sm:$0xff] }
 0x303   :  { %5298 = vmatpush1.msra.mxu1 %v5175_v39  ;;  %5955 = vmatpush1.msra.mxu0 %v5901_v10  ;;  %v3335_v26 = vpop.f32.mrf.mxu1  ;;  %v5555_v39 = vld [vmem:[%s16111_s3 + $0x1bd0] sm:$0xff]  ;;  %v5552_v10 = vld [vmem:[%s16111_s3 + $0x1bb8] sm:$0xff] }
 0x304   :  { %5299 = vmatprep.subr.mxu1 %v5172_v50  ;;  %5956 = vmatprep.subr.mxu0 %v5898_v20  ;;  %v13616_v31 = vadd.f32 %v3335_v26, %v13503_v12  ;;  %v5362_v12 = vld [vmem:[%s16111_s3 + $0x1a78] sm:$0xff]  ;;  %v6278_v50 = vld [vmem:[%s16111_s3 + $0x1fa8] sm:$0xff]  ;;  %v5551_v20 = vld [vmem:[%s16111_s3 + $0x1bb0] sm:$0xff] }
 0x305   :  { %5300 = vmatpush1.msra.mxu1 %v5171_v24  ;;  %5957 = vmatpush1.msra.mxu0 %v5897_v30  ;;  %v3337_v34 = vpop.f32.mrf.mxu1  ;;  %v6277_v24 = vld [vmem:[%s16111_s3 + $0x1fa0] sm:$0xff]  ;;  %v5548_v30 = vld [vmem:[%s16111_s3 + $0x1b98] sm:$0xff] }
 0x306   :  { %5301 = vmatprep.subr.mxu1 %v5168_v27  ;;  %5958 = vmatprep.subr.mxu0 %v5894_v28  ;;  %v13625_v37 = vadd.f32 %v3337_v34, %v13515_v17  ;;  %v6084_v17 = vld [vmem:[%s16111_s3 + $0x1e48] sm:$0xff]  ;;  %v5547_v28 = vld [vmem:[%s16111_s3 + $0x1b90] sm:$0xff]  ;;  %v6273_v26 = vld [vmem:[%s16111_s3 + $0x1f80] sm:$0xff] }
 0x307   :  { %5302 = vmatpush1.msra.mxu1 %v5167_v29  ;;  %5335 = vmatprep.mubr.f32.mxu1 %v9955_v6  ;;  %v6274_v27 = vld [vmem:[%s16111_s3 + $0x1f88] sm:$0xff]  ;;  %v5544_v29 = vld [vmem:[%s16111_s3 + $0x1b78] sm:$0xff]  ;;  %v6269_v34 = vld [vmem:[%s16111_s3 + $0x1f60] sm:$0xff] }
 0x308   :  { %5959 = vmatpush1.msra.mxu0 %v5893_v33  ;;  %5992 = vmatprep.mubr.f32.mxu0 %v9955_v6  ;;  %v5543_v33 = vld [vmem:[%s16111_s3 + $0x1b70] sm:$0xff] }
 0x309   :  { %9664 = vmatmul.mubr.msk.f32.vlgmr.msra.gmra.mxu1 %vm165_vm1, %v13185_v19  ;;  %5469 = vmatprep.subr.mxu1 %v5378_v36  ;;  %v6099_v19 = vld [vmem:[%s16111_s3 + $0x1ec0] sm:$0xff]  ;;  %v5540_v36 = vld [vmem:[%s16111_s3 + $0x1b58] sm:$0xff] }
 0x30a   :  { %9671 = vmatmul.mubr.msk.f32.vlgmr.msra.gmra.mxu0 %vm165_vm1, %v13640_v2  ;;  %6126 = vmatprep.subr.mxu0 %v6104_v3  ;;  %v5539_v3 = vld [vmem:[%s16111_s3 + $0x1b50] sm:$0xff] }
 0x30b   :  { %5470 = vmatpush1.msra.mxu1 %v5377_v41  ;;  %6127 = vmatpush1.msra.mxu0 %v6103_v16  ;;  %v6265_v41 = vld [vmem:[%s16111_s3 + $0x1f40] sm:$0xff]  ;;  %v5536_v16 = vld [vmem:[%s16111_s3 + $0x1b38] sm:$0xff] }
 0x30c   :  { %5471 = vmatprep.subr.mxu1 %v5374_v38  ;;  %6128 = vmatprep.subr.mxu0 %v6100_v18  ;;  %v6262_v38 = vld [vmem:[%s16111_s3 + $0x1f28] sm:$0xff]  ;;  %v5535_v18 = vld [vmem:[%s16111_s3 + $0x1b30] sm:$0xff] }
 0x30d   :  { %5472 = vmatpush1.msra.mxu1 %v5373_v5  ;;  %6129 = vmatpush1.msra.mxu0 %v6099_v19  ;;  %v6261_v5 = vld [vmem:[%s16111_s3 + $0x1f20] sm:$0xff]  ;;  %v5532_v19 = vld [vmem:[%s16111_s3 + $0x1b18] sm:$0xff] }
 0x30e   :  { %5473 = vmatprep.subr.mxu1 %v5370_v40  ;;  %6130 = vmatprep.subr.mxu0 %v6096_v42  ;;  %v6258_v40 = vld [vmem:[%s16111_s3 + $0x1f08] sm:$0xff] }
 0x30f   :  { %5474 = vmatpush1.msra.mxu1 %v5369_v49  ;;  %6131 = vmatpush1.msra.mxu0 %v6095_v35  ;;  %v5531_v49 = vld [vmem:[%s16111_s3 + $0x1b10] sm:$0xff] }
 0x310   :  { %5475 = vmatprep.subr.mxu1 %v5366_v15  ;;  %6132 = vmatprep.subr.mxu0 %v6092_v1  ;;  %v6257_v15 = vld [vmem:[%s16111_s3 + $0x1f00] sm:$0xff] }
 0x311   :  { %5476 = vmatpush1.msra.mxu1 %v5365_v45  ;;  %6133 = vmatpush1.msra.mxu0 %v6091_v13  ;;  %v5742_v45 = vld [vmem:[%s16111_s3 + $0x1cf8] sm:$0xff] }
 0x312   :  { %5477 = vmatprep.subr.mxu1 %v5362_v12  ;;  %6134 = vmatprep.subr.mxu0 %v6088_v46  ;;  %v6468_v12 = vld [vmem:[%s16111_s3 + $0x20e8] sm:$0xff]  ;;  %v5741_v46 = vld [vmem:[%s16111_s3 + $0x1cf0] sm:$0xff] }
 0x313   :  { %5478 = vmatpush1.msra.mxu1 %v5361_v62  ;;  %6135 = vmatpush1.msra.mxu0 %v6087_v47  ;;  %v6467_v62 = vld [vmem:[%s16111_s3 + $0x20e0] sm:$0xff]  ;;  %v13860_v47 = vld [vmem:[#allocation2 + $0x3e] sm:$0x3] }
 0x314   :  { %5479 = vmatprep.subr.mxu1 %v5358_v48  ;;  %6136 = vmatprep.subr.mxu0 %v6084_v17  ;;  %v5738_v48 = vld [vmem:[%s16111_s3 + $0x1cd8] sm:$0xff]  ;;  %v6464_v17 = vld [vmem:[%s16111_s3 + $0x20c8] sm:$0xff] }
 0x315   :  { %5480 = vmatpush1.msra.mxu1 %v5357_v7  ;;  %6137 = vmatpush1.msra.mxu0 %v6083_v58  ;;  %v3517_v55 = vpop.f32.mrf.mxu1  ;;  %v5737_v7 = vld [vmem:[%s16111_s3 + $0x1cd0] sm:$0xff]  ;;  %v5734_v58 = vld [vmem:[%s16111_s3 + $0x1cb8] sm:$0xff] }
 0x316   :  { %5481 = vmatprep.subr.mxu1 %v5354_v14  ;;  %6138 = vmatprep.subr.mxu0 %v6080_v53  ;;  %v13726_v57 = vadd.f32 %v3517_v55, %v13616_v31  ;;  %v6270_v31 = vld [vmem:[%s16111_s3 + $0x1f68] sm:$0xff]  ;;  %v5733_v53 = vld [vmem:[%s16111_s3 + $0x1cb0] sm:$0xff]  ;;  %v6455_v55 = vld [vmem:[%s16111_s3 + $0x2080] sm:$0xff] }
 0x317   :  { %5482 = vmatpush1.msra.mxu1 %v5353_v63  ;;  %6139 = vmatpush1.msra.mxu0 %v6079_v51  ;;  %v3519_v22 = vpop.f32.mrf.mxu1  ;;  %v6460_v14 = vld [vmem:[%s16111_s3 + $0x20a8] sm:$0xff]  ;;  %v6459_v63 = vld [vmem:[%s16111_s3 + $0x20a0] sm:$0xff]  ;;  %v5730_v51 = vld [vmem:[%s16111_s3 + $0x1c98] sm:$0xff] }
 0x318   :  { %5483 = vmatprep.subr.mxu1 %v5350_v9  ;;  %6140 = vmatprep.subr.mxu0 %v6076_v54  ;;  %v13735_v59 = vadd.f32 %v3519_v22, %v13625_v37  ;;  %v6266_v37 = vld [vmem:[%s16111_s3 + $0x1f48] sm:$0xff]  ;;  %v5729_v54 = vld [vmem:[%s16111_s3 + $0x1c90] sm:$0xff]  ;;  %v6451_v22 = vld [vmem:[%s16111_s3 + $0x2060] sm:$0xff] }
 0x319   :  { %5484 = vmatpush1.msra.mxu1 %v5349_v56  ;;  %5517 = vmatprep.mubr.f32.mxu1 %v9955_v6  ;;  %v6456_v9 = vld [vmem:[%s16111_s3 + $0x2088] sm:$0xff]  ;;  %v5726_v56 = vld [vmem:[%s16111_s3 + $0x1c78] sm:$0xff] }
 0x31a   :  { %6141 = vmatpush1.msra.mxu0 %v6075_v44  ;;  %6174 = vmatprep.mubr.f32.mxu0 %v9955_v6  ;;  %v5725_v44 = vld [vmem:[%s16111_s3 + $0x1c70] sm:$0xff] }
 0x31b   :  { %9666 = vmatmul.mubr.msk.f32.vlgmr.msra.gmra.mxu1 %vm165_vm1, %v13301_v11  ;;  %5651 = vmatprep.subr.mxu1 %v5560_v60  ;;  %v6281_v11 = vld [vmem:[%s16111_s3 + $0x1fc0] sm:$0xff]  ;;  %v5722_v60 = vld [vmem:[%s16111_s3 + $0x1c58] sm:$0xff] }
 0x31c   :  { %9673 = vmatmul.mubr.msk.f32.vlgmr.msra.gmra.mxu0 %vm165_vm1, %v13750_v25  ;;  %6308 = vmatprep.subr.mxu0 %v6286_v8  ;;  %v5721_v8 = vld [vmem:[%s16111_s3 + $0x1c50] sm:$0xff] }
 0x31d   :  { %5652 = vmatpush1.msra.mxu1 %v5559_v52  ;;  %6309 = vmatpush1.msra.mxu0 %v6285_v61  ;;  %v6447_v52 = vld [vmem:[%s16111_s3 + $0x2040] sm:$0xff]  ;;  %v5718_v61 = vld [vmem:[%s16111_s3 + $0x1c38] sm:$0xff] }
 0x31e   :  { %5653 = vmatprep.subr.mxu1 %v5556_v32  ;;  %6310 = vmatprep.subr.mxu0 %v6282_v21  ;;  %v6444_v32 = vld [vmem:[%s16111_s3 + $0x2028] sm:$0xff]  ;;  %v5717_v21 = vld [vmem:[%s16111_s3 + $0x1c30] sm:$0xff] }
 0x31f   :  { %5654 = vmatpush1.msra.mxu1 %v5555_v39  ;;  %6311 = vmatpush1.msra.mxu0 %v6281_v11  ;;  %v6443_v39 = vld [vmem:[%s16111_s3 + $0x2020] sm:$0xff]  ;;  %v5714_v11 = vld [vmem:[%s16111_s3 + $0x1c18] sm:$0xff] }
 0x320   :  { %5655 = vmatprep.subr.mxu1 %v5552_v10  ;;  %6312 = vmatprep.subr.mxu0 %v6278_v50  ;;  %v6440_v10 = vld [vmem:[%s16111_s3 + $0x2008] sm:$0xff] }
 0x321   :  { %5656 = vmatpush1.msra.mxu1 %v5551_v20  ;;  %6313 = vmatpush1.msra.mxu0 %v6277_v24  ;;  %v5713_v20 = vld [vmem:[%s16111_s3 + $0x1c10] sm:$0xff] }
 0x322   :  { %5657 = vmatprep.subr.mxu1 %v5548_v30  ;;  %6314 = vmatprep.subr.mxu0 %v6274_v27  ;;  %v6439_v30 = vld [vmem:[%s16111_s3 + $0x2000] sm:$0xff]  ;;  %v5924_v27 = vld [vmem:[%s16111_s3 + $0x1df8] sm:$0xff] }
 0x323   :  { %5658 = vmatpush1.msra.mxu1 %v5547_v28  ;;  %6315 = vmatpush1.msra.mxu0 %v6273_v26  ;;  %v6650_v28 = vld [vmem:[%s16111_s3 + $0x21e8] sm:$0xff]  ;;  %v5923_v26 = vld [vmem:[%s16111_s3 + $0x1df0] sm:$0xff] }
 0x324   :  { %5659 = vmatprep.subr.mxu1 %v5544_v29  ;;  %6316 = vmatprep.subr.mxu0 %v6270_v31  ;;  %v6649_v29 = vld [vmem:[%s16111_s3 + $0x21e0] sm:$0xff] }
 0x325   :  { %5660 = vmatpush1.msra.mxu1 %v5543_v33  ;;  %6317 = vmatpush1.msra.mxu0 %v6269_v34  ;;  %v13967_v31 = vld [vmem:[#allocation2 + $0x40] sm:$0x3]  ;;  %v5920_v33 = vld [vmem:[%s16111_s3 + $0x1dd8] sm:$0xff]  ;;  %v6646_v34 = vld [vmem:[%s16111_s3 + $0x21c8] sm:$0xff] }
 0x326   :  { %5661 = vmatprep.subr.mxu1 %v5540_v36  ;;  %6318 = vmatprep.subr.mxu0 %v6266_v37  ;;  %v5919_v36 = vld [vmem:[%s16111_s3 + $0x1dd0] sm:$0xff]  ;;  %v5916_v37 = vld [vmem:[%s16111_s3 + $0x1db8] sm:$0xff] }
 0x327   :  { %5662 = vmatpush1.msra.mxu1 %v5539_v3  ;;  %6319 = vmatpush1.msra.mxu0 %v6265_v41  ;;  %v3699_v42 = vpop.f32.mrf.mxu1  ;;  %v6642_v3 = vld [vmem:[%s16111_s3 + $0x21a8] sm:$0xff]  ;;  %v5915_v41 = vld [vmem:[%s16111_s3 + $0x1db0] sm:$0xff] }
 0x328   :  { %5663 = vmatprep.subr.mxu1 %v5536_v16  ;;  %6320 = vmatprep.subr.mxu0 %v6262_v38  ;;  %v13836_v35 = vadd.f32 %v3699_v42, %v13726_v57  ;;  %v6452_v57 = vld [vmem:[%s16111_s3 + $0x2068] sm:$0xff]  ;;  %v6641_v16 = vld [vmem:[%s16111_s3 + $0x21a0] sm:$0xff]  ;;  %v5912_v38 = vld [vmem:[%s16111_s3 + $0x1d98] sm:$0xff] }
 0x329   :  { %5664 = vmatpush1.msra.mxu1 %v5535_v18  ;;  %6321 = vmatpush1.msra.mxu0 %v6261_v5  ;;  %v3701_v1 = vpop.f32.mrf.mxu1  ;;  %v6638_v18 = vld [vmem:[%s16111_s3 + $0x2188] sm:$0xff]  ;;  %v5911_v5 = vld [vmem:[%s16111_s3 + $0x1d90] sm:$0xff] }
 0x32a   :  { %5665 = vmatprep.subr.mxu1 %v5532_v19  ;;  %6322 = vmatprep.subr.mxu0 %v6258_v40  ;;  %v13845_v13 = vadd.f32 %v3701_v1, %v13735_v59  ;;  %v6448_v59 = vld [vmem:[%s16111_s3 + $0x2048] sm:$0xff]  ;;  %v6637_v19 = vld [vmem:[%s16111_s3 + $0x2180] sm:$0xff]  ;;  %v5908_v40 = vld [vmem:[%s16111_s3 + $0x1d78] sm:$0xff] }
 0x32b   :  { %5666 = vmatpush1.msra.mxu1 %v5531_v49  ;;  %5699 = vmatprep.mubr.f32.mxu1 %v9955_v6  ;;  %v6634_v42 = vld [vmem:[%s16111_s3 + $0x2168] sm:$0xff]  ;;  %v5907_v49 = vld [vmem:[%s16111_s3 + $0x1d70] sm:$0xff] }
 0x32c   :  { %6323 = vmatpush1.msra.mxu0 %v6257_v15  ;;  %6356 = vmatprep.mubr.f32.mxu0 %v9955_v6  ;;  %v5904_v15 = vld [vmem:[%s16111_s3 + $0x1d58] sm:$0xff]  ;;  %v6630_v1 = vld [vmem:[%s16111_s3 + $0x2148] sm:$0xff] }
 0x32d   :  { %9668 = vmatmul.mubr.msk.f32.vlgmr.msra.gmra.mxu1 %vm165_vm1, %v13417_v23  ;;  %5833 = vmatprep.subr.mxu1 %v5742_v45  ;;  %v6463_v23 = vld [vmem:[%s16111_s3 + $0x20c0] sm:$0xff]  ;;  %v5903_v45 = vld [vmem:[%s16111_s3 + $0x1d50] sm:$0xff] }
 0x32e   :  { %9675 = vmatmul.mubr.msk.f32.vlgmr.msra.gmra.mxu0 %vm165_vm1, %v13860_v47  ;;  %6490 = vmatprep.subr.mxu0 %v6468_v12  ;;  %v6629_v12 = vld [vmem:[%s16111_s3 + $0x2140] sm:$0xff] }
 0x32f   :  { %5834 = vmatpush1.msra.mxu1 %v5741_v46  ;;  %6491 = vmatpush1.msra.mxu0 %v6467_v62  ;;  %v5900_v46 = vld [vmem:[%s16111_s3 + $0x1d38] sm:$0xff]  ;;  %v6626_v62 = vld [vmem:[%s16111_s3 + $0x2128] sm:$0xff] }
 0x330   :  { %5835 = vmatprep.subr.mxu1 %v5738_v48  ;;  %6492 = vmatprep.subr.mxu0 %v6464_v17  ;;  %v5899_v48 = vld [vmem:[%s16111_s3 + $0x1d30] sm:$0xff]  ;;  %v6625_v17 = vld [vmem:[%s16111_s3 + $0x2120] sm:$0xff] }
 0x331   :  { %5836 = vmatpush1.msra.mxu1 %v5737_v7  ;;  %6493 = vmatpush1.msra.mxu0 %v6463_v23  ;;  %v5896_v7 = vld [vmem:[%s16111_s3 + $0x1d18] sm:$0xff]  ;;  %v6622_v23 = vld [vmem:[%s16111_s3 + $0x2108] sm:$0xff] }
 0x332   :  { %5837 = vmatprep.subr.mxu1 %v5734_v58  ;;  %6494 = vmatprep.subr.mxu0 %v6460_v14  ;;  %v5895_v58 = vld [vmem:[%s16111_s3 + $0x1d10] sm:$0xff]  ;;  %v6621_v14 = vld [vmem:[%s16111_s3 + $0x2100] sm:$0xff] }
 0x333   :  { %5838 = vmatpush1.msra.mxu1 %v5733_v53  ;;  %6495 = vmatpush1.msra.mxu0 %v6459_v63  ;;  %v6106_v53 = vld [vmem:[%s16111_s3 + $0x1ef8] sm:$0xff]  ;;  %v6832_v63 = vld [vmem:[%s16111_s3 + $0x22e8] sm:$0xff] }
 0x334   :  { %5839 = vmatprep.subr.mxu1 %v5730_v51  ;;  %6496 = vmatprep.subr.mxu0 %v6456_v9  ;;  %v6105_v51 = vld [vmem:[%s16111_s3 + $0x1ef0] sm:$0xff]  ;;  %v6831_v9 = vld [vmem:[%s16111_s3 + $0x22e0] sm:$0xff] }
 0x335   :  { %5840 = vmatpush1.msra.mxu1 %v5729_v54  ;;  %6497 = vmatpush1.msra.mxu0 %v6455_v55  ;;  %v14071_v54 = vld [vmem:[#allocation2 + $0x42] sm:$0x3]  ;;  %v6102_v55 = vld [vmem:[%s16111_s3 + $0x1ed8] sm:$0xff] }
 0x336   :  { %5841 = vmatprep.subr.mxu1 %v5726_v56  ;;  %6498 = vmatprep.subr.mxu0 %v6452_v57  ;;  %v6828_v56 = vld [vmem:[%s16111_s3 + $0x22c8] sm:$0xff]  ;;  %v6101_v57 = vld [vmem:[%s16111_s3 + $0x1ed0] sm:$0xff] }
 0x337   :  { %5842 = vmatpush1.msra.mxu1 %v5725_v44  ;;  %6499 = vmatpush1.msra.mxu0 %v6451_v22  ;;  %v6098_v44 = vld [vmem:[%s16111_s3 + $0x1eb8] sm:$0xff]  ;;  %v6824_v22 = vld [vmem:[%s16111_s3 + $0x22a8] sm:$0xff] }
 0x338   :  { %5843 = vmatprep.subr.mxu1 %v5722_v60  ;;  %6500 = vmatprep.subr.mxu0 %v6448_v59  ;;  %v6097_v60 = vld [vmem:[%s16111_s3 + $0x1eb0] sm:$0xff]  ;;  %v6823_v59 = vld [vmem:[%s16111_s3 + $0x22a0] sm:$0xff] }
 0x339   :  { %5844 = vmatpush1.msra.mxu1 %v5721_v8  ;;  %6501 = vmatpush1.msra.mxu0 %v6447_v52  ;;  %v3881_v50 = vpop.f32.mrf.mxu1  ;;  %v6094_v8 = vld [vmem:[%s16111_s3 + $0x1e98] sm:$0xff]  ;;  %v6820_v52 = vld [vmem:[%s16111_s3 + $0x2288] sm:$0xff] }
 0x33a   :  { %5845 = vmatprep.subr.mxu1 %v5718_v61  ;;  %6502 = vmatprep.subr.mxu0 %v6444_v32  ;;  %v13946_v24 = vadd.f32 %v3881_v50, %v13836_v35  ;;  %v6633_v35 = vld [vmem:[%s16111_s3 + $0x2160] sm:$0xff]  ;;  %v6093_v61 = vld [vmem:[%s16111_s3 + $0x1e90] sm:$0xff]  ;;  %v6086_v50 = vld [vmem:[%s16111_s3 + $0x1e58] sm:$0xff] }
 0x33b   :  { %5846 = vmatpush1.msra.mxu1 %v5717_v21  ;;  %6503 = vmatpush1.msra.mxu0 %v6443_v39  ;;  %v6819_v32 = vld [vmem:[%s16111_s3 + $0x2280] sm:$0xff]  ;;  %v6090_v21 = vld [vmem:[%s16111_s3 + $0x1e78] sm:$0xff]  ;;  %v6816_v39 = vld [vmem:[%s16111_s3 + $0x2268] sm:$0xff] }
 0x33c   :  { %5847 = vmatprep.subr.mxu1 %v5714_v11  ;;  %6504 = vmatprep.subr.mxu0 %v6440_v10  ;;  %v6089_v11 = vld [vmem:[%s16111_s3 + $0x1e70] sm:$0xff]  ;;  %v6815_v10 = vld [vmem:[%s16111_s3 + $0x2260] sm:$0xff] }
 0x33d   :  { %5848 = vmatpush1.msra.mxu1 %v5713_v20  ;;  %5881 = vmatprep.mubr.f32.mxu1 %v9955_v6  ;;  %v6812_v20 = vld [vmem:[%s16111_s3 + $0x2248] sm:$0xff] }
 0x33e   :  { %6505 = vmatpush1.msra.mxu0 %v6439_v30  ;;  %6538 = vmatprep.mubr.f32.mxu0 %v9955_v6  ;;  %v6085_v30 = vld [vmem:[%s16111_s3 + $0x1e50] sm:$0xff] }
 0x33f   :  { %9670 = vmatmul.mubr.msk.f32.vlgmr.msra.gmra.mxu1 %vm165_vm1, %v13530_v0  ;;  %6015 = vmatprep.subr.mxu1 %v5924_v27  ;;  %v6645_v0 = vld [vmem:[%s16111_s3 + $0x21c0] sm:$0xff] }
 0x340   :  { %9677 = vmatmul.mubr.msk.f32.vlgmr.msra.gmra.mxu0 %vm165_vm1, %v13967_v31  ;;  %6672 = vmatprep.subr.mxu0 %v6650_v28  ;;  %v6811_v27 = vld [vmem:[%s16111_s3 + $0x2240] sm:$0xff]  ;;  %v6082_v28 = vld [vmem:[%s16111_s3 + $0x1e38] sm:$0xff] }
 0x341   :  { %6016 = vmatpush1.msra.mxu1 %v5923_v26  ;;  %6673 = vmatpush1.msra.mxu0 %v6649_v29  ;;  %v6808_v26 = vld [vmem:[%s16111_s3 + $0x2228] sm:$0xff]  ;;  %v6081_v29 = vld [vmem:[%s16111_s3 + $0x1e30] sm:$0xff] }
 0x342   :  { %6017 = vmatprep.subr.mxu1 %v5920_v33  ;;  %6674 = vmatprep.subr.mxu0 %v6646_v34  ;;  %v6807_v33 = vld [vmem:[%s16111_s3 + $0x2220] sm:$0xff]  ;;  %v6078_v34 = vld [vmem:[%s16111_s3 + $0x1e18] sm:$0xff] }
 0x343   :  { %6018 = vmatpush1.msra.mxu1 %v5919_v36  ;;  %6675 = vmatpush1.msra.mxu0 %v6645_v0  ;;  %v6804_v36 = vld [vmem:[%s16111_s3 + $0x2208] sm:$0xff]  ;;  %v6077_v0 = vld [vmem:[%s16111_s3 + $0x1e10] sm:$0xff] }
 0x344   :  { %6019 = vmatprep.subr.mxu1 %v5916_v37  ;;  %6676 = vmatprep.subr.mxu0 %v6642_v3  ;;  %v6803_v37 = vld [vmem:[%s16111_s3 + $0x2200] sm:$0xff]  ;;  %v6288_v3 = vld [vmem:[%s16111_s3 + $0x1ff8] sm:$0xff] }
 0x345   :  { %6020 = vmatpush1.msra.mxu1 %v5915_v41  ;;  %6677 = vmatpush1.msra.mxu0 %v6641_v16  ;;  %v7014_v41 = vld [vmem:[%s16111_s3 + $0x23e8] sm:$0xff]  ;;  %v6287_v16 = vld [vmem:[%s16111_s3 + $0x1ff0] sm:$0xff] }
 0x346   :  { %6021 = vmatprep.subr.mxu1 %v5912_v38  ;;  %6678 = vmatprep.subr.mxu0 %v6638_v18  ;;  %v7013_v38 = vld [vmem:[%s16111_s3 + $0x23e0] sm:$0xff] }
 0x347   :  { %6022 = vmatpush1.msra.mxu1 %v5911_v5  ;;  %6679 = vmatpush1.msra.mxu0 %v6637_v19  ;;  %v14175_v18 = vld [vmem:[#allocation2 + $0x44] sm:$0x3]  ;;  %v6284_v5 = vld [vmem:[%s16111_s3 + $0x1fd8] sm:$0xff]  ;;  %v7010_v19 = vld [vmem:[%s16111_s3 + $0x23c8] sm:$0xff] }
 0x348   :  { %6023 = vmatprep.subr.mxu1 %v5908_v40  ;;  %6680 = vmatprep.subr.mxu0 %v6634_v42  ;;  %v6283_v40 = vld [vmem:[%s16111_s3 + $0x1fd0] sm:$0xff]  ;;  %v6280_v42 = vld [vmem:[%s16111_s3 + $0x1fb8] sm:$0xff] }
 0x349   :  { %6024 = vmatpush1.msra.mxu1 %v5907_v49  ;;  %6681 = vmatpush1.msra.mxu0 %v6633_v35  ;;  %v7006_v49 = vld [vmem:[%s16111_s3 + $0x23a8] sm:$0xff]  ;;  %v6279_v35 = vld [vmem:[%s16111_s3 + $0x1fb0] sm:$0xff] }
 0x34a   :  { %6025 = vmatprep.subr.mxu1 %v5904_v15  ;;  %6682 = vmatprep.subr.mxu0 %v6630_v1  ;;  %v7005_v15 = vld [vmem:[%s16111_s3 + $0x23a0] sm:$0xff]  ;;  %v6276_v1 = vld [vmem:[%s16111_s3 + $0x1f98] sm:$0xff] }
 0x34b   :  { %6026 = vmatpush1.msra.mxu1 %v5903_v45  ;;  %6683 = vmatpush1.msra.mxu0 %v6629_v12  ;;  %v7002_v45 = vld [vmem:[%s16111_s3 + $0x2388] sm:$0xff]  ;;  %v6275_v12 = vld [vmem:[%s16111_s3 + $0x1f90] sm:$0xff] }
 0x34c   :  { %6027 = vmatprep.subr.mxu1 %v5900_v46  ;;  %6684 = vmatprep.subr.mxu0 %v6626_v62  ;;  %v7001_v46 = vld [vmem:[%s16111_s3 + $0x2380] sm:$0xff]  ;;  %v6272_v62 = vld [vmem:[%s16111_s3 + $0x1f78] sm:$0xff] }
 0x34d   :  { %6028 = vmatpush1.msra.mxu1 %v5899_v48  ;;  %6685 = vmatpush1.msra.mxu0 %v6625_v17  ;;  %v6998_v48 = vld [vmem:[%s16111_s3 + $0x2368] sm:$0xff]  ;;  %v6271_v17 = vld [vmem:[%s16111_s3 + $0x1f70] sm:$0xff] }
 0x34e   :  { %6029 = vmatprep.subr.mxu1 %v5896_v7  ;;  %6686 = vmatprep.subr.mxu0 %v6622_v23  ;;  %v6997_v7 = vld [vmem:[%s16111_s3 + $0x2360] sm:$0xff]  ;;  %v6268_v23 = vld [vmem:[%s16111_s3 + $0x1f58] sm:$0xff] }
 0x34f   :  { %6030 = vmatpush1.msra.mxu1 %v5895_v58  ;;  %6063 = vmatprep.mubr.f32.mxu1 %v9955_v6  ;;  %v6994_v58 = vld [vmem:[%s16111_s3 + $0x2348] sm:$0xff] }
 0x350   :  { %6687 = vmatpush1.msra.mxu0 %v6621_v14  ;;  %6720 = vmatprep.mubr.f32.mxu0 %v9955_v6  ;;  %v6267_v14 = vld [vmem:[%s16111_s3 + $0x1f50] sm:$0xff] }
 0x351   :  { %9672 = vmatmul.mubr.msk.f32.vlgmr.msra.gmra.mxu1 %vm165_vm1, %v13640_v2  ;;  %6197 = vmatprep.subr.mxu1 %v6106_v53  ;;  %v6827_v2 = vld [vmem:[%s16111_s3 + $0x22c0] sm:$0xff] }
 0x352   :  { %9679 = vmatmul.mubr.msk.f32.vlgmr.msra.gmra.mxu0 %vm165_vm1, %v14071_v54  ;;  %6854 = vmatprep.subr.mxu0 %v6832_v63  ;;  %v6993_v53 = vld [vmem:[%s16111_s3 + $0x2340] sm:$0xff]  ;;  %v6264_v63 = vld [vmem:[%s16111_s3 + $0x1f38] sm:$0xff] }
 0x353   :  { %6198 = vmatpush1.msra.mxu1 %v6105_v51  ;;  %6855 = vmatpush1.msra.mxu0 %v6831_v9  ;;  %v6990_v51 = vld [vmem:[%s16111_s3 + $0x2328] sm:$0xff]  ;;  %v6263_v9 = vld [vmem:[%s16111_s3 + $0x1f30] sm:$0xff] }
 0x354   :  { %6199 = vmatprep.subr.mxu1 %v6102_v55  ;;  %6856 = vmatprep.subr.mxu0 %v6828_v56  ;;  %v6989_v55 = vld [vmem:[%s16111_s3 + $0x2320] sm:$0xff]  ;;  %v6260_v56 = vld [vmem:[%s16111_s3 + $0x1f18] sm:$0xff] }
 0x355   :  { %6200 = vmatpush1.msra.mxu1 %v6101_v57  ;;  %6857 = vmatpush1.msra.mxu0 %v6827_v2  ;;  %v6986_v57 = vld [vmem:[%s16111_s3 + $0x2308] sm:$0xff]  ;;  %v6259_v2 = vld [vmem:[%s16111_s3 + $0x1f10] sm:$0xff] }
 0x356   :  { %6201 = vmatprep.subr.mxu1 %v6098_v44  ;;  %6858 = vmatprep.subr.mxu0 %v6824_v22  ;;  %v6985_v44 = vld [vmem:[%s16111_s3 + $0x2300] sm:$0xff]  ;;  %v6470_v22 = vld [vmem:[%s16111_s3 + $0x20f8] sm:$0xff] }
 0x357   :  { %6202 = vmatpush1.msra.mxu1 %v6097_v60  ;;  %6859 = vmatpush1.msra.mxu0 %v6823_v59  ;;  %v7196_v60 = vld [vmem:[%s16111_s3 + $0x24e8] sm:$0xff]  ;;  %v6469_v59 = vld [vmem:[%s16111_s3 + $0x20f0] sm:$0xff] }
 0x358   :  { %6203 = vmatprep.subr.mxu1 %v6094_v8  ;;  %6860 = vmatprep.subr.mxu0 %v6820_v52  ;;  %v7195_v8 = vld [vmem:[%s16111_s3 + $0x24e0] sm:$0xff] }
 0x359   :  { %6204 = vmatpush1.msra.mxu1 %v6093_v61  ;;  %6861 = vmatpush1.msra.mxu0 %v6819_v32  ;;  %v14279_v52 = vld [vmem:[#allocation2 + $0x46] sm:$0x3]  ;;  %v6466_v61 = vld [vmem:[%s16111_s3 + $0x20d8] sm:$0xff]  ;;  %v7192_v32 = vld [vmem:[%s16111_s3 + $0x24c8] sm:$0xff] }
 0x35a   :  { %6205 = vmatprep.subr.mxu1 %v6090_v21  ;;  %6862 = vmatprep.subr.mxu0 %v6816_v39  ;;  %v6465_v21 = vld [vmem:[%s16111_s3 + $0x20d0] sm:$0xff]  ;;  %v6462_v39 = vld [vmem:[%s16111_s3 + $0x20b8] sm:$0xff] }
 0x35b   :  { %6206 = vmatpush1.msra.mxu1 %v6089_v11  ;;  %6863 = vmatpush1.msra.mxu0 %v6815_v10  ;;  %v7188_v11 = vld [vmem:[%s16111_s3 + $0x24a8] sm:$0xff]  ;;  %v6461_v10 = vld [vmem:[%s16111_s3 + $0x20b0] sm:$0xff] }
 0x35c   :  { %6207 = vmatprep.subr.mxu1 %v6086_v50  ;;  %6864 = vmatprep.subr.mxu0 %v6812_v20  ;;  %v7187_v50 = vld [vmem:[%s16111_s3 + $0x24a0] sm:$0xff]  ;;  %v6458_v20 = vld [vmem:[%s16111_s3 + $0x2098] sm:$0xff] }
 0x35d   :  { %6208 = vmatpush1.msra.mxu1 %v6085_v30  ;;  %6865 = vmatpush1.msra.mxu0 %v6811_v27  ;;  %v7184_v30 = vld [vmem:[%s16111_s3 + $0x2488] sm:$0xff]  ;;  %v6457_v27 = vld [vmem:[%s16111_s3 + $0x2090] sm:$0xff] }
 0x35e   :  { %6209 = vmatprep.subr.mxu1 %v6082_v28  ;;  %6866 = vmatprep.subr.mxu0 %v6808_v26  ;;  %v7183_v28 = vld [vmem:[%s16111_s3 + $0x2480] sm:$0xff]  ;;  %v6454_v26 = vld [vmem:[%s16111_s3 + $0x2078] sm:$0xff] }
 0x35f   :  { %6210 = vmatpush1.msra.mxu1 %v6081_v29  ;;  %6867 = vmatpush1.msra.mxu0 %v6807_v33  ;;  %v7180_v29 = vld [vmem:[%s16111_s3 + $0x2468] sm:$0xff]  ;;  %v6453_v33 = vld [vmem:[%s16111_s3 + $0x2070] sm:$0xff] }
 0x360   :  { %6211 = vmatprep.subr.mxu1 %v6078_v34  ;;  %6868 = vmatprep.subr.mxu0 %v6804_v36  ;;  %v7179_v34 = vld [vmem:[%s16111_s3 + $0x2460] sm:$0xff]  ;;  %v6450_v36 = vld [vmem:[%s16111_s3 + $0x2058] sm:$0xff] }
 0x361   :  { %6212 = vmatpush1.msra.mxu1 %v6077_v0  ;;  %6245 = vmatprep.mubr.f32.mxu1 %v9955_v6  ;;  %v7176_v0 = vld [vmem:[%s16111_s3 + $0x2448] sm:$0xff] }
 0x362   :  { %6869 = vmatpush1.msra.mxu0 %v6803_v37  ;;  %6902 = vmatprep.mubr.f32.mxu0 %v9955_v6  ;;  %v6449_v37 = vld [vmem:[%s16111_s3 + $0x2050] sm:$0xff] }
 0x363   :  { %9674 = vmatmul.mubr.msk.f32.vlgmr.msra.gmra.mxu1 %vm165_vm1, %v13750_v25  ;;  %6379 = vmatprep.subr.mxu1 %v6288_v3  ;;  %v7009_v25 = vld [vmem:[%s16111_s3 + $0x23c0] sm:$0xff] }
 0x364   :  { %9681 = vmatmul.mubr.msk.f32.vlgmr.msra.gmra.mxu0 %vm165_vm1, %v14175_v18  ;;  %7036 = vmatprep.subr.mxu0 %v7014_v41  ;;  %v7175_v3 = vld [vmem:[%s16111_s3 + $0x2440] sm:$0xff]  ;;  %v6446_v41 = vld [vmem:[%s16111_s3 + $0x2038] sm:$0xff] }
 0x365   :  { %6380 = vmatpush1.msra.mxu1 %v6287_v16  ;;  %7037 = vmatpush1.msra.mxu0 %v7013_v38  ;;  %v7172_v16 = vld [vmem:[%s16111_s3 + $0x2428] sm:$0xff]  ;;  %v6445_v38 = vld [vmem:[%s16111_s3 + $0x2030] sm:$0xff] }
 0x366   :  { %6381 = vmatprep.subr.mxu1 %v6284_v5  ;;  %7038 = vmatprep.subr.mxu0 %v7010_v19  ;;  %v7171_v5 = vld [vmem:[%s16111_s3 + $0x2420] sm:$0xff]  ;;  %v6442_v19 = vld [vmem:[%s16111_s3 + $0x2018] sm:$0xff] }
 0x367   :  { %6382 = vmatpush1.msra.mxu1 %v6283_v40  ;;  %7039 = vmatpush1.msra.mxu0 %v7009_v25  ;;  %v7168_v40 = vld [vmem:[%s16111_s3 + $0x2408] sm:$0xff]  ;;  %v6441_v25 = vld [vmem:[%s16111_s3 + $0x2010] sm:$0xff] }
 0x368   :  { %6383 = vmatprep.subr.mxu1 %v6280_v42  ;;  %7040 = vmatprep.subr.mxu0 %v7006_v49  ;;  %v7167_v42 = vld [vmem:[%s16111_s3 + $0x2400] sm:$0xff]  ;;  %v6652_v49 = vld [vmem:[%s16111_s3 + $0x21f8] sm:$0xff] }
 0x369   :  { %6384 = vmatpush1.msra.mxu1 %v6279_v35  ;;  %7041 = vmatpush1.msra.mxu0 %v7005_v15  ;;  %v7378_v35 = vld [vmem:[%s16111_s3 + $0x25e8] sm:$0xff]  ;;  %v6651_v15 = vld [vmem:[%s16111_s3 + $0x21f0] sm:$0xff] }
 0x36a   :  { %6385 = vmatprep.subr.mxu1 %v6276_v1  ;;  %7042 = vmatprep.subr.mxu0 %v7002_v45  ;;  %v7377_v1 = vld [vmem:[%s16111_s3 + $0x25e0] sm:$0xff]  ;;  %v14383_v45 = vld [vmem:[#allocation2 + $0x48] sm:$0x3] }
 0x36b   :  { %6386 = vmatpush1.msra.mxu1 %v6275_v12  ;;  %7043 = vmatpush1.msra.mxu0 %v7001_v46  ;;  %v6648_v12 = vld [vmem:[%s16111_s3 + $0x21d8] sm:$0xff]  ;;  %v7374_v46 = vld [vmem:[%s16111_s3 + $0x25c8] sm:$0xff] }
 0x36c   :  { %6387 = vmatprep.subr.mxu1 %v6272_v62  ;;  %7044 = vmatprep.subr.mxu0 %v6998_v48  ;;  %v6647_v62 = vld [vmem:[%s16111_s3 + $0x21d0] sm:$0xff]  ;;  %v6644_v48 = vld [vmem:[%s16111_s3 + $0x21b8] sm:$0xff] }
 0x36d   :  { %6388 = vmatpush1.msra.mxu1 %v6271_v17  ;;  %7045 = vmatpush1.msra.mxu0 %v6997_v7  ;;  %v7370_v17 = vld [vmem:[%s16111_s3 + $0x25a8] sm:$0xff]  ;;  %v6643_v7 = vld [vmem:[%s16111_s3 + $0x21b0] sm:$0xff] }
 0x36e   :  { %6389 = vmatprep.subr.mxu1 %v6268_v23  ;;  %7046 = vmatprep.subr.mxu0 %v6994_v58  ;;  %v7369_v23 = vld [vmem:[%s16111_s3 + $0x25a0] sm:$0xff]  ;;  %v6640_v58 = vld [vmem:[%s16111_s3 + $0x2198] sm:$0xff] }
 0x36f   :  { %6390 = vmatpush1.msra.mxu1 %v6267_v14  ;;  %7047 = vmatpush1.msra.mxu0 %v6993_v53  ;;  %v7366_v14 = vld [vmem:[%s16111_s3 + $0x2588] sm:$0xff]  ;;  %v6639_v53 = vld [vmem:[%s16111_s3 + $0x2190] sm:$0xff] }
 0x370   :  { %6391 = vmatprep.subr.mxu1 %v6264_v63  ;;  %7048 = vmatprep.subr.mxu0 %v6990_v51  ;;  %v7365_v63 = vld [vmem:[%s16111_s3 + $0x2580] sm:$0xff]  ;;  %v6636_v51 = vld [vmem:[%s16111_s3 + $0x2178] sm:$0xff] }
 0x371   :  { %6392 = vmatpush1.msra.mxu1 %v6263_v9  ;;  %7049 = vmatpush1.msra.mxu0 %v6989_v55  ;;  %v7362_v9 = vld [vmem:[%s16111_s3 + $0x2568] sm:$0xff]  ;;  %v6635_v55 = vld [vmem:[%s16111_s3 + $0x2170] sm:$0xff] }
 0x372   :  { %6393 = vmatprep.subr.mxu1 %v6260_v56  ;;  %7050 = vmatprep.subr.mxu0 %v6986_v57  ;;  %v7361_v56 = vld [vmem:[%s16111_s3 + $0x2560] sm:$0xff]  ;;  %v6632_v57 = vld [vmem:[%s16111_s3 + $0x2158] sm:$0xff] }
 0x373   :  { %6394 = vmatpush1.msra.mxu1 %v6259_v2  ;;  %6427 = vmatprep.mubr.f32.mxu1 %v9955_v6  ;;  %v7358_v2 = vld [vmem:[%s16111_s3 + $0x2548] sm:$0xff] }
 0x374   :  { %7051 = vmatpush1.msra.mxu0 %v6985_v44  ;;  %7084 = vmatprep.mubr.f32.mxu0 %v9955_v6  ;;  %v6631_v44 = vld [vmem:[%s16111_s3 + $0x2150] sm:$0xff] }
 0x375   :  { %9676 = vmatmul.mubr.msk.f32.vlgmr.msra.gmra.mxu1 %vm165_vm1, %v13860_v47  ;;  %6561 = vmatprep.subr.mxu1 %v6470_v22  ;;  %v7191_v47 = vld [vmem:[%s16111_s3 + $0x24c0] sm:$0xff] }
 0x376   :  { %9683 = vmatmul.mubr.msk.f32.vlgmr.msra.gmra.mxu0 %vm165_vm1, %v14279_v52  ;;  %7218 = vmatprep.subr.mxu0 %v7196_v60  ;;  %v7357_v22 = vld [vmem:[%s16111_s3 + $0x2540] sm:$0xff]  ;;  %v6628_v60 = vld [vmem:[%s16111_s3 + $0x2138] sm:$0xff] }
 0x377   :  { %6562 = vmatpush1.msra.mxu1 %v6469_v59  ;;  %7219 = vmatpush1.msra.mxu0 %v7195_v8  ;;  %v7354_v59 = vld [vmem:[%s16111_s3 + $0x2528] sm:$0xff]  ;;  %v6627_v8 = vld [vmem:[%s16111_s3 + $0x2130] sm:$0xff] }
 0x378   :  { %6563 = vmatprep.subr.mxu1 %v6466_v61  ;;  %7220 = vmatprep.subr.mxu0 %v7192_v32  ;;  %v7353_v61 = vld [vmem:[%s16111_s3 + $0x2520] sm:$0xff]  ;;  %v6624_v32 = vld [vmem:[%s16111_s3 + $0x2118] sm:$0xff] }
 0x379   :  { %6564 = vmatpush1.msra.mxu1 %v6465_v21  ;;  %7221 = vmatpush1.msra.mxu0 %v7191_v47  ;;  %v7350_v21 = vld [vmem:[%s16111_s3 + $0x2508] sm:$0xff]  ;;  %v6623_v47 = vld [vmem:[%s16111_s3 + $0x2110] sm:$0xff] }
 0x37a   :  { %6565 = vmatprep.subr.mxu1 %v6462_v39  ;;  %7222 = vmatprep.subr.mxu0 %v7188_v11  ;;  %v7349_v39 = vld [vmem:[%s16111_s3 + $0x2500] sm:$0xff]  ;;  %v6834_v11 = vld [vmem:[%s16111_s3 + $0x22f8] sm:$0xff] }
 0x37b   :  { %6566 = vmatpush1.msra.mxu1 %v6461_v10  ;;  %7223 = vmatpush1.msra.mxu0 %v7187_v50  ;;  %v7560_v10 = vld [vmem:[%s16111_s3 + $0x26e8] sm:$0xff]  ;;  %v6833_v50 = vld [vmem:[%s16111_s3 + $0x22f0] sm:$0xff] }
 0x37c   :  { %6567 = vmatprep.subr.mxu1 %v6458_v20  ;;  %7224 = vmatprep.subr.mxu0 %v7184_v30  ;;  %v7559_v20 = vld [vmem:[%s16111_s3 + $0x26e0] sm:$0xff]  ;;  %v14487_v30 = vld [vmem:[#allocation2 + $0x4a] sm:$0x3] }
 0x37d   :  { %6568 = vmatpush1.msra.mxu1 %v6457_v27  ;;  %7225 = vmatpush1.msra.mxu0 %v7183_v28  ;;  %v6830_v27 = vld [vmem:[%s16111_s3 + $0x22d8] sm:$0xff]  ;;  %v7556_v28 = vld [vmem:[%s16111_s3 + $0x26c8] sm:$0xff] }
 0x37e   :  { %6569 = vmatprep.subr.mxu1 %v6454_v26  ;;  %7226 = vmatprep.subr.mxu0 %v7180_v29  ;;  %v6829_v26 = vld [vmem:[%s16111_s3 + $0x22d0] sm:$0xff]  ;;  %v6826_v29 = vld [vmem:[%s16111_s3 + $0x22b8] sm:$0xff] }
 0x37f   :  { %6570 = vmatpush1.msra.mxu1 %v6453_v33  ;;  %7227 = vmatpush1.msra.mxu0 %v7179_v34  ;;  %v7552_v33 = vld [vmem:[%s16111_s3 + $0x26a8] sm:$0xff]  ;;  %v6825_v34 = vld [vmem:[%s16111_s3 + $0x22b0] sm:$0xff] }
 0x380   :  { %6571 = vmatprep.subr.mxu1 %v6450_v36  ;;  %7228 = vmatprep.subr.mxu0 %v7176_v0  ;;  %v7551_v36 = vld [vmem:[%s16111_s3 + $0x26a0] sm:$0xff]  ;;  %v6822_v0 = vld [vmem:[%s16111_s3 + $0x2298] sm:$0xff] }
 0x381   :  { %6572 = vmatpush1.msra.mxu1 %v6449_v37  ;;  %7229 = vmatpush1.msra.mxu0 %v7175_v3  ;;  %v7548_v37 = vld [vmem:[%s16111_s3 + $0x2688] sm:$0xff]  ;;  %v6821_v3 = vld [vmem:[%s16111_s3 + $0x2290] sm:$0xff] }
 0x382   :  { %6573 = vmatprep.subr.mxu1 %v6446_v41  ;;  %7230 = vmatprep.subr.mxu0 %v7172_v16  ;;  %v7547_v41 = vld [vmem:[%s16111_s3 + $0x2680] sm:$0xff]  ;;  %v6818_v16 = vld [vmem:[%s16111_s3 + $0x2278] sm:$0xff] }
 0x383   :  { %6574 = vmatpush1.msra.mxu1 %v6445_v38  ;;  %7231 = vmatpush1.msra.mxu0 %v7171_v5  ;;  %v7544_v38 = vld [vmem:[%s16111_s3 + $0x2668] sm:$0xff]  ;;  %v6817_v5 = vld [vmem:[%s16111_s3 + $0x2270] sm:$0xff] }
 0x384   :  { %6575 = vmatprep.subr.mxu1 %v6442_v19  ;;  %7232 = vmatprep.subr.mxu0 %v7168_v40  ;;  %v7543_v19 = vld [vmem:[%s16111_s3 + $0x2660] sm:$0xff]  ;;  %v6814_v40 = vld [vmem:[%s16111_s3 + $0x2258] sm:$0xff] }
 0x385   :  { %6576 = vmatpush1.msra.mxu1 %v6441_v25  ;;  %6609 = vmatprep.mubr.f32.mxu1 %v9955_v6  ;;  %v7540_v25 = vld [vmem:[%s16111_s3 + $0x2648] sm:$0xff] }
 0x386   :  { %7233 = vmatpush1.msra.mxu0 %v7167_v42  ;;  %7266 = vmatprep.mubr.f32.mxu0 %v9955_v6  ;;  %v6813_v42 = vld [vmem:[%s16111_s3 + $0x2250] sm:$0xff] }
 0x387   :  { %9678 = vmatmul.mubr.msk.f32.vlgmr.msra.gmra.mxu1 %vm165_vm1, %v13967_v31  ;;  %6743 = vmatprep.subr.mxu1 %v6652_v49  ;;  %v7373_v31 = vld [vmem:[%s16111_s3 + $0x25c0] sm:$0xff] }
 0x388   :  { %9685 = vmatmul.mubr.msk.f32.vlgmr.msra.gmra.mxu0 %vm165_vm1, %v14383_v45  ;;  %7400 = vmatprep.subr.mxu0 %v7378_v35  ;;  %v7539_v49 = vld [vmem:[%s16111_s3 + $0x2640] sm:$0xff]  ;;  %v6810_v35 = vld [vmem:[%s16111_s3 + $0x2238] sm:$0xff] }
 0x389   :  { %6744 = vmatpush1.msra.mxu1 %v6651_v15  ;;  %7401 = vmatpush1.msra.mxu0 %v7377_v1  ;;  %v7536_v15 = vld [vmem:[%s16111_s3 + $0x2628] sm:$0xff]  ;;  %v6809_v1 = vld [vmem:[%s16111_s3 + $0x2230] sm:$0xff] }
 0x38a   :  { %6745 = vmatprep.subr.mxu1 %v6648_v12  ;;  %7402 = vmatprep.subr.mxu0 %v7374_v46  ;;  %v7535_v12 = vld [vmem:[%s16111_s3 + $0x2620] sm:$0xff]  ;;  %v6806_v46 = vld [vmem:[%s16111_s3 + $0x2218] sm:$0xff] }
 0x38b   :  { %6746 = vmatpush1.msra.mxu1 %v6647_v62  ;;  %7403 = vmatpush1.msra.mxu0 %v7373_v31  ;;  %v7532_v62 = vld [vmem:[%s16111_s3 + $0x2608] sm:$0xff]  ;;  %v6805_v31 = vld [vmem:[%s16111_s3 + $0x2210] sm:$0xff] }
 0x38c   :  { %6747 = vmatprep.subr.mxu1 %v6644_v48  ;;  %7404 = vmatprep.subr.mxu0 %v7370_v17  ;;  %v7531_v48 = vld [vmem:[%s16111_s3 + $0x2600] sm:$0xff]  ;;  %v7016_v17 = vld [vmem:[%s16111_s3 + $0x23f8] sm:$0xff] }
 0x38d   :  { %6748 = vmatpush1.msra.mxu1 %v6643_v7  ;;  %7405 = vmatpush1.msra.mxu0 %v7369_v23  ;;  %v7742_v7 = vld [vmem:[%s16111_s3 + $0x27e8] sm:$0xff]  ;;  %v7015_v23 = vld [vmem:[%s16111_s3 + $0x23f0] sm:$0xff] }
 0x38e   :  { %6749 = vmatprep.subr.mxu1 %v6640_v58  ;;  %7406 = vmatprep.subr.mxu0 %v7366_v14  ;;  %v7741_v58 = vld [vmem:[%s16111_s3 + $0x27e0] sm:$0xff]  ;;  %v14591_v14 = vld [vmem:[#allocation2 + $0x4c] sm:$0x3] }
 0x38f   :  { %6750 = vmatpush1.msra.mxu1 %v6639_v53  ;;  %7407 = vmatpush1.msra.mxu0 %v7365_v63  ;;  %v7012_v53 = vld [vmem:[%s16111_s3 + $0x23d8] sm:$0xff]  ;;  %v7738_v63 = vld [vmem:[%s16111_s3 + $0x27c8] sm:$0xff] }
 0x390   :  { %6751 = vmatprep.subr.mxu1 %v6636_v51  ;;  %7408 = vmatprep.subr.mxu0 %v7362_v9  ;;  %v7011_v51 = vld [vmem:[%s16111_s3 + $0x23d0] sm:$0xff]  ;;  %v7008_v9 = vld [vmem:[%s16111_s3 + $0x23b8] sm:$0xff] }
 0x391   :  { %6752 = vmatpush1.msra.mxu1 %v6635_v55  ;;  %7409 = vmatpush1.msra.mxu0 %v7361_v56  ;;  %v7734_v55 = vld [vmem:[%s16111_s3 + $0x27a8] sm:$0xff]  ;;  %v7007_v56 = vld [vmem:[%s16111_s3 + $0x23b0] sm:$0xff] }
 0x392   :  { %6753 = vmatprep.subr.mxu1 %v6632_v57  ;;  %7410 = vmatprep.subr.mxu0 %v7358_v2  ;;  %v7733_v57 = vld [vmem:[%s16111_s3 + $0x27a0] sm:$0xff]  ;;  %v7004_v2 = vld [vmem:[%s16111_s3 + $0x2398] sm:$0xff] }
 0x393   :  { %6754 = vmatpush1.msra.mxu1 %v6631_v44  ;;  %7411 = vmatpush1.msra.mxu0 %v7357_v22  ;;  %v7730_v44 = vld [vmem:[%s16111_s3 + $0x2788] sm:$0xff]  ;;  %v7003_v22 = vld [vmem:[%s16111_s3 + $0x2390] sm:$0xff] }
 0x394   :  { %6755 = vmatprep.subr.mxu1 %v6628_v60  ;;  %7412 = vmatprep.subr.mxu0 %v7354_v59  ;;  %v7729_v60 = vld [vmem:[%s16111_s3 + $0x2780] sm:$0xff]  ;;  %v7000_v59 = vld [vmem:[%s16111_s3 + $0x2378] sm:$0xff] }
 0x395   :  { %6756 = vmatpush1.msra.mxu1 %v6627_v8  ;;  %7413 = vmatpush1.msra.mxu0 %v7353_v61  ;;  %v7726_v8 = vld [vmem:[%s16111_s3 + $0x2768] sm:$0xff]  ;;  %v6999_v61 = vld [vmem:[%s16111_s3 + $0x2370] sm:$0xff] }
 0x396   :  { %6757 = vmatprep.subr.mxu1 %v6624_v32  ;;  %7414 = vmatprep.subr.mxu0 %v7350_v21  ;;  %v7725_v32 = vld [vmem:[%s16111_s3 + $0x2760] sm:$0xff]  ;;  %v6996_v21 = vld [vmem:[%s16111_s3 + $0x2358] sm:$0xff] }
 0x397   :  { %6758 = vmatpush1.msra.mxu1 %v6623_v47  ;;  %6791 = vmatprep.mubr.f32.mxu1 %v9955_v6  ;;  %v7722_v47 = vld [vmem:[%s16111_s3 + $0x2748] sm:$0xff] }
 0x398   :  { %7415 = vmatpush1.msra.mxu0 %v7349_v39  ;;  %7448 = vmatprep.mubr.f32.mxu0 %v9955_v6  ;;  %v6995_v39 = vld [vmem:[%s16111_s3 + $0x2350] sm:$0xff] }
 0x399   :  { %9680 = vmatmul.mubr.msk.f32.vlgmr.msra.gmra.mxu1 %vm165_vm1, %v14071_v54  ;;  %6925 = vmatprep.subr.mxu1 %v6834_v11  ;;  %v7555_v54 = vld [vmem:[%s16111_s3 + $0x26c0] sm:$0xff] }
 0x39a   :  { %9687 = vmatmul.mubr.msk.f32.vlgmr.msra.gmra.mxu0 %vm165_vm1, %v14487_v30  ;;  %7582 = vmatprep.subr.mxu0 %v7560_v10  ;;  %v7721_v11 = vld [vmem:[%s16111_s3 + $0x2740] sm:$0xff]  ;;  %v6992_v10 = vld [vmem:[%s16111_s3 + $0x2338] sm:$0xff] }
 0x39b   :  { %6926 = vmatpush1.msra.mxu1 %v6833_v50  ;;  %7583 = vmatpush1.msra.mxu0 %v7559_v20  ;;  %v7718_v50 = vld [vmem:[%s16111_s3 + $0x2728] sm:$0xff]  ;;  %v6991_v20 = vld [vmem:[%s16111_s3 + $0x2330] sm:$0xff] }
 0x39c   :  { %6927 = vmatprep.subr.mxu1 %v6830_v27  ;;  %7584 = vmatprep.subr.mxu0 %v7556_v28  ;;  %v7717_v27 = vld [vmem:[%s16111_s3 + $0x2720] sm:$0xff]  ;;  %v6988_v28 = vld [vmem:[%s16111_s3 + $0x2318] sm:$0xff] }
 0x39d   :  { %6928 = vmatpush1.msra.mxu1 %v6829_v26  ;;  %7585 = vmatpush1.msra.mxu0 %v7555_v54  ;;  %v7714_v26 = vld [vmem:[%s16111_s3 + $0x2708] sm:$0xff]  ;;  %v6987_v54 = vld [vmem:[%s16111_s3 + $0x2310] sm:$0xff] }
 0x39e   :  { %6929 = vmatprep.subr.mxu1 %v6826_v29  ;;  %7586 = vmatprep.subr.mxu0 %v7552_v33  ;;  %v7713_v29 = vld [vmem:[%s16111_s3 + $0x2700] sm:$0xff]  ;;  %v7198_v33 = vld [vmem:[%s16111_s3 + $0x24f8] sm:$0xff] }
 0x39f   :  { %6930 = vmatpush1.msra.mxu1 %v6825_v34  ;;  %7587 = vmatpush1.msra.mxu0 %v7551_v36  ;;  %v7924_v34 = vld [vmem:[%s16111_s3 + $0x28e8] sm:$0xff]  ;;  %v7197_v36 = vld [vmem:[%s16111_s3 + $0x24f0] sm:$0xff] }
 0x3a0   :  { %6931 = vmatprep.subr.mxu1 %v6822_v0  ;;  %7588 = vmatprep.subr.mxu0 %v7548_v37  ;;  %v7923_v0 = vld [vmem:[%s16111_s3 + $0x28e0] sm:$0xff]  ;;  %v14695_v37 = vld [vmem:[#allocation2 + $0x4e] sm:$0x3] }
 0x3a1   :  { %6932 = vmatpush1.msra.mxu1 %v6821_v3  ;;  %7589 = vmatpush1.msra.mxu0 %v7547_v41  ;;  %v7194_v3 = vld [vmem:[%s16111_s3 + $0x24d8] sm:$0xff]  ;;  %v7920_v41 = vld [vmem:[%s16111_s3 + $0x28c8] sm:$0xff] }
 0x3a2   :  { %6933 = vmatprep.subr.mxu1 %v6818_v16  ;;  %7590 = vmatprep.subr.mxu0 %v7544_v38  ;;  %v7193_v16 = vld [vmem:[%s16111_s3 + $0x24d0] sm:$0xff]  ;;  %v7190_v38 = vld [vmem:[%s16111_s3 + $0x24b8] sm:$0xff] }
 0x3a3   :  { %6934 = vmatpush1.msra.mxu1 %v6817_v5  ;;  %7591 = vmatpush1.msra.mxu0 %v7543_v19  ;;  %v7916_v5 = vld [vmem:[%s16111_s3 + $0x28a8] sm:$0xff]  ;;  %v7189_v19 = vld [vmem:[%s16111_s3 + $0x24b0] sm:$0xff] }
 0x3a4   :  { %6935 = vmatprep.subr.mxu1 %v6814_v40  ;;  %7592 = vmatprep.subr.mxu0 %v7540_v25  ;;  %v7915_v40 = vld [vmem:[%s16111_s3 + $0x28a0] sm:$0xff]  ;;  %v7186_v25 = vld [vmem:[%s16111_s3 + $0x2498] sm:$0xff] }
 0x3a5   :  { %6936 = vmatpush1.msra.mxu1 %v6813_v42  ;;  %7593 = vmatpush1.msra.mxu0 %v7539_v49  ;;  %v7912_v42 = vld [vmem:[%s16111_s3 + $0x2888] sm:$0xff]  ;;  %v7185_v49 = vld [vmem:[%s16111_s3 + $0x2490] sm:$0xff] }
 0x3a6   :  { %6937 = vmatprep.subr.mxu1 %v6810_v35  ;;  %7594 = vmatprep.subr.mxu0 %v7536_v15  ;;  %v7911_v35 = vld [vmem:[%s16111_s3 + $0x2880] sm:$0xff]  ;;  %v7182_v15 = vld [vmem:[%s16111_s3 + $0x2478] sm:$0xff] }
 0x3a7   :  { %6938 = vmatpush1.msra.mxu1 %v6809_v1  ;;  %7595 = vmatpush1.msra.mxu0 %v7535_v12  ;;  %v7908_v1 = vld [vmem:[%s16111_s3 + $0x2868] sm:$0xff]  ;;  %v7181_v12 = vld [vmem:[%s16111_s3 + $0x2470] sm:$0xff] }
 0x3a8   :  { %6939 = vmatprep.subr.mxu1 %v6806_v46  ;;  %7596 = vmatprep.subr.mxu0 %v7532_v62  ;;  %v7907_v46 = vld [vmem:[%s16111_s3 + $0x2860] sm:$0xff]  ;;  %v7178_v62 = vld [vmem:[%s16111_s3 + $0x2458] sm:$0xff] }
 0x3a9   :  { %6940 = vmatpush1.msra.mxu1 %v6805_v31  ;;  %6973 = vmatprep.mubr.f32.mxu1 %v9955_v6  ;;  %v7904_v31 = vld [vmem:[%s16111_s3 + $0x2848] sm:$0xff] }
 0x3aa   :  { %7597 = vmatpush1.msra.mxu0 %v7531_v48  ;;  %7630 = vmatprep.mubr.f32.mxu0 %v9955_v6  ;;  %v7177_v48 = vld [vmem:[%s16111_s3 + $0x2450] sm:$0xff] }
 0x3ab   :  { %9682 = vmatmul.mubr.msk.f32.vlgmr.msra.gmra.mxu1 %vm165_vm1, %v14175_v18  ;;  %7107 = vmatprep.subr.mxu1 %v7016_v17  ;;  %v7737_v18 = vld [vmem:[%s16111_s3 + $0x27c0] sm:$0xff] }
 0x3ac   :  { %9689 = vmatmul.mubr.msk.f32.vlgmr.msra.gmra.mxu0 %vm165_vm1, %v14591_v14  ;;  %7764 = vmatprep.subr.mxu0 %v7742_v7  ;;  %v7903_v17 = vld [vmem:[%s16111_s3 + $0x2840] sm:$0xff]  ;;  %v7174_v7 = vld [vmem:[%s16111_s3 + $0x2438] sm:$0xff] }
 0x3ad   :  { %7108 = vmatpush1.msra.mxu1 %v7015_v23  ;;  %7765 = vmatpush1.msra.mxu0 %v7741_v58  ;;  %v7900_v23 = vld [vmem:[%s16111_s3 + $0x2828] sm:$0xff]  ;;  %v7173_v58 = vld [vmem:[%s16111_s3 + $0x2430] sm:$0xff] }
 0x3ae   :  { %7109 = vmatprep.subr.mxu1 %v7012_v53  ;;  %7766 = vmatprep.subr.mxu0 %v7738_v63  ;;  %v7899_v53 = vld [vmem:[%s16111_s3 + $0x2820] sm:$0xff]  ;;  %v7170_v63 = vld [vmem:[%s16111_s3 + $0x2418] sm:$0xff] }
 0x3af   :  { %7110 = vmatpush1.msra.mxu1 %v7011_v51  ;;  %7767 = vmatpush1.msra.mxu0 %v7737_v18  ;;  %v7896_v51 = vld [vmem:[%s16111_s3 + $0x2808] sm:$0xff]  ;;  %v7169_v18 = vld [vmem:[%s16111_s3 + $0x2410] sm:$0xff] }
 0x3b0   :  { %7111 = vmatprep.subr.mxu1 %v7008_v9  ;;  %7768 = vmatprep.subr.mxu0 %v7734_v55  ;;  %v7895_v9 = vld [vmem:[%s16111_s3 + $0x2800] sm:$0xff]  ;;  %v7380_v55 = vld [vmem:[%s16111_s3 + $0x25f8] sm:$0xff] }
 0x3b1   :  { %7112 = vmatpush1.msra.mxu1 %v7007_v56  ;;  %7769 = vmatpush1.msra.mxu0 %v7733_v57  ;;  %v8106_v56 = vld [vmem:[%s16111_s3 + $0x29e8] sm:$0xff]  ;;  %v7379_v57 = vld [vmem:[%s16111_s3 + $0x25f0] sm:$0xff] }
 0x3b2   :  { %7113 = vmatprep.subr.mxu1 %v7004_v2  ;;  %7770 = vmatprep.subr.mxu0 %v7730_v44  ;;  %v8105_v2 = vld [vmem:[%s16111_s3 + $0x29e0] sm:$0xff]  ;;  %v14799_v44 = vld [vmem:[#allocation2 + $0x50] sm:$0x3] }
 0x3b3   :  { %7114 = vmatpush1.msra.mxu1 %v7003_v22  ;;  %7771 = vmatpush1.msra.mxu0 %v7729_v60  ;;  %v7376_v22 = vld [vmem:[%s16111_s3 + $0x25d8] sm:$0xff]  ;;  %v8102_v60 = vld [vmem:[%s16111_s3 + $0x29c8] sm:$0xff] }
 0x3b4   :  { %7115 = vmatprep.subr.mxu1 %v7000_v59  ;;  %7772 = vmatprep.subr.mxu0 %v7726_v8  ;;  %v7375_v59 = vld [vmem:[%s16111_s3 + $0x25d0] sm:$0xff]  ;;  %v7372_v8 = vld [vmem:[%s16111_s3 + $0x25b8] sm:$0xff] }
 0x3b5   :  { %7116 = vmatpush1.msra.mxu1 %v6999_v61  ;;  %7773 = vmatpush1.msra.mxu0 %v7725_v32  ;;  %v8098_v61 = vld [vmem:[%s16111_s3 + $0x29a8] sm:$0xff]  ;;  %v7371_v32 = vld [vmem:[%s16111_s3 + $0x25b0] sm:$0xff] }
 0x3b6   :  { %7117 = vmatprep.subr.mxu1 %v6996_v21  ;;  %7774 = vmatprep.subr.mxu0 %v7722_v47  ;;  %v8097_v21 = vld [vmem:[%s16111_s3 + $0x29a0] sm:$0xff]  ;;  %v7368_v47 = vld [vmem:[%s16111_s3 + $0x2598] sm:$0xff] }
 0x3b7   :  { %7118 = vmatpush1.msra.mxu1 %v6995_v39  ;;  %7775 = vmatpush1.msra.mxu0 %v7721_v11  ;;  %v8094_v39 = vld [vmem:[%s16111_s3 + $0x2988] sm:$0xff]  ;;  %v7367_v11 = vld [vmem:[%s16111_s3 + $0x2590] sm:$0xff] }
 0x3b8   :  { %7119 = vmatprep.subr.mxu1 %v6992_v10  ;;  %7776 = vmatprep.subr.mxu0 %v7718_v50  ;;  %v8093_v10 = vld [vmem:[%s16111_s3 + $0x2980] sm:$0xff]  ;;  %v7364_v50 = vld [vmem:[%s16111_s3 + $0x2578] sm:$0xff] }
 0x3b9   :  { %7120 = vmatpush1.msra.mxu1 %v6991_v20  ;;  %7777 = vmatpush1.msra.mxu0 %v7717_v27  ;;  %v8090_v20 = vld [vmem:[%s16111_s3 + $0x2968] sm:$0xff]  ;;  %v7363_v27 = vld [vmem:[%s16111_s3 + $0x2570] sm:$0xff] }
 0x3ba   :  { %7121 = vmatprep.subr.mxu1 %v6988_v28  ;;  %7778 = vmatprep.subr.mxu0 %v7714_v26  ;;  %v8089_v28 = vld [vmem:[%s16111_s3 + $0x2960] sm:$0xff]  ;;  %v7360_v26 = vld [vmem:[%s16111_s3 + $0x2558] sm:$0xff] }
 0x3bb   :  { %7122 = vmatpush1.msra.mxu1 %v6987_v54  ;;  %7155 = vmatprep.mubr.f32.mxu1 %v9955_v6  ;;  %v8086_v54 = vld [vmem:[%s16111_s3 + $0x2948] sm:$0xff] }
 0x3bc   :  { %7779 = vmatpush1.msra.mxu0 %v7713_v29  ;;  %7812 = vmatprep.mubr.f32.mxu0 %v9955_v6  ;;  %v7359_v29 = vld [vmem:[%s16111_s3 + $0x2550] sm:$0xff] }
 0x3bd   :  { %9684 = vmatmul.mubr.msk.f32.vlgmr.msra.gmra.mxu1 %vm165_vm1, %v14279_v52  ;;  %7289 = vmatprep.subr.mxu1 %v7198_v33  ;;  %v7919_v52 = vld [vmem:[%s16111_s3 + $0x28c0] sm:$0xff] }
 0x3be   :  { %9691 = vmatmul.mubr.msk.f32.vlgmr.msra.gmra.mxu0 %vm165_vm1, %v14695_v37  ;;  %7946 = vmatprep.subr.mxu0 %v7924_v34  ;;  %v8085_v33 = vld [vmem:[%s16111_s3 + $0x2940] sm:$0xff]  ;;  %v7356_v34 = vld [vmem:[%s16111_s3 + $0x2538] sm:$0xff] }
 0x3bf   :  { %7290 = vmatpush1.msra.mxu1 %v7197_v36  ;;  %7947 = vmatpush1.msra.mxu0 %v7923_v0  ;;  %v8082_v36 = vld [vmem:[%s16111_s3 + $0x2928] sm:$0xff]  ;;  %v7355_v0 = vld [vmem:[%s16111_s3 + $0x2530] sm:$0xff] }
 0x3c0   :  { %7291 = vmatprep.subr.mxu1 %v7194_v3  ;;  %7948 = vmatprep.subr.mxu0 %v7920_v41  ;;  %v8081_v3 = vld [vmem:[%s16111_s3 + $0x2920] sm:$0xff]  ;;  %v7352_v41 = vld [vmem:[%s16111_s3 + $0x2518] sm:$0xff] }
 0x3c1   :  { %7292 = vmatpush1.msra.mxu1 %v7193_v16  ;;  %7949 = vmatpush1.msra.mxu0 %v7919_v52  ;;  %v8078_v16 = vld [vmem:[%s16111_s3 + $0x2908] sm:$0xff]  ;;  %v7351_v52 = vld [vmem:[%s16111_s3 + $0x2510] sm:$0xff] }
 0x3c2   :  { %7293 = vmatprep.subr.mxu1 %v7190_v38  ;;  %7950 = vmatprep.subr.mxu0 %v7916_v5  ;;  %v8077_v38 = vld [vmem:[%s16111_s3 + $0x2900] sm:$0xff]  ;;  %v7562_v5 = vld [vmem:[%s16111_s3 + $0x26f8] sm:$0xff] }
 0x3c3   :  { %7294 = vmatpush1.msra.mxu1 %v7189_v19  ;;  %7951 = vmatpush1.msra.mxu0 %v7915_v40  ;;  %v8288_v19 = vld [vmem:[%s16111_s3 + $0x2ae8] sm:$0xff]  ;;  %v7561_v40 = vld [vmem:[%s16111_s3 + $0x26f0] sm:$0xff] }
 0x3c4   :  { %7295 = vmatprep.subr.mxu1 %v7186_v25  ;;  %7952 = vmatprep.subr.mxu0 %v7912_v42  ;;  %v8287_v25 = vld [vmem:[%s16111_s3 + $0x2ae0] sm:$0xff]  ;;  %v14903_v42 = vld [vmem:[#allocation2 + $0x52] sm:$0x3] }
 0x3c5   :  { %7296 = vmatpush1.msra.mxu1 %v7185_v49  ;;  %7953 = vmatpush1.msra.mxu0 %v7911_v35  ;;  %v7558_v49 = vld [vmem:[%s16111_s3 + $0x26d8] sm:$0xff]  ;;  %v8284_v35 = vld [vmem:[%s16111_s3 + $0x2ac8] sm:$0xff] }
 0x3c6   :  { %7297 = vmatprep.subr.mxu1 %v7182_v15  ;;  %7954 = vmatprep.subr.mxu0 %v7908_v1  ;;  %v7557_v15 = vld [vmem:[%s16111_s3 + $0x26d0] sm:$0xff]  ;;  %v7554_v1 = vld [vmem:[%s16111_s3 + $0x26b8] sm:$0xff] }
 0x3c7   :  { %7298 = vmatpush1.msra.mxu1 %v7181_v12  ;;  %7955 = vmatpush1.msra.mxu0 %v7907_v46  ;;  %v8280_v12 = vld [vmem:[%s16111_s3 + $0x2aa8] sm:$0xff]  ;;  %v7553_v46 = vld [vmem:[%s16111_s3 + $0x26b0] sm:$0xff] }
 0x3c8   :  { %7299 = vmatprep.subr.mxu1 %v7178_v62  ;;  %7956 = vmatprep.subr.mxu0 %v7904_v31  ;;  %v8279_v62 = vld [vmem:[%s16111_s3 + $0x2aa0] sm:$0xff]  ;;  %v7550_v31 = vld [vmem:[%s16111_s3 + $0x2698] sm:$0xff] }
 0x3c9   :  { %7300 = vmatpush1.msra.mxu1 %v7177_v48  ;;  %7957 = vmatpush1.msra.mxu0 %v7903_v17  ;;  %v8276_v48 = vld [vmem:[%s16111_s3 + $0x2a88] sm:$0xff]  ;;  %v7549_v17 = vld [vmem:[%s16111_s3 + $0x2690] sm:$0xff] }
 0x3ca   :  { %7301 = vmatprep.subr.mxu1 %v7174_v7  ;;  %7958 = vmatprep.subr.mxu0 %v7900_v23  ;;  %v8275_v7 = vld [vmem:[%s16111_s3 + $0x2a80] sm:$0xff]  ;;  %v7546_v23 = vld [vmem:[%s16111_s3 + $0x2678] sm:$0xff] }
 0x3cb   :  { %7302 = vmatpush1.msra.mxu1 %v7173_v58  ;;  %7959 = vmatpush1.msra.mxu0 %v7899_v53  ;;  %v8272_v58 = vld [vmem:[%s16111_s3 + $0x2a68] sm:$0xff]  ;;  %v7545_v53 = vld [vmem:[%s16111_s3 + $0x2670] sm:$0xff] }
 0x3cc   :  { %7303 = vmatprep.subr.mxu1 %v7170_v63  ;;  %7960 = vmatprep.subr.mxu0 %v7896_v51  ;;  %v8271_v63 = vld [vmem:[%s16111_s3 + $0x2a60] sm:$0xff]  ;;  %v7542_v51 = vld [vmem:[%s16111_s3 + $0x2658] sm:$0xff] }
 0x3cd   :  { %7304 = vmatpush1.msra.mxu1 %v7169_v18  ;;  %7337 = vmatprep.mubr.f32.mxu1 %v9955_v6  ;;  %v8268_v18 = vld [vmem:[%s16111_s3 + $0x2a48] sm:$0xff] }
 0x3ce   :  { %7961 = vmatpush1.msra.mxu0 %v7895_v9  ;;  %7994 = vmatprep.mubr.f32.mxu0 %v9955_v6  ;;  %v7541_v9 = vld [vmem:[%s16111_s3 + $0x2650] sm:$0xff] }
 0x3cf   :  { %9686 = vmatmul.mubr.msk.f32.vlgmr.msra.gmra.mxu1 %vm165_vm1, %v14383_v45  ;;  %7471 = vmatprep.subr.mxu1 %v7380_v55  ;;  %v8101_v45 = vld [vmem:[%s16111_s3 + $0x29c0] sm:$0xff] }
 0x3d0   :  { %9693 = vmatmul.mubr.msk.f32.vlgmr.msra.gmra.mxu0 %vm165_vm1, %v14799_v44  ;;  %8128 = vmatprep.subr.mxu0 %v8106_v56  ;;  %v8267_v55 = vld [vmem:[%s16111_s3 + $0x2a40] sm:$0xff]  ;;  %v7538_v56 = vld [vmem:[%s16111_s3 + $0x2638] sm:$0xff] }
 0x3d1   :  { %7472 = vmatpush1.msra.mxu1 %v7379_v57  ;;  %8129 = vmatpush1.msra.mxu0 %v8105_v2  ;;  %v8264_v57 = vld [vmem:[%s16111_s3 + $0x2a28] sm:$0xff]  ;;  %v7537_v2 = vld [vmem:[%s16111_s3 + $0x2630] sm:$0xff] }
 0x3d2   :  { %7473 = vmatprep.subr.mxu1 %v7376_v22  ;;  %8130 = vmatprep.subr.mxu0 %v8102_v60  ;;  %v8263_v22 = vld [vmem:[%s16111_s3 + $0x2a20] sm:$0xff]  ;;  %v7534_v60 = vld [vmem:[%s16111_s3 + $0x2618] sm:$0xff] }
 0x3d3   :  { %7474 = vmatpush1.msra.mxu1 %v7375_v59  ;;  %8131 = vmatpush1.msra.mxu0 %v8101_v45  ;;  %v8260_v59 = vld [vmem:[%s16111_s3 + $0x2a08] sm:$0xff]  ;;  %v7533_v45 = vld [vmem:[%s16111_s3 + $0x2610] sm:$0xff] }
 0x3d4   :  { %7475 = vmatprep.subr.mxu1 %v7372_v8  ;;  %8132 = vmatprep.subr.mxu0 %v8098_v61  ;;  %v8259_v8 = vld [vmem:[%s16111_s3 + $0x2a00] sm:$0xff]  ;;  %v7744_v61 = vld [vmem:[%s16111_s3 + $0x27f8] sm:$0xff] }
 0x3d5   :  { %7476 = vmatpush1.msra.mxu1 %v7371_v32  ;;  %8133 = vmatpush1.msra.mxu0 %v8097_v21  ;;  %v8470_v32 = vld [vmem:[%s16111_s3 + $0x2be8] sm:$0xff]  ;;  %v7743_v21 = vld [vmem:[%s16111_s3 + $0x27f0] sm:$0xff] }
 0x3d6   :  { %7477 = vmatprep.subr.mxu1 %v7368_v47  ;;  %8134 = vmatprep.subr.mxu0 %v8094_v39  ;;  %v8469_v47 = vld [vmem:[%s16111_s3 + $0x2be0] sm:$0xff]  ;;  %v15007_v39 = vld [vmem:[#allocation2 + $0x54] sm:$0x3] }
 0x3d7   :  { %7478 = vmatpush1.msra.mxu1 %v7367_v11  ;;  %8135 = vmatpush1.msra.mxu0 %v8093_v10  ;;  %v7740_v11 = vld [vmem:[%s16111_s3 + $0x27d8] sm:$0xff]  ;;  %v8466_v10 = vld [vmem:[%s16111_s3 + $0x2bc8] sm:$0xff] }
 0x3d8   :  { %7479 = vmatprep.subr.mxu1 %v7364_v50  ;;  %8136 = vmatprep.subr.mxu0 %v8090_v20  ;;  %v7739_v50 = vld [vmem:[%s16111_s3 + $0x27d0] sm:$0xff]  ;;  %v7736_v20 = vld [vmem:[%s16111_s3 + $0x27b8] sm:$0xff] }
 0x3d9   :  { %7480 = vmatpush1.msra.mxu1 %v7363_v27  ;;  %8137 = vmatpush1.msra.mxu0 %v8089_v28  ;;  %v8462_v27 = vld [vmem:[%s16111_s3 + $0x2ba8] sm:$0xff]  ;;  %v7735_v28 = vld [vmem:[%s16111_s3 + $0x27b0] sm:$0xff] }
 0x3da   :  { %7481 = vmatprep.subr.mxu1 %v7360_v26  ;;  %8138 = vmatprep.subr.mxu0 %v8086_v54  ;;  %v8461_v26 = vld [vmem:[%s16111_s3 + $0x2ba0] sm:$0xff]  ;;  %v7732_v54 = vld [vmem:[%s16111_s3 + $0x2798] sm:$0xff] }
 0x3db   :  { %7482 = vmatpush1.msra.mxu1 %v7359_v29  ;;  %8139 = vmatpush1.msra.mxu0 %v8085_v33  ;;  %v8458_v29 = vld [vmem:[%s16111_s3 + $0x2b88] sm:$0xff]  ;;  %v7731_v33 = vld [vmem:[%s16111_s3 + $0x2790] sm:$0xff] }
 0x3dc   :  { %7483 = vmatprep.subr.mxu1 %v7356_v34  ;;  %8140 = vmatprep.subr.mxu0 %v8082_v36  ;;  %v8457_v34 = vld [vmem:[%s16111_s3 + $0x2b80] sm:$0xff]  ;;  %v7728_v36 = vld [vmem:[%s16111_s3 + $0x2778] sm:$0xff] }
 0x3dd   :  { %7484 = vmatpush1.msra.mxu1 %v7355_v0  ;;  %8141 = vmatpush1.msra.mxu0 %v8081_v3  ;;  %v8454_v0 = vld [vmem:[%s16111_s3 + $0x2b68] sm:$0xff]  ;;  %v7727_v3 = vld [vmem:[%s16111_s3 + $0x2770] sm:$0xff] }
 0x3de   :  { %7485 = vmatprep.subr.mxu1 %v7352_v41  ;;  %8142 = vmatprep.subr.mxu0 %v8078_v16  ;;  %v8453_v41 = vld [vmem:[%s16111_s3 + $0x2b60] sm:$0xff]  ;;  %v7724_v16 = vld [vmem:[%s16111_s3 + $0x2758] sm:$0xff] }
 0x3df   :  { %7486 = vmatpush1.msra.mxu1 %v7351_v52  ;;  %7519 = vmatprep.mubr.f32.mxu1 %v9955_v6  ;;  %v8450_v52 = vld [vmem:[%s16111_s3 + $0x2b48] sm:$0xff] }
 0x3e0   :  { %8143 = vmatpush1.msra.mxu0 %v8077_v38  ;;  %8176 = vmatprep.mubr.f32.mxu0 %v9955_v6  ;;  %v7723_v38 = vld [vmem:[%s16111_s3 + $0x2750] sm:$0xff] }
 0x3e1   :  { %9688 = vmatmul.mubr.msk.f32.vlgmr.msra.gmra.mxu1 %vm165_vm1, %v14487_v30  ;;  %7653 = vmatprep.subr.mxu1 %v7562_v5  ;;  %v8283_v30 = vld [vmem:[%s16111_s3 + $0x2ac0] sm:$0xff] }
 0x3e2   :  { %9695 = vmatmul.mubr.msk.f32.vlgmr.msra.gmra.mxu0 %vm165_vm1, %v14903_v42  ;;  %8310 = vmatprep.subr.mxu0 %v8288_v19  ;;  %v8449_v5 = vld [vmem:[%s16111_s3 + $0x2b40] sm:$0xff]  ;;  %v7720_v19 = vld [vmem:[%s16111_s3 + $0x2738] sm:$0xff] }
 0x3e3   :  { %7654 = vmatpush1.msra.mxu1 %v7561_v40  ;;  %8311 = vmatpush1.msra.mxu0 %v8287_v25  ;;  %v8446_v40 = vld [vmem:[%s16111_s3 + $0x2b28] sm:$0xff]  ;;  %v7719_v25 = vld [vmem:[%s16111_s3 + $0x2730] sm:$0xff] }
 0x3e4   :  { %7655 = vmatprep.subr.mxu1 %v7558_v49  ;;  %8312 = vmatprep.subr.mxu0 %v8284_v35  ;;  %v8445_v49 = vld [vmem:[%s16111_s3 + $0x2b20] sm:$0xff]  ;;  %v7716_v35 = vld [vmem:[%s16111_s3 + $0x2718] sm:$0xff] }
 0x3e5   :  { %7656 = vmatpush1.msra.mxu1 %v7557_v15  ;;  %8313 = vmatpush1.msra.mxu0 %v8283_v30  ;;  %v8442_v15 = vld [vmem:[%s16111_s3 + $0x2b08] sm:$0xff]  ;;  %v7715_v30 = vld [vmem:[%s16111_s3 + $0x2710] sm:$0xff] }
 0x3e6   :  { %7657 = vmatprep.subr.mxu1 %v7554_v1  ;;  %8314 = vmatprep.subr.mxu0 %v8280_v12  ;;  %v8441_v1 = vld [vmem:[%s16111_s3 + $0x2b00] sm:$0xff]  ;;  %v7926_v12 = vld [vmem:[%s16111_s3 + $0x28f8] sm:$0xff] }
 0x3e7   :  { %7658 = vmatpush1.msra.mxu1 %v7553_v46  ;;  %8315 = vmatpush1.msra.mxu0 %v8279_v62  ;;  %v8652_v46 = vld [vmem:[%s16111_s3 + $0x2ce8] sm:$0xff]  ;;  %v7925_v62 = vld [vmem:[%s16111_s3 + $0x28f0] sm:$0xff] }
 0x3e8   :  { %7659 = vmatprep.subr.mxu1 %v7550_v31  ;;  %8316 = vmatprep.subr.mxu0 %v8276_v48  ;;  %v8651_v31 = vld [vmem:[%s16111_s3 + $0x2ce0] sm:$0xff]  ;;  %v15111_v48 = vld [vmem:[#allocation2 + $0x56] sm:$0x3] }
 0x3e9   :  { %7660 = vmatpush1.msra.mxu1 %v7549_v17  ;;  %8317 = vmatpush1.msra.mxu0 %v8275_v7  ;;  %v7922_v17 = vld [vmem:[%s16111_s3 + $0x28d8] sm:$0xff]  ;;  %v8648_v7 = vld [vmem:[%s16111_s3 + $0x2cc8] sm:$0xff] }
 0x3ea   :  { %7661 = vmatprep.subr.mxu1 %v7546_v23  ;;  %8318 = vmatprep.subr.mxu0 %v8272_v58  ;;  %v7921_v23 = vld [vmem:[%s16111_s3 + $0x28d0] sm:$0xff]  ;;  %v7918_v58 = vld [vmem:[%s16111_s3 + $0x28b8] sm:$0xff] }
 0x3eb   :  { %7662 = vmatpush1.msra.mxu1 %v7545_v53  ;;  %8319 = vmatpush1.msra.mxu0 %v8271_v63  ;;  %v8644_v53 = vld [vmem:[%s16111_s3 + $0x2ca8] sm:$0xff]  ;;  %v7917_v63 = vld [vmem:[%s16111_s3 + $0x28b0] sm:$0xff] }
 0x3ec   :  { %7663 = vmatprep.subr.mxu1 %v7542_v51  ;;  %8320 = vmatprep.subr.mxu0 %v8268_v18  ;;  %v8643_v51 = vld [vmem:[%s16111_s3 + $0x2ca0] sm:$0xff]  ;;  %v7914_v18 = vld [vmem:[%s16111_s3 + $0x2898] sm:$0xff] }
 0x3ed   :  { %7664 = vmatpush1.msra.mxu1 %v7541_v9  ;;  %8321 = vmatpush1.msra.mxu0 %v8267_v55  ;;  %v8640_v9 = vld [vmem:[%s16111_s3 + $0x2c88] sm:$0xff]  ;;  %v7913_v55 = vld [vmem:[%s16111_s3 + $0x2890] sm:$0xff] }
 0x3ee   :  { %7665 = vmatprep.subr.mxu1 %v7538_v56  ;;  %8322 = vmatprep.subr.mxu0 %v8264_v57  ;;  %v8639_v56 = vld [vmem:[%s16111_s3 + $0x2c80] sm:$0xff]  ;;  %v7910_v57 = vld [vmem:[%s16111_s3 + $0x2878] sm:$0xff] }
 0x3ef   :  { %7666 = vmatpush1.msra.mxu1 %v7537_v2  ;;  %8323 = vmatpush1.msra.mxu0 %v8263_v22  ;;  %v8636_v2 = vld [vmem:[%s16111_s3 + $0x2c68] sm:$0xff]  ;;  %v7909_v22 = vld [vmem:[%s16111_s3 + $0x2870] sm:$0xff] }
 0x3f0   :  { %7667 = vmatprep.subr.mxu1 %v7534_v60  ;;  %8324 = vmatprep.subr.mxu0 %v8260_v59  ;;  %v8635_v60 = vld [vmem:[%s16111_s3 + $0x2c60] sm:$0xff]  ;;  %v7906_v59 = vld [vmem:[%s16111_s3 + $0x2858] sm:$0xff] }
 0x3f1   :  { %7668 = vmatpush1.msra.mxu1 %v7533_v45  ;;  %7701 = vmatprep.mubr.f32.mxu1 %v9955_v6  ;;  %v8632_v45 = vld [vmem:[%s16111_s3 + $0x2c48] sm:$0xff] }
 0x3f2   :  { %8325 = vmatpush1.msra.mxu0 %v8259_v8  ;;  %8358 = vmatprep.mubr.f32.mxu0 %v9955_v6  ;;  %v7905_v8 = vld [vmem:[%s16111_s3 + $0x2850] sm:$0xff] }
 0x3f3   :  { %9690 = vmatmul.mubr.msk.f32.vlgmr.msra.gmra.mxu1 %vm165_vm1, %v14591_v14  ;;  %7835 = vmatprep.subr.mxu1 %v7744_v61  ;;  %v8465_v14 = vld [vmem:[%s16111_s3 + $0x2bc0] sm:$0xff] }
 0x3f4   :  { %9697 = vmatmul.mubr.msk.f32.vlgmr.msra.gmra.mxu0 %vm165_vm1, %v15007_v39  ;;  %8492 = vmatprep.subr.mxu0 %v8470_v32  ;;  %v8631_v61 = vld [vmem:[%s16111_s3 + $0x2c40] sm:$0xff]  ;;  %v7902_v32 = vld [vmem:[%s16111_s3 + $0x2838] sm:$0xff] }
 0x3f5   :  { %7836 = vmatpush1.msra.mxu1 %v7743_v21  ;;  %8493 = vmatpush1.msra.mxu0 %v8469_v47  ;;  %v8628_v21 = vld [vmem:[%s16111_s3 + $0x2c28] sm:$0xff]  ;;  %v7901_v47 = vld [vmem:[%s16111_s3 + $0x2830] sm:$0xff] }
 0x3f6   :  { %7837 = vmatprep.subr.mxu1 %v7740_v11  ;;  %8494 = vmatprep.subr.mxu0 %v8466_v10  ;;  %v8627_v11 = vld [vmem:[%s16111_s3 + $0x2c20] sm:$0xff]  ;;  %v7898_v10 = vld [vmem:[%s16111_s3 + $0x2818] sm:$0xff] }
 0x3f7   :  { %7838 = vmatpush1.msra.mxu1 %v7739_v50  ;;  %8495 = vmatpush1.msra.mxu0 %v8465_v14  ;;  %v8624_v50 = vld [vmem:[%s16111_s3 + $0x2c08] sm:$0xff]  ;;  %v7897_v14 = vld [vmem:[%s16111_s3 + $0x2810] sm:$0xff] }
 0x3f8   :  { %7839 = vmatprep.subr.mxu1 %v7736_v20  ;;  %8496 = vmatprep.subr.mxu0 %v8462_v27  ;;  %v8623_v20 = vld [vmem:[%s16111_s3 + $0x2c00] sm:$0xff]  ;;  %v8108_v27 = vld [vmem:[%s16111_s3 + $0x29f8] sm:$0xff] }
 0x3f9   :  { %7840 = vmatpush1.msra.mxu1 %v7735_v28  ;;  %8497 = vmatpush1.msra.mxu0 %v8461_v26  ;;  %v8834_v28 = vld [vmem:[%s16111_s3 + $0x2de8] sm:$0xff]  ;;  %v8107_v26 = vld [vmem:[%s16111_s3 + $0x29f0] sm:$0xff] }
 0x3fa   :  { %7841 = vmatprep.subr.mxu1 %v7732_v54  ;;  %8498 = vmatprep.subr.mxu0 %v8458_v29  ;;  %v8833_v54 = vld [vmem:[%s16111_s3 + $0x2de0] sm:$0xff]  ;;  %v15215_v29 = vld [vmem:[#allocation2 + $0x58] sm:$0x3] }
 0x3fb   :  { %7842 = vmatpush1.msra.mxu1 %v7731_v33  ;;  %8499 = vmatpush1.msra.mxu0 %v8457_v34  ;;  %v8104_v33 = vld [vmem:[%s16111_s3 + $0x29d8] sm:$0xff]  ;;  %v8830_v34 = vld [vmem:[%s16111_s3 + $0x2dc8] sm:$0xff] }
 0x3fc   :  { %7843 = vmatprep.subr.mxu1 %v7728_v36  ;;  %8500 = vmatprep.subr.mxu0 %v8454_v0  ;;  %v8103_v36 = vld [vmem:[%s16111_s3 + $0x29d0] sm:$0xff]  ;;  %v8100_v0 = vld [vmem:[%s16111_s3 + $0x29b8] sm:$0xff] }
 0x3fd   :  { %7844 = vmatpush1.msra.mxu1 %v7727_v3  ;;  %8501 = vmatpush1.msra.mxu0 %v8453_v41  ;;  %v8826_v3 = vld [vmem:[%s16111_s3 + $0x2da8] sm:$0xff]  ;;  %v8099_v41 = vld [vmem:[%s16111_s3 + $0x29b0] sm:$0xff] }
 0x3fe   :  { %7845 = vmatprep.subr.mxu1 %v7724_v16  ;;  %8502 = vmatprep.subr.mxu0 %v8450_v52  ;;  %v8825_v16 = vld [vmem:[%s16111_s3 + $0x2da0] sm:$0xff]  ;;  %v8096_v52 = vld [vmem:[%s16111_s3 + $0x2998] sm:$0xff] }
 0x3ff   :  { %7846 = vmatpush1.msra.mxu1 %v7723_v38  ;;  %8503 = vmatpush1.msra.mxu0 %v8449_v5  ;;  %v8822_v38 = vld [vmem:[%s16111_s3 + $0x2d88] sm:$0xff]  ;;  %v8095_v5 = vld [vmem:[%s16111_s3 + $0x2990] sm:$0xff] }
 0x400   :  { %7847 = vmatprep.subr.mxu1 %v7720_v19  ;;  %8504 = vmatprep.subr.mxu0 %v8446_v40  ;;  %v8821_v19 = vld [vmem:[%s16111_s3 + $0x2d80] sm:$0xff]  ;;  %v8092_v40 = vld [vmem:[%s16111_s3 + $0x2978] sm:$0xff] }
 0x401   :  { %7848 = vmatpush1.msra.mxu1 %v7719_v25  ;;  %8505 = vmatpush1.msra.mxu0 %v8445_v49  ;;  %v8818_v25 = vld [vmem:[%s16111_s3 + $0x2d68] sm:$0xff]  ;;  %v8091_v49 = vld [vmem:[%s16111_s3 + $0x2970] sm:$0xff] }
 0x402   :  { %7849 = vmatprep.subr.mxu1 %v7716_v35  ;;  %8506 = vmatprep.subr.mxu0 %v8442_v15  ;;  %v8817_v35 = vld [vmem:[%s16111_s3 + $0x2d60] sm:$0xff]  ;;  %v8088_v15 = vld [vmem:[%s16111_s3 + $0x2958] sm:$0xff] }
 0x403   :  { %7850 = vmatpush1.msra.mxu1 %v7715_v30  ;;  %7883 = vmatprep.mubr.f32.mxu1 %v9955_v6  ;;  %v8814_v30 = vld [vmem:[%s16111_s3 + $0x2d48] sm:$0xff] }
 0x404   :  { %8507 = vmatpush1.msra.mxu0 %v8441_v1  ;;  %8540 = vmatprep.mubr.f32.mxu0 %v9955_v6  ;;  %v8087_v1 = vld [vmem:[%s16111_s3 + $0x2950] sm:$0xff] }
 0x405   :  { %9692 = vmatmul.mubr.msk.f32.vlgmr.msra.gmra.mxu1 %vm165_vm1, %v14695_v37  ;;  %8017 = vmatprep.subr.mxu1 %v7926_v12  ;;  %v8647_v37 = vld [vmem:[%s16111_s3 + $0x2cc0] sm:$0xff] }
 0x406   :  { %9699 = vmatmul.mubr.msk.f32.vlgmr.msra.gmra.mxu0 %vm165_vm1, %v15111_v48  ;;  %8674 = vmatprep.subr.mxu0 %v8652_v46  ;;  %v8813_v12 = vld [vmem:[%s16111_s3 + $0x2d40] sm:$0xff]  ;;  %v8084_v46 = vld [vmem:[%s16111_s3 + $0x2938] sm:$0xff] }
 0x407   :  { %8018 = vmatpush1.msra.mxu1 %v7925_v62  ;;  %8675 = vmatpush1.msra.mxu0 %v8651_v31  ;;  %v8810_v62 = vld [vmem:[%s16111_s3 + $0x2d28] sm:$0xff]  ;;  %v8083_v31 = vld [vmem:[%s16111_s3 + $0x2930] sm:$0xff] }
 0x408   :  { %8019 = vmatprep.subr.mxu1 %v7922_v17  ;;  %8676 = vmatprep.subr.mxu0 %v8648_v7  ;;  %v8809_v17 = vld [vmem:[%s16111_s3 + $0x2d20] sm:$0xff]  ;;  %v8080_v7 = vld [vmem:[%s16111_s3 + $0x2918] sm:$0xff] }
 0x409   :  { %8020 = vmatpush1.msra.mxu1 %v7921_v23  ;;  %8677 = vmatpush1.msra.mxu0 %v8647_v37  ;;  %v8806_v23 = vld [vmem:[%s16111_s3 + $0x2d08] sm:$0xff]  ;;  %v8079_v37 = vld [vmem:[%s16111_s3 + $0x2910] sm:$0xff] }
 0x40a   :  { %8021 = vmatprep.subr.mxu1 %v7918_v58  ;;  %8678 = vmatprep.subr.mxu0 %v8644_v53  ;;  %v8805_v58 = vld [vmem:[%s16111_s3 + $0x2d00] sm:$0xff]  ;;  %v8290_v53 = vld [vmem:[%s16111_s3 + $0x2af8] sm:$0xff] }
 0x40b   :  { %8022 = vmatpush1.msra.mxu1 %v7917_v63  ;;  %8679 = vmatpush1.msra.mxu0 %v8643_v51  ;;  %v9016_v63 = vld [vmem:[%s16111_s3 + $0x2ee8] sm:$0xff]  ;;  %v8289_v51 = vld [vmem:[%s16111_s3 + $0x2af0] sm:$0xff] }
 0x40c   :  { %8023 = vmatprep.subr.mxu1 %v7914_v18  ;;  %8680 = vmatprep.subr.mxu0 %v8640_v9  ;;  %v9015_v18 = vld [vmem:[%s16111_s3 + $0x2ee0] sm:$0xff]  ;;  %v15319_v9 = vld [vmem:[#allocation2 + $0x5a] sm:$0x3] }
 0x40d   :  { %8024 = vmatpush1.msra.mxu1 %v7913_v55  ;;  %8681 = vmatpush1.msra.mxu0 %v8639_v56  ;;  %v8286_v55 = vld [vmem:[%s16111_s3 + $0x2ad8] sm:$0xff]  ;;  %v9012_v56 = vld [vmem:[%s16111_s3 + $0x2ec8] sm:$0xff] }
 0x40e   :  { %8025 = vmatprep.subr.mxu1 %v7910_v57  ;;  %8682 = vmatprep.subr.mxu0 %v8636_v2  ;;  %v8285_v57 = vld [vmem:[%s16111_s3 + $0x2ad0] sm:$0xff]  ;;  %v8282_v2 = vld [vmem:[%s16111_s3 + $0x2ab8] sm:$0xff] }
 0x40f   :  { %8026 = vmatpush1.msra.mxu1 %v7909_v22  ;;  %8683 = vmatpush1.msra.mxu0 %v8635_v60  ;;  %v9008_v22 = vld [vmem:[%s16111_s3 + $0x2ea8] sm:$0xff]  ;;  %v8281_v60 = vld [vmem:[%s16111_s3 + $0x2ab0] sm:$0xff] }
 0x410   :  { %8027 = vmatprep.subr.mxu1 %v7906_v59  ;;  %8684 = vmatprep.subr.mxu0 %v8632_v45  ;;  %v9007_v59 = vld [vmem:[%s16111_s3 + $0x2ea0] sm:$0xff]  ;;  %v8278_v45 = vld [vmem:[%s16111_s3 + $0x2a98] sm:$0xff] }
 0x411   :  { %8028 = vmatpush1.msra.mxu1 %v7905_v8  ;;  %8685 = vmatpush1.msra.mxu0 %v8631_v61  ;;  %v9004_v8 = vld [vmem:[%s16111_s3 + $0x2e88] sm:$0xff]  ;;  %v8277_v61 = vld [vmem:[%s16111_s3 + $0x2a90] sm:$0xff] }
 0x412   :  { %8029 = vmatprep.subr.mxu1 %v7902_v32  ;;  %8686 = vmatprep.subr.mxu0 %v8628_v21  ;;  %v9003_v32 = vld [vmem:[%s16111_s3 + $0x2e80] sm:$0xff]  ;;  %v8274_v21 = vld [vmem:[%s16111_s3 + $0x2a78] sm:$0xff] }
 0x413   :  { %8030 = vmatpush1.msra.mxu1 %v7901_v47  ;;  %8687 = vmatpush1.msra.mxu0 %v8627_v11  ;;  %v9000_v47 = vld [vmem:[%s16111_s3 + $0x2e68] sm:$0xff]  ;;  %v8273_v11 = vld [vmem:[%s16111_s3 + $0x2a70] sm:$0xff] }
 0x414   :  { %8031 = vmatprep.subr.mxu1 %v7898_v10  ;;  %8688 = vmatprep.subr.mxu0 %v8624_v50  ;;  %v8999_v10 = vld [vmem:[%s16111_s3 + $0x2e60] sm:$0xff]  ;;  %v8270_v50 = vld [vmem:[%s16111_s3 + $0x2a58] sm:$0xff] }
 0x415   :  { %8032 = vmatpush1.msra.mxu1 %v7897_v14  ;;  %8065 = vmatprep.mubr.f32.mxu1 %v9955_v6  ;;  %v8996_v14 = vld [vmem:[%s16111_s3 + $0x2e48] sm:$0xff] }
 0x416   :  { %8689 = vmatpush1.msra.mxu0 %v8623_v20  ;;  %8722 = vmatprep.mubr.f32.mxu0 %v9955_v6  ;;  %v8269_v20 = vld [vmem:[%s16111_s3 + $0x2a50] sm:$0xff] }
 0x417   :  { %9694 = vmatmul.mubr.msk.f32.vlgmr.msra.gmra.mxu1 %vm165_vm1, %v14799_v44  ;;  %8199 = vmatprep.subr.mxu1 %v8108_v27  ;;  %v8829_v44 = vld [vmem:[%s16111_s3 + $0x2dc0] sm:$0xff] }
 0x418   :  { %9701 = vmatmul.mubr.msk.f32.vlgmr.msra.gmra.mxu0 %vm165_vm1, %v15215_v29  ;;  %8856 = vmatprep.subr.mxu0 %v8834_v28  ;;  %v8995_v27 = vld [vmem:[%s16111_s3 + $0x2e40] sm:$0xff]  ;;  %v8266_v28 = vld [vmem:[%s16111_s3 + $0x2a38] sm:$0xff] }
 0x419   :  { %8200 = vmatpush1.msra.mxu1 %v8107_v26  ;;  %8857 = vmatpush1.msra.mxu0 %v8833_v54  ;;  %v8992_v26 = vld [vmem:[%s16111_s3 + $0x2e28] sm:$0xff]  ;;  %v8265_v54 = vld [vmem:[%s16111_s3 + $0x2a30] sm:$0xff] }
 0x41a   :  { %8201 = vmatprep.subr.mxu1 %v8104_v33  ;;  %8858 = vmatprep.subr.mxu0 %v8830_v34  ;;  %v8991_v33 = vld [vmem:[%s16111_s3 + $0x2e20] sm:$0xff]  ;;  %v8262_v34 = vld [vmem:[%s16111_s3 + $0x2a18] sm:$0xff] }
 0x41b   :  { %8202 = vmatpush1.msra.mxu1 %v8103_v36  ;;  %8859 = vmatpush1.msra.mxu0 %v8829_v44  ;;  %v8988_v36 = vld [vmem:[%s16111_s3 + $0x2e08] sm:$0xff]  ;;  %v8261_v44 = vld [vmem:[%s16111_s3 + $0x2a10] sm:$0xff] }
 0x41c   :  { %8203 = vmatprep.subr.mxu1 %v8100_v0  ;;  %8860 = vmatprep.subr.mxu0 %v8826_v3  ;;  %v8987_v0 = vld [vmem:[%s16111_s3 + $0x2e00] sm:$0xff]  ;;  %v8472_v3 = vld [vmem:[%s16111_s3 + $0x2bf8] sm:$0xff] }
 0x41d   :  { %8204 = vmatpush1.msra.mxu1 %v8099_v41  ;;  %8861 = vmatpush1.msra.mxu0 %v8825_v16  ;;  %v9198_v41 = vld [vmem:[%s16111_s3 + $0x2fe8] sm:$0xff]  ;;  %v8471_v16 = vld [vmem:[%s16111_s3 + $0x2bf0] sm:$0xff] }
 0x41e   :  { %8205 = vmatprep.subr.mxu1 %v8096_v52  ;;  %8862 = vmatprep.subr.mxu0 %v8822_v38  ;;  %v9197_v52 = vld [vmem:[%s16111_s3 + $0x2fe0] sm:$0xff]  ;;  %v15423_v38 = vld [vmem:[#allocation2 + $0x5c] sm:$0x3] }
 0x41f   :  { %8206 = vmatpush1.msra.mxu1 %v8095_v5  ;;  %8863 = vmatpush1.msra.mxu0 %v8821_v19  ;;  %v8468_v5 = vld [vmem:[%s16111_s3 + $0x2bd8] sm:$0xff]  ;;  %v9194_v19 = vld [vmem:[%s16111_s3 + $0x2fc8] sm:$0xff] }
 0x420   :  { %8207 = vmatprep.subr.mxu1 %v8092_v40  ;;  %8864 = vmatprep.subr.mxu0 %v8818_v25  ;;  %v8467_v40 = vld [vmem:[%s16111_s3 + $0x2bd0] sm:$0xff]  ;;  %v8464_v25 = vld [vmem:[%s16111_s3 + $0x2bb8] sm:$0xff] }
 0x421   :  { %8208 = vmatpush1.msra.mxu1 %v8091_v49  ;;  %8865 = vmatpush1.msra.mxu0 %v8817_v35  ;;  %v9190_v49 = vld [vmem:[%s16111_s3 + $0x2fa8] sm:$0xff]  ;;  %v8463_v35 = vld [vmem:[%s16111_s3 + $0x2bb0] sm:$0xff] }
 0x422   :  { %8209 = vmatprep.subr.mxu1 %v8088_v15  ;;  %8866 = vmatprep.subr.mxu0 %v8814_v30  ;;  %v9189_v15 = vld [vmem:[%s16111_s3 + $0x2fa0] sm:$0xff]  ;;  %v8460_v30 = vld [vmem:[%s16111_s3 + $0x2b98] sm:$0xff] }
 0x423   :  { %8210 = vmatpush1.msra.mxu1 %v8087_v1  ;;  %8867 = vmatpush1.msra.mxu0 %v8813_v12  ;;  %v9186_v1 = vld [vmem:[%s16111_s3 + $0x2f88] sm:$0xff]  ;;  %v8459_v12 = vld [vmem:[%s16111_s3 + $0x2b90] sm:$0xff] }
 0x424   :  { %8211 = vmatprep.subr.mxu1 %v8084_v46  ;;  %8868 = vmatprep.subr.mxu0 %v8810_v62  ;;  %v9185_v46 = vld [vmem:[%s16111_s3 + $0x2f80] sm:$0xff]  ;;  %v8456_v62 = vld [vmem:[%s16111_s3 + $0x2b78] sm:$0xff] }
 0x425   :  { %8212 = vmatpush1.msra.mxu1 %v8083_v31  ;;  %8869 = vmatpush1.msra.mxu0 %v8809_v17  ;;  %v9182_v31 = vld [vmem:[%s16111_s3 + $0x2f68] sm:$0xff]  ;;  %v8455_v17 = vld [vmem:[%s16111_s3 + $0x2b70] sm:$0xff] }
 0x426   :  { %8213 = vmatprep.subr.mxu1 %v8080_v7  ;;  %8870 = vmatprep.subr.mxu0 %v8806_v23  ;;  %v9181_v7 = vld [vmem:[%s16111_s3 + $0x2f60] sm:$0xff]  ;;  %v8452_v23 = vld [vmem:[%s16111_s3 + $0x2b58] sm:$0xff] }
 0x427   :  { %8214 = vmatpush1.msra.mxu1 %v8079_v37  ;;  %8247 = vmatprep.mubr.f32.mxu1 %v9955_v6  ;;  %v9178_v37 = vld [vmem:[%s16111_s3 + $0x2f48] sm:$0xff] }
 0x428   :  { %8871 = vmatpush1.msra.mxu0 %v8805_v58  ;;  %8904 = vmatprep.mubr.f32.mxu0 %v9955_v6  ;;  %v8451_v58 = vld [vmem:[%s16111_s3 + $0x2b50] sm:$0xff] }
 0x429   :  { %9696 = vmatmul.mubr.msk.f32.vlgmr.msra.gmra.mxu1 %vm165_vm1, %v14903_v42  ;;  %8381 = vmatprep.subr.mxu1 %v8290_v53  ;;  %v9011_v42 = vld [vmem:[%s16111_s3 + $0x2ec0] sm:$0xff] }
 0x42a   :  { %9703 = vmatmul.mubr.msk.f32.vlgmr.msra.gmra.mxu0 %vm165_vm1, %v15319_v9  ;;  %9038 = vmatprep.subr.mxu0 %v9016_v63  ;;  %v9177_v53 = vld [vmem:[%s16111_s3 + $0x2f40] sm:$0xff]  ;;  %v8448_v63 = vld [vmem:[%s16111_s3 + $0x2b38] sm:$0xff] }
 0x42b   :  { %8382 = vmatpush1.msra.mxu1 %v8289_v51  ;;  %9039 = vmatpush1.msra.mxu0 %v9015_v18  ;;  %v9174_v51 = vld [vmem:[%s16111_s3 + $0x2f28] sm:$0xff]  ;;  %v8447_v18 = vld [vmem:[%s16111_s3 + $0x2b30] sm:$0xff] }
 0x42c   :  { %8383 = vmatprep.subr.mxu1 %v8286_v55  ;;  %9040 = vmatprep.subr.mxu0 %v9012_v56  ;;  %v9173_v55 = vld [vmem:[%s16111_s3 + $0x2f20] sm:$0xff]  ;;  %v8444_v56 = vld [vmem:[%s16111_s3 + $0x2b18] sm:$0xff] }
 0x42d   :  { %8384 = vmatpush1.msra.mxu1 %v8285_v57  ;;  %9041 = vmatpush1.msra.mxu0 %v9011_v42  ;;  %v9170_v57 = vld [vmem:[%s16111_s3 + $0x2f08] sm:$0xff]  ;;  %v8443_v42 = vld [vmem:[%s16111_s3 + $0x2b10] sm:$0xff] }
 0x42e   :  { %8385 = vmatprep.subr.mxu1 %v8282_v2  ;;  %9042 = vmatprep.subr.mxu0 %v9008_v22  ;;  %v9169_v2 = vld [vmem:[%s16111_s3 + $0x2f00] sm:$0xff]  ;;  %v8654_v22 = vld [vmem:[%s16111_s3 + $0x2cf8] sm:$0xff] }
 0x42f   :  { %8386 = vmatpush1.msra.mxu1 %v8281_v60  ;;  %9043 = vmatpush1.msra.mxu0 %v9007_v59  ;;  %v9380_v60 = vld [vmem:[%s16111_s3 + $0x30e8] sm:$0xff]  ;;  %v8653_v59 = vld [vmem:[%s16111_s3 + $0x2cf0] sm:$0xff] }
 0x430   :  { %8387 = vmatprep.subr.mxu1 %v8278_v45  ;;  %9044 = vmatprep.subr.mxu0 %v9004_v8  ;;  %v9379_v45 = vld [vmem:[%s16111_s3 + $0x30e0] sm:$0xff]  ;;  %v15527_v8 = vld [vmem:[#allocation2 + $0x5e] sm:$0x3] }
 0x431   :  { %8388 = vmatpush1.msra.mxu1 %v8277_v61  ;;  %9045 = vmatpush1.msra.mxu0 %v9003_v32  ;;  %v8650_v61 = vld [vmem:[%s16111_s3 + $0x2cd8] sm:$0xff]  ;;  %v9376_v32 = vld [vmem:[%s16111_s3 + $0x30c8] sm:$0xff] }
 0x432   :  { %8389 = vmatprep.subr.mxu1 %v8274_v21  ;;  %9046 = vmatprep.subr.mxu0 %v9000_v47  ;;  %v8649_v21 = vld [vmem:[%s16111_s3 + $0x2cd0] sm:$0xff]  ;;  %v8646_v47 = vld [vmem:[%s16111_s3 + $0x2cb8] sm:$0xff] }
 0x433   :  { %8390 = vmatpush1.msra.mxu1 %v8273_v11  ;;  %9047 = vmatpush1.msra.mxu0 %v8999_v10  ;;  %v9372_v11 = vld [vmem:[%s16111_s3 + $0x30a8] sm:$0xff]  ;;  %v8645_v10 = vld [vmem:[%s16111_s3 + $0x2cb0] sm:$0xff] }
 0x434   :  { %8391 = vmatprep.subr.mxu1 %v8270_v50  ;;  %9048 = vmatprep.subr.mxu0 %v8996_v14  ;;  %v9371_v50 = vld [vmem:[%s16111_s3 + $0x30a0] sm:$0xff]  ;;  %v8642_v14 = vld [vmem:[%s16111_s3 + $0x2c98] sm:$0xff] }
 0x435   :  { %8392 = vmatpush1.msra.mxu1 %v8269_v20  ;;  %9049 = vmatpush1.msra.mxu0 %v8995_v27  ;;  %v9368_v20 = vld [vmem:[%s16111_s3 + $0x3088] sm:$0xff]  ;;  %v8641_v27 = vld [vmem:[%s16111_s3 + $0x2c90] sm:$0xff] }
 0x436   :  { %8393 = vmatprep.subr.mxu1 %v8266_v28  ;;  %9050 = vmatprep.subr.mxu0 %v8992_v26  ;;  %v9367_v28 = vld [vmem:[%s16111_s3 + $0x3080] sm:$0xff]  ;;  %v8638_v26 = vld [vmem:[%s16111_s3 + $0x2c78] sm:$0xff] }
 0x437   :  { %8394 = vmatpush1.msra.mxu1 %v8265_v54  ;;  %9051 = vmatpush1.msra.mxu0 %v8991_v33  ;;  %v9364_v54 = vld [vmem:[%s16111_s3 + $0x3068] sm:$0xff]  ;;  %v8637_v33 = vld [vmem:[%s16111_s3 + $0x2c70] sm:$0xff] }
 0x438   :  { %8395 = vmatprep.subr.mxu1 %v8262_v34  ;;  %9052 = vmatprep.subr.mxu0 %v8988_v36  ;;  %v9363_v34 = vld [vmem:[%s16111_s3 + $0x3060] sm:$0xff]  ;;  %v8634_v36 = vld [vmem:[%s16111_s3 + $0x2c58] sm:$0xff] }
 0x439   :  { %8396 = vmatpush1.msra.mxu1 %v8261_v44  ;;  %8429 = vmatprep.mubr.f32.mxu1 %v9955_v6  ;;  %v9360_v44 = vld [vmem:[%s16111_s3 + $0x3048] sm:$0xff] }
 0x43a   :  { %9053 = vmatpush1.msra.mxu0 %v8987_v0  ;;  %9086 = vmatprep.mubr.f32.mxu0 %v9955_v6  ;;  %v8633_v0 = vld [vmem:[%s16111_s3 + $0x2c50] sm:$0xff] }
 0x43b   :  { %9698 = vmatmul.mubr.msk.f32.vlgmr.msra.gmra.mxu1 %vm165_vm1, %v15007_v39  ;;  %8563 = vmatprep.subr.mxu1 %v8472_v3  ;;  %v9193_v39 = vld [vmem:[%s16111_s3 + $0x2fc0] sm:$0xff] }
 0x43c   :  { %9705 = vmatmul.mubr.msk.f32.vlgmr.msra.gmra.mxu0 %vm165_vm1, %v15423_v38  ;;  %9220 = vmatprep.subr.mxu0 %v9198_v41  ;;  %v9359_v3 = vld [vmem:[%s16111_s3 + $0x3040] sm:$0xff]  ;;  %v8630_v41 = vld [vmem:[%s16111_s3 + $0x2c38] sm:$0xff] }
 0x43d   :  { %8564 = vmatpush1.msra.mxu1 %v8471_v16  ;;  %9221 = vmatpush1.msra.mxu0 %v9197_v52  ;;  %v9356_v16 = vld [vmem:[%s16111_s3 + $0x3028] sm:$0xff]  ;;  %v8629_v52 = vld [vmem:[%s16111_s3 + $0x2c30] sm:$0xff] }
 0x43e   :  { %8565 = vmatprep.subr.mxu1 %v8468_v5  ;;  %9222 = vmatprep.subr.mxu0 %v9194_v19  ;;  %v9355_v5 = vld [vmem:[%s16111_s3 + $0x3020] sm:$0xff]  ;;  %v8626_v19 = vld [vmem:[%s16111_s3 + $0x2c18] sm:$0xff] }
 0x43f   :  { %8566 = vmatpush1.msra.mxu1 %v8467_v40  ;;  %9223 = vmatpush1.msra.mxu0 %v9193_v39  ;;  %v9352_v40 = vld [vmem:[%s16111_s3 + $0x3008] sm:$0xff]  ;;  %v8625_v39 = vld [vmem:[%s16111_s3 + $0x2c10] sm:$0xff] }
 0x440   :  { %8567 = vmatprep.subr.mxu1 %v8464_v25  ;;  %9224 = vmatprep.subr.mxu0 %v9190_v49  ;;  %v9351_v25 = vld [vmem:[%s16111_s3 + $0x3000] sm:$0xff]  ;;  %v8836_v49 = vld [vmem:[%s16111_s3 + $0x2df8] sm:$0xff] }
 0x441   :  { %8568 = vmatpush1.msra.mxu1 %v8463_v35  ;;  %9225 = vmatpush1.msra.mxu0 %v9189_v15  ;;  %v8835_v35 = vld [vmem:[%s16111_s3 + $0x2df0] sm:$0xff]  ;;  %v8832_v15 = vld [vmem:[%s16111_s3 + $0x2dd8] sm:$0xff] }
 0x442   :  { %8569 = vmatprep.subr.mxu1 %v8460_v30  ;;  %9226 = vmatprep.subr.mxu0 %v9186_v1  ;;  %v15628_v30 = vld [vmem:[#allocation2 + $0x60] sm:$0x3]  ;;  %v8831_v1 = vld [vmem:[%s16111_s3 + $0x2dd0] sm:$0xff] }
 0x443   :  { %8570 = vmatpush1.msra.mxu1 %v8459_v12  ;;  %9227 = vmatpush1.msra.mxu0 %v9185_v46  ;;  %v8828_v12 = vld [vmem:[%s16111_s3 + $0x2db8] sm:$0xff] }
 0x444   :  { %8571 = vmatprep.subr.mxu1 %v8456_v62  ;;  %9228 = vmatprep.subr.mxu0 %v9182_v31  ;;  %v8824_v46 = vld [vmem:[%s16111_s3 + $0x2d98] sm:$0xff]  ;;  %v8823_v62 = vld [vmem:[%s16111_s3 + $0x2d90] sm:$0xff] }
 0x445   :  { %8572 = vmatpush1.msra.mxu1 %v8455_v17  ;;  %9229 = vmatpush1.msra.mxu0 %v9181_v7  ;;  %v8820_v31 = vld [vmem:[%s16111_s3 + $0x2d78] sm:$0xff]  ;;  %v8819_v17 = vld [vmem:[%s16111_s3 + $0x2d70] sm:$0xff] }
 0x446   :  { %8573 = vmatprep.subr.mxu1 %v8452_v23  ;;  %9230 = vmatprep.subr.mxu0 %v9178_v37  ;;  %v8816_v7 = vld [vmem:[%s16111_s3 + $0x2d58] sm:$0xff]  ;;  %v8815_v23 = vld [vmem:[%s16111_s3 + $0x2d50] sm:$0xff] }
 0x447   :  { %8574 = vmatpush1.msra.mxu1 %v8451_v58  ;;  %9231 = vmatpush1.msra.mxu0 %v9177_v53  ;;  %v8812_v37 = vld [vmem:[%s16111_s3 + $0x2d38] sm:$0xff]  ;;  %v8811_v58 = vld [vmem:[%s16111_s3 + $0x2d30] sm:$0xff]  ;;  %v15666_v53 = vpop.f32.mrf.mxu0 }
 0x448   :  { %8575 = vmatprep.subr.mxu1 %v8448_v63  ;;  %9232 = vmatprep.subr.mxu0 %v9174_v51  ;;  %v8808_v63 = vld [vmem:[%s16111_s3 + $0x2d18] sm:$0xff]  ;;  %v8807_v51 = vld [vmem:[%s16111_s3 + $0x2d10] sm:$0xff] }
 0x449   :  { %8576 = vmatpush1.msra.mxu1 %v8447_v18  ;;  %9233 = vmatpush1.msra.mxu0 %v9173_v55  ;;  %v15674_v18 = vpop.f32.mrf.mxu0  ;;  %v9018_v55 = vld [vmem:[%s16111_s3 + $0x2ef8] sm:$0xff] }
 0x44a   :  { %8577 = vmatprep.subr.mxu1 %v8444_v56  ;;  %9234 = vmatprep.subr.mxu0 %v9170_v57  ;;  %v9017_v56 = vld [vmem:[%s16111_s3 + $0x2ef0] sm:$0xff]  ;;  %v9014_v57 = vld [vmem:[%s16111_s3 + $0x2ed8] sm:$0xff] }
 0x44b   :  { %8578 = vmatpush1.msra.mxu1 %v8443_v42  ;;  %8611 = vmatprep.mubr.f32.mxu1 %v9955_v6  ;;  %v9013_v42 = vld [vmem:[%s16111_s3 + $0x2ed0] sm:$0xff] }
 0x44c   :  { %9235 = vmatpush1.msra.mxu0 %v9169_v2  ;;  %9268 = vmatprep.mubr.f32.mxu0 %v9955_v6  ;;  %v15690_v2 = vpop.f32.mrf.mxu0 }
 0x44d   :  { %9700 = vmatmul.mubr.msk.f32.vlgmr.msra.gmra.mxu1 %vm165_vm1, %v15111_v48  ;;  %8745 = vmatprep.subr.mxu1 %v8654_v22  ;;  %v9375_v48 = vld [vmem:[%s16111_s3 + $0x30c0] sm:$0xff]  ;;  %v9010_v22 = vld [vmem:[%s16111_s3 + $0x2eb8] sm:$0xff] }
 0x44e   :  { %9707 = vmatmul.mubr.msk.f32.vlgmr.msra.gmra.mxu0 %vm165_vm1, %v15527_v8  ;;  %9402 = vmatprep.subr.mxu0 %v9380_v60  ;;  %v9009_v60 = vld [vmem:[%s16111_s3 + $0x2eb0] sm:$0xff] }
 0x44f   :  { %8746 = vmatpush1.msra.mxu1 %v8653_v59  ;;  %9403 = vmatpush1.msra.mxu0 %v9379_v45  ;;  %v9006_v59 = vld [vmem:[%s16111_s3 + $0x2e98] sm:$0xff]  ;;  %v9005_v45 = vld [vmem:[%s16111_s3 + $0x2e90] sm:$0xff] }
 0x450   :  { %8747 = vmatprep.subr.mxu1 %v8650_v61  ;;  %9404 = vmatprep.subr.mxu0 %v9376_v32  ;;  %v9002_v61 = vld [vmem:[%s16111_s3 + $0x2e78] sm:$0xff]  ;;  %v9001_v32 = vld [vmem:[%s16111_s3 + $0x2e70] sm:$0xff] }
 0x451   :  { %8748 = vmatpush1.msra.mxu1 %v8649_v21  ;;  %9405 = vmatpush1.msra.mxu0 %v9375_v48  ;;  %v8998_v48 = vld [vmem:[%s16111_s3 + $0x2e58] sm:$0xff] }
 0x452   :  { %8749 = vmatprep.subr.mxu1 %v8646_v47  ;;  %9406 = vmatprep.subr.mxu0 %v9372_v11  ;;  %v8997_v47 = vld [vmem:[%s16111_s3 + $0x2e50] sm:$0xff] }
 0x453   :  { %8750 = vmatpush1.msra.mxu1 %v8645_v10  ;;  %9407 = vmatpush1.msra.mxu0 %v9371_v50  ;;  %v8994_v10 = vld [vmem:[%s16111_s3 + $0x2e38] sm:$0xff]  ;;  %v8993_v50 = vld [vmem:[%s16111_s3 + $0x2e30] sm:$0xff] }
 0x454   :  { %8751 = vmatprep.subr.mxu1 %v8642_v14  ;;  %9408 = vmatprep.subr.mxu0 %v9368_v20  ;;  %v8990_v14 = vld [vmem:[%s16111_s3 + $0x2e18] sm:$0xff]  ;;  %v8989_v20 = vld [vmem:[%s16111_s3 + $0x2e10] sm:$0xff] }
 0x455   :  { %8752 = vmatpush1.msra.mxu1 %v8641_v27  ;;  %9409 = vmatpush1.msra.mxu0 %v9367_v28  ;;  %v9200_v28 = vld [vmem:[%s16111_s3 + $0x2ff8] sm:$0xff] }
 0x456   :  { %8753 = vmatprep.subr.mxu1 %v8638_v26  ;;  %9410 = vmatprep.subr.mxu0 %v9364_v54  ;;  %v9199_v26 = vld [vmem:[%s16111_s3 + $0x2ff0] sm:$0xff] }
 0x457   :  { %8754 = vmatpush1.msra.mxu1 %v8637_v33  ;;  %9411 = vmatpush1.msra.mxu0 %v9363_v34  ;;  %v9196_v33 = vld [vmem:[%s16111_s3 + $0x2fd8] sm:$0xff]  ;;  %v9195_v34 = vld [vmem:[%s16111_s3 + $0x2fd0] sm:$0xff] }
 0x458   :  { %8755 = vmatprep.subr.mxu1 %v8634_v36  ;;  %9412 = vmatprep.subr.mxu0 %v9360_v44  ;;  %v9192_v36 = vld [vmem:[%s16111_s3 + $0x2fb8] sm:$0xff]  ;;  %v9191_v44 = vld [vmem:[%s16111_s3 + $0x2fb0] sm:$0xff] }
 0x459   :  { %8756 = vmatpush1.msra.mxu1 %v8633_v0  ;;  %9413 = vmatpush1.msra.mxu0 %v9359_v3  ;;  %v9187_v3 = vld [vmem:[%s16111_s3 + $0x2f90] sm:$0xff] }
 0x45a   :  { %8757 = vmatprep.subr.mxu1 %v8630_v41  ;;  %9414 = vmatprep.subr.mxu0 %v9356_v16  ;;  %v9184_v16 = vld [vmem:[%s16111_s3 + $0x2f78] sm:$0xff] }
 0x45b   :  { %8758 = vmatpush1.msra.mxu1 %v8629_v52  ;;  %9415 = vmatpush1.msra.mxu0 %v9355_v5  ;;  %v9183_v52 = vld [vmem:[%s16111_s3 + $0x2f70] sm:$0xff]  ;;  %v9180_v5 = vld [vmem:[%s16111_s3 + $0x2f58] sm:$0xff] }
 0x45c   :  { %8759 = vmatprep.subr.mxu1 %v8626_v19  ;;  %9416 = vmatprep.subr.mxu0 %v9352_v40  ;;  %v9179_v19 = vld [vmem:[%s16111_s3 + $0x2f50] sm:$0xff] }
 0x45d   :  { %8760 = vmatpush1.msra.mxu1 %v8625_v39  ;;  %8793 = vmatprep.mubr.f32.mxu1 %v9955_v6  ;;  %v9176_v39 = vld [vmem:[%s16111_s3 + $0x2f38] sm:$0xff] }
 0x45e   :  { %9417 = vmatpush1.msra.mxu0 %v9351_v25  ;;  %9450 = vmatprep.mubr.f32.mxu0 %v9955_v6  ;;  %v9175_v25 = vld [vmem:[%s16111_s3 + $0x2f30] sm:$0xff] }
 0x45f   :  { %9702 = vmatmul.mubr.msk.f32.vlgmr.msra.gmra.mxu1 %vm165_vm1, %v15215_v29  ;;  %8927 = vmatprep.subr.mxu1 %v8836_v49  ;;  %v8827_v29 = vld [vmem:[%s16111_s3 + $0x2db0] sm:$0xff] }
 0x460   :  { %9709 = vmatmul.mubr.msk.f32.vlgmr.msra.gmra.mxu0 %vm165_vm1, %v15628_v30  ;;  %8928 = vmatpush1.msra.mxu1 %v8835_v35  ;;  %v9172_v35 = vld [vmem:[%s16111_s3 + $0x2f18] sm:$0xff] }
 0x461   :  { %8929 = vmatprep.subr.mxu1 %v8832_v15  ;;  %8975 = vmatprep.mubr.f32.mxu1 %v9955_v6  ;;  %v9171_v15 = vld [vmem:[%s16111_s3 + $0x2f10] sm:$0xff] }
 0x462   :  { %8930 = vmatpush1.msra.mxu1 %v8831_v1  ;;  %v9382_v1 = vld [vmem:[%s16111_s3 + $0x30f8] sm:$0xff] }
 0x463   :  { %8931 = vmatprep.subr.mxu1 %v8828_v12  ;;  %v9381_v12 = vld [vmem:[%s16111_s3 + $0x30f0] sm:$0xff] }
 0x464   :  { %8932 = vmatpush1.msra.mxu1 %v8827_v29 }
 0x465   :  { %8933 = vmatprep.subr.mxu1 %v8824_v46  ;;  %v9378_v46 = vld [vmem:[%s16111_s3 + $0x30d8] sm:$0xff] }
 0x466   :  { %8934 = vmatpush1.msra.mxu1 %v8823_v62  ;;  %v9377_v62 = vld [vmem:[%s16111_s3 + $0x30d0] sm:$0xff] }
 0x467   :  { %8935 = vmatprep.subr.mxu1 %v8820_v31 }
 0x468   :  { %8936 = vmatpush1.msra.mxu1 %v8819_v17  ;;  %v9374_v17 = vld [vmem:[%s16111_s3 + $0x30b8] sm:$0xff] }
 0x469   :  { %8937 = vmatprep.subr.mxu1 %v8816_v7  ;;  %v9373_v7 = vld [vmem:[%s16111_s3 + $0x30b0] sm:$0xff] }
 0x46a   :  { %8938 = vmatpush1.msra.mxu1 %v8815_v23  ;;  %v9369_v23 = vld [vmem:[%s16111_s3 + $0x3090] sm:$0xff] }
 0x46b   :  { %8939 = vmatprep.subr.mxu1 %v8812_v37 }
 0x46c   :  { %8940 = vmatpush1.msra.mxu1 %v8811_v58  ;;  %v9365_v58 = vld [vmem:[%s16111_s3 + $0x3070] sm:$0xff] }
 0x46d   :  { %8941 = vmatprep.subr.mxu1 %v8808_v63 }
 0x46e   :  { %8942 = vmatpush1.msra.mxu1 %v8807_v51  ;;  %v9362_v51 = vld [vmem:[%s16111_s3 + $0x3058] sm:$0xff] }
 0x46f   :  { %9704 = vmatmul.mubr.msk.f32.vlgmr.msra.gmra.mxu1 %vm165_vm1, %v15319_v9  ;;  %9109 = vmatprep.subr.mxu1 %v9018_v55  ;;  %v15699_v9 = vpop.f32.mrf.mxu0  ;;  %v9361_v55 = vld [vmem:[%s16111_s3 + $0x3050] sm:$0xff] }
 0x470   :  { %9110 = vmatpush1.msra.mxu1 %v9017_v56  ;;  %9157 = vmatprep.mubr.f32.mxu1 %v9955_v6  ;;  %v9358_v56 = vld [vmem:[%s16111_s3 + $0x3038] sm:$0xff] }
 0x471   :  { %9111 = vmatprep.subr.mxu1 %v9014_v57  ;;  %v15713_v21 = vpop.f32.mrf.mxu0  ;;  %v9357_v57 = vld [vmem:[%s16111_s3 + $0x3030] sm:$0xff] }
 0x472   :  { %9112 = vmatpush1.msra.mxu1 %v9013_v42 }
 0x473   :  { %9113 = vmatprep.subr.mxu1 %v9010_v22  ;;  %v15721_v11 = vpop.f32.mrf.mxu0  ;;  %v9354_v22 = vld [vmem:[%s16111_s3 + $0x3018] sm:$0xff] }
 0x474   :  { %9114 = vmatpush1.msra.mxu1 %v9009_v60  ;;  %v9353_v60 = vld [vmem:[%s16111_s3 + $0x3010] sm:$0xff] }
 0x475   :  { %9115 = vmatprep.subr.mxu1 %v9006_v59  ;;  %v15735_v27 = vpop.f32.mrf.mxu0 }
 0x476   :  { %9116 = vmatpush1.msra.mxu1 %v9005_v45 }
 0x477   :  { %9117 = vmatprep.subr.mxu1 %v9002_v61  ;;  %v15743_v54 = vpop.f32.mrf.mxu0 }
 0x478   :  { %9118 = vmatpush1.msra.mxu1 %v9001_v32 }
 0x479   :  { %9119 = vmatprep.subr.mxu1 %v8998_v48  ;;  %v15760_v0 = vpop.f32.mrf.mxu0 }
 0x47a   :  { %9120 = vmatpush1.msra.mxu1 %v8997_v47  ;;  %v15871_v47 = vpop.f32.mrf.mxu1 }
 0x47b   :  { %9121 = vmatprep.subr.mxu1 %v8994_v10  ;;  %v15768_v41 = vpop.f32.mrf.mxu0 }
 0x47c   :  { %9122 = vmatpush1.msra.mxu1 %v8993_v50  ;;  %v15873_v10 = vpop.f32.mrf.mxu1 }
 0x47d   :  { %9123 = vmatprep.subr.mxu1 %v8990_v14  ;;  %v15782_v40 = vpop.f32.mrf.mxu0 }
 0x47e   :  { %9124 = vmatpush1.msra.mxu1 %v8989_v20  ;;  %v15879_v20 = vpop.f32.mrf.mxu1 }
 0x47f   :  { %9706 = vmatmul.mubr.msk.f32.vlgmr.msra.gmra.mxu1 %vm165_vm1, %v15423_v38  ;;  %9291 = vmatprep.subr.mxu1 %v9200_v28  ;;  %v9188_v38 = vld [vmem:[%s16111_s3 + $0x2f98] sm:$0xff]  ;;  %v15790_v49 = vpop.f32.mrf.mxu0 }
 0x480   :  { %9292 = vmatpush1.msra.mxu1 %v9199_v26  ;;  %9339 = vmatprep.mubr.f32.mxu1 %v9955_v6  ;;  %v15881_v28 = vpop.f32.mrf.mxu1 }
 0x481   :  { %9293 = vmatprep.subr.mxu1 %v9196_v33  ;;  %v15804_v29 = vpop.f32.mrf.mxu0 }
 0x482   :  { %9294 = vmatpush1.msra.mxu1 %v9195_v34  ;;  %v15887_v33 = vpop.f32.mrf.mxu1 }
 0x483   :  { %9295 = vmatprep.subr.mxu1 %v9192_v36  ;;  %v15814_v31 = vpop.f32.mrf.mxu0 }
 0x484   :  { %9296 = vmatpush1.msra.mxu1 %v9191_v44  ;;  %v15889_v34 = vpop.f32.mrf.mxu1 }
 0x485   :  { %9297 = vmatprep.subr.mxu1 %v9188_v38  ;;  %v15829_v37 = vpop.f32.mrf.mxu0 }
 0x486   :  { %9298 = vmatpush1.msra.mxu1 %v9187_v3  ;;  %v15895_v38 = vpop.f32.mrf.mxu1 }
 0x487   :  { %9299 = vmatprep.subr.mxu1 %v9184_v16  ;;  %v15837_v63 = vpop.f32.mrf.mxu0 }
 0x488   :  { %9300 = vmatpush1.msra.mxu1 %v9183_v52  ;;  %v15897_v3 = vpop.f32.mrf.mxu1 }
 0x489   :  { %9301 = vmatprep.subr.mxu1 %v9180_v5  ;;  %v15851_v42 = vpop.f32.mrf.mxu0 }
 0x48a   :  { %9302 = vmatpush1.msra.mxu1 %v9179_v19  ;;  %v15903_v5 = vpop.f32.mrf.mxu1 }
 0x48b   :  { %9303 = vmatprep.subr.mxu1 %v9176_v39  ;;  %v15859_v59 = vpop.f32.mrf.mxu0  ;;  %16114 = vst [vmem:[#allocation6_spill] sm:$0xff] %v15903_v5 }
 0x48c   :  { %9304 = vmatpush1.msra.mxu1 %v9175_v25  ;;  %v15905_v19 = vpop.f32.mrf.mxu1 }
 0x48d   :  { %9305 = vmatprep.subr.mxu1 %v9172_v35  ;;  %v15863_v45 = vpop.f32.mrf.mxu0  ;;  %16115 = vst [vmem:[#allocation7_spill] sm:$0xff] %v15905_v19 }
 0x48e   :  { %9306 = vmatpush1.msra.mxu1 %v9171_v15  ;;  %v15911_v35 = vpop.f32.mrf.mxu1 }
 0x48f   :  { %9708 = vmatmul.mubr.msk.f32.vlgmr.msra.gmra.mxu1 %vm165_vm1, %v15527_v8  ;;  %9473 = vmatprep.subr.mxu1 %v9382_v1  ;;  %v9370_v8 = vld [vmem:[%s16111_s3 + $0x3098] sm:$0xff]  ;;  %v15865_v61 = vpop.f32.mrf.mxu0  ;;  %16116 = vst [vmem:[#allocation8_spill] sm:$0xff] %v15911_v35 }
 0x490   :  { %9474 = vmatpush1.msra.mxu1 %v9381_v12  ;;  %9521 = vmatprep.mubr.f32.mxu1 %v9955_v6  ;;  %v9366_v6 = vld [vmem:[%s16111_s3 + $0x3078] sm:$0xff]  ;;  %v15913_v15 = vpop.f32.mrf.mxu1 }
 0x491   :  { %9475 = vmatprep.subr.mxu1 %v9378_v46  ;;  %v15867_v32 = vpop.f32.mrf.mxu0  ;;  %16117 = vst [vmem:[#allocation9_spill] sm:$0xff] %v15913_v15 }
 0x492   :  { %9476 = vmatpush1.msra.mxu1 %v9377_v62  ;;  %v15919_v46 = vpop.f32.mrf.mxu1 }
 0x493   :  { %9477 = vmatprep.subr.mxu1 %v9374_v17  ;;  %v15869_v48 = vpop.f32.mrf.mxu0  ;;  %16118 = vst [vmem:[#allocation10_spill] sm:$0xff] %v15919_v46 }
 0x494   :  { %9478 = vmatpush1.msra.mxu1 %v9373_v7  ;;  %v15921_v62 = vpop.f32.mrf.mxu1 }
 0x495   :  { %9479 = vmatprep.subr.mxu1 %v9370_v8  ;;  %v15875_v50 = vpop.f32.mrf.mxu0  ;;  %16119 = vst [vmem:[#allocation11_spill] sm:$0xff] %v15921_v62 }
 0x496   :  { %9480 = vmatpush1.msra.mxu1 %v9369_v23  ;;  %v15927_v8 = vpop.f32.mrf.mxu1 }
 0x497   :  { %9481 = vmatprep.subr.mxu1 %v9366_v6  ;;  %v15877_v14 = vpop.f32.mrf.mxu0  ;;  %16120 = vst [vmem:[#allocation12_spill] sm:$0xff] %v15927_v8 }
 0x498   :  { %9482 = vmatpush1.msra.mxu1 %v9365_v58  ;;  %v15929_v23 = vpop.f32.mrf.mxu1 }
 0x499   :  { %9483 = vmatprep.subr.mxu1 %v9362_v51  ;;  %16121 = vst [vmem:[#allocation13_spill] sm:$0xff] %v15929_v23  ;;  %v3887_v23 = vadd.f32 %v15666_v53, %v13406_v4 }
 0x49a   :  { %9484 = vmatpush1.msra.mxu1 %v9361_v55  ;;  %v15935_v51 = vpop.f32.mrf.mxu1 }
 0x49b   :  { %9485 = vmatprep.subr.mxu1 %v9358_v56  ;;  %16122 = vst [vmem:[#allocation14_spill] sm:$0xff] %v15935_v51  ;;  %v4068_v51 = vadd.f32 %v15674_v18, %v13509_v43 }
 0x49c   :  { %9486 = vmatpush1.msra.mxu1 %v9357_v57  ;;  %v15937_v55 = vpop.f32.mrf.mxu1 }
 0x49d   :  { %9487 = vmatprep.subr.mxu1 %v9354_v22  ;;  %16123 = vst [vmem:[#allocation15_spill] sm:$0xff] %v15937_v55  ;;  %v4069_v55 = vadd.f32 %v15690_v2, %v3887_v23  ;;  %v4250_v15 = vadd.f32 %v15699_v9, %v4068_v51 }
 0x49e   :  { %9488 = vmatpush1.msra.mxu1 %v9353_v60  ;;  %v15943_v22 = vpop.f32.mrf.mxu1 }
 0x49f   :  { %9710 = vmatmul.mubr.msk.f32.vlgmr.msra.gmra.mxu1 %vm165_vm1, %v15628_v30  ;;  %v15883_v30 = vpop.f32.mrf.mxu0  ;;  %16124 = vst [vmem:[#allocation16_spill] sm:$0xff] %v15943_v22  ;;  %v4432_v19 = vadd.f32 %v15721_v11, %v4250_v15 }
 0x4a0   :  { %v15945_v60 = vpop.f32.mrf.mxu1 }
 0x4a1   :  { %v15885_v26 = vpop.f32.mrf.mxu0  ;;  %16125 = vst [vmem:[#allocation17_spill] sm:$0xff] %v15945_v60  ;;  %v4251_v60 = vadd.f32 %v15713_v21, %v4069_v55  ;;  %v4614_v43 = vadd.f32 %v15743_v54, %v4432_v19 }
 0x4a2   :  { %v15955_v46 = vpop.f32.mrf.mxu1 }
 0x4a3   :  { %v15891_v36 = vpop.f32.mrf.mxu0  ;;  %v4433_v4 = vadd.f32 %v15735_v27, %v4251_v60  ;;  %v4796_v2 = vadd.f32 %v15768_v41, %v4614_v43 }
 0x4a4   :  { %v15959_v35 = vpop.f32.mrf.mxu1 }
 0x4a5   :  { %v15893_v44 = vpop.f32.mrf.mxu0  ;;  %v4615_v18 = vadd.f32 %v15760_v0, %v4433_v4  ;;  %v4978_v21 = vadd.f32 %v15790_v49, %v4796_v2 }
 0x4a6   :  { %v15969_v53 = vpop.f32.mrf.mxu1 }
 0x4a7   :  { %v15899_v16 = vpop.f32.mrf.mxu0  ;;  %v4797_v51 = vadd.f32 %v15782_v40, %v4615_v18  ;;  %v5160_v27 = vadd.f32 %v15814_v31, %v4978_v21 }
 0x4a8   :  { %v15973_v9 = vpop.f32.mrf.mxu1 }
 0x4a9   :  { %v15901_v52 = vpop.f32.mrf.mxu0  ;;  %v4979_v15 = vadd.f32 %v15804_v29, %v4797_v51  ;;  %v5342_v0 = vadd.f32 %v15837_v63, %v5160_v27 }
 0x4aa   :  { %v15979_v55 = vpop.f32.mrf.mxu1 }
 0x4ab   :  { %v15907_v39 = vpop.f32.mrf.mxu0  ;;  %v5161_v54 = vadd.f32 %v15829_v37, %v4979_v15  ;;  %v5524_v40 = vadd.f32 %v15859_v59, %v5342_v0 }
 0x4ac   :  { %v15983_v19 = vpop.f32.mrf.mxu1 }
 0x4ad   :  { %v15909_v25 = vpop.f32.mrf.mxu0  ;;  %v5343_v60 = vadd.f32 %v15851_v42, %v5161_v54  ;;  %v5706_v29 = vadd.f32 %v15865_v61, %v5524_v40 }
 0x4ae   :  { %v15989_v43 = vpop.f32.mrf.mxu1 }
 0x4af   :  { %v15915_v1 = vpop.f32.mrf.mxu0  ;;  %v5525_v49 = vadd.f32 %v15863_v45, %v5343_v60  ;;  %v5888_v37 = vadd.f32 %v15869_v48, %v5706_v29 }
 0x4b0   :  { %v15993_v18 = vpop.f32.mrf.mxu1 }
 0x4b1   :  { %v15917_v12 = vpop.f32.mrf.mxu0  ;;  %v5707_v31 = vadd.f32 %v15867_v32, %v5525_v49  ;;  %v6070_v42 = vadd.f32 %v15877_v14, %v5888_v37 }
 0x4b2   :  { %v15999_v21 = vpop.f32.mrf.mxu1 }
 0x4b3   :  { %v15923_v17 = vpop.f32.mrf.mxu0  ;;  %v5889_v2 = vadd.f32 %v15875_v50, %v5707_v31  ;;  %v6252_v45 = vadd.f32 %v15885_v26, %v6070_v42 }
 0x4b4   :  { %v16003_v15 = vpop.f32.mrf.mxu1 }
 0x4b5   :  { %v15925_v7 = vpop.f32.mrf.mxu0  ;;  %v6071_v59 = vadd.f32 %v15883_v30, %v5889_v2  ;;  %v6434_v32 = vadd.f32 %v15893_v44, %v6252_v45 }
 0x4b6   :  { %v16009_v0 = vpop.f32.mrf.mxu1 }
 0x4b7   :  { %v15931_v6 = vpop.f32.mrf.mxu0  ;;  %v6253_v61 = vadd.f32 %v15891_v36, %v6071_v59  ;;  %v6616_v50 = vadd.f32 %v15901_v52, %v6434_v32  ;;  %v9534_v32 = vlaneseq }
 0x4b8   :  { %v16013_v60 = vpop.f32.mrf.mxu1 }
 0x4b9   :  { %v15933_v58 = vpop.f32.mrf.mxu0  ;;  %v6435_v27 = vadd.f32 %v15899_v16, %v6253_v61  ;;  %v6798_v30 = vadd.f32 %v15909_v25, %v6616_v50 }
 0x4ba   :  { %v16019_v29 = vpop.f32.mrf.mxu1 }
 0x4bb   :  { %v15939_v56 = vpop.f32.mrf.mxu0  ;;  %v6617_v14 = vadd.f32 %v15907_v39, %v6435_v27  ;;  %v6980_v36 = vadd.f32 %v15917_v12, %v6798_v30 }
 0x4bc   :  { %v16023_v31 = vpop.f32.mrf.mxu1 }
 0x4bd   :  { %v15941_v57 = vpop.f32.mrf.mxu0  ;;  %v6799_v26 = vadd.f32 %v15915_v1, %v6617_v14  ;;  %v7162_v16 = vadd.f32 %v15925_v7, %v6980_v36 }
 0x4be   :  { %v16027_v7 = vpop.f32.mrf.mxu1 }
 0x4bf   :  { %v15947_v62 = vpop.f32.mrf.mxu0  ;;  %v6981_v40 = vadd.f32 %v15923_v17, %v6799_v26  ;;  %v7344_v39 = vadd.f32 %v15933_v58, %v7162_v16 }
 0x4c0   :  { %v16031_v42 = vpop.f32.mrf.mxu1 }
 0x4c1   :  { %v15949_v8 = vpop.f32.mrf.mxu0  ;;  %v7163_v52 = vadd.f32 %v15931_v6, %v6981_v40  ;;  %v7526_v1 = vadd.f32 %v15941_v57, %v7344_v39 }
 0x4c2   :  { %v16033_v50 = vpop.f32.mrf.mxu1 }
 0x4c3   :  { %v15961_v22 = vpop.f32.mrf.mxu0  ;;  %v7345_v25 = vadd.f32 %v15939_v56, %v7163_v52  ;;  %v7708_v17 = vadd.f32 %v15949_v8, %v7526_v1 }
 0x4c4   :  { %v16035_v14 = vpop.f32.mrf.mxu1 }
 0x4c5   :  { %v15965_v5 = vpop.f32.mrf.mxu0  ;;  %v7527_v37 = vadd.f32 %v15947_v62, %v7345_v25 }
 0x4c6   :  { %v7890_v58 = vadd.f32 %v15965_v5, %v7708_v17 }
 0x4c7   :  { %v7816_v23 = vpop.f32.mrf.mxu0  ;;  %v7709_v6 = vadd.f32 %v15961_v22, %v7527_v37  ;;  %v16037_v22 = vshrl.u32 %v9534_v32, 7 }
 0x4c9   :  { %v7996_v11 = vpop.f32.mrf.mxu0  ;;  %v7891_v59 = vadd.f32 %v7816_v23, %v7709_v6  ;;  %v9536_v16 = vsub.s32 0, %v16037_v22  ;;  %v9540_v52 = vsub.s32 1, %v16037_v22 }
 0x4ca   :  { %v8072_v56 = vadd.f32 %v7996_v11, %v7890_v58  ;;  %v16039_v11 = vpop.f32.mrf.mxu1 }
 0x4cb   :  { %v7998_v41 = vpop.f32.mrf.mxu0 }
 0x4cc   :  { %v8073_v57 = vadd.f32 %v7998_v41, %v7891_v59 }
 0x4cd   :  { %v8178_v4 = vpop.f32.mrf.mxu0 }
 0x4ce   :  { %v8254_v61 = vadd.f32 %v8178_v4, %v8072_v56 }
 0x4cf   :  { %v8180_v63 = vpop.f32.mrf.mxu0 }
 0x4d0   :  { %v8255_v62 = vadd.f32 %v8180_v63, %v8073_v57  ;;  %v16045_v63 = vld [vmem:[%s16112_s4] sm:$0xf]  ;;  %v4070_v57 = vadd.f32 %v15873_v10, %v13946_v24  ;;  %v16126_v24 = vld [vmem:[#allocation6_spill] sm:$0xff]  ;;  %s9958_s4 = smov [#allocation3]  }
 0x4d1   :  { %v8360_v51 = vpop.f32.mrf.mxu0  ;;  %v9537_v25 = vrot.slane %v16045_v63, %v9536_v16  ;;  %v16129_v16 = vld [vmem:[#allocation9_spill] sm:$0xff]  ;;  %s9591_s18 = sshll.u32 %s9958_s4, 4  ;;  %s9592_s18 = int_to_ptr.vmem [resolvable:$true] %s9591_s18 }
 0x4d2   :  { %v8436_v8 = vadd.f32 %v8360_v51, %v8254_v61  ;;  %v16047_v51 = vpop.f32.mrf.mxu1  ;;  %s9933_s19 = scalar_lea.vmem %s9592_s18, 128  ;;  %p9938_p1 = scmp.lt.s32.totalorder %s9592_s18, %s9592_s18 }
 0x4d3   :  { %v8362_v48 = vpop.f32.mrf.mxu0  ;;  %p9934_p0 = scmp.ne.s32.totalorder %s9592_s18, %s9933_s19  ;;  %p9939_p2 = scmp.lt.s32.totalorder %s9933_s19, %s9933_s19 }
 0x4d4   :  { %v8437_v30 = vadd.f32 %v8362_v48, %v8255_v62 }
 0x4d5   :  { %v8542_v54 = vpop.f32.mrf.mxu0  ;;  %p9940_p3 = por %p9939_p2, %p9938_p1 }
 0x4d6   :  { %v8618_v26 = vadd.f32 %v8542_v54, %v8436_v8 }
 0x4d7   :  { %v8544_v44 = vpop.f32.mrf.mxu0  ;;  %p9941_p4 = pnand %p9940_p3, %p9934_p0 }
 0x4d8   :  { %v8619_v36 = vadd.f32 %v8544_v44, %v8437_v30 }
 0x4d9   :  { %v8724_v49 = vpop.f32.mrf.mxu0 }
 0x4da   :  { %v8800_v40 = vadd.f32 %v8724_v49, %v8618_v26 }
 0x4db   :  { %v8726_v12 = vpop.f32.mrf.mxu0 }
 0x4dc   :  { %v8801_v41 = vadd.f32 %v8726_v12, %v8619_v36  ;;  %v16051_v12 = vpop.f32.mrf.mxu1 }
 0x4de   :  { %v7703_v58 = vpop.f32.mrf.mxu1 }
 0x4e0   :  { %v7705_v62 = vpop.f32.mrf.mxu1 }
 0x4e2   :  { %v7885_v36 = vpop.f32.mrf.mxu1 }
 0x4ea   :  { %v8906_v2 = vpop.f32.mrf.mxu0 }
 0x4eb   :  { %v8982_v4 = vadd.f32 %v8906_v2, %v8800_v40  ;;  %v9541_v2 = vrot.slane %v16045_v63, %v9540_v52 }
 0x4ec   :  { %v8908_v45 = vpop.f32.mrf.mxu0 }
 0x4ed   :  { %v8983_v48 = vadd.f32 %v8908_v45, %v8801_v41  ;;  %v3889_v45 = vadd.f32 %v15871_v47, %v13845_v13  ;;  %v7887_v41 = vpop.f32.mrf.mxu1 }
 0x4ef   :  { %v4071_v32 = vadd.f32 %v15879_v20, %v3889_v45  ;;  %v16137_v45 = vld [vmem:[#allocation17_spill] sm:$0xff] }
 0x4f1   :  { %v4253_v26 = vadd.f32 %v15887_v33, %v4071_v32  ;;  %v16130_v33 = vld [vmem:[#allocation10_spill] sm:$0xff] }
 0x4f3   :  { %v4435_v13 = vadd.f32 %v15895_v38, %v4253_v26 }
 0x4f5   :  { %v4617_v10 = vadd.f32 %v16126_v24, %v4435_v13 }
 0x4fc   :  { %v9088_v27 = vpop.f32.mrf.mxu0 }
 0x4fd   :  { %v9164_v54 = vadd.f32 %v9088_v27, %v8982_v4  ;;  %v4252_v27 = vadd.f32 %v15881_v28, %v4070_v57  ;;  %v16128_v28 = vld [vmem:[#allocation8_spill] sm:$0xff] }
 0x4fe   :  { %v9090_v5 = vpop.f32.mrf.mxu0  ;;  %v4799_v4 = vadd.f32 %v16128_v28, %v4617_v10 }
 0x4ff   :  { %v9165_v49 = vadd.f32 %v9090_v5, %v8983_v48  ;;  %v4434_v5 = vadd.f32 %v15889_v34, %v4252_v27  ;;  %v16131_v34 = vld [vmem:[#allocation11_spill] sm:$0xff] }
 0x500   :  { %v4981_v52 = vadd.f32 %v16130_v33, %v4799_v4 }
 0x501   :  { %v4616_v47 = vadd.f32 %v15897_v3, %v4434_v5  ;;  %v16134_v3 = vld [vmem:[#allocation14_spill] sm:$0xff] }
 0x50e   :  { %v9270_v23 = vpop.f32.mrf.mxu0 }
 0x50f   :  { %v9346_v39 = vadd.f32 %v9270_v23, %v9164_v54  ;;  %v16127_v23 = vld [vmem:[#allocation7_spill] sm:$0xff]  ;;  %v8067_v54 = vpop.f32.mrf.mxu1 }
 0x510   :  { %v9272_v44 = vpop.f32.mrf.mxu0  ;;  %v4798_v20 = vadd.f32 %v16127_v23, %v4616_v47 }
 0x511   :  { %v9347_v37 = vadd.f32 %v9272_v44, %v9165_v49  ;;  %v16132_v49 = vld [vmem:[#allocation12_spill] sm:$0xff] }
 0x512   :  { %v4980_v48 = vadd.f32 %v16129_v16, %v4798_v20 }
 0x514   :  { %v5162_v44 = vadd.f32 %v16131_v34, %v4980_v48 }
 0x520   :  { %v9452_v1 = vpop.f32.mrf.mxu0 }
 0x521   :  { %v9528_v17 = vadd.f32 %v9452_v1, %v9346_v39  ;;  %v5163_v39 = vadd.f32 %v16132_v49, %v4981_v52  ;;  %v8069_v1 = vpop.f32.mrf.mxu1 }
 0x522   :  { %v9454_v6 = vpop.f32.mrf.mxu0 }
 0x523   :  { %v9554_v59 = vadd.f32 %v9537_v25, %v9528_v17  ;;  %v9529_v56 = vadd.f32 %v9454_v6, %v9347_v37  ;;  %v16133_v25 = vld [vmem:[#allocation13_spill] sm:$0xff]  ;;  %v5345_v37 = vadd.f32 %v16134_v3, %v5163_v39  ;;  %v16135_v17 = vld [vmem:[#allocation15_spill] sm:$0xff]  ;;  %v8249_v6 = vpop.f32.mrf.mxu1 }
 0x524   :  { %v5344_v38 = vadd.f32 %v16133_v25, %v5162_v44 }
 0x525   :  { %v9555_v61 = vadd.f32 %v9541_v2, %v9529_v56  ;;  %v9558_v8 = vmax.f32 %v9554_v59, 0.0  ;;  %v16136_v59 = vld [vmem:[#allocation16_spill] sm:$0xff]  ;;  %v8251_v27 = vpop.f32.mrf.mxu1 }
 0x526   :  { %v5526_v2 = vadd.f32 %v16135_v17, %v5344_v38  ;;  %v5527_v56 = vadd.f32 %v16136_v59, %v5345_v37 }
 0x527   :  { %v9559_v30 = vmax.f32 %v9555_v61, 0.0  ;;  %v8431_v26 = vpop.f32.mrf.mxu1 }
 0x528   :  { %v5708_v57 = vadd.f32 %v16137_v45, %v5526_v2  ;;  %v5709_v61 = vadd.f32 %v15955_v46, %v5527_v56 }
 0x529   :  { %v16062_v40 = vcombine.low %v9558_v8, %v9559_v30  ;;  %v8433_v10 = vpop.f32.mrf.mxu1 }
 0x52a   :  { %v5890_v32 = vadd.f32 %v15959_v35, %v5708_v57  ;;  %v5891_v8 = vadd.f32 %v15969_v53, %v5709_v61 }
 0x52b   :  { %v8613_v35 = vpop.f32.mrf.mxu1 }
 0x52c   :  { %v6072_v30 = vadd.f32 %v15973_v9, %v5890_v32  ;;  %v6073_v5 = vadd.f32 %v15979_v55, %v5891_v8 }
 0x52d   :  { %v8615_v28 = vpop.f32.mrf.mxu1 }
 0x52e   :  { %v6254_v13 = vadd.f32 %v15983_v19, %v6072_v30  ;;  %v6255_v47 = vadd.f32 %v15989_v43, %v6073_v5 }
 0x530   :  { %v6436_v24 = vadd.f32 %v15993_v18, %v6254_v13  ;;  %v6437_v23 = vadd.f32 %v15999_v21, %v6255_v47  ;;  %v8795_v18 = vpop.f32.mrf.mxu1 }
 0x532   :  { %v6618_v46 = vadd.f32 %v16003_v15, %v6436_v24  ;;  %v6619_v20 = vadd.f32 %v16009_v0, %v6437_v23  ;;  %v8797_v16 = vpop.f32.mrf.mxu1 }
 0x534   :  { %v6800_v53 = vadd.f32 %v16013_v60, %v6618_v46  ;;  %v6801_v9 = vadd.f32 %v16019_v29, %v6619_v20  ;;  %v8977_v48 = vpop.f32.mrf.mxu1 }
 0x536   :  { %v6982_v55 = vadd.f32 %v16023_v31, %v6800_v53  ;;  %v6983_v19 = vadd.f32 %v16027_v7, %v6801_v9  ;;  %v8979_v34 = vpop.f32.mrf.mxu1 }
 0x538   :  { %v7164_v43 = vadd.f32 %v16031_v42, %v6982_v55  ;;  %v7165_v4 = vadd.f32 %v16033_v50, %v6983_v19 }
 0x53a   :  { %v7346_v21 = vadd.f32 %v16035_v14, %v7164_v43  ;;  %v7347_v15 = vadd.f32 %v16039_v11, %v7165_v4 }
 0x53c   :  { %v7528_v0 = vadd.f32 %v16047_v51, %v7346_v21  ;;  %v7529_v60 = vadd.f32 %v16051_v12, %v7347_v15 }
 0x53e   :  { %v7710_v29 = vadd.f32 %v7703_v58, %v7528_v0  ;;  %v7711_v31 = vadd.f32 %v7705_v62, %v7529_v60  ;;  %v9544_v58 = vsub.s32 2, %v16037_v22 }
 0x53f   :  { %v9159_v49 = vpop.f32.mrf.mxu1 }
 0x540   :  { %v7892_v33 = vadd.f32 %v7885_v36, %v7710_v29  ;;  %v7893_v52 = vadd.f32 %v7887_v41, %v7711_v31  ;;  %v9548_v41 = vsub.s32 3, %v16037_v22  ;;  %v9545_v2 = vrot.slane %v16045_v63, %v9544_v58 }
 0x541   :  { %v9161_v11 = vpop.f32.mrf.mxu1 }
 0x542   :  { %v8074_v7 = vadd.f32 %v8067_v54, %v7892_v33  ;;  %v8075_v42 = vadd.f32 %v8069_v1, %v7893_v52  ;;  %v9549_v61 = vrot.slane %v16045_v63, %v9548_v41 }
 0x544   :  { %v8256_v44 = vadd.f32 %v8249_v6, %v8074_v7  ;;  %v8257_v50 = vadd.f32 %v8251_v27, %v8075_v42  ;;  %v9957_v6 = vmov 1983009808  }
 0x545   :  { %v9569_v59 = vunpack.c.l.s4 %v9957_v6 }
 0x546   :  { %v8438_v39 = vadd.f32 %v8431_v26, %v8256_v44  ;;  %v8439_v14 = vadd.f32 %v8433_v10, %v8257_v50 }
 0x547   :  { %v9570_v30 = vunpack.c.0.s8 %v9569_v59 }
 0x548   :  { %v8620_v25 = vadd.f32 %v8613_v35, %v8438_v39  ;;  %v8621_v38 = vadd.f32 %v8615_v28, %v8439_v14 }
 0x549   :  { %v9573_v47 = vsub.s32 %v9570_v30, %v16037_v22 }
 0x54a   :  { %v8802_v51 = vadd.f32 %v8795_v18, %v8620_v25  ;;  %v8803_v37 = vadd.f32 %v8797_v16, %v8621_v38 }
 0x54b   :  { %v9574_v10 = vrot.slane %v16062_v40, %v9573_v47 }
 0x54c   :  { %v8984_v12 = vadd.f32 %v8977_v48, %v8802_v51  ;;  %v8985_v62 = vadd.f32 %v8979_v34, %v8803_v37 }
 0x54e   :  { %v9166_v36 = vadd.f32 %v9159_v49, %v8984_v12  ;;  %v9167_v1 = vadd.f32 %v9161_v11, %v8985_v62 }
 0x54f   :  { %v9341_v3 = vpop.f32.mrf.mxu1 }
 0x550   :  { %v9348_v17 = vadd.f32 %v9341_v3, %v9166_v36 }
 0x551   :  { %v9343_v54 = vpop.f32.mrf.mxu1 }
 0x552   :  { %v9349_v45 = vadd.f32 %v9343_v54, %v9167_v1 }
 0x55f   :  { %v9523_v56 = vpop.f32.mrf.mxu1 }
 0x560   :  { %v9530_v57 = vadd.f32 %v9523_v56, %v9348_v17 }
 0x561   :  { %v9525_v32 = vpop.f32.mrf.mxu1 }
 0x562   :  { %v9556_v27 = vadd.f32 %v9545_v2, %v9530_v57  ;;  %v9531_v8 = vadd.f32 %v9525_v32, %v9349_v45 }
 0x564   :  { %v9557_v26 = vadd.f32 %v9549_v61, %v9531_v8  ;;  %v9560_v5 = vmax.f32 %v9556_v27, 0.0 }
 0x566   :  { %v9561_v13 = vmax.f32 %v9557_v26, 0.0 }
 0x568   :  { %v9567_v24 = vcombine.low %v9560_v5, %v9561_v13 }
 0x56a   :  { %v9581_v23 = vrot.slane %v9567_v24, %v9573_v47 }
 0x56c   :  { %v9582_v46 = vcombine.low %v9574_v10, %v9581_v23 }
 0x56e   :  { %9584 = vst [vmem:[#allocation3] sm:$0xff] %v9582_v46 }
 0x56f   :  { %9944 = shalt.err (!%p9941_p4)
}
 0x570   :  { %9594 = dma.vmem_to_hbm [thread:$0]  %s9592_s18, 128, %s16113_s5, [#allocation4]  }
 0x571   :  { %9953 = dma.done.wait [#allocation4], 128  }
 0x572   :  { %9954 = vsyncadd [#allocation4], 4294967168 }
 0x573   :  { %9598 = vsyncpa [#allocation4], 1 }

</bundles_post_ra>
